<compile_context>
chip_gen: v7x
topology: tpu7x:2x2x1
jax: 0.10.0
libtpu: 0.0.40
codegen_flags: <defaults>
</compile_context>

<pallas_src>
import math
from functools import partial

import numpy as np
import jax
import jax.numpy as jnp
from jax import lax
from jax.experimental import pallas as pl
from jax.experimental.pallas import tpu as pltpu

INPUT_DIM = 7
D_MODEL = 32
NHEAD = 8
HEAD_DIM = D_MODEL // NHEAD
NUM_LAYERS = 4
DIM_FF = 64
LN_EPS = 1e-5
OUT_PAD = 128                      # lane-dense padded output width
MATMUL_DTYPE = jnp.bfloat16        # MXU-input dtype (accumulation stays f32)


def _layernorm(h, gamma, beta):
    mean = jnp.mean(h, axis=-1, keepdims=True)
    c = h - mean
    var = jnp.mean(c * c, axis=-1, keepdims=True)
    return c * lax.rsqrt(var + LN_EPS) * gamma + beta


def _mm(a, w):
    # bf16 (or f32) MXU inputs, f32 accumulation. `w` is pre-cast in the wrapper.
    return jnp.dot(a.astype(MATMUL_DTYPE), w, preferred_element_type=jnp.float32)


def transformer_kernel(
    xm_ref, x1_ref, x2_ref, cos_ref, sin_ref, pe_ref,
    win_ref, bin_ref,
    wqkv_ref, bqkv_ref, wo_ref, bo_ref, g1_ref, be1_ref,
    w1_ref, b1_ref, w2_ref, b2_ref, g2_ref, be2_ref,
    wout_ref, bout_ref,
    o_ref,
    *, seq_len,
):
    n_tok = xm_ref.shape[0]            # Bt * T token rows in this block
    bt = n_tok // seq_len              # sequences per block

    # ---- HybridSensorPositionalEncoding (RoPE on motion + sine PE on mic) ----
    x1 = x1_ref[...]                   # (N, 3) motion cols 1,3,5
    x2 = x2_ref[...]                   # (N, 3) motion cols 2,4,6
    cos = cos_ref[...]
    sin = sin_ref[...]
    mic = xm_ref[...] + pe_ref[...]    # (N, 1)
    rot_a = x1 * cos - x2 * sin        # (N, 3)
    rot_b = x1 * sin + x2 * cos        # (N, 3)

    # ---- input projection Linear(7 -> d_model) as rank-1 VPU MACs ------------
    # (contraction dims of 1/3 would only pad the MXU; broadcasts are cheaper)
    win = win_ref[...]                 # (7, D_MODEL) f32
    h = bin_ref[...] + mic * win[0:1, :]
    for j in range(3):
        h = h + rot_a[:, j:j + 1] * win[1 + j:2 + j, :]
        h = h + rot_b[:, j:j + 1] * win[4 + j:5 + j, :]
    # h: (N, D_MODEL) f32

    # Block-diagonal head mask: headmask[hd, 0, d] = 1 iff feature d is in head hd.
    h_idx = lax.broadcasted_iota(jnp.int32, (NHEAD, 1, D_MODEL), 0)
    d_idx = lax.broadcasted_iota(jnp.int32, (NHEAD, 1, D_MODEL), 2)
    headmask = ((d_idx >= h_idx * HEAD_DIM) &
                (d_idx < (h_idx + 1) * HEAD_DIM)).astype(jnp.float32)

    scale = 1.0 / math.sqrt(HEAD_DIM)

    # ---- transformer encoder layers (post-LN, ReLU FFN) ----------------------
    # TODO(synk): dropout (p=0.1) is treated as identity (eval-mode forward).
    def layer(l, h):
        # fused QKV: one (N, D) x (D, 3D) matmul
        qkv = _mm(h, wqkv_ref[l]) + bqkv_ref[l]                     # (N, 3D) f32
        q = qkv[:, 0:D_MODEL] * scale
        k = qkv[:, D_MODEL:2 * D_MODEL]
        v = qkv[:, 2 * D_MODEL:3 * D_MODEL]

        q3 = q.reshape(bt, seq_len, D_MODEL)
        k3 = k.reshape(bt, seq_len, D_MODEL)
        v3 = v.reshape(bt, seq_len, D_MODEL)

        # All heads at once: row hd*T+i of qb is q_i masked to head hd's features,
        # so one contraction over the full D gives every head's score block.
        qb = (q3[:, None, :, :] * headmask[None]).reshape(
            bt, NHEAD * seq_len, D_MODEL)
        s = jnp.einsum('bnd,bkd->bnk',
                       qb.astype(MATMUL_DTYPE), k3.astype(MATMUL_DTYPE),
                       preferred_element_type=jnp.float32)          # (bt, NH*T, T)

        # one wide softmax over the key axis (f32)
        s = s - jnp.max(s, axis=-1, keepdims=True)
        e = jnp.exp(s)
        p = e * pl.reciprocal(jnp.sum(e, axis=-1, keepdims=True), approx=True)

        ob = jnp.einsum('bnk,bkd->bnd',
                        p.astype(MATMUL_DTYPE), v3.astype(MATMUL_DTYPE),
                        preferred_element_type=jnp.float32)         # (bt, NH*T, D)

        # take head hd's feature slice from its row block and re-concatenate heads
        ob4 = ob.reshape(bt, NHEAD, seq_len, D_MODEL)
        o_cat = jnp.sum(ob4 * headmask[None], axis=1)               # (bt, T, D)
        o2 = o_cat.reshape(n_tok, D_MODEL)

        attn = _mm(o2, wo_ref[l]) + bo_ref[l]
        h = _layernorm(h + attn, g1_ref[l], be1_ref[l])

        ff = jnp.maximum(_mm(h, w1_ref[l]) + b1_ref[l], 0.0)        # (N, DIM_FF)
        ff = _mm(ff, w2_ref[l]) + b2_ref[l]
        h = _layernorm(h + ff, g2_ref[l], be2_ref[l])
        return h

    h = lax.fori_loop(0, NUM_LAYERS, layer, h)

    # ---- output projection Linear(d_model -> 7), padded to 128 lanes ---------
    o_ref[...] = _mm(h, wout_ref[...]) + bout_ref[...]


def pos_encoding_tables(T):
    """cos/sin RoPE tables (T, 3) and mic sine PE (T, 1), as in the module."""
    rope_dim = 6
    inv_freq = 1.0 / (10000.0 ** (jnp.arange(0, rope_dim, 2, dtype=jnp.float32)
                                  / rope_dim))                      # (3,)
    t = jnp.arange(T, dtype=jnp.float32)
    freqs = t[:, None] * inv_freq[None, :]                          # (T, 3)
    return jnp.cos(freqs), jnp.sin(freqs), jnp.sin(t[:, None])      # pe: div_term=1


def init_params(key):
    """Deterministic synthetic parameters (transposed for x @ W layout)."""
    ks = jax.random.split(key, 20)

    def nrm(k, shape, scale=0.2):
        return (scale * jax.random.normal(k, shape)).astype(jnp.float32)

    L, D, F, H = NUM_LAYERS, D_MODEL, DIM_FF, INPUT_DIM
    return {
        "win_t": nrm(ks[0], (H, D)),
        "bin": nrm(ks[1], (1, D)),
        "wq": nrm(ks[2], (L, D, D)), "bq": nrm(ks[3], (L, 1, D)),
        "wk": nrm(ks[4], (L, D, D)), "bk": nrm(ks[5], (L, 1, D)),
        "wv": nrm(ks[6], (L, D, D)), "bv": nrm(ks[7], (L, 1, D)),
        "wo": nrm(ks[8], (L, D, D)), "bo": nrm(ks[9], (L, 1, D)),
        "g1": 1.0 + nrm(ks[10], (L, 1, D), 0.05),
        "be1": nrm(ks[11], (L, 1, D), 0.05),
        "w1": nrm(ks[12], (L, D, F)), "b1": nrm(ks[13], (L, 1, F)),
        "w2": nrm(ks[14], (L, F, D)), "b2": nrm(ks[15], (L, 1, D)),
        "g2": 1.0 + nrm(ks[16], (L, 1, D), 0.05),
        "be2": nrm(ks[17], (L, 1, D), 0.05),
        "wout_t": nrm(ks[18], (D, H)),
        "bout": nrm(ks[19], (1, H)),
    }


def rope_transformer_forward(x, p, *, block_batch=8):
    B, T, F = x.shape
    assert F == INPUT_DIM, "input must have 7 features [mic, 3 acc, 3 gyro]"
    assert T % 8 == 0, "sequence length must be a multiple of 8 (sublane tile)"

    bt = min(block_batch, B)
    while B % bt:                      # batch tile must divide the batch
        bt -= 1
    n_tok = B * T
    blk = bt * T                       # token rows per grid step (128 at B>=8, T=16)

    cos, sin, pe = pos_encoding_tables(T)
    cos_t = jnp.tile(cos, (B, 1))      # per-token tables, flattened like x
    sin_t = jnp.tile(sin, (B, 1))
    pe_t = jnp.tile(pe, (B, 1))

    xf = x.reshape(n_tok, INPUT_DIM).astype(jnp.float32)
    xm = xf[:, 0:1]                    # mic channel
    x1 = xf[:, 1:7:2]                  # motion cols 1,3,5
    x2 = xf[:, 2:7:2]                  # motion cols 2,4,6

    cdt = MATMUL_DTYPE
    wqkv = jnp.concatenate([p["wq"], p["wk"], p["wv"]], axis=-1).astype(cdt)
    bqkv = jnp.concatenate([p["bq"], p["bk"], p["bv"]], axis=-1)
    wout_pad = (jnp.zeros((D_MODEL, OUT_PAD), jnp.float32)
                .at[:, :INPUT_DIM].set(p["wout_t"])).astype(cdt)
    bout_pad = (jnp.zeros((1, OUT_PAD), jnp.float32)
                .at[:, :INPUT_DIM].set(p["bout"]))

    inputs = (
        xm, x1, x2, cos_t, sin_t, pe_t,
        p["win_t"], p["bin"],
        wqkv, bqkv, p["wo"].astype(cdt), p["bo"], p["g1"], p["be1"],
        p["w1"].astype(cdt), p["b1"], p["w2"].astype(cdt), p["b2"],
        p["g2"], p["be2"],
        wout_pad, bout_pad,
    )

    def tok_spec(c):
        return pl.BlockSpec((blk, c), lambda b: (b, 0))

    def const_spec(a):
        zeros = (0,) * a.ndim
        return pl.BlockSpec(a.shape, lambda b, _z=zeros: _z)

    in_specs = [tok_spec(1), tok_spec(3), tok_spec(3),
                tok_spec(3), tok_spec(3), tok_spec(1)]
    in_specs += [const_spec(a) for a in inputs[6:]]

    # NOTE: VMEM footprint is tiny at these sizes; if T or the batch tile is
    # scaled up (esp. on v7x's 64 MiB VMEM), set vmem_limit_bytes explicitly and
    # consider pipeline_mode=pl.Buffered(1) on the constant-index weight specs.
    out_pad = pl.pallas_call(
        partial(transformer_kernel, seq_len=T),
        out_shape=jax.ShapeDtypeStruct((n_tok, OUT_PAD), jnp.float32),
        grid_spec=pltpu.PrefetchScalarGridSpec(
            num_scalar_prefetch=0,
            grid=(B // bt,),
            in_specs=in_specs,
            out_specs=pl.BlockSpec((blk, OUT_PAD), lambda b: (b, 0)),
        ),
        compiler_params=pltpu.CompilerParams(
            dimension_semantics=("parallel",)),
    )(*inputs)

    return out_pad[:, :INPUT_DIM].reshape(B, T, INPUT_DIM)


# ---------------------------- pure-JAX reference -----------------------------
def reference_forward(x, p, matmul_dtype=jnp.float32):
    """Head-batched reference. matmul_dtype mirrors the kernel's MXU-input cast."""
    cdt = matmul_dtype

    def mm(a, w):
        return jnp.dot(a.astype(cdt), w.astype(cdt),
                       preferred_element_type=jnp.float32)

    B, T, _ = x.shape
    cos, sin, pe = pos_encoding_tables(T)
    x_mic = x[:, :, 0:1]
    x1 = x[:, :, 1:7:2]
    x2 = x[:, :, 2:7:2]
    xp = jnp.concatenate(
        [x_mic + pe[None],
         x1 * cos[None] - x2 * sin[None],
         x1 * sin[None] + x2 * cos[None]], axis=-1)                 # (B, T, 7)
    h = jnp.dot(xp, p["win_t"]) + p["bin"][0]                       # f32 input proj

    scale = 1.0 / math.sqrt(HEAD_DIM)
    for l in range(NUM_LAYERS):
        q = (mm(h, p["wq"][l]) + p["bq"][l][0]) * scale
        k = mm(h, p["wk"][l]) + p["bk"][l][0]
        v = mm(h, p["wv"][l]) + p["bv"][l][0]
        qh = q.reshape(B, T, NHEAD, HEAD_DIM)
        kh = k.reshape(B, T, NHEAD, HEAD_DIM)
        vh = v.reshape(B, T, NHEAD, HEAD_DIM)
        s = jnp.einsum("bqhd,bkhd->bhqk", qh.astype(cdt), kh.astype(cdt),
                       preferred_element_type=jnp.float32)
        a = jax.nn.softmax(s, axis=-1)
        o = jnp.einsum("bhqk,bkhd->bqhd", a.astype(cdt), vh.astype(cdt),
                       preferred_element_type=jnp.float32).reshape(B, T, D_MODEL)
        attn = mm(o, p["wo"][l]) + p["bo"][l][0]
        h = _layernorm(h + attn, p["g1"][l][0], p["be1"][l][0])
        ff = jax.nn.relu(mm(h, p["w1"][l]) + p["b1"][l][0])
        ff = mm(ff, p["w2"][l]) + p["b2"][l][0]
        h = _layernorm(h + ff, p["g2"][l][0], p["be2"][l][0])
    return mm(h, p["wout_t"]) + p["bout"][0]


if __name__ == "__main__":
    key = jax.random.PRNGKey(0)
    kx, kp = jax.random.split(key)

    B, T = 16, 16
    x = jax.random.normal(kx, (B, T, INPUT_DIM), dtype=jnp.float32)
    params = init_params(kp)

    out = jax.block_until_ready(rope_transformer_forward(x, params))

    # structural check against a reference using the same bf16-MXU-input policy
    ref_matched = reference_forward(x, params, matmul_dtype=MATMUL_DTYPE)
    np.testing.assert_allclose(np.asarray(out), np.asarray(ref_matched),
                               atol=2e-2, rtol=2e-2)
    # semantic sanity check against the pure-f32 module math
    ref_f32 = reference_forward(x, params, matmul_dtype=jnp.float32)
    np.testing.assert_allclose(np.asarray(out), np.asarray(ref_f32),
                               atol=1e-1, rtol=1e-1)
    print("KERNEL_OK")
</pallas_src>

<mosaic_0001>
module attributes {stable_mosaic.version = 11 : i64} {
  func.func @transformer_kernel(%arg0: i32, %arg1: memref<128x1xf32, #tpu.memory_space<vmem>>, %arg2: memref<128x3xf32, #tpu.memory_space<vmem>>, %arg3: memref<128x3xf32, #tpu.memory_space<vmem>>, %arg4: memref<128x3xf32, #tpu.memory_space<vmem>>, %arg5: memref<128x3xf32, #tpu.memory_space<vmem>>, %arg6: memref<128x1xf32, #tpu.memory_space<vmem>>, %arg7: memref<7x32xf32, #tpu.memory_space<vmem>>, %arg8: memref<1x32xf32, #tpu.memory_space<vmem>>, %arg9: memref<4x32x96xbf16, #tpu.memory_space<vmem>>, %arg10: memref<4x1x96xf32, #tpu.memory_space<vmem>>, %arg11: memref<4x32x32xbf16, #tpu.memory_space<vmem>>, %arg12: memref<4x1x32xf32, #tpu.memory_space<vmem>>, %arg13: memref<4x1x32xf32, #tpu.memory_space<vmem>>, %arg14: memref<4x1x32xf32, #tpu.memory_space<vmem>>, %arg15: memref<4x32x64xbf16, #tpu.memory_space<vmem>>, %arg16: memref<4x1x64xf32, #tpu.memory_space<vmem>>, %arg17: memref<4x64x32xbf16, #tpu.memory_space<vmem>>, %arg18: memref<4x1x32xf32, #tpu.memory_space<vmem>>, %arg19: memref<4x1x32xf32, #tpu.memory_space<vmem>>, %arg20: memref<4x1x32xf32, #tpu.memory_space<vmem>>, %arg21: memref<32x128xbf16, #tpu.memory_space<vmem>>, %arg22: memref<1x128xf32, #tpu.memory_space<vmem>>, %arg23: memref<128x128xf32, #tpu.memory_space<vmem>>) attributes {dimension_semantics = [#tpu.dimension_semantics<parallel>], iteration_bounds = array<i64: 2>, scalar_prefetch = 0 : i64, scratch_operands = 0 : i64, tpu.core_type = #tpu.core_type<tc>, window_params = [{transform_indices = @transform_0, window_bounds = array<i64: 128, 1>}, {transform_indices = @transform_1, window_bounds = array<i64: 128, 3>}, {transform_indices = @transform_2, window_bounds = array<i64: 128, 3>}, {transform_indices = @transform_3, window_bounds = array<i64: 128, 3>}, {transform_indices = @transform_4, window_bounds = array<i64: 128, 3>}, {transform_indices = @transform_5, window_bounds = array<i64: 128, 1>}, {pipeline_mode = #tpu.pipeline_mode<synchronous>, transform_indices = @transform_6, window_bounds = array<i64: 7, 32>}, {pipeline_mode = #tpu.pipeline_mode<synchronous>, transform_indices = @transform_7, window_bounds = array<i64: 1, 32>}, {pipeline_mode = #tpu.pipeline_mode<synchronous>, transform_indices = @transform_8, window_bounds = array<i64: 4, 32, 96>}, {pipeline_mode = #tpu.pipeline_mode<synchronous>, transform_indices = @transform_9, window_bounds = array<i64: 4, 1, 96>}, {pipeline_mode = #tpu.pipeline_mode<synchronous>, transform_indices = @transform_10, window_bounds = array<i64: 4, 32, 32>}, {pipeline_mode = #tpu.pipeline_mode<synchronous>, transform_indices = @transform_11, window_bounds = array<i64: 4, 1, 32>}, {pipeline_mode = #tpu.pipeline_mode<synchronous>, transform_indices = @transform_12, window_bounds = array<i64: 4, 1, 32>}, {pipeline_mode = #tpu.pipeline_mode<synchronous>, transform_indices = @transform_13, window_bounds = array<i64: 4, 1, 32>}, {pipeline_mode = #tpu.pipeline_mode<synchronous>, transform_indices = @transform_14, window_bounds = array<i64: 4, 32, 64>}, {pipeline_mode = #tpu.pipeline_mode<synchronous>, transform_indices = @transform_15, window_bounds = array<i64: 4, 1, 64>}, {pipeline_mode = #tpu.pipeline_mode<synchronous>, transform_indices = @transform_16, window_bounds = array<i64: 4, 64, 32>}, {pipeline_mode = #tpu.pipeline_mode<synchronous>, transform_indices = @transform_17, window_bounds = array<i64: 4, 1, 32>}, {pipeline_mode = #tpu.pipeline_mode<synchronous>, transform_indices = @transform_18, window_bounds = array<i64: 4, 1, 32>}, {pipeline_mode = #tpu.pipeline_mode<synchronous>, transform_indices = @transform_19, window_bounds = array<i64: 4, 1, 32>}, {pipeline_mode = #tpu.pipeline_mode<synchronous>, transform_indices = @transform_20, window_bounds = array<i64: 32, 128>}, {pipeline_mode = #tpu.pipeline_mode<synchronous>, transform_indices = @transform_21, window_bounds = array<i64: 1, 128>}, {transform_indices = @transform_22, window_bounds = array<i64: 128, 128>}]} {
    %c0 = arith.constant 0 : index
    %c0_0 = arith.constant 0 : index
    %0 = vector.load %arg2[%c0, %c0_0] : memref<128x3xf32, #tpu.memory_space<vmem>>, vector<128x3xf32>
    %c0_1 = arith.constant 0 : index
    %c0_2 = arith.constant 0 : index
    %1 = vector.load %arg3[%c0_1, %c0_2] : memref<128x3xf32, #tpu.memory_space<vmem>>, vector<128x3xf32>
    %c0_3 = arith.constant 0 : index
    %c0_4 = arith.constant 0 : index
    %2 = vector.load %arg4[%c0_3, %c0_4] : memref<128x3xf32, #tpu.memory_space<vmem>>, vector<128x3xf32>
    %c0_5 = arith.constant 0 : index
    %c0_6 = arith.constant 0 : index
    %3 = vector.load %arg5[%c0_5, %c0_6] : memref<128x3xf32, #tpu.memory_space<vmem>>, vector<128x3xf32>
    %c0_7 = arith.constant 0 : index
    %c0_8 = arith.constant 0 : index
    %4 = vector.load %arg1[%c0_7, %c0_8] : memref<128x1xf32, #tpu.memory_space<vmem>>, vector<128x1xf32>
    %c0_9 = arith.constant 0 : index
    %c0_10 = arith.constant 0 : index
    %5 = vector.load %arg6[%c0_9, %c0_10] : memref<128x1xf32, #tpu.memory_space<vmem>>, vector<128x1xf32>
    %6 = arith.addf %4, %5 : vector<128x1xf32>
    %7 = arith.mulf %0, %2 : vector<128x3xf32>
    %8 = arith.mulf %1, %3 : vector<128x3xf32>
    %9 = arith.subf %7, %8 : vector<128x3xf32>
    %10 = arith.mulf %0, %3 : vector<128x3xf32>
    %11 = arith.mulf %1, %2 : vector<128x3xf32>
    %12 = arith.addf %10, %11 : vector<128x3xf32>
    %c0_11 = arith.constant 0 : index
    %c0_12 = arith.constant 0 : index
    %13 = vector.load %arg7[%c0_11, %c0_12] : memref<7x32xf32, #tpu.memory_space<vmem>>, vector<7x32xf32>
    %c0_13 = arith.constant 0 : index
    %c0_14 = arith.constant 0 : index
    %14 = vector.load %arg8[%c0_13, %c0_14] : memref<1x32xf32, #tpu.memory_space<vmem>>, vector<1x32xf32>
    %15 = vector.extract_strided_slice %13 {offsets = [0, 0], sizes = [1, 32], strides = [1, 1]} : vector<7x32xf32> to vector<1x32xf32>
    %16 = vector.broadcast %6 : vector<128x1xf32> to vector<128x32xf32>
    %17 = vector.broadcast %15 : vector<1x32xf32> to vector<128x32xf32>
    %18 = arith.mulf %16, %17 : vector<128x32xf32>
    %19 = vector.broadcast %14 : vector<1x32xf32> to vector<128x32xf32>
    %20 = arith.addf %19, %18 : vector<128x32xf32>
    %21 = vector.extract_strided_slice %9 {offsets = [0, 0], sizes = [128, 1], strides = [1, 1]} : vector<128x3xf32> to vector<128x1xf32>
    %22 = vector.extract_strided_slice %13 {offsets = [1, 0], sizes = [1, 32], strides = [1, 1]} : vector<7x32xf32> to vector<1x32xf32>
    %23 = vector.broadcast %21 : vector<128x1xf32> to vector<128x32xf32>
    %24 = vector.broadcast %22 : vector<1x32xf32> to vector<128x32xf32>
    %25 = arith.mulf %23, %24 : vector<128x32xf32>
    %26 = arith.addf %20, %25 : vector<128x32xf32>
    %27 = vector.extract_strided_slice %12 {offsets = [0, 0], sizes = [128, 1], strides = [1, 1]} : vector<128x3xf32> to vector<128x1xf32>
    %28 = vector.extract_strided_slice %13 {offsets = [4, 0], sizes = [1, 32], strides = [1, 1]} : vector<7x32xf32> to vector<1x32xf32>
    %29 = vector.broadcast %27 : vector<128x1xf32> to vector<128x32xf32>
    %30 = vector.broadcast %28 : vector<1x32xf32> to vector<128x32xf32>
    %31 = arith.mulf %29, %30 : vector<128x32xf32>
    %32 = arith.addf %26, %31 : vector<128x32xf32>
    %33 = vector.extract_strided_slice %9 {offsets = [0, 1], sizes = [128, 1], strides = [1, 1]} : vector<128x3xf32> to vector<128x1xf32>
    %34 = vector.extract_strided_slice %13 {offsets = [2, 0], sizes = [1, 32], strides = [1, 1]} : vector<7x32xf32> to vector<1x32xf32>
    %35 = vector.broadcast %33 : vector<128x1xf32> to vector<128x32xf32>
    %36 = vector.broadcast %34 : vector<1x32xf32> to vector<128x32xf32>
    %37 = arith.mulf %35, %36 : vector<128x32xf32>
    %38 = arith.addf %32, %37 : vector<128x32xf32>
    %39 = vector.extract_strided_slice %12 {offsets = [0, 1], sizes = [128, 1], strides = [1, 1]} : vector<128x3xf32> to vector<128x1xf32>
    %40 = vector.extract_strided_slice %13 {offsets = [5, 0], sizes = [1, 32], strides = [1, 1]} : vector<7x32xf32> to vector<1x32xf32>
    %41 = vector.broadcast %39 : vector<128x1xf32> to vector<128x32xf32>
    %42 = vector.broadcast %40 : vector<1x32xf32> to vector<128x32xf32>
    %43 = arith.mulf %41, %42 : vector<128x32xf32>
    %44 = arith.addf %38, %43 : vector<128x32xf32>
    %45 = vector.extract_strided_slice %9 {offsets = [0, 2], sizes = [128, 1], strides = [1, 1]} : vector<128x3xf32> to vector<128x1xf32>
    %46 = vector.extract_strided_slice %13 {offsets = [3, 0], sizes = [1, 32], strides = [1, 1]} : vector<7x32xf32> to vector<1x32xf32>
    %47 = vector.broadcast %45 : vector<128x1xf32> to vector<128x32xf32>
    %48 = vector.broadcast %46 : vector<1x32xf32> to vector<128x32xf32>
    %49 = arith.mulf %47, %48 : vector<128x32xf32>
    %50 = arith.addf %44, %49 : vector<128x32xf32>
    %51 = vector.extract_strided_slice %12 {offsets = [0, 2], sizes = [128, 1], strides = [1, 1]} : vector<128x3xf32> to vector<128x1xf32>
    %52 = vector.extract_strided_slice %13 {offsets = [6, 0], sizes = [1, 32], strides = [1, 1]} : vector<7x32xf32> to vector<1x32xf32>
    %53 = vector.broadcast %51 : vector<128x1xf32> to vector<128x32xf32>
    %54 = vector.broadcast %52 : vector<1x32xf32> to vector<128x32xf32>
    %55 = arith.mulf %53, %54 : vector<128x32xf32>
    %56 = arith.addf %50, %55 : vector<128x32xf32>
    %57 = tpu.iota {dimensions = array<i32: 0>} : vector<8x1x32xi32>
    %58 = tpu.iota {dimensions = array<i32: 2>} : vector<8x1x32xi32>
    %c4_i32 = arith.constant 4 : i32
    %59 = vector.broadcast %c4_i32 : i32 to vector<8x1x32xi32>
    %60 = arith.muli %57, %59 : vector<8x1x32xi32>
    %61 = arith.cmpi sge, %58, %60 : vector<8x1x32xi32>
    %c1_i32 = arith.constant 1 : i32
    %62 = vector.broadcast %c1_i32 : i32 to vector<8x1x32xi32>
    %63 = arith.addi %57, %62 : vector<8x1x32xi32>
    %c4_i32_15 = arith.constant 4 : i32
    %64 = vector.broadcast %c4_i32_15 : i32 to vector<8x1x32xi32>
    %65 = arith.muli %63, %64 : vector<8x1x32xi32>
    %66 = arith.cmpi slt, %58, %65 : vector<8x1x32xi32>
    %67 = arith.andi %61, %66 : vector<8x1x32xi1>
    %68 = arith.extui %67 : vector<8x1x32xi1> to vector<8x1x32xi32>
    %69 = arith.sitofp %68 : vector<8x1x32xi32> to vector<8x1x32xf32>
    %c0_i32 = arith.constant 0 : i32
    %c4_i32_16 = arith.constant 4 : i32
    %70 = arith.addi %c0_i32, %c4_i32_16 : i32
    %c1_i32_17 = arith.constant 1 : i32
    %71 = scf.for %arg24 = %c0_i32 to %70 step %c1_i32_17 iter_args(%arg25 = %56) -> (vector<128x32xf32>)  : i32 {
      %79 = arith.index_cast %arg24 : i32 to index
      %c0_25 = arith.constant 0 : index
      %c0_26 = arith.constant 0 : index
      %80 = vector.load %arg9[%79, %c0_25, %c0_26] : memref<4x32x96xbf16, #tpu.memory_space<vmem>>, vector<1x32x96xbf16>
      %81 = vector.shape_cast %80 : vector<1x32x96xbf16> to vector<32x96xbf16>
      %82 = arith.truncf %arg25 : vector<128x32xf32> to vector<128x32xbf16>
      %cst_27 = arith.constant dense<0.000000e+00> : vector<128x96xf32>
      %83 = tpu.matmul %82, %81, %cst_27 {dimension_numbers = #tpu.dot_dimension_numbers<[1], [0], [0], [1], [0, 0, 1, 1], [], []>} : vector<128x32xbf16>, vector<32x96xbf16>, vector<128x96xf32> -> vector<128x96xf32>
      %84 = arith.index_cast %arg24 : i32 to index
      %c0_28 = arith.constant 0 : index
      %c0_29 = arith.constant 0 : index
      %85 = vector.load %arg10[%84, %c0_28, %c0_29] : memref<4x1x96xf32, #tpu.memory_space<vmem>>, vector<1x1x96xf32>
      %86 = vector.shape_cast %85 : vector<1x1x96xf32> to vector<1x96xf32>
      %87 = vector.broadcast %86 : vector<1x96xf32> to vector<128x96xf32>
      %88 = arith.addf %83, %87 : vector<128x96xf32>
      %89 = vector.extract_strided_slice %88 {offsets = [0, 0], sizes = [128, 32], strides = [1, 1]} : vector<128x96xf32> to vector<128x32xf32>
      %cst_30 = arith.constant 5.000000e-01 : f32
      %90 = vector.broadcast %cst_30 : f32 to vector<128x32xf32>
      %91 = arith.mulf %89, %90 : vector<128x32xf32>
      %92 = vector.extract_strided_slice %88 {offsets = [0, 32], sizes = [128, 32], strides = [1, 1]} : vector<128x96xf32> to vector<128x32xf32>
      %93 = vector.extract_strided_slice %88 {offsets = [0, 64], sizes = [128, 32], strides = [1, 1]} : vector<128x96xf32> to vector<128x32xf32>
      %94 = vector.shape_cast %91 : vector<128x32xf32> to vector<8x16x32xf32>
      %95 = vector.shape_cast %92 : vector<128x32xf32> to vector<8x16x32xf32>
      %96 = vector.shape_cast %93 : vector<128x32xf32> to vector<8x16x32xf32>
      %97 = vector.shape_cast %94 : vector<8x16x32xf32> to vector<8x1x16x32xf32>
      %98 = vector.shape_cast %69 : vector<8x1x32xf32> to vector<1x8x1x32xf32>
      %99 = vector.broadcast %97 : vector<8x1x16x32xf32> to vector<8x8x16x32xf32>
      %100 = vector.broadcast %98 : vector<1x8x1x32xf32> to vector<8x8x16x32xf32>
      %101 = arith.mulf %99, %100 : vector<8x8x16x32xf32>
      %102 = vector.shape_cast %101 : vector<8x8x16x32xf32> to vector<8x128x32xf32>
      %103 = arith.truncf %102 : vector<8x128x32xf32> to vector<8x128x32xbf16>
      %104 = arith.truncf %95 : vector<8x16x32xf32> to vector<8x16x32xbf16>
      "tpu.trace_start"() <{level = 10 : i32, message = "bnd,bkd->bnk"}> : () -> ()
      %cst_31 = arith.constant dense<0.000000e+00> : vector<8x128x16xf32>
      %105 = tpu.matmul %103, %104, %cst_31 {dimension_numbers = #tpu.dot_dimension_numbers<[2], [2], [1], [1], [0, 0, 0, 1, 1, 1], [0], [0]>} : vector<8x128x32xbf16>, vector<8x16x32xbf16>, vector<8x128x16xf32> -> vector<8x128x16xf32>
      "tpu.trace_stop"() : () -> ()
      %cst_32 = arith.constant dense<0xFF800000> : vector<8x128xf32>
      %106 = vector.multi_reduction <maximumf>, %105, %cst_32 [2] : vector<8x128x16xf32> to vector<8x128xf32>
      %107 = vector.shape_cast %106 : vector<8x128xf32> to vector<8x128x1xf32>
      %108 = vector.broadcast %107 : vector<8x128x1xf32> to vector<8x128x16xf32>
      %109 = arith.subf %105, %108 : vector<8x128x16xf32>
      %110 = math.exp %109 : vector<8x128x16xf32>
      %cst_33 = arith.constant dense<0.000000e+00> : vector<8x128xf32>
      %111 = vector.multi_reduction <add>, %110, %cst_33 [2] : vector<8x128x16xf32> to vector<8x128xf32>
      %112 = vector.shape_cast %111 : vector<8x128xf32> to vector<8x128x1xf32>
      %113 = tpu.reciprocal %112 {approx = true} : vector<8x128x1xf32> -> vector<8x128x1xf32>
      %114 = vector.broadcast %113 : vector<8x128x1xf32> to vector<8x128x16xf32>
      %115 = arith.mulf %110, %114 : vector<8x128x16xf32>
      %116 = arith.truncf %115 : vector<8x128x16xf32> to vector<8x128x16xbf16>
      %117 = arith.truncf %96 : vector<8x16x32xf32> to vector<8x16x32xbf16>
      "tpu.trace_start"() <{level = 10 : i32, message = "bnk,bkd->bnd"}> : () -> ()
      %cst_34 = arith.constant dense<0.000000e+00> : vector<8x128x32xf32>
      %118 = tpu.matmul %116, %117, %cst_34 {dimension_numbers = #tpu.dot_dimension_numbers<[2], [1], [1], [2], [0, 0, 0, 1, 1, 2], [0], [0]>} : vector<8x128x16xbf16>, vector<8x16x32xbf16>, vector<8x128x32xf32> -> vector<8x128x32xf32>
      "tpu.trace_stop"() : () -> ()
      %119 = vector.shape_cast %118 : vector<8x128x32xf32> to vector<8x8x16x32xf32>
      %120 = vector.shape_cast %69 : vector<8x1x32xf32> to vector<1x8x1x32xf32>
      %121 = vector.broadcast %120 : vector<1x8x1x32xf32> to vector<8x8x16x32xf32>
      %122 = arith.mulf %119, %121 : vector<8x8x16x32xf32>
      %cst_35 = arith.constant dense<0.000000e+00> : vector<8x16x32xf32>
      %123 = vector.multi_reduction <add>, %122, %cst_35 [1] : vector<8x8x16x32xf32> to vector<8x16x32xf32>
      %124 = vector.shape_cast %123 : vector<8x16x32xf32> to vector<128x32xf32>
      %125 = arith.index_cast %arg24 : i32 to index
      %c0_36 = arith.constant 0 : index
      %c0_37 = arith.constant 0 : index
      %126 = vector.load %arg11[%125, %c0_36, %c0_37] : memref<4x32x32xbf16, #tpu.memory_space<vmem>>, vector<1x32x32xbf16>
      %127 = vector.shape_cast %126 : vector<1x32x32xbf16> to vector<32x32xbf16>
      %128 = arith.truncf %124 : vector<128x32xf32> to vector<128x32xbf16>
      %cst_38 = arith.constant dense<0.000000e+00> : vector<128x32xf32>
      %129 = tpu.matmul %128, %127, %cst_38 {dimension_numbers = #tpu.dot_dimension_numbers<[1], [0], [0], [1], [0, 0, 1, 1], [], []>} : vector<128x32xbf16>, vector<32x32xbf16>, vector<128x32xf32> -> vector<128x32xf32>
      %130 = arith.index_cast %arg24 : i32 to index
      %c0_39 = arith.constant 0 : index
      %c0_40 = arith.constant 0 : index
      %131 = vector.load %arg12[%130, %c0_39, %c0_40] : memref<4x1x32xf32, #tpu.memory_space<vmem>>, vector<1x1x32xf32>
      %132 = vector.shape_cast %131 : vector<1x1x32xf32> to vector<1x32xf32>
      %133 = vector.broadcast %132 : vector<1x32xf32> to vector<128x32xf32>
      %134 = arith.addf %129, %133 : vector<128x32xf32>
      %135 = arith.addf %arg25, %134 : vector<128x32xf32>
      %136 = arith.index_cast %arg24 : i32 to index
      %c0_41 = arith.constant 0 : index
      %c0_42 = arith.constant 0 : index
      %137 = vector.load %arg13[%136, %c0_41, %c0_42] : memref<4x1x32xf32, #tpu.memory_space<vmem>>, vector<1x1x32xf32>
      %138 = vector.shape_cast %137 : vector<1x1x32xf32> to vector<1x32xf32>
      %139 = arith.index_cast %arg24 : i32 to index
      %c0_43 = arith.constant 0 : index
      %c0_44 = arith.constant 0 : index
      %140 = vector.load %arg14[%139, %c0_43, %c0_44] : memref<4x1x32xf32, #tpu.memory_space<vmem>>, vector<1x1x32xf32>
      %141 = vector.shape_cast %140 : vector<1x1x32xf32> to vector<1x32xf32>
      %cst_45 = arith.constant dense<0.000000e+00> : vector<128xf32>
      %142 = vector.multi_reduction <add>, %135, %cst_45 [1] : vector<128x32xf32> to vector<128xf32>
      %143 = vector.shape_cast %142 : vector<128xf32> to vector<128x1xf32>
      %cst_46 = arith.constant 3.200000e+01 : f32
      %144 = vector.broadcast %cst_46 : f32 to vector<128x1xf32>
      %145 = arith.divf %143, %144 : vector<128x1xf32>
      %146 = vector.broadcast %145 : vector<128x1xf32> to vector<128x32xf32>
      %147 = arith.subf %135, %146 : vector<128x32xf32>
      %148 = arith.mulf %147, %147 : vector<128x32xf32>
      %cst_47 = arith.constant dense<0.000000e+00> : vector<128xf32>
      %149 = vector.multi_reduction <add>, %148, %cst_47 [1] : vector<128x32xf32> to vector<128xf32>
      %150 = vector.shape_cast %149 : vector<128xf32> to vector<128x1xf32>
      %cst_48 = arith.constant 3.200000e+01 : f32
      %151 = vector.broadcast %cst_48 : f32 to vector<128x1xf32>
      %152 = arith.divf %150, %151 : vector<128x1xf32>
      %cst_49 = arith.constant 9.99999974E-6 : f32
      %153 = vector.broadcast %cst_49 : f32 to vector<128x1xf32>
      %154 = arith.addf %152, %153 : vector<128x1xf32>
      %155 = math.rsqrt %154 : vector<128x1xf32>
      %156 = vector.broadcast %155 : vector<128x1xf32> to vector<128x32xf32>
      %157 = arith.mulf %147, %156 : vector<128x32xf32>
      %158 = vector.broadcast %138 : vector<1x32xf32> to vector<128x32xf32>
      %159 = arith.mulf %157, %158 : vector<128x32xf32>
      %160 = vector.broadcast %141 : vector<1x32xf32> to vector<128x32xf32>
      %161 = arith.addf %159, %160 : vector<128x32xf32>
      %162 = arith.index_cast %arg24 : i32 to index
      %c0_50 = arith.constant 0 : index
      %c0_51 = arith.constant 0 : index
      %163 = vector.load %arg15[%162, %c0_50, %c0_51] : memref<4x32x64xbf16, #tpu.memory_space<vmem>>, vector<1x32x64xbf16>
      %164 = vector.shape_cast %163 : vector<1x32x64xbf16> to vector<32x64xbf16>
      %165 = arith.truncf %161 : vector<128x32xf32> to vector<128x32xbf16>
      %cst_52 = arith.constant dense<0.000000e+00> : vector<128x64xf32>
      %166 = tpu.matmul %165, %164, %cst_52 {dimension_numbers = #tpu.dot_dimension_numbers<[1], [0], [0], [1], [0, 0, 1, 1], [], []>} : vector<128x32xbf16>, vector<32x64xbf16>, vector<128x64xf32> -> vector<128x64xf32>
      %167 = arith.index_cast %arg24 : i32 to index
      %c0_53 = arith.constant 0 : index
      %c0_54 = arith.constant 0 : index
      %168 = vector.load %arg16[%167, %c0_53, %c0_54] : memref<4x1x64xf32, #tpu.memory_space<vmem>>, vector<1x1x64xf32>
      %169 = vector.shape_cast %168 : vector<1x1x64xf32> to vector<1x64xf32>
      %170 = vector.broadcast %169 : vector<1x64xf32> to vector<128x64xf32>
      %171 = arith.addf %166, %170 : vector<128x64xf32>
      %cst_55 = arith.constant 0.000000e+00 : f32
      %172 = vector.broadcast %cst_55 : f32 to vector<128x64xf32>
      %173 = arith.maximumf %171, %172 : vector<128x64xf32>
      %174 = arith.index_cast %arg24 : i32 to index
      %c0_56 = arith.constant 0 : index
      %c0_57 = arith.constant 0 : index
      %175 = vector.load %arg17[%174, %c0_56, %c0_57] : memref<4x64x32xbf16, #tpu.memory_space<vmem>>, vector<1x64x32xbf16>
      %176 = vector.shape_cast %175 : vector<1x64x32xbf16> to vector<64x32xbf16>
      %177 = arith.truncf %173 : vector<128x64xf32> to vector<128x64xbf16>
      %cst_58 = arith.constant dense<0.000000e+00> : vector<128x32xf32>
      %178 = tpu.matmul %177, %176, %cst_58 {dimension_numbers = #tpu.dot_dimension_numbers<[1], [0], [0], [1], [0, 0, 1, 1], [], []>} : vector<128x64xbf16>, vector<64x32xbf16>, vector<128x32xf32> -> vector<128x32xf32>
      %179 = arith.index_cast %arg24 : i32 to index
      %c0_59 = arith.constant 0 : index
      %c0_60 = arith.constant 0 : index
      %180 = vector.load %arg18[%179, %c0_59, %c0_60] : memref<4x1x32xf32, #tpu.memory_space<vmem>>, vector<1x1x32xf32>
      %181 = vector.shape_cast %180 : vector<1x1x32xf32> to vector<1x32xf32>
      %182 = vector.broadcast %181 : vector<1x32xf32> to vector<128x32xf32>
      %183 = arith.addf %178, %182 : vector<128x32xf32>
      %184 = arith.addf %161, %183 : vector<128x32xf32>
      %185 = arith.index_cast %arg24 : i32 to index
      %c0_61 = arith.constant 0 : index
      %c0_62 = arith.constant 0 : index
      %186 = vector.load %arg19[%185, %c0_61, %c0_62] : memref<4x1x32xf32, #tpu.memory_space<vmem>>, vector<1x1x32xf32>
      %187 = vector.shape_cast %186 : vector<1x1x32xf32> to vector<1x32xf32>
      %188 = arith.index_cast %arg24 : i32 to index
      %c0_63 = arith.constant 0 : index
      %c0_64 = arith.constant 0 : index
      %189 = vector.load %arg20[%188, %c0_63, %c0_64] : memref<4x1x32xf32, #tpu.memory_space<vmem>>, vector<1x1x32xf32>
      %190 = vector.shape_cast %189 : vector<1x1x32xf32> to vector<1x32xf32>
      %cst_65 = arith.constant dense<0.000000e+00> : vector<128xf32>
      %191 = vector.multi_reduction <add>, %184, %cst_65 [1] : vector<128x32xf32> to vector<128xf32>
      %192 = vector.shape_cast %191 : vector<128xf32> to vector<128x1xf32>
      %cst_66 = arith.constant 3.200000e+01 : f32
      %193 = vector.broadcast %cst_66 : f32 to vector<128x1xf32>
      %194 = arith.divf %192, %193 : vector<128x1xf32>
      %195 = vector.broadcast %194 : vector<128x1xf32> to vector<128x32xf32>
      %196 = arith.subf %184, %195 : vector<128x32xf32>
      %197 = arith.mulf %196, %196 : vector<128x32xf32>
      %cst_67 = arith.constant dense<0.000000e+00> : vector<128xf32>
      %198 = vector.multi_reduction <add>, %197, %cst_67 [1] : vector<128x32xf32> to vector<128xf32>
      %199 = vector.shape_cast %198 : vector<128xf32> to vector<128x1xf32>
      %cst_68 = arith.constant 3.200000e+01 : f32
      %200 = vector.broadcast %cst_68 : f32 to vector<128x1xf32>
      %201 = arith.divf %199, %200 : vector<128x1xf32>
      %cst_69 = arith.constant 9.99999974E-6 : f32
      %202 = vector.broadcast %cst_69 : f32 to vector<128x1xf32>
      %203 = arith.addf %201, %202 : vector<128x1xf32>
      %204 = math.rsqrt %203 : vector<128x1xf32>
      %205 = vector.broadcast %204 : vector<128x1xf32> to vector<128x32xf32>
      %206 = arith.mulf %196, %205 : vector<128x32xf32>
      %207 = vector.broadcast %187 : vector<1x32xf32> to vector<128x32xf32>
      %208 = arith.mulf %206, %207 : vector<128x32xf32>
      %209 = vector.broadcast %190 : vector<1x32xf32> to vector<128x32xf32>
      %210 = arith.addf %208, %209 : vector<128x32xf32>
      scf.yield %210 : vector<128x32xf32>
    }
    %c4_i32_18 = arith.constant 4 : i32
    %c0_19 = arith.constant 0 : index
    %c0_20 = arith.constant 0 : index
    %72 = vector.load %arg21[%c0_19, %c0_20] : memref<32x128xbf16, #tpu.memory_space<vmem>>, vector<32x128xbf16>
    %73 = arith.truncf %71 : vector<128x32xf32> to vector<128x32xbf16>
    %cst = arith.constant dense<0.000000e+00> : vector<128x128xf32>
    %74 = tpu.matmul %73, %72, %cst {dimension_numbers = #tpu.dot_dimension_numbers<[1], [0], [0], [1], [0, 0, 1, 1], [], []>} : vector<128x32xbf16>, vector<32x128xbf16>, vector<128x128xf32> -> vector<128x128xf32>
    %c0_21 = arith.constant 0 : index
    %c0_22 = arith.constant 0 : index
    %75 = vector.load %arg22[%c0_21, %c0_22] : memref<1x128xf32, #tpu.memory_space<vmem>>, vector<1x128xf32>
    %76 = vector.broadcast %75 : vector<1x128xf32> to vector<128x128xf32>
    %77 = arith.addf %74, %76 : vector<128x128xf32>
    %c0_23 = arith.constant 0 : index
    %c0_24 = arith.constant 0 : index
    %78 = vector.load %arg23[%c0_23, %c0_24] : memref<128x128xf32, #tpu.memory_space<vmem>>, vector<128x128xf32>
    tpu.vector_store %arg23[%c0_23, %c0_24], %77 {strides = array<i32>} : memref<128x128xf32, #tpu.memory_space<vmem>>, vector<128x128xf32>,
    return
  }
  func.func @transform_0(%arg0: i32) -> (i32, i32) {
    %c0_i32 = arith.constant 0 : i32
    %c0_i32_0 = arith.constant 0 : i32
    return %arg0, %c0_i32 : i32, i32
  }
  func.func @transform_1(%arg0: i32) -> (i32, i32) {
    %c0_i32 = arith.constant 0 : i32
    %c0_i32_0 = arith.constant 0 : i32
    return %arg0, %c0_i32 : i32, i32
  }
  func.func @transform_2(%arg0: i32) -> (i32, i32) {
    %c0_i32 = arith.constant 0 : i32
    %c0_i32_0 = arith.constant 0 : i32
    return %arg0, %c0_i32 : i32, i32
  }
  func.func @transform_3(%arg0: i32) -> (i32, i32) {
    %c0_i32 = arith.constant 0 : i32
    %c0_i32_0 = arith.constant 0 : i32
    return %arg0, %c0_i32 : i32, i32
  }
  func.func @transform_4(%arg0: i32) -> (i32, i32) {
    %c0_i32 = arith.constant 0 : i32
    %c0_i32_0 = arith.constant 0 : i32
    return %arg0, %c0_i32 : i32, i32
  }
  func.func @transform_5(%arg0: i32) -> (i32, i32) {
    %c0_i32 = arith.constant 0 : i32
    %c0_i32_0 = arith.constant 0 : i32
    return %arg0, %c0_i32 : i32, i32
  }
  func.func @transform_6(%arg0: i32) -> (i32, i32) {
    %c0_i32 = arith.constant 0 : i32
    %c0_i32_0 = arith.constant 0 : i32
    %c0_i32_1 = arith.constant 0 : i32
    return %c0_i32, %c0_i32_0 : i32, i32
  }
  func.func @transform_7(%arg0: i32) -> (i32, i32) {
    %c0_i32 = arith.constant 0 : i32
    %c0_i32_0 = arith.constant 0 : i32
    %c0_i32_1 = arith.constant 0 : i32
    return %c0_i32, %c0_i32_0 : i32, i32
  }
  func.func @transform_8(%arg0: i32) -> (i32, i32, i32) {
    %c0_i32 = arith.constant 0 : i32
    %c0_i32_0 = arith.constant 0 : i32
    %c0_i32_1 = arith.constant 0 : i32
    %c0_i32_2 = arith.constant 0 : i32
    return %c0_i32, %c0_i32_0, %c0_i32_1 : i32, i32, i32
  }
  func.func @transform_9(%arg0: i32) -> (i32, i32, i32) {
    %c0_i32 = arith.constant 0 : i32
    %c0_i32_0 = arith.constant 0 : i32
    %c0_i32_1 = arith.constant 0 : i32
    %c0_i32_2 = arith.constant 0 : i32
    return %c0_i32, %c0_i32_0, %c0_i32_1 : i32, i32, i32
  }
  func.func @transform_10(%arg0: i32) -> (i32, i32, i32) {
    %c0_i32 = arith.constant 0 : i32
    %c0_i32_0 = arith.constant 0 : i32
    %c0_i32_1 = arith.constant 0 : i32
    %c0_i32_2 = arith.constant 0 : i32
    return %c0_i32, %c0_i32_0, %c0_i32_1 : i32, i32, i32
  }
  func.func @transform_11(%arg0: i32) -> (i32, i32, i32) {
    %c0_i32 = arith.constant 0 : i32
    %c0_i32_0 = arith.constant 0 : i32
    %c0_i32_1 = arith.constant 0 : i32
    %c0_i32_2 = arith.constant 0 : i32
    return %c0_i32, %c0_i32_0, %c0_i32_1 : i32, i32, i32
  }
  func.func @transform_12(%arg0: i32) -> (i32, i32, i32) {
    %c0_i32 = arith.constant 0 : i32
    %c0_i32_0 = arith.constant 0 : i32
    %c0_i32_1 = arith.constant 0 : i32
    %c0_i32_2 = arith.constant 0 : i32
    return %c0_i32, %c0_i32_0, %c0_i32_1 : i32, i32, i32
  }
  func.func @transform_13(%arg0: i32) -> (i32, i32, i32) {
    %c0_i32 = arith.constant 0 : i32
    %c0_i32_0 = arith.constant 0 : i32
    %c0_i32_1 = arith.constant 0 : i32
    %c0_i32_2 = arith.constant 0 : i32
    return %c0_i32, %c0_i32_0, %c0_i32_1 : i32, i32, i32
  }
  func.func @transform_14(%arg0: i32) -> (i32, i32, i32) {
    %c0_i32 = arith.constant 0 : i32
    %c0_i32_0 = arith.constant 0 : i32
    %c0_i32_1 = arith.constant 0 : i32
    %c0_i32_2 = arith.constant 0 : i32
    return %c0_i32, %c0_i32_0, %c0_i32_1 : i32, i32, i32
  }
  func.func @transform_15(%arg0: i32) -> (i32, i32, i32) {
    %c0_i32 = arith.constant 0 : i32
    %c0_i32_0 = arith.constant 0 : i32
    %c0_i32_1 = arith.constant 0 : i32
    %c0_i32_2 = arith.constant 0 : i32
    return %c0_i32, %c0_i32_0, %c0_i32_1 : i32, i32, i32
  }
  func.func @transform_16(%arg0: i32) -> (i32, i32, i32) {
    %c0_i32 = arith.constant 0 : i32
    %c0_i32_0 = arith.constant 0 : i32
    %c0_i32_1 = arith.constant 0 : i32
    %c0_i32_2 = arith.constant 0 : i32
    return %c0_i32, %c0_i32_0, %c0_i32_1 : i32, i32, i32
  }
  func.func @transform_17(%arg0: i32) -> (i32, i32, i32) {
    %c0_i32 = arith.constant 0 : i32
    %c0_i32_0 = arith.constant 0 : i32
    %c0_i32_1 = arith.constant 0 : i32
    %c0_i32_2 = arith.constant 0 : i32
    return %c0_i32, %c0_i32_0, %c0_i32_1 : i32, i32, i32
  }
  func.func @transform_18(%arg0: i32) -> (i32, i32, i32) {
    %c0_i32 = arith.constant 0 : i32
    %c0_i32_0 = arith.constant 0 : i32
    %c0_i32_1 = arith.constant 0 : i32
    %c0_i32_2 = arith.constant 0 : i32
    return %c0_i32, %c0_i32_0, %c0_i32_1 : i32, i32, i32
  }
  func.func @transform_19(%arg0: i32) -> (i32, i32, i32) {
    %c0_i32 = arith.constant 0 : i32
    %c0_i32_0 = arith.constant 0 : i32
    %c0_i32_1 = arith.constant 0 : i32
    %c0_i32_2 = arith.constant 0 : i32
    return %c0_i32, %c0_i32_0, %c0_i32_1 : i32, i32, i32
  }
  func.func @transform_20(%arg0: i32) -> (i32, i32) {
    %c0_i32 = arith.constant 0 : i32
    %c0_i32_0 = arith.constant 0 : i32
    %c0_i32_1 = arith.constant 0 : i32
    return %c0_i32, %c0_i32_0 : i32, i32
  }
  func.func @transform_21(%arg0: i32) -> (i32, i32) {
    %c0_i32 = arith.constant 0 : i32
    %c0_i32_0 = arith.constant 0 : i32
    %c0_i32_1 = arith.constant 0 : i32
    return %c0_i32, %c0_i32_0 : i32, i32
  }
  func.func @transform_22(%arg0: i32) -> (i32, i32) {
    %c0_i32 = arith.constant 0 : i32
    %c0_i32_0 = arith.constant 0 : i32
    return %arg0, %c0_i32 : i32, i32
  }
}

</mosaic_0001>

<bundles_post_ra>
// kernel: tpu_custom_call.1
= control target key start
LH: loop header
LB: loop body
LE: loop exit
PB: predicated region body
PF: predicated region fallthrough
CT: control target
= control target key end

     0   :  { %s14762_s0 = inlined_call_operand.vmem [shape: f32[256,1], index: 0, kind: input, shape index: {}]   ;;  %s14763_s1 = inlined_call_operand.vmem [shape: f32[256,3], index: 1, kind: input, shape index: {}]   ;;  %s14764_s2 = inlined_call_operand.vmem [shape: f32[256,3], index: 2, kind: input, shape index: {}]   ;;  %s14765_s3 = inlined_call_operand.vmem [shape: f32[256,3], index: 3, kind: input, shape index: {}]   ;;  %s14766_s4 = inlined_call_operand.vmem [shape: f32[256,3], index: 4, kind: input, shape index: {}]   ;;  %s14767_s5 = inlined_call_operand.vmem [shape: f32[256,1], index: 5, kind: input, shape index: {}]   ;;  %s14768_s6 = inlined_call_operand.vmem [shape: f32[7,32], index: 6, kind: input, shape index: {}]   ;;  %s14769_s7 = inlined_call_operand.vmem [shape: f32[1,32], index: 7, kind: input, shape index: {}]   ;;  %s14770_s8 = inlined_call_operand.vmem [shape: bf16[4,32,96], index: 8, kind: input, shape index: {}]   ;;  %s14771_s9 = inlined_call_operand.vmem [shape: f32[4,1,96], index: 9, kind: input, shape index: {}]   ;;  %s14772_s10 = inlined_call_operand.vmem [shape: bf16[4,32,32], index: 10, kind: input, shape index: {}]   ;;  %s14773_s11 = inlined_call_operand.vmem [shape: f32[4,1,32], index: 11, kind: input, shape index: {}]   ;;  %s14774_s12 = inlined_call_operand.vmem [shape: f32[4,1,32], index: 12, kind: input, shape index: {}]   ;;  %s14775_s13 = inlined_call_operand.vmem [shape: f32[4,1,32], index: 13, kind: input, shape index: {}]   ;;  %s14776_s14 = inlined_call_operand.vmem [shape: bf16[4,32,64], index: 14, kind: input, shape index: {}]   ;;  %s14777_s15 = inlined_call_operand.vmem [shape: f32[4,1,64], index: 15, kind: input, shape index: {}]   ;;  %s14778_s16 = inlined_call_operand.vmem [shape: bf16[4,64,32], index: 16, kind: input, shape index: {}]   ;;  %s14779_s17 = inlined_call_operand.vmem [shape: f32[4,1,32], index: 17, kind: input, shape index: {}]   ;;  %s14780_s18 = inlined_call_operand.vmem [shape: f32[4,1,32], index: 18, kind: input, shape index: {}]   ;;  %s14781_s19 = inlined_call_operand.vmem [shape: f32[4,1,32], index: 19, kind: input, shape index: {}]   ;;  %s14782_s20 = inlined_call_operand.vmem [shape: bf16[32,128], index: 20, kind: input, shape index: {}]   ;;  %s14783_s21 = inlined_call_operand.vmem [shape: f32[1,128], index: 21, kind: input, shape index: {}]   ;;  %s14784_s22 = inlined_call_operand.hbm [shape: f32[256,128], index: 22, kind: output, shape index: {}]  }
   0x1   :  { %15320 = sst [smem:[#allocation188_spill]] %s14762_s0 }
   0x2   :  { %15321 = sst [smem:[#allocation189_spill]] %s14763_s1 }
   0x3   :  { %15322 = sst [smem:[#allocation190_spill]] %s14764_s2 }
   0x4   :  { %15323 = sst [smem:[#allocation191_spill]] %s14765_s3 }
   0x5   :  { %15324 = sst [smem:[#allocation192_spill]] %s14766_s4 }
   0x6   :  { %15325 = sst [smem:[#allocation193_spill]] %s14767_s5 }
   0x7   :  { %15326 = sst [smem:[#allocation194_spill]] %s14768_s6 }
   0x8   :  { %15327 = sst [smem:[#allocation195_spill]] %s14783_s21 }
   0x9   :  { %15328 = sst [smem:[#allocation196_spill]] %s14784_s22 }
   0xa   :  { %27 = vsyncpa [#allocation3], 0 }
   0xb   :  { %29 = vsyncpa [#allocation3 + $0x1], 0  ;;  %s9396_s3 = smov 0   ;;  %s9398_s28 = smov 0  }
   0xc   :  { %s9400_s29 = smov 0   ;;  %s9402_s30 = smov 0  }
   0xd LB: > { %15329 = sst [smem:[#allocation5_spill]] %s9190_s3  ;;  %s9417_s4 = sadd.s32 4294967295, %s9202_s30   ;;  %s9202_s30 = sphi %s9402_s30, %s16478_s30   ;;  %s9198_s29 = sphi %s9400_s29, %s16480_s29   ;;  %s9194_s28 = sphi %s9398_s28, %s16482_s28   ;;  %s9190_s3 = sphi %s9396_s3, %s16481_s3  }
   0xe   : > { %15330 = sst [smem:[#allocation6_spill]] %s9198_s29  ;;  %s7464_s0 = sadd.s32 4294967294, %s9202_s30  }
   0xf   : > { %15331 = sst [smem:[#allocation7_spill]] %s9202_s30  ;;  %s9421_s23 = sadd.s32 1, %s9202_s30  }
  0x10   : > { %15332 = sst [smem:[#allocation8_spill]] %s9417_s4  ;;  %s534_s1 = sadd.s32 1, %s9198_s29 }
  0x11   : > { %15333 = sst [smem:[#allocation9_spill]] %s9421_s23  ;;  %s531_s5 = ssub.s32 %s9202_s30, %s9421_s23 }
  0x12   : > { %p544_p0 = scmp.ne.s32.totalorder %s9198_s29, %s9194_s28  ;;  %p532_p1 = scmp.eq.s32.totalorder %s531_s5, 0 }
  0x13   : > { %p545_p2 = scmp.eq.s32.totalorder %s9417_s4, 1  ;;  %p550_p3 = scmp.ne.s32.totalorder %s9194_s28, %s9190_s3 }
  0x14   : > { %p551_p4 = scmp.eq.s32.totalorder %s7464_s0, 1  ;;  %p7467_p7 = scmp.ge.s32.totalorder %s9202_s30, 1 }
  0x15   : > { %s9432_s24 = scalar_select %p532_p1, %s9198_s29, %s534_s1  }
  0x16   : > { %p9434_p5 = por %p545_p2, %p544_p0  ;;  %p9438_p6 = por %p551_p4, %p550_p3 }
  0x17   : > { %15334 = sst [smem:[#allocation10_spill]] %s9432_s24  ;;  %p671_p8 = scmp.lt.s32.totalorder %s9202_s30, 3 }
  0x18   : > { %s15335_s6 = scalar_select %p9434_p5, 1, 0 }
  0x19   : > { %s15337_s25 = scalar_select %p9438_p6, 1, 0 }
  0x1a   : > { %15336 = sst [smem:[#allocation11_spill]] %s15335_s6  ;;  %p672_p9 = pnand %p7467_p7, %p671_p8 }
  0x1b   : > { %15338 = sst [smem:[#allocation12_spill]] %s15337_s25 }
  0x1c   : > { %675 = sbr.rel (%p672_p9) target bundleno = 3425 (0xd61), region = 108 }
  0x23   : > { %s7469_s26 = sshll.u32 %s9417_s4, 4  ;;  %v9272_v0 = vmov 0   ;;  %s15339_s1 = sld [smem:[#allocation188_spill]] }
  0x24   : > { %8479 = vset.pattern.permute.xlu1 %v9272_v0  ;;  %8478 = vset.pattern.permute.xlu0 %v9272_v0  ;;  %p759_p10 = scmp.lt.s32.totalorder %s7469_s26, 31  ;;  %s15340_s23 = sld [smem:[#allocation193_spill]] }
  0x25   : > { %s15341_s24 = sld [smem:[#allocation189_spill]]  ;;  %s15343_s6 = sld [smem:[#allocation191_spill]] }
  0x26   : > { %s16484_s26 = smov (!%p759_p10, %s7469_s26), 31 }
  0x27   : > { %s9445_s2 = sshll.u32 %s16484_s26, 3 }
  0x29   : > { %s9451_s5 = scalar_lea.vmem %s15339_s1, %s9445_s2  ;;  %s15342_s1 = sld [smem:[#allocation190_spill]] }
  0x2a   : > { %s9457_s25 = scalar_lea.vmem %s15340_s23, %s9445_s2  ;;  %v862_v1 = vld [vmem:[%s9451_s5 + $0x10] sm:$0xff]  ;;  %v860_v3 = vld [vmem:[%s9451_s5] sm:$0xff]  ;;  %v863_v6 = vld [vmem:[%s9451_s5 + $0x18] sm:$0xff]  ;;  %s15344_s23 = sld [smem:[#allocation192_spill]] }
  0x2b   : > { %v878_v2 = vld [vmem:[%s9457_s25 + $0x10] sm:$0xff]  ;;  %v876_v5 = vld [vmem:[%s9457_s25] sm:$0xff]  ;;  %v879_v7 = vld [vmem:[%s9457_s25 + $0x18] sm:$0xff]  ;;  %s9489_s26 = scalar_lea.vmem %s15341_s24, %s9445_s2  ;;  %s9503_s4 = scalar_lea.vmem %s15343_s6, %s9445_s2 }
  0x2c   : > { %v894_v4 = vadd.f32 %v878_v2, %v862_v1  ;;  %v892_v8 = vadd.f32 %v876_v5, %v860_v3  ;;  %v861_v9 = vld [vmem:[%s9451_s5 + $0x8] sm:$0xff]  ;;  %v895_v11 = vadd.f32 %v879_v7, %v863_v6  ;;  %v864_v15 = vld [vmem:[%s9451_s5 + $0x20] sm:$0xff]  ;;  %v867_v19 = vld [vmem:[%s9451_s5 + $0x38] sm:$0xff]  ;;  %s755_s6 = sand.u32 1, %s9194_s28  }
  0x2d   : > { %v877_v10 = vld [vmem:[%s9457_s25 + $0x8] sm:$0xff]  ;;  %v880_v16 = vld [vmem:[%s9457_s25 + $0x20] sm:$0xff]  ;;  %v883_v20 = vld [vmem:[%s9457_s25 + $0x38] sm:$0xff] }
  0x2e   : > { %1018 = vperm.xlu1 %8479, %v894_v4   ;;  %1008 = vperm.xlu0 %8478, %v892_v8   ;;  %v893_v12 = vadd.f32 %v877_v10, %v861_v9  ;;  %v865_v13 = vld [vmem:[%s9451_s5 + $0x28] sm:$0xff]  ;;  %v896_v18 = vadd.f32 %v880_v16, %v864_v15  ;;  %v866_v21 = vld [vmem:[%s9451_s5 + $0x30] sm:$0xff]  ;;  %v899_v23 = vadd.f32 %v883_v20, %v867_v19  ;;  %v868_v27 = vld [vmem:[%s9451_s5 + $0x40] sm:$0xff] }
  0x2f   : > { %v881_v14 = vld [vmem:[%s9457_s25 + $0x28] sm:$0xff]  ;;  %v882_v22 = vld [vmem:[%s9457_s25 + $0x30] sm:$0xff]  ;;  %v884_v28 = vld [vmem:[%s9457_s25 + $0x40] sm:$0xff]  ;;  %s9495_s3 = scalar_lea.vmem %s15342_s1, %s9445_s2 }
  0x30   : > { %v897_v17 = vadd.f32 %v881_v14, %v865_v13  ;;  %v898_v24 = vadd.f32 %v882_v22, %v866_v21  ;;  %v869_v25 = vld [vmem:[%s9451_s5 + $0x48] sm:$0xff]  ;;  %v900_v30 = vadd.f32 %v884_v28, %v868_v27  ;;  %v871_v31 = vld [vmem:[%s9451_s5 + $0x58] sm:$0xff]  ;;  %v870_v33 = vld [vmem:[%s9451_s5 + $0x50] sm:$0xff]  ;;  %s9509_s24 = scalar_lea.vmem %s15344_s23, %s9445_s2 }
  0x31   : > { %v885_v26 = vld [vmem:[%s9457_s25 + $0x48] sm:$0xff]  ;;  %v887_v32 = vld [vmem:[%s9457_s25 + $0x58] sm:$0xff]  ;;  %v886_v34 = vld [vmem:[%s9457_s25 + $0x50] sm:$0xff] }
  0x32   : > { %1023 = vperm.xlu1 %8479, %v895_v11   ;;  %1013 = vperm.xlu0 %8478, %v893_v12   ;;  %v901_v29 = vadd.f32 %v885_v26, %v869_v25  ;;  %v903_v35 = vadd.f32 %v887_v32, %v871_v31  ;;  %v902_v36 = vadd.f32 %v886_v34, %v870_v33  ;;  %v873_v37 = vld [vmem:[%s9451_s5 + $0x68] sm:$0xff]  ;;  %v872_v39 = vld [vmem:[%s9451_s5 + $0x60] sm:$0xff]  ;;  %v875_v41 = vld [vmem:[%s9451_s5 + $0x78] sm:$0xff] }
  0x33   : > { %v889_v38 = vld [vmem:[%s9457_s25 + $0x68] sm:$0xff]  ;;  %v888_v40 = vld [vmem:[%s9457_s25 + $0x60] sm:$0xff]  ;;  %v891_v42 = vld [vmem:[%s9457_s25 + $0x78] sm:$0xff] }
  0x34   : > { %v905_v43 = vadd.f32 %v889_v38, %v873_v37  ;;  %v874_v44 = vld [vmem:[%s9451_s5 + $0x70] sm:$0xff]  ;;  %v9516_v46 = vld [vmem:[%s9489_s26 + $0x8] sm:$0xff]  ;;  %v904_v48 = vadd.f32 %v888_v40, %v872_v39  ;;  %v9528_v51 = vld [vmem:[%s9489_s26] sm:$0xff]  ;;  %v907_v55 = vadd.f32 %v891_v42, %v875_v41  ;;  %s10445_s5 = smov 0  }
  0x35   : > { %v890_v45 = vld [vmem:[%s9457_s25 + $0x70] sm:$0xff]  ;;  %v9519_v47 = vld [vmem:[%s9495_s3 + $0x8] sm:$0xff]  ;;  %v9531_v52 = vld [vmem:[%s9495_s3] sm:$0xff]  ;;  %s10210_s25 = sshll.u32 %s755_s6, 7 }
  0x36   : > { %1033 = vperm.xlu1 %8479, %v897_v17   ;;  %1028 = vperm.xlu0 %8478, %v896_v18   ;;  %v9522_v49 = vld [vmem:[%s9503_s4 + $0x8] sm:$0xff]  ;;  %v9534_v53 = vld [vmem:[%s9503_s4] sm:$0xff]  ;;  %v9544_v58 = vld [vmem:[%s9489_s26 + $0x18] sm:$0xff]  ;;  %v906_v60 = vadd.f32 %v890_v45, %v874_v44  ;;  %s10406_s2 = scalar_lea.vmem [#allocation2], %s10210_s25 }
  0x37   : > { %v9525_v50 = vld [vmem:[%s9509_s24 + $0x8] sm:$0xff]  ;;  %v9537_v54 = vld [vmem:[%s9509_s24] sm:$0xff]  ;;  %v909_v56 = vmul.f32 %v9522_v49, %v9516_v46  ;;  %v9547_v59 = vld [vmem:[%s9495_s3 + $0x18] sm:$0xff]  ;;  %v908_v61 = vmul.f32 %v9534_v53, %v9528_v51 }
  0x38   : > { %v925_v57 = vmul.f32 %v9525_v50, %v9519_v47  ;;  %v924_v62 = vmul.f32 %v9537_v54, %v9531_v52  ;;  %v9554_v63 = vld [vmem:[%s9503_s4 + $0x18] sm:$0xff]  ;;  %v9560_v1 = vld [vmem:[%s9489_s26 + $0x10] sm:$0xff]  ;;  %v9578_v8 = vld [vmem:[%s9489_s26 + $0x28] sm:$0xff] }
  0x39   : > { %v9557_v0 = vld [vmem:[%s9509_s24 + $0x18] sm:$0xff]  ;;  %v9563_v2 = vld [vmem:[%s9495_s3 + $0x10] sm:$0xff]  ;;  %v911_v6 = vmul.f32 %v9554_v63, %v9544_v58  ;;  %v9581_v9 = vld [vmem:[%s9495_s3 + $0x28] sm:$0xff] }
  0x3a   : > { %1043 = vperm.xlu1 %8479, %v899_v23   ;;  %1038 = vperm.xlu0 %8478, %v898_v24   ;;  %v9566_v3 = vld [vmem:[%s9503_s4 + $0x10] sm:$0xff]  ;;  %v9571_v5 = vsub.f32 %v909_v56, %v925_v57  ;;  %v927_v7 = vmul.f32 %v9557_v0, %v9547_v59  ;;  %v9583_v10 = vsub.f32 %v908_v61, %v924_v62  ;;  %v9590_v13 = vld [vmem:[%s9503_s4 + $0x28] sm:$0xff]  ;;  %v9596_v15 = vld [vmem:[%s9489_s26 + $0x20] sm:$0xff] }
  0x3b   : > { %v9569_v4 = vld [vmem:[%s9509_s24 + $0x10] sm:$0xff]  ;;  %v910_v11 = vmul.f32 %v9566_v3, %v9560_v1  ;;  %v9593_v14 = vld [vmem:[%s9509_s24 + $0x28] sm:$0xff]  ;;  %v9599_v16 = vld [vmem:[%s9495_s3 + $0x20] sm:$0xff]  ;;  %v913_v20 = vmul.f32 %v9590_v13, %v9578_v8 }
  0x3c   : > { %15345 = vst [vmem:[#allocation13_spill] sm:$0xff] %v9571_v5  ;;  %15346 = vst [vmem:[#allocation14_spill] sm:$0xff] %v9583_v10  ;;  %v926_v12 = vmul.f32 %v9569_v4, %v9563_v2  ;;  %v9602_v17 = vld [vmem:[%s9503_s4 + $0x20] sm:$0xff]  ;;  %v9608_v19 = vsub.f32 %v911_v6, %v927_v7  ;;  %v929_v21 = vmul.f32 %v9593_v14, %v9581_v9  ;;  %v9615_v22 = vld [vmem:[%s9489_s26 + $0x38] sm:$0xff] }
  0x3d   : > { %v9605_v18 = vld [vmem:[%s9509_s24 + $0x20] sm:$0xff]  ;;  %v9618_v23 = vld [vmem:[%s9495_s3 + $0x38] sm:$0xff]  ;;  %v912_v25 = vmul.f32 %v9602_v17, %v9596_v15  ;;  %v9640_v31 = vld [vmem:[%s9503_s4 + $0x30] sm:$0xff] }
  0x3e   : > { %1053 = vperm.xlu1 %8479, %v901_v29   ;;  %1048 = vperm.xlu0 %8478, %v900_v30   ;;  %15347 = vst [vmem:[#allocation15_spill] sm:$0xff] %v9608_v19  ;;  %v9621_v24 = vsub.f32 %v910_v11, %v926_v12  ;;  %v928_v26 = vmul.f32 %v9605_v18, %v9599_v16  ;;  %v9628_v27 = vld [vmem:[%s9503_s4 + $0x38] sm:$0xff]  ;;  %v9634_v29 = vld [vmem:[%s9489_s26 + $0x30] sm:$0xff]  ;;  %v9656_v37 = vld [vmem:[%s9495_s3 + $0x48] sm:$0xff] }
  0x3f   : > { %v9631_v28 = vld [vmem:[%s9509_s24 + $0x38] sm:$0xff]  ;;  %v9637_v30 = vld [vmem:[%s9495_s3 + $0x30] sm:$0xff]  ;;  %v9646_v33 = vsub.f32 %v913_v20, %v929_v21  ;;  %v915_v34 = vmul.f32 %v9628_v27, %v9615_v22  ;;  %v914_v39 = vmul.f32 %v9640_v31, %v9634_v29  ;;  %v9666_v41 = vld [vmem:[%s9503_s4 + $0x48] sm:$0xff] }
  0x40   : > { %15348 = vst [vmem:[#allocation16_spill] sm:$0xff] %v9621_v24  ;;  %v9643_v32 = vld [vmem:[%s9509_s24 + $0x30] sm:$0xff]  ;;  %v9659_v38 = vsub.f32 %v912_v25, %v928_v26  ;;  %v9669_v42 = vld [vmem:[%s9509_s24 + $0x48] sm:$0xff]  ;;  %v9675_v44 = vld [vmem:[%s9495_s3 + $0x40] sm:$0xff] }
  0x41   : > { %15349 = vst [vmem:[#allocation17_spill] sm:$0xff] %v9646_v33  ;;  %v930_v40 = vmul.f32 %v9643_v32, %v9637_v30  ;;  %v9678_v45 = vld [vmem:[%s9503_s4 + $0x40] sm:$0xff]  ;;  %v933_v57 = vmul.f32 %v9669_v42, %v9656_v37  ;;  %v9694_v61 = vld [vmem:[%s9495_s3 + $0x58] sm:$0xff]  ;;  %v9710_v20 = vld [vmem:[%s9489_s26 + $0x50] sm:$0xff] }
  0x42   : > { %1063 = vperm.xlu1 %8479, %v903_v35   ;;  %1058 = vperm.xlu0 %8478, %v902_v36   ;;  %v931_v35 = vmul.f32 %v9631_v28, %v9618_v23  ;;  %v9653_v36 = vld [vmem:[%s9489_s26 + $0x48] sm:$0xff]  ;;  %15350 = vst [vmem:[#allocation18_spill] sm:$0xff] %v9659_v38  ;;  %v9704_v11 = vld [vmem:[%s9503_s4 + $0x58] sm:$0xff]  ;;  %15354 = vst [vmem:[#allocation22_spill] sm:$0xff] %v9710_v20 }
  0x43   : > { %v917_v56 = vmul.f32 %v9666_v41, %v9653_v36  ;;  %v9697_v62 = vsub.f32 %v914_v39, %v930_v40  ;;  %15353 = vst [vmem:[#allocation21_spill] sm:$0xff] %v9704_v11  ;;  %v9707_v12 = vld [vmem:[%s9509_s24 + $0x58] sm:$0xff]  ;;  %v9713_v21 = vld [vmem:[%s9495_s3 + $0x50] sm:$0xff]  ;;  %v9729_v40 = vld [vmem:[%s9489_s26 + $0x68] sm:$0xff] }
  0x44   : > { %15355 = vst [vmem:[#allocation23_spill] sm:$0xff] %v9713_v21  ;;  %v9716_v25 = vld [vmem:[%s9503_s4 + $0x50] sm:$0xff]  ;;  %v935_v39 = vmul.f32 %v9707_v12, %v9694_v61  ;;  %15359 = vst [vmem:[#allocation27_spill] sm:$0xff] %v9729_v40 }
  0x45   : > { %15352 = vst [vmem:[#allocation20_spill] sm:$0xff] %v9697_v62  ;;  %15356 = vst [vmem:[#allocation24_spill] sm:$0xff] %v9716_v25  ;;  %v9719_v26 = vld [vmem:[%s9509_s24 + $0x50] sm:$0xff] }
  0x46   : > { %1073 = vperm.xlu1 %8479, %v905_v43   ;;  %1068 = vperm.xlu0 %8478, %v904_v48   ;;  %v9672_v43 = vld [vmem:[%s9489_s26 + $0x40] sm:$0xff]  ;;  %15357 = vst [vmem:[#allocation25_spill] sm:$0xff] %v9719_v26 }
  0x47   : > { %v9681_v48 = vld [vmem:[%s9509_s24 + $0x40] sm:$0xff]  ;;  %v916_v6 = vmul.f32 %v9678_v45, %v9672_v43 }
  0x48   : > { %v932_v7 = vmul.f32 %v9681_v48, %v9675_v44 }
  0x4a   : > { %1083 = vperm.xlu1 %8479, %v907_v55   ;;  %1078 = vperm.xlu0 %8478, %v906_v60   ;;  %v9684_v55 = vsub.f32 %v915_v34, %v931_v35  ;;  %v9691_v60 = vld [vmem:[%s9489_s26 + $0x58] sm:$0xff]  ;;  %v9722_v34 = vsub.f32 %v917_v56, %v933_v57  ;;  %v918_v56 = vmul.f32 %v9716_v25, %v9710_v20 }
  0x4b   : > { %v919_v35 = vmul.f32 %v9704_v11, %v9691_v60  ;;  %v934_v57 = vmul.f32 %v9719_v26, %v9713_v21  ;;  %v9767_v21 = vld [vmem:[%s9489_s26 + $0x78] sm:$0xff] }
  0x4c   : > { %15351 = vst [vmem:[#allocation19_spill] sm:$0xff] %v9684_v55  ;;  %15358 = vst [vmem:[#allocation26_spill] sm:$0xff] %v9722_v34  ;;  %v9770_v26 = vld [vmem:[%s9495_s3 + $0x78] sm:$0xff] }
  0x4d   : > { %v9773_v20 = vsub.f32 %v918_v56, %v934_v57 }
  0x4e   : > { %1135 = vperm.xlu1 %8479, %v9571_v5   ;;  %1130 = vperm.xlu0 %8478, %v9583_v10   ;;  %v9751_v10 = vld [vmem:[%s9495_s3 + $0x60] sm:$0xff] }
  0x4f   : > { %15364 = vst [vmem:[#allocation32_spill] sm:$0xff] %v9751_v10  ;;  %15368 = vst [vmem:[#allocation36_spill] sm:$0xff] %v9773_v20 }
  0x52   : > { %1145 = vperm.xlu1 %8479, %v9608_v19   ;;  %1140 = vperm.xlu0 %8478, %v9621_v24   ;;  %v9745_v19 = vld [vmem:[%s9509_s24 + $0x68] sm:$0xff]  ;;  %v9748_v24 = vld [vmem:[%s9489_s26 + $0x60] sm:$0xff] }
  0x53   : > { %15363 = vst [vmem:[#allocation31_spill] sm:$0xff] %v9745_v19 }
  0x56   : > { %1155 = vperm.xlu1 %8479, %v9646_v33   ;;  %1150 = vperm.xlu0 %8478, %v9659_v38   ;;  %v9732_v33 = vld [vmem:[%s9495_s3 + $0x68] sm:$0xff]  ;;  %v9735_v38 = vsub.f32 %v916_v6, %v932_v7  ;;  %v9754_v6 = vld [vmem:[%s9503_s4 + $0x60] sm:$0xff] }
  0x57   : > { %15360 = vst [vmem:[#allocation28_spill] sm:$0xff] %v9732_v33  ;;  %15365 = vst [vmem:[#allocation33_spill] sm:$0xff] %v9754_v6  ;;  %v9757_v7 = vld [vmem:[%s9509_s24 + $0x60] sm:$0xff]  ;;  %v937_v25 = vmul.f32 %v9745_v19, %v9732_v33  ;;  %v920_v11 = vmul.f32 %v9754_v6, %v9748_v24  ;;  %v9789_v33 = vld [vmem:[%s9495_s3 + $0x70] sm:$0xff]  ;;  %s15394_s3 = sld [smem:[#allocation194_spill]] }
  0x58   : > { %15361 = vst [vmem:[#allocation29_spill] sm:$0xff] %v9735_v38  ;;  %15366 = vst [vmem:[#allocation34_spill] sm:$0xff] %v9757_v7  ;;  %v9792_v19 = vld [vmem:[%s9503_s4 + $0x70] sm:$0xff] }
  0x5a   : > { %1165 = vperm.xlu1 %8479, %v9684_v55   ;;  %1160 = vperm.xlu0 %8478, %v9697_v62   ;;  %v9742_v55 = vld [vmem:[%s9503_s4 + $0x68] sm:$0xff]  ;;  %v9760_v62 = vsub.f32 %v919_v35, %v935_v39  ;;  %v936_v35 = vmul.f32 %v9757_v7, %v9751_v10  ;;  %v9780_v39 = vld [vmem:[%s9503_s4 + $0x78] sm:$0xff] }
  0x5b   : > { %15362 = vst [vmem:[#allocation30_spill] sm:$0xff] %v9742_v55  ;;  %v921_v5 = vmul.f32 %v9742_v55, %v9729_v40  ;;  %v9786_v55 = vld [vmem:[%s9489_s26 + $0x70] sm:$0xff]  ;;  %v923_v57 = vmul.f32 %v9780_v39, %v9767_v21 }
  0x5c   : > { %15367 = vst [vmem:[#allocation35_spill] sm:$0xff] %v9760_v62  ;;  %v9795_v40 = vld [vmem:[%s9509_s24 + $0x70] sm:$0xff]  ;;  %v9805_v6 = vsub.f32 %v920_v11, %v936_v35  ;;  %v922_v10 = vmul.f32 %v9792_v19, %v9786_v55  ;;  %v956_v35 = vmul.f32 %v9537_v54, %v9528_v51  ;;  %v974_v51 = vmul.f32 %v9566_v3, %v9563_v2 }
  0x5d   : > { %v9798_v56 = vsub.f32 %v921_v5, %v937_v25  ;;  %v938_v7 = vmul.f32 %v9795_v40, %v9789_v33  ;;  %v957_v25 = vmul.f32 %v9525_v50, %v9516_v46  ;;  %v959_v46 = vmul.f32 %v9557_v0, %v9544_v58 }
  0x5e   : > { %1175 = vperm.xlu1 %8479, %v9722_v34   ;;  %1170 = vperm.xlu0 %8478, %v9735_v38   ;;  %v9783_v34 = vld [vmem:[%s9509_s24 + $0x78] sm:$0xff]  ;;  %v958_v50 = vmul.f32 %v9569_v4, %v9560_v1  ;;  %v977_v54 = vmul.f32 %v9590_v13, %v9581_v9  ;;  %v963_v1 = vmul.f32 %v9631_v28, %v9615_v22  ;;  %v15369_v22 = vld [vmem:[#allocation21_spill] sm:$0xff]  ;;  %v15370_v28 = vld [vmem:[#allocation22_spill] sm:$0xff] }
  0x5f   : > { %v939_v38 = vmul.f32 %v9783_v34, %v9770_v26  ;;  %v9819_v11 = vsub.f32 %v922_v10, %v938_v7  ;;  %v979_v2 = vmul.f32 %v9628_v27, %v9618_v23  ;;  %v962_v4 = vmul.f32 %v9643_v32, %v9634_v29  ;;  %v15371_v29 = vld [vmem:[#allocation25_spill] sm:$0xff]  ;;  %v15373_v32 = vld [vmem:[#allocation24_spill] sm:$0xff] }
  0x60   : > { %v9847_v58 = vadd.f32 %v974_v51, %v958_v50  ;;  %v965_v10 = vmul.f32 %v9669_v42, %v9653_v36  ;;  %v981_v13 = vmul.f32 %v9666_v41, %v9656_v37  ;;  %v983_v23 = vmul.f32 %v15369_v22, %v9694_v61  ;;  %v15374_v41 = vld [vmem:[#allocation27_spill] sm:$0xff]  ;;  %v15378_v61 = vld [vmem:[#allocation34_spill] sm:$0xff]  ;;  %v15388_v51 = vld [vmem:[#allocation20_spill] sm:$0xff] }
  0x61   : > { %v9812_v5 = vsub.f32 %v923_v57, %v939_v38  ;;  %v9868_v9 = vadd.f32 %v979_v2, %v963_v1  ;;  %v15375_v42 = vld [vmem:[#allocation31_spill] sm:$0xff] }
  0x62   : > { %1185 = vperm.xlu1 %8479, %v9760_v62   ;;  %1180 = vperm.xlu0 %8478, %v9773_v20   ;;  %v973_v62 = vmul.f32 %v9522_v49, %v9519_v47  ;;  %v972_v20 = vmul.f32 %v9534_v53, %v9531_v52  ;;  %v975_v47 = vmul.f32 %v9554_v63, %v9547_v59 }
  0x63   : > { %v961_v53 = vmul.f32 %v9593_v14, %v9578_v8  ;;  %v960_v59 = vmul.f32 %v9605_v18, %v9596_v15  ;;  %v976_v63 = vmul.f32 %v9602_v17, %v9599_v16  ;;  %v978_v8 = vmul.f32 %v9640_v31, %v9637_v30  ;;  %v15372_v31 = vld [vmem:[#allocation23_spill] sm:$0xff] }
  0x64   : > { %v9826_v38 = vadd.f32 %v973_v62, %v957_v25  ;;  %v9833_v49 = vadd.f32 %v972_v20, %v956_v35  ;;  %v9840_v52 = vadd.f32 %v975_v47, %v959_v46  ;;  %v964_v15 = vmul.f32 %v9681_v48, %v9672_v43  ;;  %v15380_v20 = vld [vmem:[#allocation33_spill] sm:$0xff]  ;;  %v15393_v1 = vld [vmem:[#allocation35_spill] sm:$0xff] }
  0x65   : > { %v9854_v0 = vadd.f32 %v977_v54, %v961_v53  ;;  %v9861_v3 = vadd.f32 %v976_v63, %v960_v59  ;;  %v9875_v14 = vadd.f32 %v978_v8, %v962_v4  ;;  %v980_v16 = vmul.f32 %v9678_v45, %v9675_v44  ;;  %v15376_v44 = vld [vmem:[#allocation28_spill] sm:$0xff]  ;;  %v15377_v45 = vld [vmem:[#allocation30_spill] sm:$0xff]  ;;  %v15389_v53 = vld [vmem:[#allocation19_spill] sm:$0xff] }
  0x66   : > { %1195 = vperm.xlu1 %8479, %v9798_v56   ;;  %1190 = vperm.xlu0 %8478, %v9805_v6   ;;  %v9882_v17 = vadd.f32 %v981_v13, %v965_v10  ;;  %v967_v18 = vmul.f32 %v9707_v12, %v9691_v60  ;;  %v966_v30 = vmul.f32 %v15371_v29, %v15370_v28  ;;  %v15379_v12 = vld [vmem:[#allocation32_spill] sm:$0xff]  ;;  %v15390_v54 = vld [vmem:[#allocation29_spill] sm:$0xff]  ;;  %v15391_v59 = vld [vmem:[#allocation26_spill] sm:$0xff] }
  0x67   : > { %v9889_v27 = vadd.f32 %v980_v16, %v964_v15  ;;  %v982_v36 = vmul.f32 %v15373_v32, %v15372_v31  ;;  %v969_v43 = vmul.f32 %v15375_v42, %v15374_v41  ;;  %v985_v48 = vmul.f32 %v15377_v45, %v15376_v44  ;;  %v15392_v63 = vld [vmem:[#allocation36_spill] sm:$0xff] }
  0x68   : > { %v9896_v37 = vadd.f32 %v983_v23, %v967_v18  ;;  %v968_v62 = vmul.f32 %v15378_v61, %v9748_v24  ;;  %v984_v7 = vmul.f32 %v15380_v20, %v15379_v12  ;;  %v971_v25 = vmul.f32 %v9783_v34, %v9767_v21  ;;  %v15382_v34 = vld [vmem:[#allocation13_spill] sm:$0xff] }
  0x69   : > { %v9903_v60 = vadd.f32 %v982_v36, %v966_v30  ;;  %v9910_v57 = vadd.f32 %v985_v48, %v969_v43  ;;  %v987_v35 = vmul.f32 %v9780_v39, %v9770_v26  ;;  %v970_v24 = vmul.f32 %v9795_v40, %v9786_v55  ;;  %v15383_v55 = vld [vmem:[#allocation14_spill] sm:$0xff]  ;;  %v15387_v39 = vld [vmem:[#allocation17_spill] sm:$0xff] }
  0x6a   : > { %1205 = vperm.xlu1 %8479, %v9812_v5   ;;  %1200 = vperm.xlu0 %8478, %v9819_v11   ;;  %v9917_v46 = vadd.f32 %v984_v7, %v968_v62  ;;  %v986_v47 = vmul.f32 %v9792_v19, %v9789_v33  ;;  %v9273_v26 = vmov 1   ;;  %v15384_v19 = vld [vmem:[#allocation16_spill] sm:$0xff]  ;;  %v15385_v33 = vld [vmem:[#allocation15_spill] sm:$0xff]  ;;  %v15386_v40 = vld [vmem:[#allocation18_spill] sm:$0xff]  ;;  %v9274_v43 = vmov 2  }
  0x6b   : > { %v9924_v50 = vadd.f32 %v987_v35, %v971_v25  ;;  %v14831_v48 = vlaneseq }
  0x6c   : > { %v9927_v21 = vadd.f32 %v986_v47, %v970_v24  ;;  %v10016_v24 = vld [vmem:[%s15394_s3] sm:$0x7f] }
  0x6d   : > { %15381 = vst [vmem:[#allocation21_spill] sm:$0xff] %v9924_v50  ;;  %v10001_v12 = vshrl.u32 %v14831_v48, 7 }
  0x6e   : > { %1251 = vperm.xlu1 %8479, %v9826_v38   ;;  %1246 = vperm.xlu0 %8478, %v9833_v49  }
  0x6f   : > { %v1088_v25 = vsub.s32 0, %v10001_v12 }
  0x72   : > { %1261 = vperm.xlu1 %8479, %v9840_v52   ;;  %1256 = vperm.xlu0 %8478, %v9847_v58  }
  0x76   : > { %1271 = vperm.xlu1 %8479, %v9854_v0   ;;  %1266 = vperm.xlu0 %8478, %v9861_v3  }
  0x7a   : > { %1281 = vperm.xlu1 %8479, %v9868_v9   ;;  %1276 = vperm.xlu0 %8478, %v9875_v14  }
  0x7e   : > { %1291 = vperm.xlu1 %8479, %v9882_v17   ;;  %1286 = vperm.xlu0 %8478, %v9889_v27  }
  0x82   : > { %1301 = vperm.xlu1 %8479, %v9896_v37   ;;  %1296 = vperm.xlu0 %8478, %v9903_v60  }
  0x86   : > { %1311 = vperm.xlu1 %8479, %v9910_v57   ;;  %1306 = vperm.xlu0 %8478, %v9917_v46  }
  0x8a   : > { %1321 = vperm.xlu1 %8479, %v9924_v50   ;;  %1316 = vperm.xlu0 %8478, %v9927_v21  }
  0x8e   : > { %8481 = vset.pattern.permute.xlu1 %v9273_v26  ;;  %8480 = vset.pattern.permute.xlu0 %v9273_v26  ;;  %v10022_v26 = vrot.slane %v10016_v24, %v1088_v25 }
  0x8f   : > { %1365 = vperm.xlu1 %8481, %v15382_v34   ;;  %1361 = vperm.xlu0 %8480, %v15383_v55  }
  0x93   : > { %1369 = vperm.xlu1 %8481, %v15384_v19   ;;  %1373 = vperm.xlu0 %8480, %v15385_v33  }
  0x97   : > { %1377 = vperm.xlu1 %8481, %v15386_v40   ;;  %1381 = vperm.xlu0 %8480, %v15387_v39  }
  0x9b   : > { %1385 = vperm.xlu1 %8481, %v15388_v51   ;;  %1389 = vperm.xlu0 %8480, %v15389_v53  }
  0x9f   : > { %1393 = vperm.xlu1 %8481, %v15390_v54   ;;  %1397 = vperm.xlu0 %8480, %v15391_v59  }
  0xa3   : > { %1401 = vperm.xlu1 %8481, %v15392_v63   ;;  %1405 = vperm.xlu0 %8480, %v15393_v1  }
  0xa7   : > { %1409 = vperm.xlu1 %8481, %v9805_v6   ;;  %1413 = vperm.xlu0 %8480, %v9798_v56  }
  0xab   : > { %1417 = vperm.xlu1 %8481, %v9819_v11   ;;  %1421 = vperm.xlu0 %8480, %v9812_v5  }
  0xad   : > { %v9947_v2 = vpop.permute.xlu1 %1018  ;;  %v9949_v4 = vpop.permute.xlu0 %1008 }
  0xaf   : > { %1461 = vperm.xlu1 %8481, %v9833_v49   ;;  %1465 = vperm.xlu0 %8480, %v9826_v38  }
  0xb1   : > { %v9953_v8 = vpop.permute.xlu1 %1023  ;;  %v9955_v10 = vpop.permute.xlu0 %1013 }
  0xb3   : > { %1469 = vperm.xlu1 %8481, %v9847_v58   ;;  %1473 = vperm.xlu0 %8480, %v9840_v52  }
  0xb5   : > { %v9959_v13 = vpop.permute.xlu1 %1033  ;;  %v9961_v15 = vpop.permute.xlu0 %1028 }
  0xb7   : > { %1477 = vperm.xlu1 %8481, %v9861_v3   ;;  %1481 = vperm.xlu0 %8480, %v9854_v0  }
  0xb9   : > { %v9965_v16 = vpop.permute.xlu1 %1043  ;;  %v9967_v18 = vpop.permute.xlu0 %1038 }
  0xbb   : > { %1485 = vperm.xlu1 %8481, %v9875_v14   ;;  %1489 = vperm.xlu0 %8480, %v9868_v9  }
  0xbd   : > { %v9971_v22 = vpop.permute.xlu1 %1053  ;;  %v9973_v23 = vpop.permute.xlu0 %1048 }
  0xbf   : > { %1493 = vperm.xlu1 %8481, %v9889_v27   ;;  %1497 = vperm.xlu0 %8480, %v9882_v17  }
  0xc1   : > { %v9977_v28 = vpop.permute.xlu1 %1063  ;;  %v9979_v29 = vpop.permute.xlu0 %1058 }
  0xc3   : > { %1501 = vperm.xlu1 %8481, %v9903_v60   ;;  %1505 = vperm.xlu0 %8480, %v9896_v37  }
  0xc5   : > { %v9983_v30 = vpop.permute.xlu1 %1073  ;;  %v1069_v31 = vpop.permute.xlu0 %1068 }
  0xc7   : > { %1509 = vperm.xlu1 %8481, %v9917_v46   ;;  %1513 = vperm.xlu0 %8480, %v9910_v57  }
  0xc9   : > { %v9987_v32 = vpop.permute.xlu1 %1083  ;;  %v1079_v36 = vpop.permute.xlu0 %1078 }
  0xcb   : > { %1517 = vperm.xlu1 %8481, %v9927_v21   ;;  %1521 = vperm.xlu0 %8480, %v9924_v50  }
  0xcd   : > { %v1136_v41 = vpop.permute.xlu1 %1135  ;;  %v1131_v42 = vpop.permute.xlu0 %1130 }
  0xcf   : > { %8482 = vset.pattern.permute.xlu1 %v9274_v43  ;;  %8483 = vset.pattern.permute.xlu0 %v9274_v43  ;;  %v1091_v43 = vmul.f32 %v10022_v26, %v9955_v10 }
  0xd0   : > { %1561 = vperm.xlu1 %8482, %v15383_v55   ;;  %1565 = vperm.xlu0 %8483, %v15382_v34   ;;  %v1210_v34 = vsub.s32 1, %v10001_v12 }
  0xd1   : > { %v1146_v44 = vpop.permute.xlu1 %1145  ;;  %v1141_v45 = vpop.permute.xlu0 %1140 }
  0xd4   : > { %1569 = vperm.xlu1 %8482, %v15384_v19   ;;  %1577 = vperm.xlu0 %8483, %v15386_v40   ;;  %v10033_v40 = vrot.slane %v10016_v24, %v1210_v34 }
  0xd5   : > { %v9995_v61 = vpop.permute.xlu1 %1155  ;;  %v9997_v62 = vpop.permute.xlu0 %1150 }
  0xd6   : > { %v1212_v10 = vmul.f32 %v10033_v40, %v1131_v42 }
  0xd8   : > { %1573 = vperm.xlu1 %8482, %v15385_v33   ;;  %1585 = vperm.xlu0 %8483, %v15388_v51   ;;  %v1102_v33 = vmul.f32 %v10022_v26, %v1069_v31  ;;  %v10041_v51 = vld [vmem:[%s14769_s7] ss:$0 sm:$0xff]  ;;  %v1104_v31 = vmul.f32 %v10022_v26, %v1079_v36 }
  0xd9   : > { %v10004_v20 = vpop.permute.xlu1 %1165  ;;  %v10006_v7 = vpop.permute.xlu0 %1160 }
  0xdc   : > { %1581 = vperm.xlu1 %8482, %v15387_v39   ;;  %1593 = vperm.xlu0 %8483, %v15390_v54   ;;  %v1326_v54 = vsub.s32 4, %v10001_v12 }
  0xdd   : > { %v10011_v35 = vpop.permute.xlu1 %1175  ;;  %v10018_v47 = vpop.permute.xlu0 %1170 }
  0xde   : > { %v10059_v36 = vrot.slane %v10016_v24, %v1326_v54 }
  0xe0   : > { %1589 = vperm.xlu1 %8482, %v15389_v53   ;;  %1601 = vperm.xlu0 %8483, %v15392_v63   ;;  %v1124_v63 = vadd.f32 %v10041_v51, %v1102_v33  ;;  %v1213_v33 = vmul.f32 %v10033_v40, %v1136_v41 }
  0xe1   : > { %v10026_v55 = vpop.permute.xlu1 %1185  ;;  %v10028_v19 = vpop.permute.xlu0 %1180 }
  0xe4   : > { %1597 = vperm.xlu1 %8482, %v15391_v59   ;;  %1609 = vperm.xlu0 %8483, %v9805_v6   ;;  %v1090_v6 = vmul.f32 %v10022_v26, %v9949_v4  ;;  %v1093_v4 = vmul.f32 %v10022_v26, %v9953_v8 }
  0xe5   : > { %v10036_v39 = vpop.permute.xlu1 %1195  ;;  %v1191_v53 = vpop.permute.xlu0 %1190 }
  0xe6   : > { %v1224_v59 = vmul.f32 %v10033_v40, %v1191_v53  ;;  %v1126_v53 = vadd.f32 %v10041_v51, %v1104_v31  ;;  %v1112_v41 = vadd.f32 %v10041_v51, %v1090_v6  ;;  %v1095_v6 = vmul.f32 %v10022_v26, %v9959_v13 }
  0xe8   : > { %1605 = vperm.xlu1 %8482, %v15393_v1   ;;  %v10052_v25 = vadd.f32 %v1224_v59, %v1124_v63  ;;  %1617 = vperm.xlu0 %8483, %v9819_v11   ;;  %v1113_v63 = vadd.f32 %v10041_v51, %v1091_v43  ;;  %v1092_v11 = vmul.f32 %v10022_v26, %v9947_v2 }
  0xe9   : > { %v10055_v34 = vpop.permute.xlu1 %1205  ;;  %v1201_v48 = vpop.permute.xlu0 %1200  ;;  %v1228_v50 = vadd.f32 %v1212_v10, %v1112_v41  ;;  %v1214_v43 = vmul.f32 %v10033_v40, %v1141_v45  ;;  %v1115_v2 = vadd.f32 %v10041_v51, %v1093_v4  ;;  %v1096_v41 = vmul.f32 %v10022_v26, %v9967_v18 }
  0xea   : > { %v1226_v1 = vmul.f32 %v10033_v40, %v1201_v48  ;;  %v1229_v42 = vadd.f32 %v1213_v33, %v1113_v63  ;;  %v1215_v48 = vmul.f32 %v10033_v40, %v1146_v44  ;;  %v1094_v44 = vmul.f32 %v10022_v26, %v9961_v15 }
  0xeb   : > { %v1117_v15 = vadd.f32 %v10041_v51, %v1095_v6 }
  0xec   : > { %1613 = vperm.xlu1 %8482, %v9798_v56   ;;  %v10071_v54 = vadd.f32 %v1226_v1, %v1126_v53  ;;  %1661 = vperm.xlu0 %8483, %v9833_v49   ;;  %v1114_v49 = vadd.f32 %v10041_v51, %v1092_v11  ;;  %v1231_v10 = vadd.f32 %v1215_v48, %v1115_v2 }
  0xed   : > { %v1252_v31 = vpop.permute.xlu1 %1251  ;;  %v1247_v8 = vpop.permute.xlu0 %1246  ;;  %v1217_v1 = vmul.f32 %v10033_v40, %v9995_v61  ;;  %v1116_v61 = vadd.f32 %v10041_v51, %v1094_v44  ;;  %v1219_v48 = vmul.f32 %v10033_v40, %v10004_v20  ;;  %v1118_v20 = vadd.f32 %v10041_v51, %v1096_v41 }
  0xee   : > { %v1329_v59 = vmul.f32 %v10059_v36, %v1252_v31  ;;  %v1328_v56 = vmul.f32 %v10059_v36, %v1247_v8  ;;  %v1230_v63 = vadd.f32 %v1214_v43, %v1114_v49  ;;  %v1098_v2 = vmul.f32 %v10022_v26, %v9973_v23 }
  0xef   : > { %v1221_v44 = vmul.f32 %v10033_v40, %v10011_v35  ;;  %v1103_v41 = vmul.f32 %v10022_v26, %v9983_v30 }
  0xf0   : > { %v10081_v53 = vadd.f32 %v1329_v59, %v1229_v42  ;;  %1621 = vperm.xlu1 %8482, %v9812_v5   ;;  %v10087_v33 = vadd.f32 %v1328_v56, %v1228_v50  ;;  %1669 = vperm.xlu0 %8483, %v9847_v58   ;;  %v1216_v5 = vmul.f32 %v10033_v40, %v9997_v62 }
  0xf1   : > { %v1262_v45 = vpop.permute.xlu1 %1261  ;;  %v1257_v4 = vpop.permute.xlu0 %1256  ;;  %v1097_v50 = vmul.f32 %v10022_v26, %v9965_v16  ;;  %v1233_v42 = vadd.f32 %v1217_v1, %v1117_v15  ;;  %v1099_v56 = vmul.f32 %v10022_v26, %v9971_v22  ;;  %v1120_v35 = vadd.f32 %v10041_v51, %v1098_v2 }
  0xf2   : > { %v1331_v13 = vmul.f32 %v10059_v36, %v1262_v45  ;;  %v1330_v11 = vmul.f32 %v10059_v36, %v1257_v4  ;;  %v1232_v8 = vadd.f32 %v1216_v5, %v1116_v61  ;;  %v1100_v4 = vmul.f32 %v10022_v26, %v9979_v29 }
  0xf3   : > { %v1119_v18 = vadd.f32 %v10041_v51, %v1097_v50  ;;  %v1121_v23 = vadd.f32 %v10041_v51, %v1099_v56  ;;  %v1227_v56 = vmul.f32 %v10033_v40, %v10055_v34 }
  0xf4   : > { %v10099_v58 = vadd.f32 %v1331_v13, %v1231_v10  ;;  %1665 = vperm.xlu1 %8482, %v9826_v38   ;;  %v10105_v31 = vadd.f32 %v1330_v11, %v1230_v63  ;;  %1677 = vperm.xlu0 %8483, %v9861_v3   ;;  %v1218_v38 = vmul.f32 %v10033_v40, %v10006_v7 }
  0xf5   : > { %v1272_v62 = vpop.permute.xlu1 %1271  ;;  %v1267_v59 = vpop.permute.xlu0 %1266  ;;  %v1235_v49 = vadd.f32 %v1219_v48, %v1119_v18  ;;  %v1101_v13 = vmul.f32 %v10022_v26, %v9977_v28  ;;  %v1237_v5 = vadd.f32 %v1221_v44, %v1121_v23  ;;  %v1223_v11 = vmul.f32 %v10033_v40, %v10026_v55 }
  0xf6   : > { %v1333_v16 = vmul.f32 %v10059_v36, %v1272_v62  ;;  %v1332_v43 = vmul.f32 %v10059_v36, %v1267_v59  ;;  %v1234_v10 = vadd.f32 %v1218_v38, %v1118_v20  ;;  %v1122_v55 = vadd.f32 %v10041_v51, %v1100_v4 }
  0xf7   : > { %v1123_v29 = vadd.f32 %v10041_v51, %v1101_v13  ;;  %v1125_v38 = vadd.f32 %v10041_v51, %v1103_v41 }
  0xf8   : > { %v10117_v3 = vadd.f32 %v1333_v16, %v1233_v42  ;;  %1673 = vperm.xlu1 %8482, %v9840_v52   ;;  %v10123_v6 = vadd.f32 %v1332_v43, %v1232_v8  ;;  %1685 = vperm.xlu0 %8483, %v9875_v14   ;;  %v1220_v52 = vmul.f32 %v10033_v40, %v10018_v47 }
  0xf9   : > { %v1282_v7 = vpop.permute.xlu1 %1281  ;;  %v1277_v45 = vpop.permute.xlu0 %1276  ;;  %v1239_v48 = vadd.f32 %v1223_v11, %v1123_v29 }
  0xfa   : > { %v1335_v22 = vmul.f32 %v10059_v36, %v1282_v7  ;;  %v1334_v1 = vmul.f32 %v10059_v36, %v1277_v45  ;;  %v1236_v50 = vadd.f32 %v1220_v52, %v1120_v35  ;;  %v15395_v52 = vlaneseq }
  0xfc   : > { %v10135_v14 = vadd.f32 %v1335_v22, %v1235_v49  ;;  %1681 = vperm.xlu1 %8482, %v9854_v0   ;;  %v10141_v63 = vadd.f32 %v1334_v1, %v1234_v10  ;;  %1693 = vperm.xlu0 %8483, %v9889_v27   ;;  %v1222_v0 = vmul.f32 %v10033_v40, %v10028_v19  ;;  %v1761_v1 = vand.u32 127, %v15395_v52 }
  0xfd   : > { %v1292_v47 = vpop.permute.xlu1 %1291  ;;  %v1287_v15 = vpop.permute.xlu0 %1286  ;;  %v1225_v19 = vmul.f32 %v10033_v40, %v10036_v39 }
  0xfe   : > { %v1337_v28 = vmul.f32 %v10059_v36, %v1292_v47  ;;  %v1336_v61 = vmul.f32 %v10059_v36, %v1287_v15  ;;  %v1238_v8 = vadd.f32 %v1222_v0, %v1122_v55  ;;  %vm1763_vm0 = vcmp.ge.s32.totalorder %v1761_v1, 4 }
  0xff   : > { %v1241_v18 = vadd.f32 %v1225_v19, %v1125_v38  ;;  %vm1764_vm1 = vcmp.ge.s32.totalorder %v1761_v1, 8  ;;  %vm1765_vm2 = vcmp.ge.s32.totalorder %v1761_v1, 12  ;;  %vm1766_vm3 = vcmp.ge.s32.totalorder %v1761_v1, 16 }
 0x100   : > { %v10153_v27 = vadd.f32 %v1337_v28, %v1237_v5  ;;  %1689 = vperm.xlu1 %8482, %v9868_v9   ;;  %v10157_v62 = vadd.f32 %v1336_v61, %v1236_v50  ;;  %1701 = vperm.xlu0 %8483, %v9903_v60   ;;  %v1105_v9 = vmul.f32 %v10022_v26, %v9987_v32  ;;  %v1426_v32 = vsub.s32 2, %v10001_v12 }
 0x101   : > { %v1302_v42 = vpop.permute.xlu1 %1301  ;;  %v1297_v59 = vpop.permute.xlu0 %1296  ;;  %vm1771_vm6 = vcmp.lt.s32.totalorder %v1761_v1, 8  ;;  %vm1772_vm7 = vcmp.lt.s32.totalorder %v1761_v1, 12  ;;  %vm1773_vm8 = vcmp.lt.s32.totalorder %v1761_v1, 16  ;;  %vm1774_vm9 = vcmp.lt.s32.totalorder %v1761_v1, 20 }
 0x102   : > { %v1339_v16 = vmul.f32 %v10059_v36, %v1302_v42  ;;  %v1338_v30 = vmul.f32 %v10059_v36, %v1297_v59  ;;  %v1127_v26 = vadd.f32 %v10041_v51, %v1105_v9  ;;  %v10189_v51 = vrot.slane %v10016_v24, %v1426_v32  ;;  %vm10215_vm10 = vmand %vm1763_vm0, %vm1771_vm6 }
 0x103   : > { %vm1768_vm11 = vcmp.ge.s32.totalorder %v1761_v1, 24  ;;  %vm1769_vm12 = vcmp.ge.s32.totalorder %v1761_v1, 28  ;;  %vm1775_vm13 = vcmp.lt.s32.totalorder %v1761_v1, 24  ;;  %vm1780_vm14 = vmand %vm1764_vm1, %vm1772_vm7  ;;  %vm1776_vm15 = vcmp.lt.s32.totalorder %v1761_v1, 28 }
 0x104   : > { %v10167_v43 = vadd.f32 %v1339_v16, %v1239_v48  ;;  %1697 = vperm.xlu1 %8482, %v9882_v17   ;;  %v10170_v60 = vadd.f32 %v1338_v30, %v1238_v8  ;;  %1709 = vperm.xlu0 %8483, %v9917_v46   ;;  %v1243_v40 = vadd.f32 %v1227_v56, %v1127_v26  ;;  %vm1777_vm4 = vcmp.lt.s32.totalorder %v1761_v1, 32  ;;  %vm1781_vm5 = vmand %vm1765_vm2, %vm1773_vm8 }
 0x105   : > { %v1312_v39 = vpop.permute.xlu1 %1311  ;;  %v1307_v2 = vpop.permute.xlu0 %1306  ;;  %vm1782_vm0 = vmand %vm1766_vm3, %vm1774_vm9  ;;  %vm15399_vm6 = vcmp.lt.s32.totalorder %v1761_v1, 4  ;;  %vm15403_vm1 = vcmp.ge.s32.totalorder %v1761_v1, 20 }
 0x106   : > { %v1341_v20 = vmul.f32 %v10059_v36, %v1312_v39  ;;  %v1340_v7 = vmul.f32 %v10059_v36, %v1307_v2  ;;  %vm1783_vm2 = vmand %vm15403_vm1, %vm1775_vm13 }
 0x107   : > { %vm1784_vm3 = vmand %vm1768_vm11, %vm1776_vm15 }
 0x108   : > { %v10179_v49 = vadd.f32 %v1341_v20, %v1241_v18  ;;  %1705 = vperm.xlu1 %8482, %v9896_v37   ;;  %v10183_v17 = vadd.f32 %v1340_v7, %v10052_v25  ;;  %1717 = vperm.xlu0 %8483, %v9927_v21   ;;  %vm1785_vm7 = vmand %vm1769_vm12, %vm1777_vm4 }
 0x109   : > { %v1322_v46 = vpop.permute.xlu1 %1321  ;;  %v1317_v44 = vpop.permute.xlu0 %1316 }
 0x10a   : > { %v1343_v34 = vmul.f32 %v10059_v36, %v1322_v46  ;;  %v1342_v22 = vmul.f32 %v10059_v36, %v1317_v44  ;;  %v15396_v36 = vld [vmem:[#allocation21_spill] sm:$0xff] }
 0x10c   : > { %v10191_v45 = vadd.f32 %v1343_v34, %v1243_v40  ;;  %1713 = vperm.xlu1 %8482, %v9910_v57   ;;  %v10195_v37 = vadd.f32 %v1342_v22, %v10071_v54  ;;  %v1526_v22 = vsub.s32 5, %v10001_v12 }
 0x10e   : > { %v1366_v21 = vpop.permute.xlu1 %1365  ;;  %v1362_v10 = vpop.permute.xlu0 %1361 }
 0x10f   : > { %v1429_v25 = vmul.f32 %v10189_v51, %v1366_v21  ;;  %v1428_v23 = vmul.f32 %v10189_v51, %v1362_v10 }
 0x110   : > { %1721 = vperm.xlu1 %8482, %v15396_v36  }
 0x111   : > { %v10202_v13 = vadd.f32 %v1429_v25, %v10081_v53  ;;  %v10206_v57 = vadd.f32 %v1428_v23, %v10087_v33 }
 0x112   : > { %v1370_v54 = vpop.permute.xlu1 %1369  ;;  %v1374_v4 = vpop.permute.xlu0 %1373 }
 0x113   : > { %v1430_v35 = vmul.f32 %v10189_v51, %v1370_v54  ;;  %v1431_v53 = vmul.f32 %v10189_v51, %v1374_v4 }
 0x115   : > { %v10220_v47 = vadd.f32 %v1430_v35, %v10105_v31  ;;  %v10224_v5 = vadd.f32 %v1431_v53, %v10099_v58  ;;  %v9275_v31 = vmov 0.0  }
 0x116   : > { %v1378_v11 = vpop.permute.xlu1 %1377  ;;  %v1382_v15 = vpop.permute.xlu0 %1381  ;;  %v10230_v50 = vsel %vm15399_vm6, 1.0, %v9275_v31  ;;  %v10234_v0 = vsel %vm10215_vm10, 1.0, %v9275_v31  ;;  %v10236_v58 = vsel %vm1780_vm14, 1.0, %v9275_v31  ;;  %v10241_v29 = vsel %vm1781_vm5, 1.0, %v9275_v31 }
 0x117   : > { %v1432_v28 = vmul.f32 %v10189_v51, %v1378_v11  ;;  %15400 = vst [vmem:[#allocation22_spill] sm:$0xff] %v10230_v50  ;;  %15401 = vst [vmem:[#allocation25_spill] sm:$0xff] %v10234_v0  ;;  %v1433_v61 = vmul.f32 %v10189_v51, %v1382_v15  ;;  %v10243_v41 = vsel %vm1782_vm0, 1.0, %v9275_v31  ;;  %v10248_v42 = vsel %vm1783_vm2, 1.0, %v9275_v31 }
 0x118   : > { %15402 = vst [vmem:[#allocation23_spill] sm:$0xff] %v10236_v58  ;;  %15404 = vst [vmem:[#allocation24_spill] sm:$0xff] %v10241_v29  ;;  %v10253_v16 = vsel %vm1784_vm3, 1.0, %v9275_v31  ;;  %v10256_v30 = vsel %vm1785_vm7, 1.0, %v9275_v31 }
 0x119   : > { %15405 = vst [vmem:[#allocation27_spill] sm:$0xff] %v10243_v41  ;;  %v1448_v55 = vadd.f32 %v1432_v28, %v10123_v6  ;;  %15406 = vst [vmem:[#allocation31_spill] sm:$0xff] %v10248_v42  ;;  %v1449_v48 = vadd.f32 %v1433_v61, %v10117_v3 }
 0x11a   : > { %v1386_v19 = vpop.permute.xlu1 %1385  ;;  %15407 = vst [vmem:[#allocation28_spill] sm:$0xff] %v10253_v16  ;;  %v1390_v8 = vpop.permute.xlu0 %1389  ;;  %15408 = vst [vmem:[#allocation30_spill] sm:$0xff] %v10256_v30 }
 0x11b   : > { %v1434_v59 = vmul.f32 %v10189_v51, %v1386_v19  ;;  %v1435_v6 = vmul.f32 %v10189_v51, %v1390_v8 }
 0x11d   : > { %v1450_v38 = vadd.f32 %v1434_v59, %v10141_v63  ;;  %v1451_v9 = vadd.f32 %v1435_v6, %v10135_v14 }
 0x11e   : > { %v1394_v39 = vpop.permute.xlu1 %1393  ;;  %v1398_v18 = vpop.permute.xlu0 %1397 }
 0x11f   : > { %v1436_v3 = vmul.f32 %v10189_v51, %v1394_v39  ;;  %v1437_v56 = vmul.f32 %v10189_v51, %v1398_v18 }
 0x121   : > { %v1452_v20 = vadd.f32 %v1436_v3, %v10157_v62  ;;  %v1453_v2 = vadd.f32 %v1437_v56, %v10153_v27 }
 0x122   : > { %v1402_v7 = vpop.permute.xlu1 %1401  ;;  %v1406_v26 = vpop.permute.xlu0 %1405 }
 0x123   : > { %v1438_v32 = vmul.f32 %v10189_v51, %v1402_v7  ;;  %v1439_v46 = vmul.f32 %v10189_v51, %v1406_v26 }
 0x125   : > { %v1454_v63 = vadd.f32 %v1438_v32, %v10170_v60  ;;  %v1455_v14 = vadd.f32 %v1439_v46, %v10167_v43  ;;  %v10278_v60 = vrot.slane %v10016_v24, %v1526_v22 }
 0x126   : > { %v1410_v40 = vpop.permute.xlu1 %1409  ;;  %v1414_v44 = vpop.permute.xlu0 %1413 }
 0x127   : > { %v1440_v34 = vmul.f32 %v10189_v51, %v1410_v40  ;;  %v1441_v62 = vmul.f32 %v10189_v51, %v1414_v44 }
 0x129   : > { %v1456_v27 = vadd.f32 %v1440_v34, %v10183_v17  ;;  %v10274_v21 = vadd.f32 %v1441_v62, %v10179_v49 }
 0x12a   : > { %v1418_v25 = vpop.permute.xlu1 %1417  ;;  %v1422_v52 = vpop.permute.xlu0 %1421 }
 0x12b   : > { %v1442_v10 = vmul.f32 %v10189_v51, %v1418_v25  ;;  %v1443_v43 = vmul.f32 %v10189_v51, %v1422_v52 }
 0x12d   : > { %v1458_v1 = vadd.f32 %v1442_v10, %v10195_v37  ;;  %v10283_v23 = vadd.f32 %v1443_v43, %v10191_v45 }
 0x12e   : > { %v1462_v36 = vpop.permute.xlu1 %1461  ;;  %v1466_v54 = vpop.permute.xlu0 %1465 }
 0x12f   : > { %v1528_v17 = vmul.f32 %v10278_v60, %v1462_v36  ;;  %v1529_v49 = vmul.f32 %v10278_v60, %v1466_v54 }
 0x131   : > { %v1544_v35 = vadd.f32 %v1528_v17, %v10206_v57  ;;  %v10289_v4 = vadd.f32 %v1529_v49, %v10202_v13 }
 0x132   : > { %v1470_v53 = vpop.permute.xlu1 %1469  ;;  %v1474_v51 = vpop.permute.xlu0 %1473 }
 0x133   : > { %v1530_v33 = vmul.f32 %v10278_v60, %v1470_v53  ;;  %v1531_v37 = vmul.f32 %v10278_v60, %v1474_v51 }
 0x135   : > { %v1546_v45 = vadd.f32 %v1530_v33, %v10220_v47  ;;  %v10295_v11 = vadd.f32 %v1531_v37, %v10224_v5 }
 0x136   : > { %v1478_v28 = vpop.permute.xlu1 %1477  ;;  %v1482_v31 = vpop.permute.xlu0 %1481 }
 0x137   : > { %v1532_v15 = vmul.f32 %v10278_v60, %v1478_v28  ;;  %v1533_v57 = vmul.f32 %v10278_v60, %v1482_v31 }
 0x139   : > { %v10299_v61 = vadd.f32 %v1532_v15, %v1448_v55  ;;  %v10301_v13 = vadd.f32 %v1533_v57, %v1449_v48 }
 0x13a   : > { %v1486_v19 = vpop.permute.xlu1 %1485  ;;  %v1490_v8 = vpop.permute.xlu0 %1489 }
 0x13b   : > { %v1534_v59 = vmul.f32 %v10278_v60, %v1486_v19  ;;  %v1535_v6 = vmul.f32 %v10278_v60, %v1490_v8 }
 0x13d   : > { %v10305_v47 = vadd.f32 %v1534_v59, %v1450_v38  ;;  %v10307_v5 = vadd.f32 %v1535_v6, %v1451_v9 }
 0x13e   : > { %v1494_v39 = vpop.permute.xlu1 %1493  ;;  %v1498_v18 = vpop.permute.xlu0 %1497 }
 0x13f   : > { %v1536_v3 = vmul.f32 %v10278_v60, %v1494_v39  ;;  %v1537_v56 = vmul.f32 %v10278_v60, %v1498_v18 }
 0x141   : > { %v10311_v55 = vadd.f32 %v1536_v3, %v1452_v20  ;;  %v10313_v48 = vadd.f32 %v1537_v56, %v1453_v2 }
 0x142   : > { %v1502_v7 = vpop.permute.xlu1 %1501  ;;  %v1506_v26 = vpop.permute.xlu0 %1505 }
 0x143   : > { %v1538_v32 = vmul.f32 %v10278_v60, %v1502_v7  ;;  %v1539_v46 = vmul.f32 %v10278_v60, %v1506_v26 }
 0x145   : > { %v10317_v38 = vadd.f32 %v1538_v32, %v1454_v63  ;;  %v10319_v9 = vadd.f32 %v1539_v46, %v1455_v14 }
 0x146   : > { %v1510_v40 = vpop.permute.xlu1 %1509  ;;  %v10322_v44 = vpop.permute.xlu0 %1513 }
 0x147   : > { %v1540_v34 = vmul.f32 %v10278_v60, %v1510_v40 }
 0x149   : > { %v10324_v22 = vadd.f32 %v1540_v34, %v1456_v27  ;;  %v1626_v27 = vsub.s32 3, %v10001_v12 }
 0x14a   : > { %v1518_v20 = vpop.permute.xlu1 %1517  ;;  %v10327_v62 = vpop.permute.xlu0 %1521 }
 0x14b   : > { %v1542_v2 = vmul.f32 %v10278_v60, %v1518_v20  ;;  %v10333_v37 = vrot.slane %v10016_v24, %v1626_v27 }
 0x14d   : > { %v10329_v25 = vadd.f32 %v1542_v2, %v1458_v1  ;;  %v1726_v1 = vsub.s32 6, %v10001_v12 }
 0x14f   : > { %v1562_v10 = vpop.permute.xlu1 %1561  ;;  %v1566_v52 = vpop.permute.xlu0 %1565  ;;  %v10338_v57 = vrot.slane %v10016_v24, %v1726_v1 }
 0x150   : > { %v1628_v31 = vmul.f32 %v10333_v37, %v1562_v10  ;;  %v1629_v12 = vmul.f32 %v10333_v37, %v1566_v52 }
 0x152   : > { %v1644_v8 = vadd.f32 %v1628_v31, %v1544_v35  ;;  %v1645_v35 = vadd.f32 %v1629_v12, %v10289_v4 }
 0x153   : > { %v1570_v63 = vpop.permute.xlu1 %1569  ;;  %v1578_v43 = vpop.permute.xlu0 %1577 }
 0x154   : > { %v1630_v6 = vmul.f32 %v10333_v37, %v1570_v63  ;;  %v1632_v32 = vmul.f32 %v10333_v37, %v1578_v43 }
 0x156   : > { %v1646_v7 = vadd.f32 %v1630_v6, %v1546_v45  ;;  %v1648_v2 = vadd.f32 %v1632_v32, %v10299_v61 }
 0x157   : > { %v1574_v14 = vpop.permute.xlu1 %1573  ;;  %v1586_v36 = vpop.permute.xlu0 %1585 }
 0x158   : > { %v1631_v40 = vmul.f32 %v10333_v37, %v1574_v14  ;;  %v1634_v10 = vmul.f32 %v10333_v37, %v1586_v36 }
 0x15a   : > { %v1647_v27 = vadd.f32 %v1631_v40, %v10295_v11  ;;  %v1650_v31 = vadd.f32 %v1634_v10, %v10305_v47 }
 0x15b   : > { %v1582_v17 = vpop.permute.xlu1 %1581  ;;  %v1594_v54 = vpop.permute.xlu0 %1593 }
 0x15c   : > { %v1633_v4 = vmul.f32 %v10333_v37, %v1582_v17  ;;  %v1636_v61 = vmul.f32 %v10333_v37, %v1594_v54 }
 0x15f   : > { %v1590_v49 = vpop.permute.xlu1 %1589  ;;  %v1602_v53 = vpop.permute.xlu0 %1601 }
 0x160   : > { %v1635_v12 = vmul.f32 %v10333_v37, %v1590_v49 }
 0x163   : > { %v1598_v33 = vpop.permute.xlu1 %1597  ;;  %v1610_v51 = vpop.permute.xlu0 %1609 }
 0x167   : > { %v1606_v28 = vpop.permute.xlu1 %1605  ;;  %v1618_v15 = vpop.permute.xlu0 %1617 }
 0x16b   : > { %v10340_v19 = vpop.permute.xlu1 %1613  ;;  %v1662_v59 = vpop.permute.xlu0 %1661 }
 0x16c   : > { %v1728_v39 = vmul.f32 %v10338_v57, %v1662_v59 }
 0x16e   : > { %v10344_v3 = vadd.f32 %v1728_v39, %v1644_v8   ;;  %v1649_v39 = vadd.f32 %v1633_v4, %v10301_v13 }
 0x16f   : > { %v10346_v18 = vpop.permute.xlu1 %1621  ;;  %v1670_v56 = vpop.permute.xlu0 %1669 }
 0x170   : > { %v1730_v24 = vmul.f32 %v10338_v57, %v1670_v56  ;;  %v1652_v56 = vadd.f32 %v1636_v61, %v10311_v55 }
 0x172   : > { %v10351_v26 = vadd.f32 %v1730_v24, %v1646_v7   ;;  %v1638_v7 = vmul.f32 %v10333_v37, %v1602_v53 }
 0x173   : > { %v1666_v46 = vpop.permute.xlu1 %1665  ;;  %v1678_v20 = vpop.permute.xlu0 %1677 }
 0x174   : > { %v1729_v34 = vmul.f32 %v10338_v57, %v1666_v46  ;;  %v1732_v45 = vmul.f32 %v10338_v57, %v1678_v20  ;;  %v1651_v46 = vadd.f32 %v1635_v12, %v10307_v5  ;;  %v1654_v49 = vadd.f32 %v1638_v7, %v10317_v38 }
 0x176   : > { %v10359_v52 = vadd.f32 %v1729_v34, %v1645_v35   ;;  %v10361_v63 = vadd.f32 %v1732_v45, %v1648_v2   ;;  %v1637_v35 = vmul.f32 %v10333_v37, %v1598_v33  ;;  %v1640_v34 = vmul.f32 %v10333_v37, %v1610_v51 }
 0x177   : > { %v1674_v43 = vpop.permute.xlu1 %1673  ;;  %v1686_v1 = vpop.permute.xlu0 %1685  ;;  %v1639_v45 = vmul.f32 %v10333_v37, %v1606_v28  ;;  %v1541_v51 = vmul.f32 %v10278_v60, %v10322_v44  ;;  %v1543_v44 = vmul.f32 %v10278_v60, %v10327_v62 }
 0x178   : > { %v1731_v14 = vmul.f32 %v10338_v57, %v1674_v43  ;;  %v1734_v36 = vmul.f32 %v10338_v57, %v1686_v1  ;;  %v1653_v10 = vadd.f32 %v1637_v35, %v10313_v48  ;;  %v1656_v33 = vadd.f32 %v1640_v34, %v10324_v22 }
 0x179   : > { %v1641_v48 = vmul.f32 %v10333_v37, %v10340_v19  ;;  %v1643_v19 = vmul.f32 %v10333_v37, %v10346_v18 }
 0x17a   : > { %v10369_v59 = vadd.f32 %v1731_v14, %v1647_v27   ;;  %v1750_v8 = vadd.f32 %v1734_v36, %v1650_v31   ;;  %v1642_v27 = vmul.f32 %v10333_v37, %v1618_v15  ;;  %v1655_v31 = vadd.f32 %v1639_v45, %v10319_v9 }
 0x17b   : > { %v1682_v6 = vpop.permute.xlu1 %1681  ;;  %v1694_v17 = vpop.permute.xlu0 %1693  ;;  %v1557_v36 = vadd.f32 %v1541_v51, %v10274_v21 }
 0x17c   : > { %v1733_v11 = vmul.f32 %v10338_v57, %v1682_v6  ;;  %v1736_v47 = vmul.f32 %v10338_v57, %v1694_v17  ;;  %v1658_v22 = vadd.f32 %v1642_v27, %v10329_v25  ;;  %v1559_v17 = vadd.f32 %v1543_v44, %v10283_v23 }
 0x17d   : > { %v1657_v9 = vadd.f32 %v1641_v48, %v1557_v36 }
 0x17e   : > { %v1749_v54 = vadd.f32 %v1733_v11, %v1649_v39   ;;  %v1752_v32 = vadd.f32 %v1736_v47, %v1652_v56   ;;  %v1659_v7 = vadd.f32 %v1643_v19, %v1559_v17 }
 0x17f   : > { %v1690_v24 = vpop.permute.xlu1 %1689  ;;  %v1702_v40 = vpop.permute.xlu0 %1701 }
 0x180   : > { %v1735_v13 = vmul.f32 %v10338_v57, %v1690_v24  ;;  %v1738_v55 = vmul.f32 %v10338_v57, %v1702_v40 }
 0x182   : > { %v1751_v20 = vadd.f32 %v1735_v13, %v1651_v46   ;;  %v1754_v53 = vadd.f32 %v1738_v55, %v1654_v49  }
 0x183   : > { %v1698_v2 = vpop.permute.xlu1 %1697  ;;  %v1710_v43 = vpop.permute.xlu0 %1709 }
 0x184   : > { %v1737_v5 = vmul.f32 %v10338_v57, %v1698_v2  ;;  %v1740_v38 = vmul.f32 %v10338_v57, %v1710_v43 }
 0x186   : > { %v1753_v4 = vadd.f32 %v1737_v5, %v1653_v10   ;;  %v1756_v14 = vadd.f32 %v1740_v38, %v1656_v33  }
 0x187   : > { %v1706_v1 = vpop.permute.xlu1 %1705  ;;  %v1718_v61 = vpop.permute.xlu0 %1717 }
 0x188   : > { %v1739_v28 = vmul.f32 %v10338_v57, %v1706_v1  ;;  %v1742_v15 = vmul.f32 %v10338_v57, %v1718_v61 }
 0x18a   : > { %v1755_v6 = vadd.f32 %v1739_v28, %v1655_v31   ;;  %v1758_v39 = vadd.f32 %v1742_v15, %v1658_v22  }
 0x18b   : > { %v1714_v12 = vpop.permute.xlu1 %1713 }
 0x18c   : > { %v1741_v11 = vmul.f32 %v10338_v57, %v1714_v12 }
 0x18e   : > { %v1757_v25 = vadd.f32 %v1741_v11, %v1657_v9  }
 0x18f   : > { %v1722_v56 = vpop.permute.xlu1 %1721 }
 0x190   : > { %v1743_v47 = vmul.f32 %v10338_v57, %v1722_v56 }
 0x192   : > { %v1759_v21 = vadd.f32 %v1743_v47, %v1659_v7  }
 0x193 LB: >> { %v15409_v30 = vld [vmem:[#allocation30_spill] sm:$0xff]  ;;  %v15410_v16 = vld [vmem:[#allocation28_spill] sm:$0xff]  ;;  %v15411_v42 = vld [vmem:[#allocation31_spill] sm:$0xff]  ;;  %15417 = vst [vmem:[#allocation37_spill] sm:$0xff] %v9206_v21  ;;  %vm1859_vm4 = vcmask 261120   ;;  %s10499_s26 = sshll.u32 %s9270_s5, 4  ;;  %v1831_v60 = vpack.c.bf16 %v9262_v52, %v9266_v3  ;;  %v1832_v37 = vpack.c.bf16 %v9254_v59, %v9258_v26  ;;  %v1833_v57 = vpack.c.bf16 %v9246_v54, %v9250_v63  ;;  %s1839_s24 = scalar_lea.vmem %s14771_s9, %s9270_s5  ;;  %v9234_v32 = vphi %v1752_v32, %v16462_v32   ;;  %v9230_v4 = vphi %v1753_v4, %v16461_v4   ;;  %v9226_v53 = vphi %v1754_v53, %v16460_v53   ;;  %v9222_v6 = vphi %v1755_v6, %v16459_v6   ;;  %v9218_v14 = vphi %v1756_v14, %v16458_v14   ;;  %v9214_v25 = vphi %v1757_v25, %v16457_v25   ;;  %v9210_v39 = vphi %v1758_v39, %v16456_v39   ;;  %v9206_v21 = vphi %v1759_v21, %v16455_v21   ;;  %s9270_s5 = sphi %s10445_s5, %s1807_s5   ;;  %v9266_v3 = vphi %v10344_v3, %v16470_v3   ;;  %v9262_v52 = vphi %v10359_v52, %v16469_v52   ;;  %v9258_v26 = vphi %v10351_v26, %v16468_v26   ;;  %v9254_v59 = vphi %v10369_v59, %v16467_v59   ;;  %v9250_v63 = vphi %v10361_v63, %v16466_v63   ;;  %v9246_v54 = vphi %v1749_v54, %v16465_v54   ;;  %v9242_v8 = vphi %v1750_v8, %v16464_v8   ;;  %v9238_v20 = vphi %v1751_v20, %v16463_v20  }
 0x194   : >> { %v15412_v41 = vld [vmem:[#allocation27_spill] sm:$0xff]  ;;  %v15413_v29 = vld [vmem:[#allocation24_spill] sm:$0xff]  ;;  %v15415_v0 = vld [vmem:[#allocation25_spill] sm:$0xff]  ;;  %15418 = vst [vmem:[#allocation38_spill] sm:$0xff] %v9210_v39  ;;  %s1826_s1 = scalar_lea.vmem %s14770_s8, %s10499_s26  ;;  %v1834_v18 = vpack.c.bf16 %v9238_v20, %v9242_v8  ;;  %v1835_v24 = vpack.c.bf16 %v9230_v4, %v9234_v32  ;;  %v1836_v46 = vpack.c.bf16 %v9222_v6, %v9226_v53  ;;  %v1837_v35 = vpack.c.bf16 %v9214_v25, %v9218_v14  ;;  %s9276_s21 = smov 96  }
 0x195   : >> { %v15414_v58 = vld [vmem:[#allocation23_spill] sm:$0xff]  ;;  %v15416_v50 = vld [vmem:[#allocation22_spill] sm:$0xff]  ;;  %15419 = vst [vmem:[#allocation39_spill] sm:$0xff] %v9214_v25  ;;  %15420 = vst [vmem:[#allocation40_spill] sm:$0xff] %v9218_v14  ;;  %7895 = vmatprep.mubr.msk.bf16.mxu0 %vm1859_vm4, %v1831_v60  ;;  %v1838_v13 = vpack.c.bf16 %v9206_v21, %v9210_v39  ;;  %s9277_s22 = smov 64   ;;  %vm3213_vm5 = vcmask 130048   ;;  %s13591_s4 = scalar_lea.vmem %s14772_s10, %s10499_s26 }
 0x196   : >> { %15421 = vst [vmem:[#allocation41_spill] sm:$0xff] %v9222_v6  ;;  %15422 = vst [vmem:[#allocation42_spill] sm:$0xff] %v9226_v53  ;;  %v8484_v23 = vld [vmem:[%s1826_s1] sm:$0xff]   ;;  %v8485_v62 = vld [vmem:[%s1826_s1 + $0x8] sm:$0xff]   ;;  %s6060_s0 = scalar_lea.vmem %s14773_s11, %s9270_s5  ;;  %s6475_s23 = scalar_lea.vmem %s14776_s14, %s10499_s26  ;;  %vm6696_vm8 = vcmask 523264  }
 0x197   : >> { %15423 = vst [vmem:[#allocation43_spill] sm:$0xff] %v9230_v4  ;;  %15424 = vst [vmem:[#allocation44_spill] sm:$0xff] %v9234_v32  ;;  %7891 = vmatprep.subr.bf16.mxu0 %v8484_v23  ;;  %v10533_v40 = vld [vmem:[%s1839_s24] ss:$0 sm:$0xff]  ;;  %s6219_s30 = scalar_lea.vmem %s14775_s13, %s9270_s5  ;;  %s6836_s27 = scalar_lea.vmem %s14781_s19, %s9270_s5 }
 0x198   : >> { %15425 = vst [vmem:[#allocation45_spill] sm:$0xff] %v9238_v20  ;;  %15426 = vst [vmem:[#allocation46_spill] sm:$0xff] %v9242_v8  ;;  %7892 = vmatpush3.bf16.msra.mxu0 %v8484_v23 }
 0x199   : >> { %15427 = vst [vmem:[#allocation47_spill] sm:$0xff] %v9246_v54  ;;  %15428 = vst [vmem:[#allocation48_spill] sm:$0xff] %v9250_v63  ;;  %7893 = vmatprep.subr.bf16.mxu0 %v8485_v62 }
 0x19a   : >> { %15429 = vst [vmem:[#allocation49_spill] sm:$0xff] %v9254_v59  ;;  %15430 = vst [vmem:[#allocation50_spill] sm:$0xff] %v9258_v26 }
 0x19b   : >> { %15431 = vst [vmem:[#allocation51_spill] sm:$0xff] %v9262_v52  ;;  %15432 = vst [vmem:[#allocation52_spill] sm:$0xff] %v9266_v3 }
 0x19c   : >> { %7894 = vmatpush3.bf16.msra.mxu0 %v8485_v62 }
 0x19f   : >> { %7896 = vmatmul.mubr.msk.bf16.vlgmr.msra.gmra.mrb[0].mxu0 %vm1859_vm4, %v1832_v37 }
 0x1a0   : >> { %7899 = vmatprep.mubr.msk.bf16.mxu0 %vm1859_vm4, %v1833_v57 }
 0x1a7   : >> { %7900 = vmatmul.mubr.msk.bf16.gmra.mrb[4].mxu0 %vm1859_vm4, %v1834_v18 }
 0x1a8   : >> { %7903 = vmatprep.mubr.msk.bf16.mxu0 %vm1859_vm4, %v1835_v24 }
 0x1af   : >> { %7904 = vmatmul.mubr.msk.bf16.gmra.mrb[8].mxu0 %vm1859_vm4, %v1836_v46 }
 0x1b0   : >> { %7907 = vmatprep.mubr.msk.bf16.mxu0 %vm1859_vm4, %v1837_v35 }
 0x1b7   : >> { %7908 = vmatmul.mubr.msk.bf16.gmra.mrb[12].mxu0 %vm1859_vm4, %v1838_v13 }
 0x272   : >> { %v7897_v49 = vpop.f32.mrb[0].mxu0 }
 0x273   : >> { %v1927_v34 = vadd.f32 %v7897_v49, %v10533_v40  ;;  %v1918_v55 = vpop.f32.mrb[1].mxu0 }
 0x274   : >> { %v1919_v2 = vadd.f32 %v10533_v40, %v1918_v55  ;;  %v7898_v10 = vpop.f32.mrb[2].mxu0 }
 0x275   : >> { %v10537_v45 = vmul.f32 0.5, %v1927_v34  ;;  %v1930_v5 = vadd.f32 %v7898_v10, %v10533_v40  ;;  %v1921_v43 = vpop.f32.mrb[3].mxu0 }
 0x276   : >> { %v10540_v33 = vmul.f32 0.5, %v1919_v2  ;;  %v1922_v27 = vadd.f32 %v10533_v40, %v1921_v43 }
 0x277   : >> { %v10543_v38 = vmul.f32 0.5, %v1930_v5  ;;  %v2190_v51 = vpack.c.bf16 %v1930_v5, %v1927_v34  ;;  %v2013_v1 = vmul.f32 %v15416_v50, %v10537_v45  ;;  %v10549_v31 = vmul.f32 %v15415_v0, %v10537_v45 }
 0x278   : >> { %v10551_v48 = vmul.f32 0.5, %v1922_v27  ;;  %v2189_v28 = vpack.c.bf16 %v1922_v27, %v1919_v2  ;;  %v1997_v61 = vmul.f32 %v15416_v50, %v10540_v33  ;;  %v10557_v22 = vmul.f32 %v15414_v58, %v10537_v45 }
 0x279   : >> { %2325 = vrot.lane.b32.xlu0 %v2190_v51, %s9276_s21  ;;  %v2014_v15 = vmul.f32 %v15416_v50, %v10543_v38  ;;  %v10564_v36 = vmul.f32 %v15415_v0, %v10543_v38  ;;  %v10568_v44 = vmul.f32 %v15414_v58, %v10543_v38  ;;  %v10572_v12 = vmul.f32 %v15415_v0, %v10540_v33 }
 0x27a   : >> { %4686 = vrot.lane.b32.xlu1 %v2189_v28, %s9277_s22  ;;  %v1998_v9 = vmul.f32 %v15416_v50, %v10551_v48  ;;  %v7901_v19 = vpop.f32.mrb[4].mxu0  ;;  %v10579_v11 = vmul.f32 %v15415_v0, %v10551_v48  ;;  %v10583_v17 = vmul.f32 %v15413_v29, %v10537_v45  ;;  %v10587_v56 = vmul.f32 %v15413_v29, %v10543_v38 }
 0x27b   : >> { %v2133_v7 = vpack.c.bf16 %v2014_v15, %v2013_v1  ;;  %v1943_v47 = vadd.f32 %v7901_v19, %v10533_v40  ;;  %v1934_v60 = vpop.f32.mrb[5].mxu0  ;;  %v10604_v49 = vmul.f32 %v15414_v58, %v10540_v33  ;;  %v10608_v34 = vmul.f32 %v15414_v58, %v10551_v48 }
 0x27c   : >> { %v2125_v37 = vpack.c.bf16 %v1998_v9, %v1997_v61  ;;  %v1935_v57 = vadd.f32 %v10533_v40, %v1934_v60  ;;  %v7902_v18 = vpop.f32.mrb[6].mxu0  ;;  %v10614_v2 = vmul.f32 %v15412_v41, %v10537_v45  ;;  %v10618_v10 = vmul.f32 %v15412_v41, %v10543_v38 }
 0x27d   : >> { %4810 = vrot.lane.b32.xlu0 %v2190_v51, %s9277_s22  ;;  %7931 = vmatprep.mubr.msk.bf16.mxu0 %vm1859_vm4, %v2133_v7  ;;  %v1946_v35 = vadd.f32 %v7902_v18, %v10533_v40  ;;  %v1937_v13 = vpop.f32.mrb[7].mxu0  ;;  %v10620_v5 = vmul.f32 0.5, %v1943_v47  ;;  %v10628_v61 = vmul.f32 %v15413_v29, %v10540_v33  ;;  %v10632_v15 = vmul.f32 %v15413_v29, %v10551_v48 }
 0x27e   : >> { %7913 = vmatprep.mubr.msk.bf16.mxu1 %vm1859_vm4, %v2125_v37  ;;  %v1938_v55 = vadd.f32 %v10533_v40, %v1937_v13  ;;  %v10640_v19 = vmul.f32 %v15411_v42, %v10537_v45  ;;  %v10644_v7 = vmul.f32 %v15411_v42, %v10543_v38  ;;  %v10654_v37 = vmul.f32 %v15412_v41, %v10551_v48 }
 0x27f   : >> { %v2192_v43 = vpack.c.bf16 %v1946_v35, %v1943_v47  ;;  %v10635_v9 = vmul.f32 0.5, %v1946_v35  ;;  %v10648_v47 = vmul.f32 %v15412_v41, %v10540_v33  ;;  %v10658_v18 = vmul.f32 %v15410_v16, %v10537_v45 }
 0x280   : >> { %v2191_v51 = vpack.c.bf16 %v1938_v55, %v1935_v57  ;;  %v10662_v35 = vmul.f32 %v15410_v16, %v10543_v38  ;;  %v10673_v46 = vmul.f32 %v15411_v42, %v10551_v48  ;;  %v10682_v27 = vmul.f32 %v15409_v30, %v10537_v45 }
 0x281   : >> { %2198 = vrot.lane.b32.xlu0 %v2189_v28, %s9276_s21  ;;  %2579 = vrot.lane.b32.xlu1 %v2192_v43, %s9276_s21  ;;  %v10669_v28 = vmul.f32 %v15411_v42, %v10540_v33  ;;  %v10684_v21 = vmul.f32 0.5, %v1935_v57  ;;  %v10693_v23 = vmul.f32 %v15409_v30, %v10543_v38  ;;  %v10700_v57 = vmul.f32 %v15410_v16, %v10540_v33 }
 0x282   : >> { %v7905_v60 = vpop.f32.mrb[8].mxu0  ;;  %v10710_v38 = vmul.f32 %v15416_v50, %v10620_v5  ;;  %v10716_v14 = vmul.f32 %v15416_v50, %v10635_v9  ;;  %v10722_v6 = vmul.f32 %v15409_v30, %v10540_v33  ;;  %v10730_v4 = vmul.f32 %v15415_v0, %v10620_v5 }
 0x283   : >> { %v1959_v13 = vadd.f32 %v7905_v60, %v10533_v40  ;;  %v1950_v1 = vpop.f32.mrb[9].mxu0  ;;  %v10695_v60 = vmul.f32 0.5, %v1938_v55  ;;  %v10740_v33 = vmul.f32 %v15416_v50, %v10684_v21  ;;  %v10753_v53 = vmul.f32 %v15414_v58, %v10620_v5 }
 0x284   : >> { %v1951_v24 = vadd.f32 %v10533_v40, %v1950_v1  ;;  %v7906_v62 = vpop.f32.mrb[10].mxu0  ;;  %v10726_v1 = vmul.f32 %v15409_v30, %v10551_v48  ;;  %15433 = vst [vmem:[#allocation53_spill] sm:$0xff] %v10730_v4  ;;  %v10757_v8 = vmul.f32 %v15414_v58, %v10635_v9  ;;  %v10768_v54 = vmul.f32 %v15415_v0, %v10684_v21 }
 0x285   : >> { %2452 = vrot.lane.b32.xlu1 %v2191_v51, %s9276_s21  ;;  %v1962_v25 = vadd.f32 %v7906_v62, %v10533_v40  ;;  %v1953_v39 = vpop.f32.mrb[11].mxu0  ;;  %5058 = vrot.lane.b32.xlu0 %v2192_v43, %s9277_s22  ;;  %v10704_v62 = vmul.f32 %v15410_v16, %v10551_v48  ;;  %15435 = vst [vmem:[#allocation55_spill] sm:$0xff] %v10740_v33  ;;  %15437 = vst [vmem:[#allocation57_spill] sm:$0xff] %v10753_v53  ;;  %v10770_v26 = vmul.f32 0.5, %v1959_v13 }
 0x286   : >> { %v1954_v45 = vadd.f32 %v10533_v40, %v1953_v39  ;;  %v10744_v48 = vmul.f32 %v15416_v50, %v10695_v60  ;;  %15438 = vst [vmem:[#allocation58_spill] sm:$0xff] %v10757_v8  ;;  %15439 = vst [vmem:[#allocation59_spill] sm:$0xff] %v10768_v54  ;;  %v10781_v52 = vmul.f32 %v15415_v0, %v10695_v60  ;;  %v10783_v33 = vmul.f32 0.5, %v1951_v24 }
 0x287   : >> { %v2194_v43 = vpack.c.bf16 %v1962_v25, %v1959_v13  ;;  %v10818_v8 = vmul.f32 %v15414_v58, %v10695_v60  ;;  %v10831_v54 = vmul.f32 %v15413_v29, %v10684_v21  ;;  %v10873_v4 = vmul.f32 %v15411_v42, %v10684_v21 }
 0x288   : >> { %v2193_v55 = vpack.c.bf16 %v1954_v45, %v1951_v24  ;;  %15436 = vst [vmem:[#allocation56_spill] sm:$0xff] %v10744_v48  ;;  %15440 = vst [vmem:[#allocation60_spill] sm:$0xff] %v10781_v52  ;;  %v10796_v48 = vmul.f32 0.5, %v1962_v25  ;;  %v10823_v24 = vmul.f32 %v15412_v41, %v10620_v5  ;;  %v10835_v25 = vmul.f32 %v15413_v29, %v10695_v60 }
 0x289   : >> { %4934 = vrot.lane.b32.xlu1 %v2191_v51, %s9277_s22  ;;  %5306 = vrot.lane.b32.xlu0 %v2194_v43, %s9277_s22  ;;  %v10736_v51 = vmul.f32 %v15415_v0, %v10635_v9  ;;  %15446 = vst [vmem:[#allocation66_spill] sm:$0xff] %v10818_v8  ;;  %15447 = vst [vmem:[#allocation67_spill] sm:$0xff] %v10831_v54  ;;  %v10851_v52 = vmul.f32 %v15412_v41, %v10684_v21 }
 0x28a   : >> { %v7909_v39 = vpop.f32.mrb[12].mxu0  ;;  %15448 = vst [vmem:[#allocation68_spill] sm:$0xff] %v10835_v25  ;;  %15452 = vst [vmem:[#allocation72_spill] sm:$0xff] %v10873_v4  ;;  %v10885_v8 = vmul.f32 %v15409_v30, %v10620_v5  ;;  %v10901_v54 = vmul.f32 %v15410_v16, %v10695_v60  ;;  %v10915_v25 = vmul.f32 %v15409_v30, %v10684_v21 }
 0x28b   : >> { %15434 = vst [vmem:[#allocation54_spill] sm:$0xff] %v10736_v51  ;;  %v10747_v32 = vadd.f32 %v7909_v39, %v10533_v40  ;;  %v1966_v20 = vpop.f32.mrb[13].mxu0  ;;  %15451 = vst [vmem:[#allocation71_spill] sm:$0xff] %v10851_v52  ;;  %v10869_v51 = vmul.f32 %v15410_v16, %v10635_v9  ;;  %v10911_v52 = vmul.f32 %v15416_v50, %v10796_v48 }
 0x28c   : >> { %v10760_v63 = vadd.f32 %v10533_v40, %v1966_v20  ;;  %v7910_v59 = vpop.f32.mrb[14].mxu0  ;;  %15454 = vst [vmem:[#allocation74_spill] sm:$0xff] %v10885_v8  ;;  %15457 = vst [vmem:[#allocation77_spill] sm:$0xff] %v10901_v54  ;;  %v10933_v8 = vmul.f32 %v15416_v50, %v10783_v33  ;;  %v10969_v54 = vmul.f32 %v15413_v29, %v10796_v48 }
 0x28d   : >> { %2833 = vrot.lane.b32.xlu1 %v2194_v43, %s9276_s21  ;;  %v10774_v3 = vadd.f32 %v7910_v59, %v10533_v40  ;;  %2706 = vrot.lane.b32.xlu0 %v2193_v55, %s9276_s21  ;;  %v1969_v20 = vpop.f32.mrb[15].mxu0  ;;  %v10790_v43 = vmul.f32 %v15413_v29, %v10620_v5  ;;  %v10794_v59 = vmul.f32 %v15413_v29, %v10635_v9 }
 0x28e   : >> { %v10786_v13 = vadd.f32 %v10533_v40, %v1969_v20  ;;  %v10806_v40 = vmul.f32 %v15414_v58, %v10684_v21  ;;  %v10808_v20 = vmul.f32 0.5, %v1954_v45  ;;  %v10827_v45 = vmul.f32 %v15412_v41, %v10635_v9  ;;  %15459 = vst [vmem:[#allocation79_spill] sm:$0xff] %v10911_v52  ;;  %15460 = vst [vmem:[#allocation80_spill] sm:$0xff] %v10915_v25 }
 0x28f   : >> { %15441 = vst [vmem:[#allocation61_spill] sm:$0xff] %v10790_v43  ;;  %15442 = vst [vmem:[#allocation62_spill] sm:$0xff] %v10794_v59  ;;  %v10800_v39 = vpack.c.bf16 %v10774_v3, %v10747_v32  ;;  %v10843_v43 = vmul.f32 %v15411_v42, %v10620_v5  ;;  %v10847_v59 = vmul.f32 %v15411_v42, %v10635_v9 }
 0x290   : >> { %15444 = vst [vmem:[#allocation64_spill] sm:$0xff] %v10806_v40  ;;  %v10812_v53 = vpack.c.bf16 %v10786_v13, %v10760_v63  ;;  %v10863_v40 = vmul.f32 %v15410_v16, %v10620_v5  ;;  %v10905_v5 = vmul.f32 %v15416_v50, %v10770_v26  ;;  %15464 = vst [vmem:[#allocation84_spill] sm:$0xff] %v10933_v8 }
 0x291   : >> { %15443 = vst [vmem:[#allocation63_spill] sm:$0xff] %v10800_v39  ;;  %5182 = vrot.lane.b32.xlu1 %v2193_v55, %s9277_s22  ;;  %15449 = vst [vmem:[#allocation69_spill] sm:$0xff] %v10843_v43  ;;  %v10859_v55 = vmul.f32 %v15412_v41, %v10695_v60  ;;  %v10889_v43 = vmul.f32 %v15409_v30, %v10635_v9  ;;  %v10929_v9 = vmul.f32 %v15415_v0, %v10796_v48 }
 0x292   : >> { %15445 = vst [vmem:[#allocation65_spill] sm:$0xff] %v10812_v53  ;;  %2960 = vrot.lane.b32.xlu0 %v10812_v53, %s9276_s21  ;;  %15450 = vst [vmem:[#allocation70_spill] sm:$0xff] %v10847_v59  ;;  %v10877_v53 = vmul.f32 %v15411_v42, %v10695_v60  ;;  %v10893_v59 = vmul.f32 %v15410_v16, %v10684_v21  ;;  %v10941_v4 = vmul.f32 %v15416_v50, %v10808_v20 }
 0x293   : >> { %15455 = vst [vmem:[#allocation75_spill] sm:$0xff] %v10889_v43  ;;  %15458 = vst [vmem:[#allocation78_spill] sm:$0xff] %v10905_v5  ;;  %v10951_v43 = vmul.f32 %v15414_v58, %v10796_v48  ;;  %v10955_v21 = vmul.f32 %v15415_v0, %v10783_v33  ;;  %v10981_v25 = vmul.f32 %v15414_v58, %v10808_v20 }
 0x294   : >> { %15453 = vst [vmem:[#allocation73_spill] sm:$0xff] %v10877_v53  ;;  %15456 = vst [vmem:[#allocation76_spill] sm:$0xff] %v10893_v59  ;;  %v10925_v53 = vmul.f32 %v15415_v0, %v10770_v26  ;;  %v10945_v59 = vmul.f32 %v15414_v58, %v10770_v26  ;;  %v10985_v8 = vmul.f32 %v15412_v41, %v10770_v26 }
 0x295   : >> { %3087 = vrot.lane.b32.xlu1 %v10800_v39, %s9276_s21  ;;  %v10919_v39 = vmul.f32 %v15409_v30, %v10695_v60  ;;  %15463 = vst [vmem:[#allocation83_spill] sm:$0xff] %v10929_v9  ;;  %15465 = vst [vmem:[#allocation85_spill] sm:$0xff] %v10941_v4  ;;  %v10959_v60 = vmul.f32 %v15415_v0, %v10808_v20  ;;  %v10991_v52 = vmul.f32 %v15412_v41, %v10796_v48  ;;  %s6217_s21 = scalar_lea.vmem %s14774_s12, %s9270_s5 }
 0x296   : >> { %15462 = vst [vmem:[#allocation82_spill] sm:$0xff] %v10925_v53  ;;  %15466 = vst [vmem:[#allocation86_spill] sm:$0xff] %v10945_v59  ;;  %v10973_v53 = vmul.f32 %v15414_v58, %v10783_v33  ;;  %v10995_v9 = vmul.f32 %v15413_v29, %v10783_v33  ;;  %v10999_v5 = vmul.f32 %v15413_v29, %v10808_v20 }
 0x297   : >> { %15461 = vst [vmem:[#allocation81_spill] sm:$0xff] %v10919_v39  ;;  %15467 = vst [vmem:[#allocation87_spill] sm:$0xff] %v10951_v43  ;;  %v10965_v39 = vmul.f32 %v15413_v29, %v10770_v26  ;;  %v11009_v4 = vmul.f32 %v15411_v42, %v10796_v48  ;;  %v11031_v43 = vmul.f32 %v15410_v16, %v10796_v48 }
 0x298   : >> { %15468 = vst [vmem:[#allocation88_spill] sm:$0xff] %v10955_v21  ;;  %15469 = vst [vmem:[#allocation89_spill] sm:$0xff] %v10959_v60  ;;  %v11005_v60 = vmul.f32 %v15411_v42, %v10770_v26  ;;  %v11021_v21 = vmul.f32 %v15412_v41, %v10808_v20  ;;  %v11039_v59 = vmul.f32 %v15411_v42, %v10808_v20 }
 0x299   : >> { %15470 = vst [vmem:[#allocation90_spill] sm:$0xff] %v10965_v39  ;;  %15471 = vst [vmem:[#allocation91_spill] sm:$0xff] %v10969_v54  ;;  %v11013_v39 = vmul.f32 %v15412_v41, %v10783_v33  ;;  %v11035_v54 = vmul.f32 %v15411_v42, %v10783_v33 }
 0x29a   : >> { %15472 = vst [vmem:[#allocation92_spill] sm:$0xff] %v10973_v53  ;;  %15473 = vst [vmem:[#allocation93_spill] sm:$0xff] %v10981_v25  ;;  %v11025_v53 = vmul.f32 %v15410_v16, %v10770_v26  ;;  %v11049_v25 = vmul.f32 %v15409_v30, %v10796_v48  ;;  %v1993_v48 = vmul.f32 0.5, %v10760_v63 }
 0x29b   : >> { %15474 = vst [vmem:[#allocation94_spill] sm:$0xff] %v10985_v8  ;;  %15475 = vst [vmem:[#allocation95_spill] sm:$0xff] %v10995_v9  ;;  %v11061_v9 = vmul.f32 %v15410_v16, %v10808_v20 }
 0x29c   : >> { %15476 = vst [vmem:[#allocation96_spill] sm:$0xff] %v10999_v5  ;;  %15477 = vst [vmem:[#allocation97_spill] sm:$0xff] %v11005_v60  ;;  %v11045_v5 = vmul.f32 %v15409_v30, %v10770_v26  ;;  %v11053_v60 = vmul.f32 %v15410_v16, %v10783_v33  ;;  %v11065_v26 = vmul.f32 %v15409_v30, %v10783_v33 }
 0x29d   : >> { %15478 = vst [vmem:[#allocation98_spill] sm:$0xff] %v11009_v4  ;;  %15479 = vst [vmem:[#allocation99_spill] sm:$0xff] %v11013_v39  ;;  %v11071_v39 = vmul.f32 %v15409_v30, %v10808_v20  ;;  %v1994_v20 = vmul.f32 0.5, %v10786_v13  ;;  %v11108_v13 = vmul.f32 %v15415_v0, %v1993_v48 }
 0x29e   : >> { %15480 = vst [vmem:[#allocation100_spill] sm:$0xff] %v11025_v53  ;;  %15481 = vst [vmem:[#allocation101_spill] sm:$0xff] %v11035_v54  ;;  %v1995_v54 = vmul.f32 0.5, %v10747_v32 }
 0x29f   : >> { %15482 = vst [vmem:[#allocation102_spill] sm:$0xff] %v11039_v59  ;;  %15483 = vst [vmem:[#allocation103_spill] sm:$0xff] %v11045_v5  ;;  %v1996_v59 = vmul.f32 0.5, %v10774_v3  ;;  %v11096_v3 = vmul.f32 %v15416_v50, %v1993_v48  ;;  %v11099_v8 = vmul.f32 %v15416_v50, %v1994_v20  ;;  %v11111_v4 = vmul.f32 %v15415_v0, %v1994_v20 }
 0x2a0   : >> { %15484 = vst [vmem:[#allocation104_spill] sm:$0xff] %v11053_v60  ;;  %15485 = vst [vmem:[#allocation105_spill] sm:$0xff] %v11061_v9  ;;  %v11080_v33 = vmul.f32 %v15416_v50, %v1995_v54  ;;  %v11090_v60 = vmul.f32 %v15415_v0, %v1995_v54  ;;  %v11142_v9 = vmul.f32 %v15413_v29, %v1993_v48 }
 0x2a1   : >> { %15486 = vst [vmem:[#allocation106_spill] sm:$0xff] %v11065_v26  ;;  %15487 = vst [vmem:[#allocation107_spill] sm:$0xff] %v11071_v39  ;;  %v11083_v53 = vmul.f32 %v15416_v50, %v1996_v59  ;;  %v11093_v32 = vmul.f32 %v15415_v0, %v1996_v59  ;;  %v11102_v26 = vmul.f32 %v15414_v58, %v1995_v54 }
 0x2a2   : >> { %15488 = vst [vmem:[#allocation108_spill] sm:$0xff] %v11080_v33  ;;  %15490 = vst [vmem:[#allocation110_spill] sm:$0xff] %v11096_v3  ;;  %v11105_v63 = vmul.f32 %v15414_v58, %v1996_v59  ;;  %v11118_v50 = vmul.f32 %v15413_v29, %v1995_v54  ;;  %v11128_v0 = vmul.f32 %v15414_v58, %v1993_v48 }
 0x2a3   : >> { %15489 = vst [vmem:[#allocation109_spill] sm:$0xff] %v11083_v53  ;;  %15491 = vst [vmem:[#allocation111_spill] sm:$0xff] %v11099_v8  ;;  %v11121_v53 = vmul.f32 %v15413_v29, %v1996_v59  ;;  %v11131_v39 = vmul.f32 %v15414_v58, %v1994_v20  ;;  %v11136_v3 = vmul.f32 %v15412_v41, %v1995_v54 }
 0x2a4   : >> { %15492 = vst [vmem:[#allocation112_spill] sm:$0xff] %v11108_v13  ;;  %15493 = vst [vmem:[#allocation113_spill] sm:$0xff] %v11111_v4  ;;  %v11139_v8 = vmul.f32 %v15412_v41, %v1996_v59  ;;  %v11147_v13 = vmul.f32 %v15413_v29, %v1994_v20  ;;  %v11150_v58 = vmul.f32 %v15411_v42, %v1995_v54 }
 0x2a5   : >> { %15494 = vst [vmem:[#allocation114_spill] sm:$0xff] %v11118_v50  ;;  %15495 = vst [vmem:[#allocation115_spill] sm:$0xff] %v11121_v53  ;;  %v11153_v33 = vmul.f32 %v15411_v42, %v1996_v59  ;;  %v11158_v53 = vmul.f32 %v15412_v41, %v1993_v48  ;;  %v11161_v4 = vmul.f32 %v15412_v41, %v1994_v20 }
 0x2a6   : >> { %15496 = vst [vmem:[#allocation116_spill] sm:$0xff] %v11128_v0  ;;  %15497 = vst [vmem:[#allocation117_spill] sm:$0xff] %v11131_v39  ;;  %v11164_v5 = vmul.f32 %v15410_v16, %v1995_v54  ;;  %v11171_v39 = vmul.f32 %v15410_v16, %v1996_v59  ;;  %v11174_v50 = vmul.f32 %v15411_v42, %v1993_v48 }
 0x2a7   : >> { %15498 = vst [vmem:[#allocation118_spill] sm:$0xff] %v11136_v3  ;;  %15499 = vst [vmem:[#allocation119_spill] sm:$0xff] %v11139_v8  ;;  %v11179_v41 = vmul.f32 %v15411_v42, %v1994_v20  ;;  %v11182_v8 = vmul.f32 %v15409_v30, %v1995_v54  ;;  %v11185_v29 = vmul.f32 %v15409_v30, %v1996_v59 }
 0x2a8   : >> { %15500 = vst [vmem:[#allocation120_spill] sm:$0xff] %v11150_v58  ;;  %15501 = vst [vmem:[#allocation121_spill] sm:$0xff] %v11153_v33  ;;  %v11190_v58 = vmul.f32 %v15410_v16, %v1993_v48  ;;  %v11193_v33 = vmul.f32 %v15410_v16, %v1994_v20  ;;  %v11196_v3 = vmul.f32 %v15409_v30, %v1993_v48 }
 0x2a9   : >> { %15502 = vst [vmem:[#allocation122_spill] sm:$0xff] %v11164_v5  ;;  %15503 = vst [vmem:[#allocation123_spill] sm:$0xff] %v11171_v39  ;;  %v11203_v59 = vmul.f32 %v15409_v30, %v1994_v20  ;;  %v15505_v20 = vpack.c.bf16 %v10564_v36, %v10549_v31 }
 0x2aa   : >> { %15504 = vst [vmem:[#allocation124_spill] sm:$0xff] %v11182_v8 }
 0x2eb   : >> { %v2326_v16 = vpop.permute.xlu0 %2325 }
 0x2ec   : >> { %8288 = vmatprep.subr.msk.bf16.mxu0 %vm1859_vm4, %v2326_v16  ;;  %v2352_v48 = vsel %vm1859_vm4, %v2326_v16, 0  ;;  %v11211_v39 = vpop.permute.xlu1 %4686  ;;  %v15506_v16 = vpack.c.bf16 %v10568_v44, %v10557_v22  ;;  %v15513_v22 = vpack.c.bf16 %v10618_v10, %v10614_v2  ;;  %v15519_v2 = vpack.c.bf16 %v10693_v23, %v10682_v27  ;;  %v15524_v23 = vld [vmem:[#allocation54_spill] sm:$0xff]  ;;  %v15525_v27 = vld [vmem:[#allocation53_spill] sm:$0xff] }
 0x2ed   : >> { %7930 = vmatpush3.bf16.xpose.msra.mxu0 %v2352_v48  ;;  %v15520_v10 = vpack.c.bf16 %v10704_v62, %v10700_v57  ;;  %v15534_v62 = vld [vmem:[#allocation59_spill] sm:$0xff] }
 0x2ef   : >> { %v11213_v42 = vpop.permute.xlu0 %4810 }
 0x2f3   : >> { %v2199_v54 = vpop.permute.xlu0 %2198  ;;  %v2580_v8 = vpop.permute.xlu1 %2579 }
 0x2f4   : >> { %8287 = vmatprep.subr.msk.bf16.mxu1 %vm1859_vm4, %v2199_v54  ;;  %7932 = vmatmul.mubr.msk.bf16.vlgmr.msra.gmra.mrb[16].mxu0 %vm1859_vm4, %v15505_v20  ;;  %v2225_v5 = vsel %vm1859_vm4, %v2199_v54, 0  ;;  %v2606_v0 = vsel %vm1859_vm4, %v2580_v8, 0  ;;  %v15536_v20 = vld [vmem:[#allocation62_spill] sm:$0xff] }
 0x2f5   : >> { %7912 = vmatpush3.bf16.xpose.msra.mxu1 %v2225_v5  ;;  %7935 = vmatprep.mubr.msk.bf16.mxu0 %vm1859_vm4, %v15506_v16  ;;  %v15510_v5 = vpack.c.bf16 %v10579_v11, %v10572_v12  ;;  %v15514_v11 = vpack.c.bf16 %v10632_v15, %v10628_v61  ;;  %v15521_v61 = vpack.c.bf16 %v10716_v14, %v10710_v38  ;;  %v15537_v16 = vld [vmem:[#allocation61_spill] sm:$0xff] }
 0x2f6   : >> { %8290 = vmatprep.subr.msk.bf16.mxu0 %vm1859_vm4, %v2580_v8  ;;  %v15511_v8 = vpack.c.bf16 %v10587_v56, %v10583_v17  ;;  %v15515_v17 = vpack.c.bf16 %v10644_v7, %v10640_v19  ;;  %v15516_v56 = vpack.c.bf16 %v10654_v37, %v10648_v47  ;;  %v15523_v19 = vpack.c.bf16 %v10726_v1, %v10722_v6  ;;  %v15528_v37 = vld [vmem:[#allocation55_spill] sm:$0xff]  ;;  %v15533_v1 = vld [vmem:[#allocation60_spill] sm:$0xff] }
 0x2f7   : >> { %7966 = vmatpush3.bf16.xpose.msra.mxu0 %v2606_v0  ;;  %v2453_v48 = vpop.permute.xlu1 %2452  ;;  %v11227_v30 = vpop.permute.xlu0 %5058  ;;  %v15512_v0 = vpack.c.bf16 %v10608_v34, %v10604_v49  ;;  %v15517_v49 = vpack.c.bf16 %v10662_v35, %v10658_v18  ;;  %v15518_v34 = vpack.c.bf16 %v10673_v46, %v10669_v28  ;;  %v15526_v7 = vpack.c.bf16 %v15524_v23, %v15525_v27  ;;  %v15527_v28 = vld [vmem:[#allocation56_spill] sm:$0xff]  ;;  %v15530_v18 = vld [vmem:[#allocation58_spill] sm:$0xff]  ;;  %v15531_v35 = vld [vmem:[#allocation57_spill] sm:$0xff] }
 0x2f8   : >> { %15507 = vst [vmem:[#allocation125_spill] sm:$0xff] %v11227_v30  ;;  %8289 = vmatprep.subr.msk.bf16.mxu1 %vm1859_vm4, %v2453_v48  ;;  %v2479_v31 = vsel %vm1859_vm4, %v2453_v48, 0  ;;  %v15529_v14 = vpack.c.bf16 %v15527_v28, %v15528_v37  ;;  %v15532_v57 = vpack.c.bf16 %v15530_v18, %v15531_v35  ;;  %v15535_v38 = vpack.c.bf16 %v15533_v1, %v15534_v62  ;;  %v15558_v27 = vld [vmem:[#allocation77_spill] sm:$0xff]  ;;  %v15561_v28 = vld [vmem:[#allocation79_spill] sm:$0xff]  ;;  %v15562_v37 = vld [vmem:[#allocation78_spill] sm:$0xff] }
 0x2f9   : >> { %v15538_v48 = vpack.c.bf16 %v15536_v20, %v15537_v16  ;;  %v15565_v18 = vld [vmem:[#allocation80_spill] sm:$0xff]  ;;  %v15570_v62 = vld [vmem:[#allocation85_spill] sm:$0xff]  ;;  %v15573_v16 = vld [vmem:[#allocation87_spill] sm:$0xff] }
 0x2fb   : >> { %v11231_v36 = vpop.permute.xlu1 %4934  ;;  %v11233_v54 = vpop.permute.xlu0 %5306 }
 0x2fc   : >> { %15508 = vst [vmem:[#allocation126_spill] sm:$0xff] %v11231_v36  ;;  %15509 = vst [vmem:[#allocation127_spill] sm:$0xff] %v11233_v54  ;;  %7914 = vmatmul.mubr.msk.bf16.vlgmr.msra.gmra.mrb[0].mxu1 %vm1859_vm4, %v15510_v5  ;;  %7936 = vmatmul.mubr.msk.bf16.gmra.mrb[20].mxu0 %vm1859_vm4, %v15511_v8  ;;  %v15539_v5 = vld [vmem:[#allocation66_spill] sm:$0xff]  ;;  %v15540_v8 = vld [vmem:[#allocation64_spill] sm:$0xff] }
 0x2fd   : >> { %7917 = vmatprep.mubr.msk.bf16.mxu1 %vm1859_vm4, %v15512_v0  ;;  %7939 = vmatprep.mubr.msk.bf16.mxu0 %vm1859_vm4, %v15513_v22  ;;  %v15541_v0 = vpack.c.bf16 %v15539_v5, %v15540_v8  ;;  %v15542_v22 = vpack.c.bf16 %v10827_v45, %v10823_v24  ;;  %v15551_v24 = vpack.c.bf16 %v10869_v51, %v10863_v40  ;;  %v15552_v45 = vld [vmem:[#allocation73_spill] sm:$0xff] }
 0x2fe   : >> { %7948 = vmatpush3.bf16.xpose.msra.mxu1 %v2479_v31  ;;  %v15563_v51 = vpack.c.bf16 %v15561_v28, %v15562_v37  ;;  %v15576_v8 = vld [vmem:[#allocation89_spill] sm:$0xff]  ;;  %v15600_v37 = vld [vmem:[#allocation103_spill] sm:$0xff] }
 0x2ff   : >> { %v2834_v44 = vpop.permute.xlu1 %2833  ;;  %v2707_v12 = vpop.permute.xlu0 %2706 }
 0x300   : >> { %8292 = vmatprep.subr.msk.bf16.mxu0 %vm1859_vm4, %v2834_v44  ;;  %8291 = vmatprep.subr.msk.bf16.mxu1 %vm1859_vm4, %v2707_v12  ;;  %v2860_v46 = vsel %vm1859_vm4, %v2834_v44, 0  ;;  %v2733_v6 = vsel %vm1859_vm4, %v2707_v12, 0  ;;  %v15543_v44 = vld [vmem:[#allocation68_spill] sm:$0xff]  ;;  %v15544_v12 = vld [vmem:[#allocation67_spill] sm:$0xff] }
 0x303   : >> { %v11285_v15 = vpop.permute.xlu1 %5182 }
 0x304   : >> { %7918 = vmatmul.mubr.msk.bf16.gmra.mrb[4].mxu1 %vm1859_vm4, %v15514_v11  ;;  %7940 = vmatmul.mubr.msk.bf16.gmra.mrb[24].mxu0 %vm1859_vm4, %v15515_v17  ;;  %15522 = vst [vmem:[#allocation128_spill] sm:$0xff] %v11285_v15  ;;  %v2961_v31 = vpop.permute.xlu0 %2960  ;;  %v15545_v11 = vpack.c.bf16 %v15543_v44, %v15544_v12  ;;  %v15546_v17 = vld [vmem:[#allocation70_spill] sm:$0xff]  ;;  %v15579_v44 = vld [vmem:[#allocation91_spill] sm:$0xff] }
 0x305   : >> { %7921 = vmatprep.mubr.msk.bf16.mxu1 %vm1859_vm4, %v15516_v56  ;;  %7943 = vmatprep.mubr.msk.bf16.mxu0 %vm1859_vm4, %v15517_v49  ;;  %v15547_v56 = vld [vmem:[#allocation69_spill] sm:$0xff]  ;;  %v15580_v12 = vld [vmem:[#allocation90_spill] sm:$0xff] }
 0x306   : >> { %v15548_v49 = vpack.c.bf16 %v15546_v17, %v15547_v56  ;;  %v15582_v17 = vld [vmem:[#allocation93_spill] sm:$0xff]  ;;  %v15583_v56 = vld [vmem:[#allocation92_spill] sm:$0xff] }
 0x307   : >> { %v3088_v47 = vpop.permute.xlu1 %3087 }
 0x308   : >> { %v3114_v40 = vsel %vm1859_vm4, %v3088_v47, 0 }
 0x30c   : >> { %7922 = vmatmul.mubr.msk.bf16.gmra.mrb[8].mxu1 %vm1859_vm4, %v15518_v34  ;;  %7944 = vmatmul.mubr.msk.bf16.gmra.mrb[28].mxu0 %vm1859_vm4, %v15519_v2  ;;  %v15549_v34 = vld [vmem:[#allocation71_spill] sm:$0xff] }
 0x30d   : >> { %7925 = vmatprep.mubr.msk.bf16.mxu1 %vm1859_vm4, %v15520_v10  ;;  %7967 = vmatprep.mubr.msk.bf16.mxu0 %vm1859_vm4, %v15521_v61  ;;  %v15550_v2 = vpack.c.bf16 %v10859_v55, %v15549_v34  ;;  %v15553_v10 = vld [vmem:[#allocation72_spill] sm:$0xff]  ;;  %v15585_v34 = vld [vmem:[#allocation94_spill] sm:$0xff] }
 0x30e   : >> { %v15554_v61 = vpack.c.bf16 %v15552_v45, %v15553_v10  ;;  %v15590_v10 = vld [vmem:[#allocation98_spill] sm:$0xff] }
 0x314   : >> { %7926 = vmatmul.mubr.msk.bf16.gmra.mrb[12].mxu1 %vm1859_vm4, %v15523_v19  ;;  %7968 = vmatmul.mubr.msk.bf16.vlgmr.msra.gmra.mrb[32].mxu0 %vm1859_vm4, %v15526_v7  ;;  %v15556_v19 = vld [vmem:[#allocation74_spill] sm:$0xff]  ;;  %v15559_v7 = vld [vmem:[#allocation76_spill] sm:$0xff] }
 0x315   : >> { %7949 = vmatprep.mubr.msk.bf16.mxu1 %vm1859_vm4, %v15529_v14  ;;  %7971 = vmatprep.mubr.msk.bf16.mxu0 %vm1859_vm4, %v15532_v57  ;;  %v15560_v55 = vpack.c.bf16 %v15558_v27, %v15559_v7  ;;  %v15564_v14 = vld [vmem:[#allocation81_spill] sm:$0xff]  ;;  %v15567_v57 = vld [vmem:[#allocation83_spill] sm:$0xff]  ;;  %v15597_v7 = vld [vmem:[#allocation102_spill] sm:$0xff] }
 0x316   : >> { %8002 = vmatpush3.bf16.xpose.msra.mxu0 %v2860_v46  ;;  %v15555_v46 = vld [vmem:[#allocation75_spill] sm:$0xff]  ;;  %v15566_v35 = vpack.c.bf16 %v15564_v14, %v15565_v18  ;;  %v15603_v14 = vld [vmem:[#allocation104_spill] sm:$0xff]  ;;  %v15605_v18 = vld [vmem:[#allocation109_spill] sm:$0xff] }
 0x317   : >> { %8294 = vmatprep.subr.msk.bf16.mxu0 %vm1859_vm4, %v3088_v47  ;;  %v15557_v23 = vpack.c.bf16 %v15555_v46, %v15556_v19  ;;  %v2987_v47 = vsel %vm1859_vm4, %v2961_v31, 0  ;;  %v15593_v19 = vld [vmem:[#allocation99_spill] sm:$0xff] }
 0x31c   : >> { %7950 = vmatmul.mubr.msk.bf16.vlgmr.msra.gmra.mrb[16].mxu1 %vm1859_vm4, %v15535_v38  ;;  %7972 = vmatmul.mubr.msk.bf16.gmra.mrb[36].mxu0 %vm1859_vm4, %v15538_v48  ;;  %v15571_v38 = vld [vmem:[#allocation84_spill] sm:$0xff]  ;;  %v15574_v48 = vld [vmem:[#allocation86_spill] sm:$0xff] }
 0x31d   : >> { %7953 = vmatprep.mubr.msk.bf16.mxu1 %vm1859_vm4, %v15541_v0  ;;  %7975 = vmatprep.mubr.msk.bf16.mxu0 %vm1859_vm4, %v15542_v22  ;;  %v15572_v20 = vpack.c.bf16 %v15570_v62, %v15571_v38  ;;  %v15575_v5 = vpack.c.bf16 %v15573_v16, %v15574_v48  ;;  %v15577_v0 = vld [vmem:[#allocation88_spill] sm:$0xff]  ;;  %v15612_v62 = vld [vmem:[#allocation111_spill] sm:$0xff]  ;;  %v15613_v38 = vld [vmem:[#allocation110_spill] sm:$0xff]  ;;  %v15615_v16 = vpack.c.bf16 %v11105_v63, %v11102_v26 }
 0x31e   : >> { %7984 = vmatpush3.bf16.xpose.msra.mxu1 %v2733_v6  ;;  %v15568_v6 = vld [vmem:[#allocation82_spill] sm:$0xff]  ;;  %v15578_v22 = vpack.c.bf16 %v15576_v8, %v15577_v0  ;;  %v15616_v48 = vld [vmem:[#allocation113_spill] sm:$0xff]  ;;  %v15623_v0 = vld [vmem:[#allocation116_spill] sm:$0xff] }
 0x31f   : >> { %8293 = vmatprep.subr.msk.bf16.mxu1 %vm1859_vm4, %v2961_v31  ;;  %v15569_v1 = vpack.c.bf16 %v15567_v57, %v15568_v6  ;;  %v15587_v31 = vld [vmem:[#allocation96_spill] sm:$0xff]  ;;  %v15608_v57 = vld [vmem:[#allocation107_spill] sm:$0xff]  ;;  %v15609_v6 = vld [vmem:[#allocation106_spill] sm:$0xff] }
 0x320   : >> { %v15622_v8 = vld [vmem:[#allocation117_spill] sm:$0xff]  ;;  %v15625_v26 = vld [vmem:[#allocation119_spill] sm:$0xff]  ;;  %v15626_v63 = vld [vmem:[#allocation118_spill] sm:$0xff] }
 0x324   : >> { %7954 = vmatmul.mubr.msk.bf16.gmra.mrb[20].mxu1 %vm1859_vm4, %v15545_v11  ;;  %7976 = vmatmul.mubr.msk.bf16.gmra.mrb[40].mxu0 %vm1859_vm4, %v15548_v49  ;;  %v15581_v11 = vpack.c.bf16 %v15579_v44, %v15580_v12  ;;  %v15584_v49 = vpack.c.bf16 %v15582_v17, %v15583_v56  ;;  %v15627_v44 = vpack.c.bf16 %v15625_v26, %v15626_v63  ;;  %v15630_v17 = vld [vmem:[#allocation120_spill] sm:$0xff] }
 0x325   : >> { %7957 = vmatprep.mubr.msk.bf16.mxu1 %vm1859_vm4, %v15550_v2  ;;  %7979 = vmatprep.mubr.msk.bf16.mxu0 %vm1859_vm4, %v15551_v24  ;;  %v15586_v2 = vpack.c.bf16 %v10991_v52, %v15585_v34  ;;  %v15588_v24 = vld [vmem:[#allocation95_spill] sm:$0xff]  ;;  %v15595_v52 = vld [vmem:[#allocation100_spill] sm:$0xff]  ;;  %v15628_v12 = vpack.c.bf16 %v11147_v13, %v11142_v9  ;;  %v15632_v56 = vpack.c.bf16 %v11161_v4, %v11158_v53  ;;  %v15634_v34 = vld [vmem:[#allocation122_spill] sm:$0xff] }
 0x326   : >> { %v15589_v45 = vpack.c.bf16 %v15587_v31, %v15588_v24  ;;  %v15596_v27 = vpack.c.bf16 %v11031_v43, %v15595_v52  ;;  %v15636_v9 = vpack.c.bf16 %v11179_v41, %v11174_v50  ;;  %v15637_v13 = vld [vmem:[#allocation124_spill] sm:$0xff]  ;;  %v15639_v53 = vpack.c.bf16 %v11193_v33, %v11190_v58 }
 0x327   : >> { %v15638_v31 = vpack.c.bf16 %v11185_v29, %v15637_v13  ;;  %v15640_v4 = vpack.c.bf16 %v11203_v59, %v11196_v3 }
 0x32c   : >> { %7958 = vmatmul.mubr.msk.bf16.gmra.mrb[24].mxu1 %vm1859_vm4, %v15554_v61  ;;  %7980 = vmatmul.mubr.msk.bf16.gmra.mrb[44].mxu0 %vm1859_vm4, %v15557_v23  ;;  %v15591_v61 = vld [vmem:[#allocation97_spill] sm:$0xff]  ;;  %v15594_v23 = vpack.c.bf16 %v11021_v21, %v15593_v19 }
 0x32d   : >> { %7961 = vmatprep.mubr.msk.bf16.mxu1 %vm1859_vm4, %v15560_v55  ;;  %8003 = vmatprep.mubr.msk.bf16.mxu0 %vm1859_vm4, %v15563_v51  ;;  %v15592_v46 = vpack.c.bf16 %v15590_v10, %v15591_v61  ;;  %v15598_v55 = vld [vmem:[#allocation101_spill] sm:$0xff]  ;;  %v15601_v51 = vpack.c.bf16 %v11049_v25, %v15600_v37  ;;  %v15611_v25 = vpack.c.bf16 %v11093_v32, %v11090_v60  ;;  %v15619_v60 = vld [vmem:[#allocation115_spill] sm:$0xff]  ;;  %v15620_v32 = vld [vmem:[#allocation114_spill] sm:$0xff] }
 0x32e   : >> { %v15599_v28 = vpack.c.bf16 %v15597_v7, %v15598_v55 }
 0x334   : >> { %7962 = vmatmul.mubr.msk.bf16.gmra.mrb[28].mxu1 %vm1859_vm4, %v15566_v35  ;;  %8004 = vmatmul.mubr.msk.bf16.vlgmr.msra.gmra.mrb[48].mxu0 %vm1859_vm4, %v15569_v1  ;;  %v15606_v35 = vld [vmem:[#allocation108_spill] sm:$0xff]  ;;  %v15610_v1 = vpack.c.bf16 %v15608_v57, %v15609_v6 }
 0x335   : >> { %8038 = vmatpush3.bf16.xpose.msra.mxu0 %v3114_v40  ;;  %7985 = vmatprep.mubr.msk.bf16.mxu1 %vm1859_vm4, %v15572_v20  ;;  %v15602_v40 = vld [vmem:[#allocation105_spill] sm:$0xff]  ;;  %v15607_v43 = vpack.c.bf16 %v15605_v18, %v15606_v35  ;;  %v15614_v20 = vpack.c.bf16 %v15612_v62, %v15613_v38 }
 0x336   : >> { %8007 = vmatprep.mubr.msk.bf16.mxu0 %vm1859_vm4, %v15575_v5  ;;  %8073 = vmatprep.subr.bf16.mxu0 %v11213_v42  ;;  %v15604_v21 = vpack.c.bf16 %v15602_v40, %v15603_v14  ;;  %v15617_v5 = vld [vmem:[#allocation112_spill] sm:$0xff] }
 0x33c   : >> { %7986 = vmatmul.mubr.msk.bf16.vlgmr.msra.gmra.mrb[32].mxu1 %vm1859_vm4, %v15578_v22  ;;  %8008 = vmatmul.mubr.msk.bf16.gmra.mrb[52].mxu0 %vm1859_vm4, %v15581_v11  ;;  %v15624_v22 = vpack.c.bf16 %v15622_v8, %v15623_v0  ;;  %v15629_v11 = vld [vmem:[#allocation121_spill] sm:$0xff] }
 0x33d   : >> { %8020 = vmatpush3.bf16.xpose.msra.mxu1 %v2987_v47  ;;  %7989 = vmatprep.mubr.msk.bf16.mxu1 %vm1859_vm4, %v15584_v49  ;;  %v15618_v47 = vpack.c.bf16 %v15616_v48, %v15617_v5  ;;  %v15633_v49 = vld [vmem:[#allocation123_spill] sm:$0xff] }
 0x33e   : >> { %8011 = vmatprep.mubr.msk.bf16.mxu0 %vm1859_vm4, %v15586_v2  ;;  %8055 = vmatprep.subr.bf16.mxu1 %v11211_v39  ;;  %v15635_v2 = vpack.c.bf16 %v15633_v49, %v15634_v34 }
 0x344   : >> { %7990 = vmatmul.mubr.msk.bf16.gmra.mrb[36].mxu1 %vm1859_vm4, %v15589_v45  ;;  %8012 = vmatmul.mubr.msk.bf16.gmra.mrb[56].mxu0 %vm1859_vm4, %v15592_v46 }
 0x345   : >> { %7993 = vmatprep.mubr.msk.bf16.mxu1 %vm1859_vm4, %v15594_v23  ;;  %8015 = vmatprep.mubr.msk.bf16.mxu0 %vm1859_vm4, %v15596_v27 }
 0x34c   : >> { %7994 = vmatmul.mubr.msk.bf16.gmra.mrb[40].mxu1 %vm1859_vm4, %v15599_v28  ;;  %8016 = vmatmul.mubr.msk.bf16.gmra.mrb[60].mxu0 %vm1859_vm4, %v15601_v51 }
 0x34d   : >> { %7997 = vmatprep.mubr.msk.bf16.mxu1 %vm1859_vm4, %v15604_v21  ;;  %8039 = vmatprep.mubr.msk.bf16.mxu0 %vm1859_vm4, %v15607_v43 }
 0x354   : >> { %7998 = vmatmul.mubr.msk.bf16.gmra.mrb[44].mxu1 %vm1859_vm4, %v15610_v1  ;;  %8040 = vmatmul.mubr.msk.bf16.vlgmr.msra.gmra.mrb[64].mxu0 %vm1859_vm4, %v15611_v25 }
 0x355   : >> { %8074 = vmatpush3.bf16.msra.mxu0 %v11213_v42  ;;  %8021 = vmatprep.mubr.msk.bf16.mxu1 %vm1859_vm4, %v15614_v20  ;;  %v15621_v42 = vpack.c.bf16 %v15619_v60, %v15620_v32 }
 0x356   : >> { %8043 = vmatprep.mubr.msk.bf16.mxu0 %vm1859_vm4, %v15615_v16  ;;  %8109 = vmatprep.subr.bf16.mxu0 %v11227_v30 }
 0x35c   : >> { %8022 = vmatmul.mubr.msk.bf16.vlgmr.msra.gmra.mrb[48].mxu1 %vm1859_vm4, %v15618_v47  ;;  %8044 = vmatmul.mubr.msk.bf16.gmra.mrb[68].mxu0 %vm1859_vm4, %v15621_v42 }
 0x35d   : >> { %8056 = vmatpush3.bf16.msra.mxu1 %v11211_v39  ;;  %8025 = vmatprep.mubr.msk.bf16.mxu1 %vm1859_vm4, %v15624_v22  ;;  %v15631_v39 = vpack.c.bf16 %v15629_v11, %v15630_v17 }
 0x35e   : >> { %8047 = vmatprep.mubr.msk.bf16.mxu0 %vm1859_vm4, %v15627_v44  ;;  %8091 = vmatprep.subr.bf16.mxu1 %v11231_v36 }
 0x364   : >> { %8026 = vmatmul.mubr.msk.bf16.gmra.mrb[52].mxu1 %vm1859_vm4, %v15628_v12  ;;  %8048 = vmatmul.mubr.msk.bf16.gmra.mrb[72].mxu0 %vm1859_vm4, %v15631_v39 }
 0x365   : >> { %8029 = vmatprep.mubr.msk.bf16.mxu1 %vm1859_vm4, %v15632_v56  ;;  %8051 = vmatprep.mubr.msk.bf16.mxu0 %vm1859_vm4, %v15635_v2 }
 0x36c   : >> { %8030 = vmatmul.mubr.msk.bf16.gmra.mrb[56].mxu1 %vm1859_vm4, %v15636_v9  ;;  %8052 = vmatmul.mubr.msk.bf16.gmra.mrb[76].mxu0 %vm1859_vm4, %v15638_v31 }
 0x36d   : >> { %8033 = vmatprep.mubr.msk.bf16.mxu1 %vm1859_vm4, %v15639_v53 }
 0x374   : >> { %8034 = vmatmul.mubr.msk.bf16.gmra.mrb[60].mxu1 %vm1859_vm4, %v15640_v4 }
 0x3c7   : >> { %v11491_v24 = vpop.f32.mrb[16].mxu0 }
 0x3c8   : >> { %v11493_v50 = vpop.f32.mrb[17].mxu0  ;;  %v3268_v29 = vsel %vm3213_vm5, %v11491_v24, -inf }
 0x3c9   : >> { %3269 = vmax.xlane.f32.xlu1 %v3268_v29  ;;  %v11497_v41 = vpop.f32.mrb[18].mxu0  ;;  %v3262_v58 = vsel %vm3213_vm5, %v11493_v50, -inf }
 0x3ca   : >> { %v11499_v45 = vpop.f32.mrb[19].mxu0  ;;  %v3271_v14 = vsel %vm3213_vm5, %v11497_v41, -inf }
 0x3cb   : >> { %v3265_v16 = vsel %vm3213_vm5, %v11499_v45, -inf }
 0x3cd   : >> { %3263 = vmax.xlane.f32.xlu1 %v3262_v58 }
 0x3cf   : >> { %v11503_v33 = vpop.f32.mrb[0].mxu1  ;;  %v11505_v3 = vpop.f32.mrb[20].mxu0 }
 0x3d0   : >> { %v11507_v59 = vpop.f32.mrb[1].mxu1  ;;  %v11509_v10 = vpop.f32.mrb[21].mxu0  ;;  %v3220_v61 = vsel %vm3213_vm5, %v11503_v33, -inf  ;;  %v3280_v37 = vsel %vm3213_vm5, %v11505_v3, -inf }
 0x3d1   : >> { %v11513_v46 = vpop.f32.mrb[2].mxu1  ;;  %v11515_v19 = vpop.f32.mrb[22].mxu0  ;;  %3221 = vmax.xlane.f32.xlu0 %v3220_v61  ;;  %v3214_v7 = vsel %vm3213_vm5, %v11507_v59, -inf  ;;  %v3274_v62 = vsel %vm3213_vm5, %v11509_v10, -inf }
 0x3d2   : >> { %v11517_v23 = vpop.f32.mrb[3].mxu1  ;;  %v11519_v52 = vpop.f32.mrb[23].mxu0  ;;  %v3223_v6 = vsel %vm3213_vm5, %v11513_v46, -inf  ;;  %v3283_v42 = vsel %vm3213_vm5, %v11515_v19, -inf }
 0x3d3   : >> { %15641 = vst [vmem:[#allocation54_spill] sm:$0xff] %v11519_v52  ;;  %v3217_v27 = vsel %vm3213_vm5, %v11517_v23, -inf  ;;  %v3277_v49 = vsel %vm3213_vm5, %v11519_v52, -inf }
 0x3d4   : >> { %3218 = vmax.xlane.f32.xlu1 %v3217_v27 }
 0x3d5   : >> { %3215 = vmax.xlane.f32.xlu0 %v3214_v7 }
 0x3d7   : >> { %v11525_v55 = vpop.f32.mrb[4].mxu1  ;;  %v11527_v28 = vpop.f32.mrb[24].mxu0 }
 0x3d8   : >> { %15642 = vst [vmem:[#allocation53_spill] sm:$0xff] %v11527_v28  ;;  %v11531_v51 = vpop.f32.mrb[5].mxu1  ;;  %3281 = vmax.xlane.f32.xlu1 %v3280_v37  ;;  %v11533_v40 = vpop.f32.mrb[25].mxu0  ;;  %v3232_v57 = vsel %vm3213_vm5, %v11525_v55, -inf  ;;  %v3292_v22 = vsel %vm3213_vm5, %v11527_v28, -inf }
 0x3d9   : >> { %15643 = vst [vmem:[#allocation56_spill] sm:$0xff] %v11533_v40  ;;  %v11537_v21 = vpop.f32.mrb[6].mxu1  ;;  %v11539_v18 = vpop.f32.mrb[26].mxu0  ;;  %3272 = vmax.xlane.f32.xlu0 %v3271_v14  ;;  %v3226_v32 = vsel %vm3213_vm5, %v11531_v51, -inf  ;;  %v3286_v9 = vsel %vm3213_vm5, %v11533_v40, -inf }
 0x3da   : >> { %15644 = vst [vmem:[#allocation55_spill] sm:$0xff] %v11537_v21  ;;  %15645 = vst [vmem:[#allocation58_spill] sm:$0xff] %v11539_v18  ;;  %v11541_v35 = vpop.f32.mrb[7].mxu1  ;;  %v11543_v43 = vpop.f32.mrb[27].mxu0  ;;  %v3235_v44 = vsel %vm3213_vm5, %v11537_v21, -inf  ;;  %v3295_v7 = vsel %vm3213_vm5, %v11539_v18, -inf }
 0x3db   : >> { %15646 = vst [vmem:[#allocation57_spill] sm:$0xff] %v11541_v35  ;;  %15647 = vst [vmem:[#allocation60_spill] sm:$0xff] %v11543_v43  ;;  %v3229_v53 = vsel %vm3213_vm5, %v11541_v35, -inf }
 0x3dc   : >> { %3233 = vmax.xlane.f32.xlu1 %v3232_v57 }
 0x3dd   : >> { %3224 = vmax.xlane.f32.xlu0 %v3223_v6 }
 0x3df   : >> { %v11549_v1 = vpop.f32.mrb[8].mxu1  ;;  %v11551_v25 = vpop.f32.mrb[28].mxu0 }
 0x3e0   : >> { %15648 = vst [vmem:[#allocation59_spill] sm:$0xff] %v11549_v1  ;;  %15649 = vst [vmem:[#allocation62_spill] sm:$0xff] %v11551_v25  ;;  %v11555_v38 = vpop.f32.mrb[9].mxu1  ;;  %3275 = vmax.xlane.f32.xlu1 %v3274_v62  ;;  %v11557_v20 = vpop.f32.mrb[29].mxu0  ;;  %v3244_v56 = vsel %vm3213_vm5, %v11549_v1, -inf  ;;  %v3304_v57 = vsel %vm3213_vm5, %v11551_v25, -inf }
 0x3e1   : >> { %15650 = vst [vmem:[#allocation61_spill] sm:$0xff] %v11555_v38  ;;  %15651 = vst [vmem:[#allocation66_spill] sm:$0xff] %v11557_v20  ;;  %v11561_v48 = vpop.f32.mrb[10].mxu1  ;;  %v11563_v5 = vpop.f32.mrb[30].mxu0  ;;  %3266 = vmax.xlane.f32.xlu0 %v3265_v16  ;;  %v3238_v27 = vsel %vm3213_vm5, %v11555_v38, -inf }
 0x3e2   : >> { %15652 = vst [vmem:[#allocation64_spill] sm:$0xff] %v11561_v48  ;;  %15653 = vst [vmem:[#allocation68_spill] sm:$0xff] %v11563_v5  ;;  %v11565_v47 = vpop.f32.mrb[11].mxu1  ;;  %v11567_v60 = vpop.f32.mrb[31].mxu0  ;;  %v3247_v16 = vsel %vm3213_vm5, %v11561_v48, -inf }
 0x3e3   : >> { %15654 = vst [vmem:[#allocation67_spill] sm:$0xff] %v11565_v47  ;;  %15655 = vst [vmem:[#allocation70_spill] sm:$0xff] %v11567_v60 }
 0x3e4   : >> { %3227 = vmax.xlane.f32.xlu1 %v3226_v32 }
 0x3e5   : >> { %3284 = vmax.xlane.f32.xlu0 %v3283_v42 }
 0x3e7   : >> { %v11573_v8 = vpop.f32.mrb[12].mxu1  ;;  %v11575_v0 = vpop.f32.mrb[32].mxu0 }
 0x3e8   : >> { %15656 = vst [vmem:[#allocation69_spill] sm:$0xff] %v11573_v8  ;;  %15657 = vst [vmem:[#allocation71_spill] sm:$0xff] %v11575_v0  ;;  %v11579_v26 = vpop.f32.mrb[13].mxu1  ;;  %3293 = vmax.xlane.f32.xlu1 %v3292_v22  ;;  %v11581_v63 = vpop.f32.mrb[33].mxu0 }
 0x3e9   : >> { %15658 = vst [vmem:[#allocation73_spill] sm:$0xff] %v11579_v26  ;;  %15659 = vst [vmem:[#allocation72_spill] sm:$0xff] %v11581_v63  ;;  %v11585_v12 = vpop.f32.mrb[14].mxu1  ;;  %v11587_v11 = vpop.f32.mrb[34].mxu0  ;;  %3236 = vmax.xlane.f32.xlu0 %v3235_v44  ;;  %v3250_v54 = vsel %vm3213_vm5, %v11579_v26, -inf  ;;  %v3358_v25 = vsel %vm3213_vm5, %v11581_v63, -inf }
 0x3ea   : >> { %15660 = vst [vmem:[#allocation75_spill] sm:$0xff] %v11585_v12  ;;  %15661 = vst [vmem:[#allocation74_spill] sm:$0xff] %v11587_v11  ;;  %v11589_v17 = vpop.f32.mrb[15].mxu1  ;;  %v11591_v39 = vpop.f32.mrb[35].mxu0  ;;  %v3259_v26 = vsel %vm3213_vm5, %v11585_v12, -inf }
 0x3eb   : >> { %15662 = vst [vmem:[#allocation77_spill] sm:$0xff] %v11589_v17  ;;  %15663 = vst [vmem:[#allocation76_spill] sm:$0xff] %v11591_v39 }
 0x3ec   : >> { %3245 = vmax.xlane.f32.xlu1 %v3244_v56  ;;  %v3256_v56 = vsel %vm3213_vm5, %v11573_v8, -inf }
 0x3ed   : >> { %3278 = vmax.xlane.f32.xlu0 %v3277_v49  ;;  %v3289_v49 = vsel %vm3213_vm5, %v11543_v43, -inf }
 0x3ef   : >> { %v11597_v34 = vpop.f32.mrb[16].mxu1  ;;  %v11599_v2 = vpop.f32.mrb[36].mxu0 }
 0x3f0   : >> { %15664 = vst [vmem:[#allocation79_spill] sm:$0xff] %v11597_v34  ;;  %15665 = vst [vmem:[#allocation78_spill] sm:$0xff] %v11599_v2  ;;  %v11603_v13 = vpop.f32.mrb[17].mxu1  ;;  %3287 = vmax.xlane.f32.xlu1 %v3286_v9  ;;  %v11605_v31 = vpop.f32.mrb[37].mxu0  ;;  %v3376_v40 = vsel %vm3213_vm5, %v11599_v2, -inf }
 0x3f1   : >> { %15666 = vst [vmem:[#allocation81_spill] sm:$0xff] %v11603_v13  ;;  %15667 = vst [vmem:[#allocation80_spill] sm:$0xff] %v11605_v31  ;;  %v11609_v4 = vpop.f32.mrb[18].mxu1  ;;  %v11611_v29 = vpop.f32.mrb[38].mxu0  ;;  %3230 = vmax.xlane.f32.xlu0 %v3229_v53  ;;  %v3310_v63 = vsel %vm3213_vm5, %v11603_v13, -inf  ;;  %v3370_v28 = vsel %vm3213_vm5, %v11605_v31, -inf }
 0x3f2   : >> { %15668 = vst [vmem:[#allocation83_spill] sm:$0xff] %v11609_v4  ;;  %15669 = vst [vmem:[#allocation82_spill] sm:$0xff] %v11611_v29  ;;  %v11613_v58 = vpop.f32.mrb[19].mxu1  ;;  %v11615_v61 = vpop.f32.mrb[39].mxu0  ;;  %v3319_v13 = vsel %vm3213_vm5, %v11609_v4, -inf }
 0x3f3   : >> { %15670 = vst [vmem:[#allocation85_spill] sm:$0xff] %v11613_v58  ;;  %15671 = vst [vmem:[#allocation84_spill] sm:$0xff] %v11615_v61 }
 0x3f4   : >> { %3239 = vmax.xlane.f32.xlu1 %v3238_v27  ;;  %v3298_v27 = vsel %vm3213_vm5, %v11557_v20, -inf  ;;  %v3364_v20 = vsel %vm3213_vm5, %v11575_v0, -inf  ;;  %v3316_v0 = vsel %vm3213_vm5, %v11597_v34, -inf  ;;  %v3253_v34 = vsel %vm3213_vm5, %v11589_v17, -inf }
 0x3f5   : >> { %3296 = vmax.xlane.f32.xlu0 %v3295_v7 }
 0x3f7   : >> { %v11621_v37 = vpop.f32.mrb[20].mxu1  ;;  %v11623_v14 = vpop.f32.mrb[40].mxu0 }
 0x3f8   : >> { %15672 = vst [vmem:[#allocation87_spill] sm:$0xff] %v11621_v37  ;;  %15673 = vst [vmem:[#allocation86_spill] sm:$0xff] %v11623_v14  ;;  %v11627_v6 = vpop.f32.mrb[21].mxu1  ;;  %3305 = vmax.xlane.f32.xlu1 %v3304_v57  ;;  %v11629_v62 = vpop.f32.mrb[41].mxu0  ;;  %v3328_v2 = vsel %vm3213_vm5, %v11621_v37, -inf  ;;  %v3313_v37 = vsel %vm3213_vm5, %v11613_v58, -inf }
 0x3f9   : >> { %15674 = vst [vmem:[#allocation89_spill] sm:$0xff] %v11627_v6  ;;  %15675 = vst [vmem:[#allocation88_spill] sm:$0xff] %v11629_v62  ;;  %v11633_v32 = vpop.f32.mrb[22].mxu1  ;;  %v11635_v42 = vpop.f32.mrb[42].mxu0  ;;  %3248 = vmax.xlane.f32.xlu0 %v3247_v16  ;;  %v3241_v16 = vsel %vm3213_vm5, %v11565_v47, -inf  ;;  %v3322_v31 = vsel %vm3213_vm5, %v11627_v6, -inf }
 0x3fa   : >> { %15676 = vst [vmem:[#allocation91_spill] sm:$0xff] %v11633_v32  ;;  %15677 = vst [vmem:[#allocation90_spill] sm:$0xff] %v11635_v42  ;;  %v11637_v22 = vpop.f32.mrb[23].mxu1  ;;  %v11639_v44 = vpop.f32.mrb[43].mxu0  ;;  %v3331_v6 = vsel %vm3213_vm5, %v11633_v32, -inf }
 0x3fb   : >> { %15678 = vst [vmem:[#allocation93_spill] sm:$0xff] %v11637_v22  ;;  %15679 = vst [vmem:[#allocation92_spill] sm:$0xff] %v11639_v44 }
 0x3fc   : >> { %3257 = vmax.xlane.f32.xlu1 %v3256_v56 }
 0x3fd   : >> { %3290 = vmax.xlane.f32.xlu0 %v3289_v49 }
 0x3ff   : >> { %v11645_v9 = vpop.f32.mrb[24].mxu1  ;;  %v11647_v53 = vpop.f32.mrb[44].mxu0 }
 0x400   : >> { %15680 = vst [vmem:[#allocation94_spill] sm:$0xff] %v11645_v9  ;;  %15681 = vst [vmem:[#allocation96_spill] sm:$0xff] %v11647_v53  ;;  %v11651_v7 = vpop.f32.mrb[25].mxu1  ;;  %3299 = vmax.xlane.f32.xlu1 %v3298_v27  ;;  %v11653_v57 = vpop.f32.mrb[45].mxu0  ;;  %v3307_v27 = vsel %vm3213_vm5, %v11563_v5, -inf }
 0x401   : >> { %15682 = vst [vmem:[#allocation95_spill] sm:$0xff] %v11651_v7  ;;  %15683 = vst [vmem:[#allocation98_spill] sm:$0xff] %v11653_v57  ;;  %v11657_v56 = vpop.f32.mrb[26].mxu1  ;;  %v11659_v15 = vpop.f32.mrb[46].mxu0  ;;  %3242 = vmax.xlane.f32.xlu0 %v3241_v16 }
 0x402   : >> { %15684 = vst [vmem:[#allocation97_spill] sm:$0xff] %v11657_v56  ;;  %v11661_v49 = vpop.f32.mrb[27].mxu1  ;;  %v11663_v36 = vpop.f32.mrb[47].mxu0 }
 0x403   : >> { %15685 = vst [vmem:[#allocation99_spill] sm:$0xff] %v11661_v49  ;;  %15686 = vst [vmem:[#allocation100_spill] sm:$0xff] %v11663_v36 }
 0x404   : >> { %3251 = vmax.xlane.f32.xlu1 %v3250_v54 }
 0x405   : >> { %3308 = vmax.xlane.f32.xlu0 %v3307_v27 }
 0x407   : >> { %v11669_v30 = vpop.f32.mrb[28].mxu1  ;;  %v11671_v47 = vpop.f32.mrb[48].mxu0 }
 0x408   : >> { %15687 = vst [vmem:[#allocation102_spill] sm:$0xff] %v11669_v30  ;;  %v11675_v16 = vpop.f32.mrb[29].mxu1  ;;  %3365 = vmax.xlane.f32.xlu1 %v3364_v20  ;;  %v11677_v43 = vpop.f32.mrb[49].mxu0  ;;  %v3301_v20 = vsel %vm3213_vm5, %v11567_v60, -inf }
 0x409   : >> { %15688 = vst [vmem:[#allocation101_spill] sm:$0xff] %v11675_v16  ;;  %15689 = vst [vmem:[#allocation103_spill] sm:$0xff] %v11677_v43  ;;  %v11681_v54 = vpop.f32.mrb[30].mxu1  ;;  %v11683_v8 = vpop.f32.mrb[50].mxu0  ;;  %3260 = vmax.xlane.f32.xlu0 %v3259_v26 }
 0x40a   : >> { %15690 = vst [vmem:[#allocation105_spill] sm:$0xff] %v11681_v54  ;;  %15691 = vst [vmem:[#allocation104_spill] sm:$0xff] %v11683_v8  ;;  %v11685_v27 = vpop.f32.mrb[31].mxu1  ;;  %v11687_v5 = vpop.f32.mrb[51].mxu0 }
 0x40b   : >> { %15692 = vst [vmem:[#allocation109_spill] sm:$0xff] %v11685_v27  ;;  %15693 = vst [vmem:[#allocation108_spill] sm:$0xff] %v11687_v5 }
 0x40c   : >> { %3317 = vmax.xlane.f32.xlu1 %v3316_v0 }
 0x40d   : >> { %3302 = vmax.xlane.f32.xlu0 %v3301_v20 }
 0x40f   : >> { %v11693_v48 = vpop.f32.mrb[32].mxu1  ;;  %v11695_v12 = vpop.f32.mrb[52].mxu0 }
 0x410   : >> { %15694 = vst [vmem:[#allocation107_spill] sm:$0xff] %v11693_v48  ;;  %15695 = vst [vmem:[#allocation106_spill] sm:$0xff] %v11695_v12  ;;  %v11699_v26 = vpop.f32.mrb[33].mxu1  ;;  %3359 = vmax.xlane.f32.xlu1 %v3358_v25  ;;  %v11701_v18 = vpop.f32.mrb[53].mxu0  ;;  %v3367_v25 = vsel %vm3213_vm5, %v11587_v11, -inf }
 0x411   : >> { %15696 = vst [vmem:[#allocation111_spill] sm:$0xff] %v11699_v26  ;;  %15697 = vst [vmem:[#allocation110_spill] sm:$0xff] %v11701_v18  ;;  %v11705_v0 = vpop.f32.mrb[34].mxu1  ;;  %v11707_v38 = vpop.f32.mrb[54].mxu0  ;;  %3254 = vmax.xlane.f32.xlu0 %v3253_v34 }
 0x412   : >> { %15698 = vst [vmem:[#allocation113_spill] sm:$0xff] %v11705_v0  ;;  %15699 = vst [vmem:[#allocation112_spill] sm:$0xff] %v11707_v38  ;;  %v11709_v20 = vpop.f32.mrb[35].mxu1  ;;  %v11711_v60 = vpop.f32.mrb[55].mxu0 }
 0x413   : >> { %15700 = vst [vmem:[#allocation115_spill] sm:$0xff] %v11709_v20  ;;  %15701 = vst [vmem:[#allocation114_spill] sm:$0xff] %v11711_v60 }
 0x414   : >> { %3311 = vmax.xlane.f32.xlu1 %v3310_v63 }
 0x415   : >> { %3368 = vmax.xlane.f32.xlu0 %v3367_v25 }
 0x417   : >> { %v11717_v35 = vpop.f32.mrb[36].mxu1  ;;  %v11719_v17 = vpop.f32.mrb[56].mxu0 }
 0x418   : >> { %15702 = vst [vmem:[#allocation117_spill] sm:$0xff] %v11717_v35  ;;  %15703 = vst [vmem:[#allocation116_spill] sm:$0xff] %v11719_v17  ;;  %v11723_v34 = vpop.f32.mrb[37].mxu1  ;;  %3377 = vmax.xlane.f32.xlu1 %v3376_v40  ;;  %v11725_v52 = vpop.f32.mrb[57].mxu0  ;;  %v3361_v40 = vsel %vm3213_vm5, %v11591_v39, -inf }
 0x419   : >> { %15704 = vst [vmem:[#allocation119_spill] sm:$0xff] %v11723_v34  ;;  %15705 = vst [vmem:[#allocation118_spill] sm:$0xff] %v11725_v52  ;;  %v11729_v63 = vpop.f32.mrb[38].mxu1  ;;  %v11731_v1 = vpop.f32.mrb[58].mxu0  ;;  %3320 = vmax.xlane.f32.xlu0 %v3319_v13 }
 0x41a   : >> { %15706 = vst [vmem:[#allocation121_spill] sm:$0xff] %v11729_v63  ;;  %15707 = vst [vmem:[#allocation120_spill] sm:$0xff] %v11731_v1  ;;  %v11733_v25 = vpop.f32.mrb[39].mxu1  ;;  %v11735_v11 = vpop.f32.mrb[59].mxu0 }
 0x41b   : >> { %15708 = vst [vmem:[#allocation123_spill] sm:$0xff] %v11733_v25  ;;  %15709 = vst [vmem:[#allocation122_spill] sm:$0xff] %v11735_v11 }
 0x41c   : >> { %3329 = vmax.xlane.f32.xlu1 %v3328_v2 }
 0x41d   : >> { %3362 = vmax.xlane.f32.xlu0 %v3361_v40 }
 0x41f   : >> { %v11741_v21 = vpop.f32.mrb[40].mxu1  ;;  %v11743_v4 = vpop.f32.mrb[60].mxu0 }
 0x420   : >> { %15710 = vst [vmem:[#allocation124_spill] sm:$0xff] %v11741_v21  ;;  %15711 = vst [vmem:[#allocation129_spill] sm:$0xff] %v11743_v4  ;;  %v11747_v13 = vpop.f32.mrb[41].mxu1  ;;  %3371 = vmax.xlane.f32.xlu1 %v3370_v28  ;;  %v11749_v1 = vpop.f32.mrb[61].mxu0  ;;  %v3379_v28 = vsel %vm3213_vm5, %v11611_v29, -inf }
 0x421   : >> { %15712 = vst [vmem:[#allocation130_spill] sm:$0xff] %v11747_v13  ;;  %15713 = vst [vmem:[#allocation131_spill] sm:$0xff] %v11749_v1  ;;  %v11753_v2 = vpop.f32.mrb[42].mxu1  ;;  %v11755_v11 = vpop.f32.mrb[62].mxu0  ;;  %3314 = vmax.xlane.f32.xlu0 %v3313_v37 }
 0x422   : >> { %15714 = vst [vmem:[#allocation132_spill] sm:$0xff] %v11753_v2  ;;  %15715 = vst [vmem:[#allocation133_spill] sm:$0xff] %v11755_v11  ;;  %v11757_v40 = vpop.f32.mrb[43].mxu1  ;;  %v11759_v39 = vpop.f32.mrb[63].mxu0  ;;  %v3388_v11 = vsel %vm3213_vm5, %v11623_v14, -inf  ;;  %v3340_v14 = vsel %vm3213_vm5, %v11645_v9, -inf }
 0x423   : >> { %15716 = vst [vmem:[#allocation134_spill] sm:$0xff] %v11757_v40  ;;  %15717 = vst [vmem:[#allocation135_spill] sm:$0xff] %v11759_v39  ;;  %v3325_v9 = vsel %vm3213_vm5, %v11637_v22, -inf }
 0x424   : >> { %3323 = vmax.xlane.f32.xlu1 %v3322_v31 }
 0x425   : >> { %3380 = vmax.xlane.f32.xlu0 %v3379_v28 }
 0x427   : >> { %v11765_v1 = vpop.f32.mrb[44].mxu1  ;;  %v11767_v58 = vpop.f32.mrb[64].mxu0 }
 0x428   : >> { %15718 = vst [vmem:[#allocation136_spill] sm:$0xff] %v11765_v1  ;;  %15719 = vst [vmem:[#allocation137_spill] sm:$0xff] %v11767_v58  ;;  %v11771_v37 = vpop.f32.mrb[45].mxu1  ;;  %3389 = vmax.xlane.f32.xlu1 %v3388_v11  ;;  %v11773_v40 = vpop.f32.mrb[65].mxu0  ;;  %v3373_v11 = vsel %vm3213_vm5, %v11615_v61, -inf }
 0x429   : >> { %15720 = vst [vmem:[#allocation138_spill] sm:$0xff] %v11771_v37  ;;  %15721 = vst [vmem:[#allocation139_spill] sm:$0xff] %v11773_v40  ;;  %v11777_v31 = vpop.f32.mrb[46].mxu1  ;;  %v11779_v39 = vpop.f32.mrb[66].mxu0  ;;  %3332 = vmax.xlane.f32.xlu0 %v3331_v6 }
 0x42a   : >> { %15722 = vst [vmem:[#allocation140_spill] sm:$0xff] %v11777_v31  ;;  %15723 = vst [vmem:[#allocation141_spill] sm:$0xff] %v11779_v39  ;;  %v11781_v28 = vpop.f32.mrb[47].mxu1  ;;  %v11783_v29 = vpop.f32.mrb[67].mxu0  ;;  %v3382_v39 = vsel %vm3213_vm5, %v11629_v62, -inf  ;;  %v3334_v62 = vsel %vm3213_vm5, %v11651_v7, -inf }
 0x42b   : >> { %15724 = vst [vmem:[#allocation142_spill] sm:$0xff] %v11781_v28  ;;  %15725 = vst [vmem:[#allocation143_spill] sm:$0xff] %v11783_v29  ;;  %v3343_v7 = vsel %vm3213_vm5, %v11657_v56, -inf }
 0x42c   : >> { %3341 = vmax.xlane.f32.xlu1 %v3340_v14 }
 0x42d   : >> { %3374 = vmax.xlane.f32.xlu0 %v3373_v11 }
 0x42f   : >> { %v11789_v40 = vpop.f32.mrb[48].mxu1  ;;  %v11791_v32 = vpop.f32.mrb[68].mxu0 }
 0x430   : >> { %15726 = vst [vmem:[#allocation144_spill] sm:$0xff] %v11789_v40  ;;  %15727 = vst [vmem:[#allocation145_spill] sm:$0xff] %v11791_v32  ;;  %3383 = vmax.xlane.f32.xlu1 %v3382_v39  ;;  %v11795_v6 = vpop.f32.mrb[49].mxu1  ;;  %v11797_v28 = vpop.f32.mrb[69].mxu0  ;;  %v3391_v39 = vsel %vm3213_vm5, %v11635_v42, -inf }
 0x431   : >> { %15728 = vst [vmem:[#allocation146_spill] sm:$0xff] %v11795_v6  ;;  %15729 = vst [vmem:[#allocation147_spill] sm:$0xff] %v11797_v28  ;;  %v11801_v14 = vpop.f32.mrb[70].mxu0  ;;  %3326 = vmax.xlane.f32.xlu0 %v3325_v9  ;;  %v11803_v61 = vpop.f32.mrb[50].mxu1  ;;  %v3400_v9 = vsel %vm3213_vm5, %v11647_v53, -inf  ;;  %v3352_v53 = vsel %vm3213_vm5, %v11669_v30, -inf }
 0x432   : >> { %15730 = vst [vmem:[#allocation148_spill] sm:$0xff] %v11801_v14  ;;  %15731 = vst [vmem:[#allocation149_spill] sm:$0xff] %v11803_v61  ;;  %v11805_v11 = vpop.f32.mrb[51].mxu1  ;;  %v11807_v29 = vpop.f32.mrb[71].mxu0  ;;  %v3337_v30 = vsel %vm3213_vm5, %v11661_v49, -inf  ;;  %v3460_v49 = vsel %vm3213_vm5, %v11671_v47, -inf }
 0x433   : >> { %15732 = vst [vmem:[#allocation150_spill] sm:$0xff] %v11805_v11  ;;  %15733 = vst [vmem:[#allocation151_spill] sm:$0xff] %v11807_v29 }
 0x434   : >> { %3335 = vmax.xlane.f32.xlu1 %v3334_v62 }
 0x435   : >> { %3392 = vmax.xlane.f32.xlu0 %v3391_v39 }
 0x437   : >> { %v11813_v28 = vpop.f32.mrb[52].mxu1  ;;  %v11815_v22 = vpop.f32.mrb[72].mxu0 }
 0x438   : >> { %15734 = vst [vmem:[#allocation152_spill] sm:$0xff] %v11813_v28  ;;  %15735 = vst [vmem:[#allocation153_spill] sm:$0xff] %v11815_v22  ;;  %3401 = vmax.xlane.f32.xlu1 %v3400_v9  ;;  %v11819_v14 = vpop.f32.mrb[53].mxu1  ;;  %v11821_v11 = vpop.f32.mrb[73].mxu0  ;;  %v3385_v9 = vsel %vm3213_vm5, %v11639_v44, -inf }
 0x439   : >> { %15736 = vst [vmem:[#allocation154_spill] sm:$0xff] %v11819_v14  ;;  %15737 = vst [vmem:[#allocation155_spill] sm:$0xff] %v11821_v11  ;;  %v11825_v62 = vpop.f32.mrb[74].mxu0  ;;  %3344 = vmax.xlane.f32.xlu0 %v3343_v7  ;;  %v11827_v42 = vpop.f32.mrb[54].mxu1  ;;  %v3394_v7 = vsel %vm3213_vm5, %v11653_v57, -inf  ;;  %v3346_v57 = vsel %vm3213_vm5, %v11675_v16, -inf }
 0x43a   : >> { %15738 = vst [vmem:[#allocation156_spill] sm:$0xff] %v11825_v62  ;;  %15739 = vst [vmem:[#allocation157_spill] sm:$0xff] %v11827_v42  ;;  %v11829_v39 = vpop.f32.mrb[55].mxu1  ;;  %v11831_v29 = vpop.f32.mrb[75].mxu0 }
 0x43b   : >> { %15740 = vst [vmem:[#allocation158_spill] sm:$0xff] %v11829_v39  ;;  %15741 = vst [vmem:[#allocation159_spill] sm:$0xff] %v11831_v29 }
 0x43c   : >> { %3353 = vmax.xlane.f32.xlu1 %v3352_v53 }
 0x43d   : >> { %3386 = vmax.xlane.f32.xlu0 %v3385_v9 }
 0x43f   : >> { %v11837_v11 = vpop.f32.mrb[56].mxu1  ;;  %v11839_v56 = vpop.f32.mrb[76].mxu0 }
 0x440   : >> { %15742 = vst [vmem:[#allocation160_spill] sm:$0xff] %v11837_v11  ;;  %15743 = vst [vmem:[#allocation161_spill] sm:$0xff] %v11839_v56  ;;  %3395 = vmax.xlane.f32.xlu1 %v3394_v7  ;;  %v11843_v62 = vpop.f32.mrb[57].mxu1  ;;  %v11845_v39 = vpop.f32.mrb[77].mxu0  ;;  %v3403_v7 = vsel %vm3213_vm5, %v11659_v15, -inf }
 0x441   : >> { %15744 = vst [vmem:[#allocation162_spill] sm:$0xff] %v11843_v62  ;;  %15745 = vst [vmem:[#allocation163_spill] sm:$0xff] %v11845_v39  ;;  %v11849_v53 = vpop.f32.mrb[78].mxu0  ;;  %3338 = vmax.xlane.f32.xlu0 %v3337_v30  ;;  %v11851_v44 = vpop.f32.mrb[58].mxu1 }
 0x442   : >> { %15746 = vst [vmem:[#allocation164_spill] sm:$0xff] %v11849_v53  ;;  %15747 = vst [vmem:[#allocation165_spill] sm:$0xff] %v11851_v44  ;;  %v11853_v9 = vpop.f32.mrb[59].mxu1  ;;  %v11855_v29 = vpop.f32.mrb[79].mxu0  ;;  %v3355_v53 = vsel %vm3213_vm5, %v11681_v54, -inf  ;;  %v3349_v54 = vsel %vm3213_vm5, %v11685_v27, -inf }
 0x443   : >> { %15748 = vst [vmem:[#allocation166_spill] sm:$0xff] %v11853_v9  ;;  %15749 = vst [vmem:[#allocation167_spill] sm:$0xff] %v11855_v29 }
 0x444   : >> { %3347 = vmax.xlane.f32.xlu1 %v3346_v57  ;;  %v3412_v57 = vsel %vm3213_vm5, %v11693_v48, -inf  ;;  %v3463_v48 = vsel %vm3213_vm5, %v11683_v8, -inf }
 0x445   : >> { %3404 = vmax.xlane.f32.xlu0 %v3403_v7  ;;  %v3397_v7 = vsel %vm3213_vm5, %v11663_v36, -inf }
 0x447   : >> { %v11861_v39 = vpop.f32.mrb[60].mxu1 }
 0x448   : >> { %15750 = vst [vmem:[#allocation168_spill] sm:$0xff] %v11861_v39  ;;  %3461 = vmax.xlane.f32.xlu1 %v3460_v49  ;;  %v11865_v30 = vpop.f32.mrb[61].mxu1  ;;  %v3454_v49 = vsel %vm3213_vm5, %v11677_v43, -inf }
 0x449   : >> { %15751 = vst [vmem:[#allocation169_spill] sm:$0xff] %v11865_v30  ;;  %3356 = vmax.xlane.f32.xlu0 %v3355_v53  ;;  %v11869_v29 = vpop.f32.mrb[62].mxu1  ;;  %v3406_v53 = vsel %vm3213_vm5, %v11699_v26, -inf  ;;  %v3448_v26 = vsel %vm3213_vm5, %v11765_v1, -inf  ;;  %v15768_v1 = vld [vmem:[#allocation134_spill] sm:$0xff] }
 0x44a   : >> { %15752 = vst [vmem:[#allocation170_spill] sm:$0xff] %v11869_v29  ;;  %v11871_v16 = vpop.f32.mrb[63].mxu1 }
 0x44b   : >> { %15753 = vst [vmem:[#allocation171_spill] sm:$0xff] %v11871_v16 }
 0x44c   : >> { %3413 = vmax.xlane.f32.xlu1 %v3412_v57 }
 0x44d   : >> { %3398 = vmax.xlane.f32.xlu0 %v3397_v7  ;;  %v3457_v7 = vsel %vm3213_vm5, %v11687_v5, -inf }
 0x450   : >> { %3455 = vmax.xlane.f32.xlu1 %v3454_v49  ;;  %v3472_v49 = vsel %vm3213_vm5, %v11695_v12, -inf }
 0x451   : >> { %3350 = vmax.xlane.f32.xlu0 %v3349_v54  ;;  %v3415_v54 = vsel %vm3213_vm5, %v11705_v0, -inf }
 0x454   : >> { %3407 = vmax.xlane.f32.xlu1 %v3406_v53  ;;  %v3409_v53 = vsel %vm3213_vm5, %v11709_v20, -inf }
 0x455   : >> { %3464 = vmax.xlane.f32.xlu0 %v3463_v48  ;;  %v3424_v48 = vsel %vm3213_vm5, %v11717_v35, -inf }
 0x456   : >> { %v11885_v57 = vpop.xlane.xlu1 %3269 }
 0x458   : >> { %3473 = vmax.xlane.f32.xlu1 %v3472_v49  ;;  %v3418_v49 = vsel %vm3213_vm5, %v11723_v34, -inf }
 0x459   : >> { %3416 = vmax.xlane.f32.xlu0 %v3415_v54  ;;  %v3466_v54 = vsel %vm3213_vm5, %v11701_v18, -inf }
 0x45a   : >> { %v11893_v27 = vpop.xlane.xlu1 %3263 }
 0x45c   : >> { %3425 = vmax.xlane.f32.xlu1 %v3424_v48  ;;  %v3436_v48 = vsel %vm3213_vm5, %v11741_v21, -inf }
 0x45d   : >> { %3458 = vmax.xlane.f32.xlu0 %v3457_v7  ;;  %v3484_v7 = vsel %vm3213_vm5, %v11719_v17, -inf }
 0x45e   : >> { %v11901_v8 = vpop.xlane.xlu0 %3221 }
 0x460   : >> { %3467 = vmax.xlane.f32.xlu1 %v3466_v54  ;;  %v3475_v54 = vsel %vm3213_vm5, %v11707_v38, -inf }
 0x461   : >> { %v11909_v0 = vpop.xlane.xlu1 %3218  ;;  %3410 = vmax.xlane.f32.xlu0 %v3409_v53  ;;  %v3478_v53 = vsel %vm3213_vm5, %v11725_v52, -inf  ;;  %v15754_v52 = vld [vmem:[#allocation120_spill] sm:$0xff] }
 0x462   : >> { %v11913_v5 = vpop.xlane.xlu0 %3215 }
 0x464   : >> { %3419 = vmax.xlane.f32.xlu1 %v3418_v49  ;;  %v3427_v49 = vsel %vm3213_vm5, %v11729_v63, -inf }
 0x465   : >> { %v11921_v18 = vpop.xlane.xlu1 %3281  ;;  %3476 = vmax.xlane.f32.xlu0 %v3475_v54  ;;  %v3430_v54 = vsel %vm3213_vm5, %v11747_v13, -inf }
 0x466   : >> { %v11925_v20 = vpop.xlane.xlu0 %3272 }
 0x468   : >> { %3485 = vmax.xlane.f32.xlu1 %v3484_v7  ;;  %v3469_v7 = vsel %vm3213_vm5, %v11711_v60, -inf }
 0x469   : >> { %v11933_v34 = vpop.xlane.xlu1 %3233  ;;  %3428 = vmax.xlane.f32.xlu0 %v3427_v49  ;;  %v3496_v49 = vsel %vm3213_vm5, %v11743_v4, -inf  ;;  %v15762_v4 = vld [vmem:[#allocation122_spill] sm:$0xff] }
 0x46a   : >> { %v11937_v38 = vpop.xlane.xlu0 %3224 }
 0x46c   : >> { %3437 = vmax.xlane.f32.xlu1 %v3436_v48  ;;  %v3421_v48 = vsel %vm3213_vm5, %v11733_v25, -inf }
 0x46d   : >> { %v11945_v17 = vpop.xlane.xlu1 %3275  ;;  %3470 = vmax.xlane.f32.xlu0 %v3469_v7 }
 0x46e   : >> { %v11949_v63 = vpop.xlane.xlu0 %3266 }
 0x470   : >> { %3479 = vmax.xlane.f32.xlu1 %v3478_v53  ;;  %v3487_v53 = vsel %vm3213_vm5, %v15754_v52, -inf }
 0x471   : >> { %v11957_v21 = vpop.xlane.xlu1 %3227  ;;  %3422 = vmax.xlane.f32.xlu0 %v3421_v48  ;;  %v15755_v48 = vld [vmem:[#allocation53_spill] sm:$0xff] }
 0x472   : >> { %v11961_v60 = vpop.xlane.xlu0 %3284 }
 0x474   : >> { %3431 = vmax.xlane.f32.xlu1 %v3430_v54  ;;  %v3439_v54 = vsel %vm3213_vm5, %v11753_v2, -inf  ;;  %v15772_v2 = vld [vmem:[#allocation58_spill] sm:$0xff] }
 0x475   : >> { %v11969_v35 = vpop.xlane.xlu1 %3293  ;;  %3488 = vmax.xlane.f32.xlu0 %v3487_v53  ;;  %v15767_v53 = vld [vmem:[#allocation131_spill] sm:$0xff] }
 0x476   : >> { %v11973_v12 = vpop.xlane.xlu0 %3236  ;;  %v3490_v36 = vsel %vm3213_vm5, %v15767_v53, -inf  ;;  %v15773_v53 = vld [vmem:[#allocation133_spill] sm:$0xff] }
 0x477   : >> { %15756 = vst [vmem:[#allocation53_spill] sm:$0xff] %v11973_v12 }
 0x478   : >> { %3497 = vmax.xlane.f32.xlu1 %v3496_v49  ;;  %v3481_v49 = vsel %vm3213_vm5, %v15762_v4, -inf }
 0x479   : >> { %v11981_v13 = vpop.xlane.xlu1 %3245  ;;  %3440 = vmax.xlane.f32.xlu0 %v3439_v54  ;;  %v15764_v54 = vld [vmem:[#allocation56_spill] sm:$0xff] }
 0x47a   : >> { %15758 = vst [vmem:[#allocation172_spill] sm:$0xff] %v11981_v13  ;;  %v11985_v43 = vpop.xlane.xlu0 %3278  ;;  %v3442_v13 = vsel %vm3213_vm5, %v11771_v37, -inf }
 0x47b   : >> { %15760 = vst [vmem:[#allocation173_spill] sm:$0xff] %v11985_v43 }
 0x47c   : >> { %3449 = vmax.xlane.f32.xlu1 %v3448_v26  ;;  %v3433_v26 = vsel %vm3213_vm5, %v15768_v1, -inf }
 0x47d   : >> { %v11993_v12 = vpop.xlane.xlu1 %3287  ;;  %3482 = vmax.xlane.f32.xlu0 %v3481_v49  ;;  %v15770_v49 = vld [vmem:[#allocation61_spill] sm:$0xff] }
 0x47e   : >> { %15763 = vst [vmem:[#allocation174_spill] sm:$0xff] %v11993_v12  ;;  %v11997_v7 = vpop.xlane.xlu0 %3230  ;;  %v3556_v12 = vsel %vm3213_vm5, %v11767_v58, -inf  ;;  %v15782_v58 = vld [vmem:[#allocation135_spill] sm:$0xff] }
 0x47f   : >> { %15765 = vst [vmem:[#allocation56_spill] sm:$0xff] %v11997_v7 }
 0x480   : >> { %3491 = vmax.xlane.f32.xlu1 %v3490_v36  ;;  %v3499_v36 = vsel %vm3213_vm5, %v15773_v53, -inf }
 0x481   : >> { %v12005_v43 = vpop.xlane.xlu1 %3239  ;;  %3434 = vmax.xlane.f32.xlu0 %v3433_v26  ;;  %v15775_v26 = vld [vmem:[#allocation62_spill] sm:$0xff] }
 0x482   : >> { %15769 = vst [vmem:[#allocation175_spill] sm:$0xff] %v12005_v43  ;;  %v12009_v25 = vpop.xlane.xlu0 %3296  ;;  %v3508_v43 = vsel %vm3213_vm5, %v11789_v40, -inf  ;;  %v15788_v40 = vld [vmem:[#allocation142_spill] sm:$0xff] }
 0x483   : >> { %15771 = vst [vmem:[#allocation61_spill] sm:$0xff] %v12009_v25 }
 0x484   : >> { %3443 = vmax.xlane.f32.xlu1 %v3442_v13  ;;  %v3451_v13 = vsel %vm3213_vm5, %v11777_v31, -inf  ;;  %v15792_v31 = vld [vmem:[#allocation68_spill] sm:$0xff] }
 0x485   : >> { %v12017_v7 = vpop.xlane.xlu1 %3305  ;;  %3500 = vmax.xlane.f32.xlu0 %v3499_v36  ;;  %v15787_v36 = vld [vmem:[#allocation139_spill] sm:$0xff] }
 0x486   : >> { %15774 = vst [vmem:[#allocation58_spill] sm:$0xff] %v12017_v7  ;;  %v12021_v52 = vpop.xlane.xlu0 %3248  ;;  %v3550_v7 = vsel %vm3213_vm5, %v15787_v36, -inf  ;;  %v15793_v36 = vld [vmem:[#allocation141_spill] sm:$0xff] }
 0x487   : >> { %15776 = vst [vmem:[#allocation62_spill] sm:$0xff] %v12021_v52 }
 0x488   : >> { %3557 = vmax.xlane.f32.xlu1 %v3556_v12  ;;  %v3493_v12 = vsel %vm3213_vm5, %v15782_v58, -inf }
 0x489   : >> { %v12029_v37 = vpop.xlane.xlu1 %3257  ;;  %3452 = vmax.xlane.f32.xlu0 %v3451_v13  ;;  %v15784_v13 = vld [vmem:[#allocation66_spill] sm:$0xff] }
 0x48a   : >> { %15778 = vst [vmem:[#allocation176_spill] sm:$0xff] %v12029_v37  ;;  %v12033_v25 = vpop.xlane.xlu0 %3290  ;;  %v3502_v37 = vsel %vm3213_vm5, %v11795_v6, -inf }
 0x48b   : >> { %15780 = vst [vmem:[#allocation177_spill] sm:$0xff] %v12033_v25 }
 0x48c   : >> { %3509 = vmax.xlane.f32.xlu1 %v3508_v43  ;;  %v3445_v43 = vsel %vm3213_vm5, %v15788_v40, -inf }
 0x48d   : >> { %v12041_v52 = vpop.xlane.xlu1 %3299  ;;  %3494 = vmax.xlane.f32.xlu0 %v3493_v12  ;;  %v15790_v12 = vld [vmem:[#allocation73_spill] sm:$0xff] }
 0x48e   : >> { %15783 = vst [vmem:[#allocation178_spill] sm:$0xff] %v12041_v52  ;;  %v12045_v4 = vpop.xlane.xlu0 %3242  ;;  %v3568_v52 = vsel %vm3213_vm5, %v11791_v32, -inf  ;;  %v15802_v32 = vld [vmem:[#allocation143_spill] sm:$0xff] }
 0x48f   : >> { %15785 = vst [vmem:[#allocation66_spill] sm:$0xff] %v12045_v4 }
 0x490   : >> { %3551 = vmax.xlane.f32.xlu1 %v3550_v7  ;;  %v3559_v7 = vsel %vm3213_vm5, %v15793_v36, -inf }
 0x491   : >> { %v12053_v25 = vpop.xlane.xlu1 %3251  ;;  %3446 = vmax.xlane.f32.xlu0 %v3445_v43  ;;  %v15795_v43 = vld [vmem:[#allocation71_spill] sm:$0xff] }
 0x492   : >> { %15789 = vst [vmem:[#allocation179_spill] sm:$0xff] %v12053_v25  ;;  %v12057_v1 = vpop.xlane.xlu0 %3308  ;;  %v3520_v25 = vsel %vm3213_vm5, %v11813_v28, -inf  ;;  %v15808_v28 = vld [vmem:[#allocation150_spill] sm:$0xff] }
 0x493   : >> { %15791 = vst [vmem:[#allocation73_spill] sm:$0xff] %v12057_v1 }
 0x494   : >> { %3503 = vmax.xlane.f32.xlu1 %v3502_v37  ;;  %v3511_v37 = vsel %vm3213_vm5, %v11803_v61, -inf  ;;  %v15812_v61 = vld [vmem:[#allocation74_spill] sm:$0xff] }
 0x495   : >> { %v12065_v4 = vpop.xlane.xlu1 %3365  ;;  %3560 = vmax.xlane.f32.xlu0 %v3559_v7  ;;  %v15807_v7 = vld [vmem:[#allocation147_spill] sm:$0xff] }
 0x496   : >> { %15794 = vst [vmem:[#allocation68_spill] sm:$0xff] %v12065_v4  ;;  %v12069_v53 = vpop.xlane.xlu0 %3260  ;;  %v3562_v4 = vsel %vm3213_vm5, %v15807_v7, -inf  ;;  %v15813_v7 = vld [vmem:[#allocation148_spill] sm:$0xff] }
 0x497   : >> { %15796 = vst [vmem:[#allocation71_spill] sm:$0xff] %v12069_v53 }
 0x498   : >> { %3569 = vmax.xlane.f32.xlu1 %v3568_v52  ;;  %v3553_v52 = vsel %vm3213_vm5, %v15802_v32, -inf }
 0x499   : >> { %v12077_v6 = vpop.xlane.xlu1 %3317  ;;  %3512 = vmax.xlane.f32.xlu0 %v3511_v37  ;;  %v15804_v37 = vld [vmem:[#allocation72_spill] sm:$0xff] }
 0x49a   : >> { %15798 = vst [vmem:[#allocation180_spill] sm:$0xff] %v12077_v6  ;;  %v12081_v1 = vpop.xlane.xlu0 %3302  ;;  %v3514_v6 = vsel %vm3213_vm5, %v11819_v14, -inf }
 0x49b   : >> { %15800 = vst [vmem:[#allocation181_spill] sm:$0xff] %v12081_v1 }
 0x49c   : >> { %3521 = vmax.xlane.f32.xlu1 %v3520_v25  ;;  %v3505_v25 = vsel %vm3213_vm5, %v15808_v28, -inf }
 0x49d   : >> { %v12089_v53 = vpop.xlane.xlu1 %3359  ;;  %3554 = vmax.xlane.f32.xlu0 %v3553_v52  ;;  %v15810_v52 = vld [vmem:[#allocation81_spill] sm:$0xff] }
 0x49e   : >> { %15803 = vst [vmem:[#allocation182_spill] sm:$0xff] %v12089_v53  ;;  %v12093_v58 = vpop.xlane.xlu0 %3254  ;;  %v3580_v53 = vsel %vm3213_vm5, %v11815_v22, -inf  ;;  %v15822_v22 = vld [vmem:[#allocation151_spill] sm:$0xff] }
 0x49f   : >> { %15805 = vst [vmem:[#allocation72_spill] sm:$0xff] %v12093_v58 }
 0x4a0   : >> { %3563 = vmax.xlane.f32.xlu1 %v3562_v4  ;;  %v3571_v4 = vsel %vm3213_vm5, %v15813_v7, -inf  ;;  %v15826_v7 = vld [vmem:[#allocation85_spill] sm:$0xff] }
 0x4a1   : >> { %v12101_v1 = vpop.xlane.xlu1 %3311  ;;  %3506 = vmax.xlane.f32.xlu0 %v3505_v25  ;;  %v15815_v25 = vld [vmem:[#allocation78_spill] sm:$0xff] }
 0x4a2   : >> { %15809 = vst [vmem:[#allocation183_spill] sm:$0xff] %v12101_v1  ;;  %v12105_v40 = vpop.xlane.xlu0 %3368  ;;  %v3532_v1 = vsel %vm3213_vm5, %v11837_v11, -inf  ;;  %v15828_v11 = vld [vmem:[#allocation158_spill] sm:$0xff] }
 0x4a3   : >> { %15811 = vst [vmem:[#allocation81_spill] sm:$0xff] %v12105_v40 }
 0x4a4   : >> { %3515 = vmax.xlane.f32.xlu1 %v3514_v6  ;;  %v3523_v6 = vsel %vm3213_vm5, %v11827_v42, -inf  ;;  %v15832_v42 = vld [vmem:[#allocation82_spill] sm:$0xff] }
 0x4a5   : >> { %v12113_v58 = vpop.xlane.xlu1 %3377  ;;  %3572 = vmax.xlane.f32.xlu0 %v3571_v4  ;;  %v15827_v4 = vld [vmem:[#allocation155_spill] sm:$0xff] }
 0x4a6   : >> { %15814 = vst [vmem:[#allocation74_spill] sm:$0xff] %v12113_v58  ;;  %v12117_v36 = vpop.xlane.xlu0 %3320  ;;  %v3574_v58 = vsel %vm3213_vm5, %v15827_v4, -inf  ;;  %v15833_v4 = vld [vmem:[#allocation156_spill] sm:$0xff] }
 0x4a7   : >> { %15816 = vst [vmem:[#allocation78_spill] sm:$0xff] %v12117_v36 }
 0x4a8   : >> { %3581 = vmax.xlane.f32.xlu1 %v3580_v53  ;;  %v3565_v53 = vsel %vm3213_vm5, %v15822_v22, -inf  ;;  %v15835_v22 = vld [vmem:[#allocation86_spill] sm:$0xff] }
 0x4a9   : >> { %v12125_v14 = vpop.xlane.xlu1 %3329  ;;  %3524 = vmax.xlane.f32.xlu0 %v3523_v6  ;;  %v15824_v6 = vld [vmem:[#allocation80_spill] sm:$0xff] }
 0x4aa   : >> { %15818 = vst [vmem:[#allocation184_spill] sm:$0xff] %v12125_v14  ;;  %v12129_v40 = vpop.xlane.xlu0 %3362  ;;  %v3526_v14 = vsel %vm3213_vm5, %v11843_v62, -inf }
 0x4ab   : >> { %15820 = vst [vmem:[#allocation185_spill] sm:$0xff] %v12129_v40 }
 0x4ac   : >> { %3533 = vmax.xlane.f32.xlu1 %v3532_v1  ;;  %v3517_v1 = vsel %vm3213_vm5, %v15828_v11, -inf }
 0x4ad   : >> { %v12137_v36 = vpop.xlane.xlu1 %3371  ;;  %3566 = vmax.xlane.f32.xlu0 %v3565_v53 }
 0x4ae   : >> { %15823 = vst [vmem:[#allocation186_spill] sm:$0xff] %v12137_v36  ;;  %v12141_v32 = vpop.xlane.xlu0 %3314  ;;  %v15836_v36 = vld [vmem:[#allocation91_spill] sm:$0xff] }
 0x4af   : >> { %15825 = vst [vmem:[#allocation80_spill] sm:$0xff] %v12141_v32 }
 0x4b0   : >> { %3575 = vmax.xlane.f32.xlu1 %v3574_v58  ;;  %v3583_v58 = vsel %vm3213_vm5, %v15833_v4, -inf  ;;  %v3535_v4 = vsel %vm3213_vm5, %v11851_v44, -inf  ;;  %v15842_v44 = vld [vmem:[#allocation159_spill] sm:$0xff] }
 0x4b1   : >> { %v12149_v40 = vpop.xlane.xlu1 %3323  ;;  %3518 = vmax.xlane.f32.xlu0 %v3517_v1  ;;  %v15834_v1 = vsub.f32 %v11491_v24, %v11885_v57  ;;  %v15838_v24 = vsub.f32 %v11503_v33, %v11901_v8  ;;  %v15843_v33 = vsub.f32 %v11493_v50, %v11893_v27  ;;  %v15847_v50 = vsub.f32 %v11507_v59, %v11913_v5  ;;  %v15853_v59 = vld [vmem:[#allocation164_spill] sm:$0xff] }
 0x4b2   : >> { %15829 = vst [vmem:[#allocation85_spill] sm:$0xff] %v12149_v40  ;;  %v12153_v28 = vpop.xlane.xlu0 %3380  ;;  %v3595_v5 = vsel %vm3213_vm5, %v15853_v59, -inf  ;;  %v15857_v59 = vld [vmem:[#allocation97_spill] sm:$0xff] }
 0x4b3   : >> { %15831 = vst [vmem:[#allocation187_spill] sm:$0xff] %v12153_v28  ;;  %v3762_v11 = vmul.f32 1.442695, %v15834_v1  ;;  %v3730_v57 = vmul.f32 1.442695, %v15838_v24  ;;  %v15839_v1 = vld [vmem:[#allocation94_spill] sm:$0xff] }
 0x4b4   : >> { %3527 = vmax.xlane.f32.xlu1 %v3526_v14  ;;  %v3592_v14 = vsel %vm3213_vm5, %v11839_v56, -inf  ;;  %v15841_v28 = vld [vmem:[#allocation84_spill] sm:$0xff]  ;;  %v3758_v8 = vmul.f32 1.442695, %v15843_v33  ;;  %v15845_v56 = vld [vmem:[#allocation93_spill] sm:$0xff] }
 0x4b5   : >> { %v12161_v32 = vpop.xlane.xlu1 %3389  ;;  %3584 = vmax.xlane.f32.xlu0 %v3583_v58  ;;  %8494 = vpow2.f32 %v3762_v11  ;;  %v15844_v24 = vld [vmem:[#allocation88_spill] sm:$0xff]  ;;  %v3726_v27 = vmul.f32 1.442695, %v15847_v50 }
 0x4b6   : >> { %v12168_v53 = vpop.xlane.xlu0 %3332  ;;  %8496 = vpow2.f32 %v3730_v57  ;;  %v15848_v57 = vld [vmem:[#allocation95_spill] sm:$0xff] }
 0x4b7   : >> { %8498 = vpow2.f32 %v3758_v8 }
 0x4b8   : >> { %3593 = vmax.xlane.f32.xlu1 %v3592_v14  ;;  %v3544_v14 = vsel %vm3213_vm5, %v11861_v39, -inf  ;;  %v15850_v39 = vsub.f32 %v11497_v41, %v11925_v20  ;;  %8500 = vpow2.f32 %v3726_v27  ;;  %v15854_v41 = vsub.f32 %v11505_v3, %v11921_v18 }
 0x4b9   : >> { %v12176_v58 = vpop.xlane.xlu1 %3341  ;;  %3536 = vmax.xlane.f32.xlu0 %v3535_v4  ;;  %v3577_v4 = vsel %vm3213_vm5, %v15842_v44, -inf  ;;  %v3547_v3 = vsel %vm3213_vm5, %v11869_v29, -inf  ;;  %v15892_v29 = vld [vmem:[#allocation173_spill] sm:$0xff] }
 0x4ba   : >> { %15837 = vst [vmem:[#allocation82_spill] sm:$0xff] %v12176_v58  ;;  %v12183_v62 = vpop.xlane.xlu0 %3374  ;;  %v3770_v20 = vmul.f32 1.442695, %v15854_v41  ;;  %v15867_v41 = vsub.f32 %v11517_v23, %v11909_v0  ;;  %v15871_v23 = vsub.f32 %v11531_v51, %v11957_v21 }
 0x4bb   : >> { %15840 = vst [vmem:[#allocation86_spill] sm:$0xff] %v12183_v62 }
 0x4bc   : >> { %3545 = vmax.xlane.f32.xlu1 %v3544_v14  ;;  %v15846_v14 = vld [vmem:[#allocation163_spill] sm:$0xff]  ;;  %v3734_v0 = vmul.f32 1.442695, %v15871_v23 }
 0x4bd   : >> { %v12191_v11 = vpop.xlane.xlu1 %3383  ;;  %3578 = vmax.xlane.f32.xlu0 %v3577_v4  ;;  %v3586_v62 = vsel %vm3213_vm5, %v15846_v14, -inf  ;;  %v3529_v4 = vsel %vm3213_vm5, %v11853_v9, -inf  ;;  %v15851_v14 = vld [vmem:[#allocation90_spill] sm:$0xff]  ;;  %v15862_v9 = vld [vmem:[#allocation92_spill] sm:$0xff] }
 0x4be   : >> { %v12198_v58 = vpop.xlane.xlu0 %3326 }
 0x4bf   : >> { %v12222_v8 = vpop.eup %8494 }
 0x4c0   : >> { %3587 = vmax.xlane.f32.xlu1 %v3586_v62  ;;  %v3764_v62 = vmul.f32 1.442695, %v15850_v39  ;;  %15852 = vst [vmem:[#allocation94_spill] sm:$0xff] %v12222_v8  ;;  %v15855_v39 = vld [vmem:[#allocation96_spill] sm:$0xff]  ;;  %v4036_v27 = vsel %vm3213_vm5, %v12222_v8, 0.0 }
 0x4c1   : >> { %v12206_v44 = vpop.xlane.xlu1 %3335  ;;  %3530 = vmax.xlane.f32.xlu0 %v3529_v4  ;;  %v3538_v4 = vsel %vm3213_vm5, %v11865_v30, -inf }
 0x4c2   : >> { %v12213_v40 = vpop.xlane.xlu0 %3392  ;;  %8502 = vpow2.f32 %v3764_v62  ;;  %v15860_v62 = vld [vmem:[#allocation102_spill] sm:$0xff] }
 0x4c3   : >> { %15849 = vst [vmem:[#allocation91_spill] sm:$0xff] %v12213_v40  ;;  %8504 = vpow2.f32 %v3770_v20 }
 0x4c4   : >> { %3539 = vmax.xlane.f32.xlu1 %v3538_v4  ;;  %v15856_v4 = vsub.f32 %v11513_v46, %v11937_v38  ;;  %v15859_v46 = vsub.f32 %v11525_v55, %v11933_v34  ;;  %v15864_v55 = vld [vmem:[#allocation167_spill] sm:$0xff] }
 0x4c5   : >> { %v12226_v50 = vpop.xlane.xlu1 %3401  ;;  %3596 = vmax.xlane.f32.xlu0 %v3595_v5  ;;  %v12242_v5 = vpop.eup %8496  ;;  %v3589_v34 = vsel %vm3213_vm5, %v15864_v55, -inf }
 0x4c6   : >> { %v12233_v33 = vpop.xlane.xlu0 %3344  ;;  %v3732_v30 = vmul.f32 1.442695, %v15856_v4  ;;  %15858 = vst [vmem:[#allocation84_spill] sm:$0xff] %v12242_v5  ;;  %v3738_v38 = vmul.f32 1.442695, %v15859_v46  ;;  %v3988_v20 = vsel %vm3213_vm5, %v12242_v5, 0.0 }
 0x4c7   : >> { %v15868_v5 = vld [vmem:[#allocation99_spill] sm:$0xff] }
 0x4c8   : >> { %4037 = vadd.xlane.f32.xlu1 %v4036_v27  ;;  %8506 = vpow2.f32 %v3732_v30  ;;  %v15861_v27 = vsub.f32 %v11499_v45, %v11949_v63  ;;  %v15865_v45 = vsub.f32 %v11509_v10, %v11945_v17  ;;  %v15866_v30 = vld [vmem:[#allocation98_spill] sm:$0xff]  ;;  %v3541_v10 = vsel %vm3213_vm5, %v11871_v16, -inf  ;;  %v15889_v16 = vld [vmem:[#allocation107_spill] sm:$0xff] }
 0x4c9   : >> { %v12246_v18 = vpop.xlane.xlu1 %3353  ;;  %3548 = vmax.xlane.f32.xlu0 %v3547_v3  ;;  %v12262_v3 = vpop.eup %8498  ;;  %8508 = vpow2.f32 %v3738_v38 }
 0x4ca   : >> { %v12253_v4 = vpop.xlane.xlu0 %3386  ;;  %v3760_v40 = vmul.f32 1.442695, %v15861_v27  ;;  %15863 = vst [vmem:[#allocation88_spill] sm:$0xff] %v12262_v3  ;;  %v3766_v63 = vmul.f32 1.442695, %v15865_v45  ;;  %v4030_v38 = vsel %vm3213_vm5, %v12262_v3, 0.0 }
 0x4cb   : >> { %v15880_v3 = vld [vmem:[#allocation53_spill] sm:$0xff] }
 0x4cc   : >> { %3989 = vadd.xlane.f32.xlu1 %v3988_v20  ;;  %v3728_v20 = vmul.f32 1.442695, %v15867_v41  ;;  %8510 = vpow2.f32 %v3760_v40  ;;  %v15872_v40 = vld [vmem:[#allocation101_spill] sm:$0xff] }
 0x4cd   : >> { %v12266_v46 = vpop.xlane.xlu1 %3395  ;;  %3590 = vmax.xlane.f32.xlu0 %v3589_v34  ;;  %v12282_v34 = vpop.eup %8500  ;;  %8512 = vpow2.f32 %v3766_v63 }
 0x4ce   : >> { %v12273_v8 = vpop.xlane.xlu0 %3338  ;;  %15869 = vst [vmem:[#allocation93_spill] sm:$0xff] %v12282_v34  ;;  %v12286_v17 = vpop.eup %8502  ;;  %8514 = vpow2.f32 %v3728_v20  ;;  %v3982_v63 = vsel %vm3213_vm5, %v12282_v34, 0.0 }
 0x4cf   : >> { %15870 = vst [vmem:[#allocation95_spill] sm:$0xff] %v12286_v17  ;;  %v4039_v51 = vsel %vm3213_vm5, %v12286_v17, 0.0  ;;  %8516 = vpow2.f32 %v3734_v0 }
 0x4d0   : >> { %4031 = vadd.xlane.f32.xlu1 %v4030_v38  ;;  %v15873_v38 = vsub.f32 %v11515_v19, %v11961_v60  ;;  %v15877_v19 = vsub.f32 %v15755_v48, %v11969_v35 }
 0x4d1   : >> { %v12288_v45 = vpop.xlane.xlu1 %3347  ;;  %3542 = vmax.xlane.f32.xlu0 %v3541_v10  ;;  %v12304_v10 = vpop.eup %8504 }
 0x4d2   : >> { %v12295_v55 = vpop.xlane.xlu0 %3404  ;;  %v3772_v27 = vmul.f32 1.442695, %v15873_v38  ;;  %15874 = vst [vmem:[#allocation90_spill] sm:$0xff] %v12304_v10  ;;  %v12308_v21 = vpop.eup %8506  ;;  %v3778_v60 = vmul.f32 1.442695, %v15877_v19  ;;  %v4048_v0 = vsel %vm3213_vm5, %v12304_v10, 0.0 }
 0x4d3   : >> { %15875 = vst [vmem:[#allocation96_spill] sm:$0xff] %v12308_v21  ;;  %v3991_v35 = vsel %vm3213_vm5, %v12308_v21, 0.0 }
 0x4d4   : >> { %3983 = vadd.xlane.f32.xlu1 %v3982_v63  ;;  %8518 = vpow2.f32 %v3772_v27  ;;  %v15879_v63 = vld [vmem:[#allocation55_spill] sm:$0xff]  ;;  %v15887_v27 = vld [vmem:[#allocation172_spill] sm:$0xff] }
 0x4d5   : >> { %v12310_v23 = vpop.xlane.xlu1 %3461  ;;  %4040 = vadd.xlane.f32.xlu0 %v4039_v51  ;;  %v15881_v41 = vsub.f32 %v15879_v63, %v15880_v3  ;;  %v12326_v51 = vpop.eup %8508  ;;  %8520 = vpow2.f32 %v3778_v60  ;;  %v15886_v3 = vld [vmem:[#allocation59_spill] sm:$0xff] }
 0x4d6   : >> { %15876 = vst [vmem:[#allocation97_spill] sm:$0xff] %v12310_v23  ;;  %v12317_v38 = vpop.xlane.xlu0 %3356  ;;  %15883 = vst [vmem:[#allocation92_spill] sm:$0xff] %v12326_v51  ;;  %v12330_v48 = vpop.eup %8510  ;;  %v4000_v60 = vsel %vm3213_vm5, %v12326_v51, 0.0  ;;  %v15902_v51 = vld [vmem:[#allocation56_spill] sm:$0xff] }
 0x4d7   : >> { %15878 = vst [vmem:[#allocation102_spill] sm:$0xff] %v12317_v38  ;;  %v3740_v34 = vmul.f32 1.442695, %v15881_v41  ;;  %15884 = vst [vmem:[#allocation98_spill] sm:$0xff] %v12330_v48  ;;  %v15888_v41 = vsub.f32 %v15886_v3, %v15887_v27  ;;  %v4033_v3 = vsel %vm3213_vm5, %v12330_v48, 0.0 }
 0x4d8   : >> { %4049 = vadd.xlane.f32.xlu1 %v4048_v0  ;;  %v15891_v0 = vld [vmem:[#allocation54_spill] sm:$0xff] }
 0x4d9   : >> { %v12332_v19 = vpop.xlane.xlu1 %3413  ;;  %3992 = vadd.xlane.f32.xlu0 %v3991_v35  ;;  %v3746_v63 = vmul.f32 1.442695, %v15888_v41  ;;  %8522 = vpow2.f32 %v3740_v34  ;;  %v15893_v38 = vsub.f32 %v15891_v0, %v15892_v29  ;;  %v12348_v35 = vpop.eup %8512  ;;  %v15897_v29 = vld [vmem:[#allocation174_spill] sm:$0xff]  ;;  %v15899_v0 = vld [vmem:[#allocation103_spill] sm:$0xff] }
 0x4da   : >> { %15885 = vst [vmem:[#allocation99_spill] sm:$0xff] %v12332_v19  ;;  %v12339_v10 = vpop.xlane.xlu0 %3398  ;;  %15895 = vst [vmem:[#allocation55_spill] sm:$0xff] %v12348_v35  ;;  %v12352_v27 = vpop.eup %8514  ;;  %v15898_v34 = vsub.f32 %v15764_v54, %v15897_v29 }
 0x4db   : >> { %15890 = vst [vmem:[#allocation101_spill] sm:$0xff] %v12339_v10  ;;  %v3768_v21 = vmul.f32 1.442695, %v15893_v38  ;;  %15896 = vst [vmem:[#allocation53_spill] sm:$0xff] %v12352_v27  ;;  %8524 = vpow2.f32 %v3746_v63  ;;  %v4042_v63 = vsel %vm3213_vm5, %v12348_v35, 0.0  ;;  %v3985_v54 = vsel %vm3213_vm5, %v12352_v27, 0.0 }
 0x4dc   : >> { %4001 = vadd.xlane.f32.xlu1 %v4000_v60  ;;  %v3774_v38 = vmul.f32 1.442695, %v15898_v34  ;;  %v15901_v60 = vld [vmem:[#allocation57_spill] sm:$0xff] }
 0x4dd   : >> { %v12354_v41 = vpop.xlane.xlu1 %3455  ;;  %4034 = vadd.xlane.f32.xlu0 %v4033_v3  ;;  %8526 = vpow2.f32 %v3768_v21  ;;  %v15903_v10 = vsub.f32 %v15901_v60, %v15902_v51  ;;  %v12370_v3 = vpop.eup %8516  ;;  %v15910_v60 = vld [vmem:[#allocation111_spill] sm:$0xff] }
 0x4de   : >> { %v12361_v20 = vpop.xlane.xlu0 %3350  ;;  %15905 = vst [vmem:[#allocation172_spill] sm:$0xff] %v12370_v3  ;;  %v12374_v29 = vpop.eup %8518  ;;  %8528 = vpow2.f32 %v3774_v38  ;;  %v3994_v38 = vsel %vm3213_vm5, %v12370_v3, 0.0  ;;  %v15923_v3 = vld [vmem:[#allocation62_spill] sm:$0xff] }
 0x4df   : >> { %15900 = vst [vmem:[#allocation59_spill] sm:$0xff] %v12361_v20  ;;  %v3736_v48 = vmul.f32 1.442695, %v15903_v10  ;;  %15906 = vst [vmem:[#allocation107_spill] sm:$0xff] %v12374_v29  ;;  %v15908_v10 = vld [vmem:[#allocation175_spill] sm:$0xff] }
 0x4e0   : >> { %4043 = vadd.xlane.f32.xlu1 %v4042_v63  ;;  %v15909_v21 = vsub.f32 %v15770_v49, %v15908_v10  ;;  %v15912_v63 = vld [vmem:[#allocation61_spill] sm:$0xff]  ;;  %v4051_v49 = vsel %vm3213_vm5, %v12374_v29, 0.0 }
 0x4e1   : >> { %v12376_v34 = vpop.xlane.xlu1 %3407  ;;  %3986 = vadd.xlane.f32.xlu0 %v3985_v54  ;;  %8530 = vpow2.f32 %v3736_v48  ;;  %v15913_v35 = vsub.f32 %v15772_v2, %v15912_v63  ;;  %v12392_v54 = vpop.eup %8520  ;;  %v15918_v2 = vld [vmem:[#allocation58_spill] sm:$0xff] }
 0x4e2   : >> { %15907 = vst [vmem:[#allocation54_spill] sm:$0xff] %v12376_v34  ;;  %v3742_v51 = vmul.f32 1.442695, %v15909_v21  ;;  %v12383_v23 = vpop.xlane.xlu0 %3464  ;;  %15915 = vst [vmem:[#allocation174_spill] sm:$0xff] %v12392_v54  ;;  %v15919_v48 = vsub.f32 %v15775_v26, %v15918_v2  ;;  %v15932_v34 = vld [vmem:[#allocation117_spill] sm:$0xff] }
 0x4e3   : >> { %15911 = vst [vmem:[#allocation173_spill] sm:$0xff] %v12383_v23  ;;  %v3780_v27 = vmul.f32 1.442695, %v15913_v35  ;;  %v12396_v10 = vpop.eup %8522 }
 0x4e4   : >> { %3995 = vadd.xlane.f32.xlu1 %v3994_v38  ;;  %15916 = vst [vmem:[#allocation103_spill] sm:$0xff] %v12396_v10  ;;  %8532 = vpow2.f32 %v3742_v51  ;;  %v3786_v35 = vmul.f32 1.442695, %v15919_v48  ;;  %v15922_v38 = vld [vmem:[#allocation64_spill] sm:$0xff]  ;;  %v4060_v51 = vsel %vm3213_vm5, %v12392_v54, 0.0  ;;  %v4003_v26 = vsel %vm3213_vm5, %v12396_v10, 0.0 }
 0x4e5   : >> { %v12398_v21 = vpop.xlane.xlu1 %3473  ;;  %4052 = vadd.xlane.f32.xlu0 %v4051_v49  ;;  %8534 = vpow2.f32 %v3780_v27  ;;  %v15924_v23 = vsub.f32 %v15922_v38, %v15923_v3  ;;  %v12414_v49 = vpop.eup %8524  ;;  %v15929_v27 = vld [vmem:[#allocation69_spill] sm:$0xff] }
 0x4e6   : >> { %15917 = vst [vmem:[#allocation57_spill] sm:$0xff] %v12398_v21  ;;  %v12405_v19 = vpop.xlane.xlu0 %3416  ;;  %15926 = vst [vmem:[#allocation175_spill] sm:$0xff] %v12414_v49  ;;  %8536 = vpow2.f32 %v3786_v35  ;;  %v4012_v35 = vsel %vm3213_vm5, %v12414_v49, 0.0  ;;  %v15945_v49 = vld [vmem:[#allocation66_spill] sm:$0xff] }
 0x4e7   : >> { %15921 = vst [vmem:[#allocation56_spill] sm:$0xff] %v12405_v19  ;;  %v3748_v29 = vmul.f32 1.442695, %v15924_v23  ;;  %v12418_v2 = vpop.eup %8526  ;;  %v15930_v23 = vld [vmem:[#allocation176_spill] sm:$0xff]  ;;  %v15935_v19 = vld [vmem:[#allocation177_spill] sm:$0xff] }
 0x4e8   : >> { %4061 = vadd.xlane.f32.xlu1 %v4060_v51  ;;  %15927 = vst [vmem:[#allocation111_spill] sm:$0xff] %v12418_v2  ;;  %v15931_v3 = vsub.f32 %v15929_v27, %v15930_v23  ;;  %v15934_v51 = vld [vmem:[#allocation60_spill] sm:$0xff]  ;;  %v4045_v27 = vsel %vm3213_vm5, %v12418_v2, 0.0 }
 0x4e9   : >> { %v12420_v48 = vpop.xlane.xlu1 %3425  ;;  %4004 = vadd.xlane.f32.xlu0 %v4003_v26  ;;  %8538 = vpow2.f32 %v3748_v29  ;;  %v15936_v20 = vsub.f32 %v15934_v51, %v15935_v19  ;;  %v12436_v26 = vpop.eup %8528  ;;  %v15942_v51 = vld [vmem:[#allocation110_spill] sm:$0xff] }
 0x4ea   : >> { %15928 = vst [vmem:[#allocation61_spill] sm:$0xff] %v12420_v48  ;;  %v3754_v38 = vmul.f32 1.442695, %v15931_v3  ;;  %v12427_v54 = vpop.xlane.xlu0 %3458  ;;  %15938 = vst [vmem:[#allocation64_spill] sm:$0xff] %v12436_v26 }
 0x4eb   : >> { %15933 = vst [vmem:[#allocation58_spill] sm:$0xff] %v12427_v54  ;;  %v3776_v10 = vmul.f32 1.442695, %v15936_v20  ;;  %v12440_v23 = vpop.eup %8530  ;;  %v15940_v20 = vld [vmem:[#allocation178_spill] sm:$0xff] }
 0x4ec   : >> { %4013 = vadd.xlane.f32.xlu1 %v4012_v35  ;;  %15939 = vst [vmem:[#allocation62_spill] sm:$0xff] %v12440_v23  ;;  %8540 = vpow2.f32 %v3754_v38  ;;  %v15941_v19 = vsub.f32 %v15784_v13, %v15940_v20  ;;  %v15944_v35 = vld [vmem:[#allocation67_spill] sm:$0xff]  ;;  %v4054_v38 = vsel %vm3213_vm5, %v12436_v26, 0.0  ;;  %v3997_v13 = vsel %vm3213_vm5, %v12440_v23, 0.0 }
 0x4ed   : >> { %v12442_v3 = vpop.xlane.xlu1 %3467  ;;  %4046 = vadd.xlane.f32.xlu0 %v4045_v27  ;;  %8542 = vpow2.f32 %v3776_v10  ;;  %v15946_v54 = vsub.f32 %v15944_v35, %v15945_v49  ;;  %v15953_v35 = vld [vmem:[#allocation119_spill] sm:$0xff] }
 0x4ee   : >> { %v3782_v29 = vmul.f32 1.442695, %v15941_v19  ;;  %v12449_v17 = vpop.xlane.xlu0 %3410  ;;  %v12458_v27 = vpop.eup %8532 }
 0x4ef   : >> { %15943 = vst [vmem:[#allocation69_spill] sm:$0xff] %v12449_v17  ;;  %v3744_v2 = vmul.f32 1.442695, %v15946_v54  ;;  %15948 = vst [vmem:[#allocation176_spill] sm:$0xff] %v12458_v27  ;;  %v12462_v20 = vpop.eup %8534  ;;  %v15951_v54 = vld [vmem:[#allocation179_spill] sm:$0xff] }
 0x4f0   : >> { %4055 = vadd.xlane.f32.xlu1 %v4054_v38  ;;  %15949 = vst [vmem:[#allocation117_spill] sm:$0xff] %v12462_v20  ;;  %8544 = vpow2.f32 %v3782_v29  ;;  %v15952_v10 = vsub.f32 %v15790_v12, %v15951_v54  ;;  %v15955_v38 = vld [vmem:[#allocation73_spill] sm:$0xff]  ;;  %v4006_v29 = vsel %vm3213_vm5, %v12458_v27, 0.0  ;;  %v4063_v12 = vsel %vm3213_vm5, %v12462_v20, 0.0  ;;  %v15966_v27 = vld [vmem:[#allocation71_spill] sm:$0xff] }
 0x4f1   : >> { %v12464_v19 = vpop.xlane.xlu1 %3419  ;;  %3998 = vadd.xlane.f32.xlu0 %v3997_v13  ;;  %8546 = vpow2.f32 %v3744_v2  ;;  %v15956_v26 = vsub.f32 %v15792_v31, %v15955_v38  ;;  %v12480_v13 = vpop.eup %8536  ;;  %v15961_v31 = vld [vmem:[#allocation68_spill] sm:$0xff] }
 0x4f2   : >> { %15950 = vst [vmem:[#allocation60_spill] sm:$0xff] %v12464_v19  ;;  %v3750_v49 = vmul.f32 1.442695, %v15952_v10  ;;  %v12471_v63 = vpop.xlane.xlu0 %3476  ;;  %15958 = vst [vmem:[#allocation178_spill] sm:$0xff] %v12480_v13  ;;  %v15962_v2 = vsub.f32 %v15795_v43, %v15961_v31  ;;  %v15975_v19 = vld [vmem:[#allocation124_spill] sm:$0xff] }
 0x4f3   : >> { %15954 = vst [vmem:[#allocation177_spill] sm:$0xff] %v12471_v63  ;;  %v3788_v23 = vmul.f32 1.442695, %v15956_v26  ;;  %v12484_v54 = vpop.eup %8538 }
 0x4f4   : >> { %4007 = vadd.xlane.f32.xlu1 %v4006_v29  ;;  %15959 = vst [vmem:[#allocation110_spill] sm:$0xff] %v12484_v54  ;;  %8548 = vpow2.f32 %v3750_v49  ;;  %v3826_v26 = vmul.f32 1.442695, %v15962_v2  ;;  %v15965_v29 = vld [vmem:[#allocation75_spill] sm:$0xff]  ;;  %v4072_v49 = vsel %vm3213_vm5, %v12480_v13, 0.0  ;;  %v4015_v43 = vsel %vm3213_vm5, %v12484_v54, 0.0 }
 0x4f5   : >> { %v12486_v10 = vpop.xlane.xlu1 %3485  ;;  %4064 = vadd.xlane.f32.xlu0 %v4063_v12  ;;  %8550 = vpow2.f32 %v3788_v23  ;;  %v15967_v63 = vsub.f32 %v15965_v29, %v15966_v27  ;;  %v15972_v23 = vld [vmem:[#allocation79_spill] sm:$0xff] }
 0x4f6   : >> { %15960 = vst [vmem:[#allocation67_spill] sm:$0xff] %v12486_v10  ;;  %v12493_v48 = vpop.xlane.xlu0 %3428  ;;  %v12502_v12 = vpop.eup %8540  ;;  %8552 = vpow2.f32 %v3826_v26 }
 0x4f7   : >> { %15964 = vst [vmem:[#allocation66_spill] sm:$0xff] %v12493_v48  ;;  %v3756_v20 = vmul.f32 1.442695, %v15967_v63  ;;  %15969 = vst [vmem:[#allocation179_spill] sm:$0xff] %v12502_v12  ;;  %v12506_v31 = vpop.eup %8542  ;;  %v15973_v63 = vld [vmem:[#allocation180_spill] sm:$0xff]  ;;  %v15978_v48 = vld [vmem:[#allocation181_spill] sm:$0xff] }
 0x4f8   : >> { %4073 = vadd.xlane.f32.xlu1 %v4072_v49  ;;  %15970 = vst [vmem:[#allocation119_spill] sm:$0xff] %v12506_v31  ;;  %v15974_v27 = vsub.f32 %v15972_v23, %v15973_v63  ;;  %v15977_v49 = vld [vmem:[#allocation70_spill] sm:$0xff]  ;;  %v4024_v26 = vsel %vm3213_vm5, %v12502_v12, 0.0  ;;  %v4057_v23 = vsel %vm3213_vm5, %v12506_v31, 0.0  ;;  %v15988_v12 = vld [vmem:[#allocation72_spill] sm:$0xff] }
 0x4f9   : >> { %v12508_v2 = vpop.xlane.xlu1 %3437  ;;  %4016 = vadd.xlane.f32.xlu0 %v4015_v43  ;;  %8554 = vpow2.f32 %v3756_v20  ;;  %v15979_v17 = vsub.f32 %v15977_v49, %v15978_v48  ;;  %v15985_v49 = vld [vmem:[#allocation118_spill] sm:$0xff] }
 0x4fa   : >> { %15971 = vst [vmem:[#allocation73_spill] sm:$0xff] %v12508_v2  ;;  %v3794_v29 = vmul.f32 1.442695, %v15974_v27  ;;  %v12515_v13 = vpop.xlane.xlu0 %3470  ;;  %v12524_v43 = vpop.eup %8544 }
 0x4fb   : >> { %15976 = vst [vmem:[#allocation68_spill] sm:$0xff] %v12515_v13  ;;  %v3784_v54 = vmul.f32 1.442695, %v15979_v17  ;;  %15981 = vst [vmem:[#allocation75_spill] sm:$0xff] %v12524_v43  ;;  %v12528_v63 = vpop.eup %8546  ;;  %v15983_v17 = vld [vmem:[#allocation182_spill] sm:$0xff] }
 0x4fc   : >> { %4025 = vadd.xlane.f32.xlu1 %v4024_v26  ;;  %15982 = vst [vmem:[#allocation71_spill] sm:$0xff] %v12528_v63  ;;  %8556 = vpow2.f32 %v3794_v29  ;;  %v15984_v48 = vsub.f32 %v15804_v37, %v15983_v17  ;;  %v15987_v26 = vld [vmem:[#allocation77_spill] sm:$0xff]  ;;  %v4066_v29 = vsel %vm3213_vm5, %v12524_v43, 0.0  ;;  %v4009_v37 = vsel %vm3213_vm5, %v12528_v63, 0.0 }
 0x4fd   : >> { %v12530_v27 = vpop.xlane.xlu1 %3479  ;;  %4058 = vadd.xlane.f32.xlu0 %v4057_v23  ;;  %8558 = vpow2.f32 %v3784_v54  ;;  %v15989_v13 = vsub.f32 %v15987_v26, %v15988_v12  ;;  %v15996_v26 = vld [vmem:[#allocation130_spill] sm:$0xff] }
 0x4fe   : >> { %v3822_v20 = vmul.f32 1.442695, %v15984_v48  ;;  %v12537_v21 = vpop.xlane.xlu0 %3422  ;;  %v12546_v23 = vpop.eup %8548 }
 0x4ff   : >> { %15986 = vst [vmem:[#allocation79_spill] sm:$0xff] %v12537_v21  ;;  %v3752_v31 = vmul.f32 1.442695, %v15989_v13  ;;  %15991 = vst [vmem:[#allocation180_spill] sm:$0xff] %v12546_v23  ;;  %v12550_v17 = vpop.eup %8550  ;;  %v15994_v13 = vld [vmem:[#allocation183_spill] sm:$0xff] }
 0x500   : >> { %4067 = vadd.xlane.f32.xlu1 %v4066_v29  ;;  %15992 = vst [vmem:[#allocation124_spill] sm:$0xff] %v12550_v17  ;;  %8560 = vpow2.f32 %v3822_v20  ;;  %v15995_v54 = vsub.f32 %v15810_v52, %v15994_v13  ;;  %v15998_v29 = vld [vmem:[#allocation81_spill] sm:$0xff]  ;;  %v4018_v20 = vsel %vm3213_vm5, %v12546_v23, 0.0  ;;  %v4075_v52 = vsel %vm3213_vm5, %v12550_v17, 0.0  ;;  %v16009_v23 = vld [vmem:[#allocation78_spill] sm:$0xff] }
 0x501   : >> { %v12552_v48 = vpop.xlane.xlu1 %3431  ;;  %4010 = vadd.xlane.f32.xlu0 %v4009_v37  ;;  %8562 = vpow2.f32 %v3752_v31  ;;  %v15999_v43 = vsub.f32 %v15812_v61, %v15998_v29  ;;  %v12568_v37 = vpop.eup %8552  ;;  %v16004_v61 = vld [vmem:[#allocation74_spill] sm:$0xff] }
 0x502   : >> { %15993 = vst [vmem:[#allocation70_spill] sm:$0xff] %v12552_v48  ;;  %v3790_v12 = vmul.f32 1.442695, %v15995_v54  ;;  %v12559_v38 = vpop.xlane.xlu0 %3488  ;;  %16001 = vst [vmem:[#allocation182_spill] sm:$0xff] %v12568_v37  ;;  %v16005_v31 = vsub.f32 %v15815_v25, %v16004_v61  ;;  %v16017_v48 = vld [vmem:[#allocation136_spill] sm:$0xff] }
 0x503   : >> { %15997 = vst [vmem:[#allocation181_spill] sm:$0xff] %v12559_v38  ;;  %v3828_v63 = vmul.f32 1.442695, %v15999_v43  ;;  %v12572_v13 = vpop.eup %8554 }
 0x504   : >> { %4019 = vadd.xlane.f32.xlu1 %v4018_v20  ;;  %16002 = vst [vmem:[#allocation118_spill] sm:$0xff] %v12572_v13  ;;  %8564 = vpow2.f32 %v3790_v12  ;;  %v3834_v43 = vmul.f32 1.442695, %v16005_v31  ;;  %v16008_v20 = vld [vmem:[#allocation83_spill] sm:$0xff]  ;;  %v4132_v12 = vsel %vm3213_vm5, %v12568_v37, 0.0  ;;  %v4027_v25 = vsel %vm3213_vm5, %v12572_v13, 0.0 }
 0x505   : >> { %v12574_v54 = vpop.xlane.xlu1 %3497  ;;  %4076 = vadd.xlane.f32.xlu0 %v4075_v52  ;;  %8566 = vpow2.f32 %v3828_v63  ;;  %v16010_v38 = vsub.f32 %v16008_v20, %v16009_v23  ;;  %v16014_v63 = vld [vmem:[#allocation87_spill] sm:$0xff] }
 0x506   : >> { %16003 = vst [vmem:[#allocation77_spill] sm:$0xff] %v12574_v54  ;;  %v12581_v2 = vpop.xlane.xlu0 %3440  ;;  %v12590_v52 = vpop.eup %8556  ;;  %8568 = vpow2.f32 %v3834_v43  ;;  %v16038_v54 = vld [vmem:[#allocation138_spill] sm:$0xff] }
 0x507   : >> { %16007 = vst [vmem:[#allocation72_spill] sm:$0xff] %v12581_v2  ;;  %v3796_v17 = vmul.f32 1.442695, %v16010_v38  ;;  %16012 = vst [vmem:[#allocation183_spill] sm:$0xff] %v12590_v52  ;;  %v12594_v61 = vpop.eup %8558  ;;  %v16015_v38 = vld [vmem:[#allocation184_spill] sm:$0xff]  ;;  %v16020_v2 = vld [vmem:[#allocation185_spill] sm:$0xff] }
 0x508   : >> { %4133 = vadd.xlane.f32.xlu1 %v4132_v12  ;;  %16013 = vst [vmem:[#allocation130_spill] sm:$0xff] %v12594_v61  ;;  %v16016_v23 = vsub.f32 %v16014_v63, %v16015_v38  ;;  %v16019_v12 = vld [vmem:[#allocation76_spill] sm:$0xff]  ;;  %v4084_v43 = vsel %vm3213_vm5, %v12590_v52, 0.0  ;;  %v4069_v63 = vsel %vm3213_vm5, %v12594_v61, 0.0 }
 0x509   : >> { %v12596_v31 = vpop.xlane.xlu1 %3449  ;;  %4028 = vadd.xlane.f32.xlu0 %v4027_v25  ;;  %8570 = vpow2.f32 %v3796_v17  ;;  %v16021_v21 = vsub.f32 %v16019_v12, %v16020_v2  ;;  %v16028_v12 = vld [vmem:[#allocation131_spill] sm:$0xff] }
 0x50a   : >> { %v3802_v20 = vmul.f32 1.442695, %v16016_v23  ;;  %v12603_v37 = vpop.xlane.xlu0 %3482  ;;  %v12612_v25 = vpop.eup %8560 }
 0x50b   : >> { %16018 = vst [vmem:[#allocation81_spill] sm:$0xff] %v12603_v37  ;;  %v3824_v13 = vmul.f32 1.442695, %v16021_v21  ;;  %16023 = vst [vmem:[#allocation74_spill] sm:$0xff] %v12612_v25  ;;  %v12616_v38 = vpop.eup %8562  ;;  %v16026_v21 = vld [vmem:[#allocation186_spill] sm:$0xff]  ;;  %v16041_v37 = vld [vmem:[#allocation133_spill] sm:$0xff] }
 0x50c   : >> { %4085 = vadd.xlane.f32.xlu1 %v4084_v43  ;;  %16024 = vst [vmem:[#allocation83_spill] sm:$0xff] %v12616_v38  ;;  %8572 = vpow2.f32 %v3802_v20  ;;  %v16027_v2 = vsub.f32 %v15824_v6, %v16026_v21  ;;  %v16030_v43 = vld [vmem:[#allocation80_spill] sm:$0xff]  ;;  %v4126_v20 = vsel %vm3213_vm5, %v12612_v25, 0.0  ;;  %v4021_v6 = vsel %vm3213_vm5, %v12616_v38, 0.0 }
 0x50d   : >> { %v12618_v23 = vpop.xlane.xlu1 %3491  ;;  %4070 = vadd.xlane.f32.xlu0 %v4069_v63  ;;  %8574 = vpow2.f32 %v3824_v13  ;;  %v16031_v52 = vsub.f32 %v15826_v7, %v16030_v43  ;;  %v16035_v7 = vld [vmem:[#allocation89_spill] sm:$0xff] }
 0x50e   : >> { %16025 = vst [vmem:[#allocation78_spill] sm:$0xff] %v12618_v23  ;;  %v3830_v17 = vmul.f32 1.442695, %v16027_v2  ;;  %v12625_v10 = vpop.xlane.xlu0 %3434  ;;  %v12634_v63 = vpop.eup %8564  ;;  %v16036_v13 = vld [vmem:[#allocation85_spill] sm:$0xff] }
 0x50f   : >> { %16029 = vst [vmem:[#allocation87_spill] sm:$0xff] %v12625_v10  ;;  %v3792_v61 = vmul.f32 1.442695, %v16031_v52  ;;  %16033 = vst [vmem:[#allocation184_spill] sm:$0xff] %v12634_v63  ;;  %v12638_v21 = vpop.eup %8566  ;;  %v16037_v52 = vsub.f32 %v16035_v7, %v16036_v13 }
 0x510   : >> { %4127 = vadd.xlane.f32.xlu1 %v4126_v20  ;;  %16034 = vst [vmem:[#allocation136_spill] sm:$0xff] %v12638_v21  ;;  %8576 = vpow2.f32 %v3830_v17  ;;  %v16039_v20 = vld [vmem:[#allocation187_spill] sm:$0xff]  ;;  %v4078_v17 = vsel %vm3213_vm5, %v12634_v63, 0.0  ;;  %v4135_v7 = vsel %vm3213_vm5, %v12638_v21, 0.0 }
 0x511   : >> { %v12640_v2 = vpop.xlane.xlu1 %3443  ;;  %4022 = vadd.xlane.f32.xlu0 %v4021_v6  ;;  %v3798_v43 = vmul.f32 1.442695, %v16037_v52  ;;  %8578 = vpow2.f32 %v3792_v61  ;;  %v16040_v10 = vsub.f32 %v15832_v42, %v16039_v20  ;;  %v12656_v6 = vpop.eup %8568  ;;  %v16044_v42 = vsub.f32 %v15835_v22, %v12161_v32  ;;  %v16045_v61 = vld [vmem:[#allocation137_spill] sm:$0xff] }
 0x512   : >> { %v12647_v25 = vpop.xlane.xlu0 %3500  ;;  %16042 = vst [vmem:[#allocation76_spill] sm:$0xff] %v12656_v6 }
 0x513   : >> { %v3836_v38 = vmul.f32 1.442695, %v16040_v10  ;;  %v12660_v13 = vpop.eup %8570  ;;  %8580 = vpow2.f32 %v3798_v43  ;;  %v3842_v10 = vmul.f32 1.442695, %v16044_v42  ;;  %v4144_v43 = vsel %vm3213_vm5, %v12656_v6, 0.0 }
 0x514   : >> { %4079 = vadd.xlane.f32.xlu1 %v4078_v17  ;;  %16043 = vst [vmem:[#allocation185_spill] sm:$0xff] %v12660_v13  ;;  %v16047_v17 = vsub.f32 %v15836_v36, %v12168_v53  ;;  %v4087_v32 = vsel %vm3213_vm5, %v12660_v13, 0.0  ;;  %v16051_v36 = vld [vmem:[#allocation82_spill] sm:$0xff] }
 0x515   : >> { %v12662_v52 = vpop.xlane.xlu1 %3557  ;;  %4136 = vadd.xlane.f32.xlu0 %v4135_v7  ;;  %8582 = vpow2.f32 %v3836_v38  ;;  %v16052_v53 = vsub.f32 %v15839_v1, %v16051_v36 }
 0x516   : >> { %v12669_v23 = vpop.xlane.xlu0 %3452  ;;  %v3804_v29 = vmul.f32 1.442695, %v16047_v17  ;;  %v12678_v7 = vpop.eup %8572  ;;  %8584 = vpow2.f32 %v3842_v10  ;;  %v16053_v17 = vld [vmem:[#allocation144_spill] sm:$0xff] }
 0x517   : >> { %16046 = vst [vmem:[#allocation186_spill] sm:$0xff] %v12669_v23  ;;  %16049 = vst [vmem:[#allocation131_spill] sm:$0xff] %v12678_v7  ;;  %v12682_v22 = vpop.eup %8574  ;;  %v3810_v38 = vmul.f32 1.442695, %v16052_v53  ;;  %v16056_v23 = vld [vmem:[#allocation135_spill] sm:$0xff]  ;;  %v4096_v10 = vsel %vm3213_vm5, %v12678_v7, 0.0 }
 0x518   : >> { %4145 = vadd.xlane.f32.xlu1 %v4144_v43  ;;  %16050 = vst [vmem:[#allocation80_spill] sm:$0xff] %v12682_v22  ;;  %8586 = vpow2.f32 %v3804_v29  ;;  %v16054_v43 = vld [vmem:[#allocation86_spill] sm:$0xff]  ;;  %v4129_v1 = vsel %vm3213_vm5, %v12682_v22, 0.0 }
 0x519   : >> { %v12684_v42 = vpop.xlane.xlu1 %3509  ;;  %4088 = vadd.xlane.f32.xlu0 %v4087_v32  ;;  %v16055_v6 = vsub.f32 %v15841_v28, %v16054_v43  ;;  %8588 = vpow2.f32 %v3810_v38  ;;  %v16059_v28 = vsub.f32 %v15844_v24, %v12191_v11  ;;  %v16063_v7 = vld [vmem:[#allocation142_spill] sm:$0xff] }
 0x51a   : >> { %v12691_v20 = vpop.xlane.xlu0 %3494  ;;  %v12700_v32 = vpop.eup %8576 }
 0x51b   : >> { %v3832_v13 = vmul.f32 1.442695, %v16055_v6  ;;  %16057 = vst [vmem:[#allocation89_spill] sm:$0xff] %v12700_v32  ;;  %v12704_v36 = vpop.eup %8578  ;;  %v3838_v29 = vmul.f32 1.442695, %v16059_v28  ;;  %v16060_v6 = vld [vmem:[#allocation139_spill] sm:$0xff] }
 0x51c   : >> { %4097 = vadd.xlane.f32.xlu1 %v4096_v10  ;;  %16058 = vst [vmem:[#allocation85_spill] sm:$0xff] %v12704_v36  ;;  %v16062_v10 = vsub.f32 %v15845_v56, %v12198_v58  ;;  %v4138_v38 = vsel %vm3213_vm5, %v12700_v32, 0.0  ;;  %v4081_v11 = vsel %vm3213_vm5, %v12704_v36, 0.0  ;;  %v16066_v56 = vsub.f32 %v15848_v57, %v12206_v44  ;;  %v16070_v36 = vld [vmem:[#allocation141_spill] sm:$0xff] }
 0x51d   : >> { %v12706_v53 = vpop.xlane.xlu1 %3551  ;;  %4130 = vadd.xlane.f32.xlu0 %v4129_v1  ;;  %8590 = vpow2.f32 %v3832_v13  ;;  %v12722_v1 = vpop.eup %8580  ;;  %v16067_v13 = vld [vmem:[#allocation146_spill] sm:$0xff] }
 0x51e   : >> { %v12713_v63 = vpop.xlane.xlu0 %3446  ;;  %v3800_v21 = vmul.f32 1.442695, %v16062_v10  ;;  %16064 = vst [vmem:[#allocation187_spill] sm:$0xff] %v12722_v1  ;;  %8592 = vpow2.f32 %v3838_v29  ;;  %v3806_v58 = vmul.f32 1.442695, %v16066_v56  ;;  %v4090_v29 = vsel %vm3213_vm5, %v12722_v1, 0.0 }
 0x51f   : >> { %16061 = vst [vmem:[#allocation138_spill] sm:$0xff] %v12713_v63  ;;  %v12726_v24 = vpop.eup %8582  ;;  %v16076_v1 = vld [vmem:[#allocation149_spill] sm:$0xff] }
 0x520   : >> { %4139 = vadd.xlane.f32.xlu1 %v4138_v38  ;;  %16065 = vst [vmem:[#allocation133_spill] sm:$0xff] %v12726_v24  ;;  %8594 = vpow2.f32 %v3800_v21  ;;  %v16068_v38 = vld [vmem:[#allocation91_spill] sm:$0xff]  ;;  %v4147_v44 = vsel %vm3213_vm5, %v12726_v24, 0.0 }
 0x521   : >> { %v12728_v28 = vpop.xlane.xlu1 %3503  ;;  %4082 = vadd.xlane.f32.xlu0 %v4081_v11  ;;  %v16069_v43 = vsub.f32 %v15851_v14, %v16068_v38  ;;  %v12744_v11 = vpop.eup %8584  ;;  %8596 = vpow2.f32 %v3806_v58  ;;  %v16073_v14 = vsub.f32 %v15855_v39, %v12226_v50 }
 0x522   : >> { %v12735_v22 = vpop.xlane.xlu0 %3560  ;;  %16071 = vst [vmem:[#allocation137_spill] sm:$0xff] %v12744_v11  ;;  %v12748_v57 = vpop.eup %8586  ;;  %v4156_v58 = vsel %vm3213_vm5, %v12744_v11, 0.0  ;;  %v16082_v11 = vld [vmem:[#allocation143_spill] sm:$0xff] }
 0x523   : >> { %v3844_v32 = vmul.f32 1.442695, %v16069_v43  ;;  %16072 = vst [vmem:[#allocation82_spill] sm:$0xff] %v12748_v57  ;;  %v3850_v21 = vmul.f32 1.442695, %v16073_v14  ;;  %v16074_v43 = vld [vmem:[#allocation145_spill] sm:$0xff] }
 0x524   : >> { %4091 = vadd.xlane.f32.xlu1 %v4090_v29  ;;  %v16075_v29 = vsub.f32 %v15857_v59, %v12233_v33  ;;  %v4099_v50 = vsel %vm3213_vm5, %v12748_v57, 0.0  ;;  %v16079_v33 = vsub.f32 %v15860_v62, %v12246_v18 }
 0x525   : >> { %v12750_v56 = vpop.xlane.xlu1 %3569  ;;  %4148 = vadd.xlane.f32.xlu0 %v4147_v44  ;;  %8598 = vpow2.f32 %v3844_v32  ;;  %v12766_v44 = vpop.eup %8588  ;;  %v16080_v32 = vld [vmem:[#allocation152_spill] sm:$0xff] }
 0x526   : >> { %v12757_v63 = vpop.xlane.xlu0 %3512  ;;  %v3812_v10 = vmul.f32 1.442695, %v16075_v29  ;;  %16077 = vst [vmem:[#allocation144_spill] sm:$0xff] %v12766_v44  ;;  %8600 = vpow2.f32 %v3850_v21  ;;  %v3818_v59 = vmul.f32 1.442695, %v16079_v33  ;;  %v4108_v21 = vsel %vm3213_vm5, %v12766_v44, 0.0 }
 0x527   : >> { %v12770_v39 = vpop.eup %8590  ;;  %v16088_v44 = vld [vmem:[#allocation150_spill] sm:$0xff] }
 0x528   : >> { %4157 = vadd.xlane.f32.xlu1 %v4156_v58  ;;  %16078 = vst [vmem:[#allocation86_spill] sm:$0xff] %v12770_v39  ;;  %8602 = vpow2.f32 %v3812_v10  ;;  %v16081_v58 = vsub.f32 %v15862_v9, %v12253_v4  ;;  %v4141_v18 = vsel %vm3213_vm5, %v12770_v39, 0.0  ;;  %v16085_v9 = vsub.f32 %v15866_v30, %v12266_v46  ;;  %v16086_v10 = vld [vmem:[#allocation147_spill] sm:$0xff] }
 0x529   : >> { %v12772_v14 = vpop.xlane.xlu1 %3521  ;;  %4100 = vadd.xlane.f32.xlu0 %v4099_v50  ;;  %v12788_v50 = vpop.eup %8592  ;;  %8604 = vpow2.f32 %v3818_v59 }
 0x52a   : >> { %v12779_v24 = vpop.xlane.xlu0 %3554  ;;  %v3840_v38 = vmul.f32 1.442695, %v16081_v58  ;;  %16083 = vst [vmem:[#allocation135_spill] sm:$0xff] %v12788_v50  ;;  %v12792_v62 = vpop.eup %8594  ;;  %v3846_v4 = vmul.f32 1.442695, %v16085_v9  ;;  %v4150_v59 = vsel %vm3213_vm5, %v12788_v50, 0.0 }
 0x52b   : >> { %16084 = vst [vmem:[#allocation139_spill] sm:$0xff] %v12792_v62  ;;  %v4093_v46 = vsel %vm3213_vm5, %v12792_v62, 0.0 }
 0x52c   : >> { %4109 = vadd.xlane.f32.xlu1 %v4108_v21  ;;  %8606 = vpow2.f32 %v3840_v38  ;;  %v16087_v21 = vsub.f32 %v15868_v5, %v12273_v8  ;;  %v16092_v8 = vsub.f32 %v15872_v40, %v12288_v45  ;;  %v16093_v38 = vld [vmem:[#allocation154_spill] sm:$0xff] }
 0x52d   : >> { %v12794_v33 = vpop.xlane.xlu1 %3563  ;;  %4142 = vadd.xlane.f32.xlu0 %v4141_v18  ;;  %v12810_v18 = vpop.eup %8596  ;;  %8608 = vpow2.f32 %v3846_v4 }
 0x52e   : >> { %v12801_v57 = vpop.xlane.xlu0 %3506  ;;  %v3808_v29 = vmul.f32 1.442695, %v16087_v21  ;;  %16089 = vst [vmem:[#allocation142_spill] sm:$0xff] %v12810_v18  ;;  %v3814_v5 = vmul.f32 1.442695, %v16092_v8  ;;  %v4102_v4 = vsel %vm3213_vm5, %v12810_v18, 0.0 }
 0x52f   : >> { %v12814_v30 = vpop.eup %8598  ;;  %v16105_v18 = vld [vmem:[#allocation102_spill] sm:$0xff] }
 0x530   : >> { %4151 = vadd.xlane.f32.xlu1 %v4150_v59  ;;  %16090 = vst [vmem:[#allocation146_spill] sm:$0xff] %v12814_v30  ;;  %8610 = vpow2.f32 %v3808_v29  ;;  %v16095_v59 = vsub.f32 %v11659_v15, %v12295_v55  ;;  %v4159_v45 = vsel %vm3213_vm5, %v12814_v30, 0.0  ;;  %v16100_v15 = vld [vmem:[#allocation97_spill] sm:$0xff] }
 0x531   : >> { %v12816_v9 = vpop.xlane.xlu1 %3515  ;;  %4094 = vadd.xlane.f32.xlu0 %v4093_v46  ;;  %v12832_v46 = vpop.eup %8600  ;;  %8612 = vpow2.f32 %v3814_v5  ;;  %v16101_v55 = vsub.f32 %v11671_v47, %v16100_v15 }
 0x532   : >> { %16091 = vst [vmem:[#allocation91_spill] sm:$0xff] %v12816_v9  ;;  %v12823_v39 = vpop.xlane.xlu0 %3572  ;;  %v3852_v58 = vmul.f32 1.442695, %v16095_v59  ;;  %16097 = vst [vmem:[#allocation145_spill] sm:$0xff] %v12832_v46  ;;  %v12836_v40 = vpop.eup %8602  ;;  %v16102_v59 = vld [vmem:[#allocation153_spill] sm:$0xff]  ;;  %v4168_v5 = vsel %vm3213_vm5, %v12832_v46, 0.0 }
 0x533   : >> { %16094 = vst [vmem:[#allocation141_spill] sm:$0xff] %v12823_v39  ;;  %16098 = vst [vmem:[#allocation149_spill] sm:$0xff] %v12836_v40  ;;  %v3890_v29 = vmul.f32 1.442695, %v16101_v55  ;;  %v4111_v47 = vsel %vm3213_vm5, %v12836_v40, 0.0  ;;  %v16115_v46 = vld [vmem:[#allocation101_spill] sm:$0xff] }
 0x534   : >> { %4103 = vadd.xlane.f32.xlu1 %v4102_v4  ;;  %8614 = vpow2.f32 %v3852_v58  ;;  %v16104_v4 = vld [vmem:[#allocation105_spill] sm:$0xff]  ;;  %v16125_v9 = vld [vmem:[#allocation59_spill] sm:$0xff] }
 0x535   : >> { %v12838_v8 = vpop.xlane.xlu1 %3581  ;;  %4160 = vadd.xlane.f32.xlu0 %v4159_v45  ;;  %v16106_v39 = vsub.f32 %v16104_v4, %v16105_v18  ;;  %v12854_v45 = vpop.eup %8604  ;;  %8616 = vpow2.f32 %v3890_v29  ;;  %v16112_v4 = vld [vmem:[#allocation160_spill] sm:$0xff] }
 0x536   : >> { %16099 = vst [vmem:[#allocation152_spill] sm:$0xff] %v12838_v8  ;;  %v12845_v21 = vpop.xlane.xlu0 %3524  ;;  %16108 = vst [vmem:[#allocation147_spill] sm:$0xff] %v12854_v45  ;;  %v12858_v15 = vpop.eup %8606  ;;  %v4120_v29 = vsel %vm3213_vm5, %v12854_v45, 0.0 }
 0x537   : >> { %16103 = vst [vmem:[#allocation143_spill] sm:$0xff] %v12845_v21  ;;  %v3820_v30 = vmul.f32 1.442695, %v16106_v39  ;;  %16109 = vst [vmem:[#allocation150_spill] sm:$0xff] %v12858_v15  ;;  %v16110_v39 = vld [vmem:[#allocation99_spill] sm:$0xff] }
 0x538   : >> { %4169 = vadd.xlane.f32.xlu1 %v4168_v5  ;;  %v16111_v58 = vsub.f32 %v15889_v16, %v16110_v39  ;;  %v16114_v5 = vld [vmem:[#allocation100_spill] sm:$0xff]  ;;  %v4153_v16 = vsel %vm3213_vm5, %v12858_v15, 0.0 }
 0x539   : >> { %v12860_v55 = vpop.xlane.xlu1 %3533  ;;  %4112 = vadd.xlane.f32.xlu0 %v4111_v47  ;;  %8618 = vpow2.f32 %v3820_v30  ;;  %v16116_v21 = vsub.f32 %v16114_v5, %v16115_v46  ;;  %v12876_v47 = vpop.eup %8608  ;;  %v16121_v30 = vsub.f32 %v15899_v0, %v12354_v41  ;;  %v16122_v46 = vld [vmem:[#allocation155_spill] sm:$0xff] }
 0x53a   : >> { %v3858_v18 = vmul.f32 1.442695, %v16111_v58  ;;  %v12867_v62 = vpop.xlane.xlu0 %3566  ;;  %16118 = vst [vmem:[#allocation97_spill] sm:$0xff] %v12876_v47  ;;  %v12880_v39 = vpop.eup %8610 }
 0x53b   : >> { %16113 = vst [vmem:[#allocation154_spill] sm:$0xff] %v12867_v62  ;;  %v3848_v40 = vmul.f32 1.442695, %v16116_v21  ;;  %16119 = vst [vmem:[#allocation153_spill] sm:$0xff] %v12880_v39  ;;  %v3886_v21 = vmul.f32 1.442695, %v16121_v30 }
 0x53c   : >> { %4121 = vadd.xlane.f32.xlu1 %v4120_v29  ;;  %8620 = vpow2.f32 %v3858_v18  ;;  %v16124_v29 = vld [vmem:[#allocation109_spill] sm:$0xff]  ;;  %v4162_v18 = vsel %vm3213_vm5, %v12876_v47, 0.0  ;;  %v4105_v41 = vsel %vm3213_vm5, %v12880_v39, 0.0 }
 0x53d   : >> { %v12882_v58 = vpop.xlane.xlu1 %3575  ;;  %4154 = vadd.xlane.f32.xlu0 %v4153_v16  ;;  %8622 = vpow2.f32 %v3848_v40  ;;  %v16126_v45 = vsub.f32 %v16124_v29, %v16125_v9  ;;  %v12898_v16 = vpop.eup %8612  ;;  %v16131_v9 = vld [vmem:[#allocation54_spill] sm:$0xff]  ;;  %v16136_v47 = vld [vmem:[#allocation173_spill] sm:$0xff] }
 0x53e   : >> { %16120 = vst [vmem:[#allocation105_spill] sm:$0xff] %v12882_v58  ;;  %v12889_v8 = vpop.xlane.xlu0 %3518  ;;  %16128 = vst [vmem:[#allocation99_spill] sm:$0xff] %v12898_v16  ;;  %v12902_v0 = vpop.eup %8614  ;;  %8624 = vpow2.f32 %v3886_v21  ;;  %v16132_v40 = vsub.f32 %v15910_v60, %v16131_v9  ;;  %v4114_v21 = vsel %vm3213_vm5, %v12898_v16, 0.0  ;;  %v16145_v58 = vld [vmem:[#allocation161_spill] sm:$0xff] }
 0x53f   : >> { %16123 = vst [vmem:[#allocation102_spill] sm:$0xff] %v12889_v8  ;;  %v3816_v15 = vmul.f32 1.442695, %v16126_v45  ;;  %16129 = vst [vmem:[#allocation160_spill] sm:$0xff] %v12902_v0  ;;  %v4171_v60 = vsel %vm3213_vm5, %v12902_v0, 0.0  ;;  %v16168_v29 = vld [vmem:[#allocation69_spill] sm:$0xff] }
 0x540   : >> { %4163 = vadd.xlane.f32.xlu1 %v4162_v18  ;;  %v3854_v45 = vmul.f32 1.442695, %v16132_v40  ;;  %v16135_v18 = vld [vmem:[#allocation104_spill] sm:$0xff] }
 0x541   : >> { %v12904_v30 = vpop.xlane.xlu1 %3527  ;;  %4106 = vadd.xlane.f32.xlu0 %v4105_v41  ;;  %8626 = vpow2.f32 %v3816_v15  ;;  %v16137_v8 = vsub.f32 %v16135_v18, %v16136_v47  ;;  %v12920_v41 = vpop.eup %8616  ;;  %v16142_v15 = vld [vmem:[#allocation106_spill] sm:$0xff] }
 0x542   : >> { %16130 = vst [vmem:[#allocation100_spill] sm:$0xff] %v12904_v30  ;;  %v12911_v5 = vpop.xlane.xlu0 %3584  ;;  %16139 = vst [vmem:[#allocation155_spill] sm:$0xff] %v12920_v41  ;;  %8628 = vpow2.f32 %v3854_v45  ;;  %v4228_v45 = vsel %vm3213_vm5, %v12920_v41, 0.0  ;;  %v16158_v41 = vld [vmem:[#allocation58_spill] sm:$0xff]  ;;  %v16188_v30 = vld [vmem:[#allocation121_spill] sm:$0xff] }
 0x543   : >> { %16134 = vst [vmem:[#allocation101_spill] sm:$0xff] %v12911_v5  ;;  %v3892_v39 = vmul.f32 1.442695, %v16137_v8  ;;  %v12924_v9 = vpop.eup %8618  ;;  %v16143_v8 = vld [vmem:[#allocation57_spill] sm:$0xff]  ;;  %v16148_v5 = vld [vmem:[#allocation56_spill] sm:$0xff] }
 0x544   : >> { %4115 = vadd.xlane.f32.xlu1 %v4114_v21  ;;  %16140 = vst [vmem:[#allocation109_spill] sm:$0xff] %v12924_v9  ;;  %v16144_v47 = vsub.f32 %v16142_v15, %v16143_v8  ;;  %v16147_v21 = vld [vmem:[#allocation113_spill] sm:$0xff]  ;;  %v4123_v15 = vsel %vm3213_vm5, %v12924_v9, 0.0 }
 0x545   : >> { %v12926_v40 = vpop.xlane.xlu1 %3593  ;;  %4172 = vadd.xlane.f32.xlu0 %v4171_v60  ;;  %8630 = vpow2.f32 %v3892_v39  ;;  %v16149_v62 = vsub.f32 %v16147_v21, %v16148_v5  ;;  %v16155_v21 = vld [vmem:[#allocation168_spill] sm:$0xff] }
 0x546   : >> { %16141 = vst [vmem:[#allocation59_spill] sm:$0xff] %v12926_v40  ;;  %v3898_v18 = vmul.f32 1.442695, %v16144_v47  ;;  %v12933_v16 = vpop.xlane.xlu0 %3536  ;;  %v12942_v60 = vpop.eup %8620 }
 0x547   : >> { %16146 = vst [vmem:[#allocation54_spill] sm:$0xff] %v12933_v16  ;;  %v3860_v0 = vmul.f32 1.442695, %v16149_v62  ;;  %16151 = vst [vmem:[#allocation104_spill] sm:$0xff] %v12942_v60  ;;  %v12946_v8 = vpop.eup %8622  ;;  %v16153_v62 = vld [vmem:[#allocation61_spill] sm:$0xff] }
 0x548   : >> { %4229 = vadd.xlane.f32.xlu1 %v4228_v45  ;;  %16152 = vst [vmem:[#allocation173_spill] sm:$0xff] %v12946_v8  ;;  %8632 = vpow2.f32 %v3898_v18  ;;  %v16154_v39 = vsub.f32 %v15932_v34, %v16153_v62  ;;  %v16157_v45 = vld [vmem:[#allocation108_spill] sm:$0xff]  ;;  %v4180_v18 = vsel %vm3213_vm5, %v12942_v60, 0.0  ;;  %v4165_v34 = vsel %vm3213_vm5, %v12946_v8, 0.0 }
 0x549   : >> { %v12948_v47 = vpop.xlane.xlu1 %3545  ;;  %4124 = vadd.xlane.f32.xlu0 %v4123_v15  ;;  %8634 = vpow2.f32 %v3860_v0  ;;  %v16159_v16 = vsub.f32 %v16157_v45, %v16158_v41  ;;  %v12964_v15 = vpop.eup %8624 }
 0x54a   : >> { %v3866_v5 = vmul.f32 1.442695, %v16154_v39  ;;  %v12955_v50 = vpop.xlane.xlu0 %3578  ;;  %16161 = vst [vmem:[#allocation57_spill] sm:$0xff] %v12964_v15 }
 0x54b   : >> { %16156 = vst [vmem:[#allocation106_spill] sm:$0xff] %v12955_v50  ;;  %v3888_v9 = vmul.f32 1.442695, %v16159_v16  ;;  %v12968_v62 = vpop.eup %8626  ;;  %v16164_v16 = vsub.f32 %v15942_v51, %v12442_v3 }
 0x54c   : >> { %4181 = vadd.xlane.f32.xlu1 %v4180_v18  ;;  %16162 = vst [vmem:[#allocation161_spill] sm:$0xff] %v12968_v62  ;;  %8636 = vpow2.f32 %v3866_v5  ;;  %v16167_v18 = vld [vmem:[#allocation115_spill] sm:$0xff]  ;;  %v4222_v5 = vsel %vm3213_vm5, %v12964_v15, 0.0  ;;  %v4117_v3 = vsel %vm3213_vm5, %v12968_v62, 0.0  ;;  %v16179_v15 = vld [vmem:[#allocation177_spill] sm:$0xff] }
 0x54d   : >> { %v12970_v39 = vpop.xlane.xlu1 %3587  ;;  %4166 = vadd.xlane.f32.xlu0 %v4165_v34  ;;  %v3894_v0 = vmul.f32 1.442695, %v16164_v16  ;;  %8638 = vpow2.f32 %v3888_v9  ;;  %v16169_v60 = vsub.f32 %v16167_v18, %v16168_v29  ;;  %v12986_v34 = vpop.eup %8628  ;;  %v16174_v29 = vld [vmem:[#allocation60_spill] sm:$0xff] }
 0x54e   : >> { %16163 = vst [vmem:[#allocation113_spill] sm:$0xff] %v12970_v39  ;;  %v12977_v40 = vpop.xlane.xlu0 %3530  ;;  %16171 = vst [vmem:[#allocation61_spill] sm:$0xff] %v12986_v34  ;;  %v16175_v9 = vsub.f32 %v15953_v35, %v16174_v29 }
 0x54f   : >> { %16166 = vst [vmem:[#allocation56_spill] sm:$0xff] %v12977_v40  ;;  %v3856_v8 = vmul.f32 1.442695, %v16169_v60  ;;  %v12990_v51 = vpop.eup %8630  ;;  %8640 = vpow2.f32 %v3894_v0  ;;  %v4174_v0 = vsel %vm3213_vm5, %v12986_v34, 0.0  ;;  %v16189_v34 = vld [vmem:[#allocation66_spill] sm:$0xff] }
 0x550   : >> { %4223 = vadd.xlane.f32.xlu1 %v4222_v5  ;;  %16172 = vst [vmem:[#allocation168_spill] sm:$0xff] %v12990_v51  ;;  %v3862_v60 = vmul.f32 1.442695, %v16175_v9  ;;  %v16178_v5 = vld [vmem:[#allocation112_spill] sm:$0xff]  ;;  %v4231_v35 = vsel %vm3213_vm5, %v12990_v51, 0.0 }
 0x551   : >> { %v12992_v16 = vpop.xlane.xlu1 %3539  ;;  %4118 = vadd.xlane.f32.xlu0 %v4117_v3  ;;  %8642 = vpow2.f32 %v3856_v8  ;;  %v16180_v40 = vsub.f32 %v16178_v5, %v16179_v15  ;;  %v16184_v8 = vld [vmem:[#allocation116_spill] sm:$0xff] }
 0x552   : >> { %16173 = vst [vmem:[#allocation108_spill] sm:$0xff] %v12992_v16  ;;  %v12999_v45 = vpop.xlane.xlu0 %3596  ;;  %v13008_v3 = vpop.eup %8632  ;;  %8644 = vpow2.f32 %v3862_v60 }
 0x553   : >> { %16177 = vst [vmem:[#allocation58_spill] sm:$0xff] %v12999_v45  ;;  %v3900_v62 = vmul.f32 1.442695, %v16180_v40  ;;  %16182 = vst [vmem:[#allocation115_spill] sm:$0xff] %v13008_v3  ;;  %v13012_v29 = vpop.eup %8634  ;;  %v16185_v40 = vld [vmem:[#allocation67_spill] sm:$0xff]  ;;  %v16190_v45 = vsub.f32 %v16188_v30, %v16189_v34  ;;  %v4240_v16 = vsel %vm3213_vm5, %v13008_v3, 0.0 }
 0x554   : >> { %4175 = vadd.xlane.f32.xlu1 %v4174_v0  ;;  %16183 = vst [vmem:[#allocation69_spill] sm:$0xff] %v13012_v29  ;;  %v16186_v15 = vsub.f32 %v16184_v8, %v16185_v40  ;;  %v4183_v60 = vsel %vm3213_vm5, %v13012_v29, 0.0  ;;  %v16194_v30 = vld [vmem:[#allocation73_spill] sm:$0xff]  ;;  %v16197_v40 = vld [vmem:[#allocation114_spill] sm:$0xff] }
 0x555   : >> { %v13014_v9 = vpop.xlane.xlu1 %4037  ;;  %4232 = vadd.xlane.f32.xlu0 %v4231_v35  ;;  %8646 = vpow2.f32 %v3900_v62  ;;  %v3868_v0 = vmul.f32 1.442695, %v16190_v45  ;;  %v16195_v62 = vsub.f32 %v15975_v19, %v16194_v30  ;;  %v16204_v30 = vld [vmem:[#allocation123_spill] sm:$0xff]  ;;  %v16207_v29 = vld [vmem:[#allocation70_spill] sm:$0xff] }
 0x556   : >> { %v3906_v5 = vmul.f32 1.442695, %v16186_v15  ;;  %v13019_v39 = vpop.xlane.xlu0 %3548  ;;  %v13028_v18 = vpop.eup %8636  ;;  %v16198_v15 = vld [vmem:[#allocation68_spill] sm:$0xff] }
 0x557   : >> { %16187 = vst [vmem:[#allocation60_spill] sm:$0xff] %v13019_v39  ;;  %16192 = vst [vmem:[#allocation112_spill] sm:$0xff] %v13028_v18  ;;  %v13032_v35 = vpop.eup %8638  ;;  %v3874_v45 = vmul.f32 1.442695, %v16195_v62  ;;  %v16199_v51 = vsub.f32 %v16197_v40, %v16198_v15  ;;  %v4192_v39 = vsel %vm3213_vm5, %v13028_v18, 0.0  ;;  %v16208_v18 = vsub.f32 %v15996_v26, %v16207_v29 }
 0x558   : >> { %4241 = vadd.xlane.f32.xlu1 %v4240_v16  ;;  %16193 = vst [vmem:[#allocation177_spill] sm:$0xff] %v13032_v35  ;;  %8648 = vpow2.f32 %v3906_v5  ;;  %v16202_v5 = vsub.f32 %v15985_v49, %v12530_v27  ;;  %v16210_v27 = vld [vmem:[#allocation120_spill] sm:$0xff]  ;;  %v16211_v49 = vld [vmem:[#allocation181_spill] sm:$0xff] }
 0x559   : >> { %v13034_v8 = vpop.xlane.xlu1 %3989  ;;  %4184 = vadd.xlane.f32.xlu0 %v4183_v60  ;;  %8650 = vpow2.f32 %v3868_v0  ;;  %v3896_v16 = vmul.f32 1.442695, %v16199_v51  ;;  %v13048_v50 = vpop.eup %8640  ;;  %v4225_v0 = vsel %vm3213_vm5, %v13032_v35, 0.0  ;;  %v16205_v51 = vld [vmem:[#allocation79_spill] sm:$0xff] }
 0x55a   : >> { %v13039_v34 = vpop.xlane.xlu0 %3590  ;;  %16201 = vst [vmem:[#allocation67_spill] sm:$0xff] %v13048_v50  ;;  %v3902_v19 = vmul.f32 1.442695, %v16202_v5  ;;  %v16206_v62 = vsub.f32 %v16204_v30, %v16205_v51  ;;  %8652 = vpow2.f32 %v3874_v45  ;;  %v16213_v35 = vld [vmem:[#allocation171_spill] sm:$0xff]  ;;  %v4234_v30 = vsel %vm3213_vm5, %v13048_v50, 0.0  ;;  %v16214_v45 = vld [vmem:[#allocation129_spill] sm:$0xff] }
 0x55b   : >> { %16196 = vst [vmem:[#allocation116_spill] sm:$0xff] %v13039_v34  ;;  %v13055_v60 = vpop.eup %8642  ;;  %v3870_v34 = vmul.f32 1.442695, %v16208_v18  ;;  %8654 = vpow2.f32 %v3896_v16 }
 0x55c   : >> { %4193 = vadd.xlane.f32.xlu1 %v4192_v39  ;;  %16203 = vst [vmem:[#allocation121_spill] sm:$0xff] %v13055_v60  ;;  %v3864_v40 = vmul.f32 1.442695, %v16206_v62  ;;  %v16212_v39 = vsub.f32 %v16210_v27, %v16211_v49  ;;  %v13072_v51 = vpop.eup %8644  ;;  %8656 = vpow2.f32 %v3902_v19  ;;  %v4177_v29 = vsel %vm3213_vm5, %v13055_v60, 0.0  ;;  %v16217_v62 = vld [vmem:[#allocation132_spill] sm:$0xff] }
 0x55d   : >> { %v4032_v15 = vpop.xlane.xlu1 %4031  ;;  %4226 = vadd.xlane.f32.xlu0 %v4225_v0  ;;  %v16215_v0 = vld [vmem:[#allocation77_spill] sm:$0xff]  ;;  %v16218_v27 = vld [vmem:[#allocation72_spill] sm:$0xff]  ;;  %v16220_v19 = vsub.f32 %v16017_v48, %v12596_v31 }
 0x55e   : >> { %v13063_v3 = vpop.xlane.xlu0 %3542  ;;  %v3908_v5 = vmul.f32 1.442695, %v16212_v39  ;;  %v16216_v26 = vsub.f32 %v16214_v45, %v16215_v0  ;;  %8658 = vpow2.f32 %v3864_v40  ;;  %v16219_v49 = vsub.f32 %v16217_v62, %v16218_v27  ;;  %v16222_v0 = vld [vmem:[#allocation81_spill] sm:$0xff] }
 0x55f   : >> { %16209 = vst [vmem:[#allocation66_spill] sm:$0xff] %v13063_v3  ;;  %v13079_v16 = vpop.eup %8646  ;;  %8660 = vpow2.f32 %v3870_v34  ;;  %v3882_v50 = vmul.f32 1.442695, %v16220_v19  ;;  %v4186_v40 = vsel %vm3213_vm5, %v13072_v51, 0.0 }
 0x560   : >> { %v3914_v18 = vmul.f32 1.442695, %v16216_v26  ;;  %4235 = vadd.xlane.f32.xlu1 %v4234_v30  ;;  %v3876_v39 = vmul.f32 1.442695, %v16219_v49  ;;  %8662 = vpow2.f32 %v3908_v5  ;;  %v16221_v30 = vld [vmem:[#allocation122_spill] sm:$0xff]  ;;  %v4243_v34 = vsel %vm3213_vm5, %v13079_v16, 0.0 }
 0x561   : >> { %v3984_v41 = vpop.xlane.xlu1 %3983  ;;  %4178 = vadd.xlane.f32.xlu0 %v4177_v29  ;;  %v16223_v26 = vsub.f32 %v16221_v30, %v16222_v0  ;;  %v16228_v30 = vld [vmem:[#allocation78_spill] sm:$0xff] }
 0x562   : >> { %v4041_v45 = vpop.xlane.xlu0 %4040  ;;  %v13092_v3 = vpop.eup %8648  ;;  %8664 = vpow2.f32 %v3914_v18  ;;  %v16229_v0 = vsub.f32 %v16028_v12, %v16228_v30  ;;  %v16234_v12 = vsub.f32 %v16038_v54, %v12640_v2  ;;  %v16236_v54 = vsub.f32 %v16045_v61, %v12662_v52 }
 0x563   : >> { %v3904_v60 = vmul.f32 1.442695, %v16223_v26  ;;  %16224 = vst [vmem:[#allocation73_spill] sm:$0xff] %v13092_v3  ;;  %v13096_v29 = vpop.eup %8650  ;;  %8666 = vpow2.f32 %v3876_v39  ;;  %v4252_v5 = vsel %vm3213_vm5, %v13092_v3, 0.0 }
 0x564   : >> { %4187 = vadd.xlane.f32.xlu1 %v4186_v40  ;;  %8668 = vpow2.f32 %v3882_v50  ;;  %v13102_v62 = vpop.eup %8652  ;;  %v4195_v18 = vsel %vm3213_vm5, %v13096_v29, 0.0  ;;  %v3878_v30 = vmul.f32 1.442695, %v16234_v12  ;;  %v3954_v2 = vmul.f32 1.442695, %v16236_v54 }
 0x565   : >> { %v13098_v48 = vpop.xlane.xlu1 %4049  ;;  %4244 = vadd.xlane.f32.xlu0 %v4243_v34  ;;  %8670 = vpow2.f32 %v3904_v60  ;;  %16225 = vst [vmem:[#allocation114_spill] sm:$0xff] %v13102_v62  ;;  %v13106_v27 = vpop.eup %8654  ;;  %v4204_v19 = vsel %vm3213_vm5, %v13102_v62, 0.0  ;;  %v16232_v34 = vld [vmem:[#allocation87_spill] sm:$0xff] }
 0x566   : >> { %v3993_v31 = vpop.xlane.xlu0 %3992  ;;  %8672 = vrcp.f32 %v4041_v45  ;;  %v13110_v39 = vpop.eup %8656  ;;  %v4237_v26 = vsel %vm3213_vm5, %v13106_v27, 0.0 }
 0x567   : >> { %8674 = vrcp.f32 %v4032_v15  ;;  %16226 = vst [vmem:[#allocation68_spill] sm:$0xff] %v13110_v39  ;;  %v3910_v15 = vmul.f32 1.442695, %v16229_v0  ;;  %v16235_v0 = vsub.f32 %v16041_v37, %v12647_v25  ;;  %v16237_v37 = vld [vmem:[#allocation140_spill] sm:$0xff]  ;;  %v16238_v25 = vld [vmem:[#allocation186_spill] sm:$0xff] }
 0x568   : >> { %4253 = vadd.xlane.f32.xlu1 %v4252_v5  ;;  %8676 = vrcp.f32 %v13014_v9  ;;  %v13113_v60 = vpop.eup %8658  ;;  %v16231_v9 = vld [vmem:[#allocation134_spill] sm:$0xff] }
 0x569   : >> { %v13108_v49 = vpop.xlane.xlu1 %4001  ;;  %4196 = vadd.xlane.f32.xlu0 %v4195_v18  ;;  %v13117_v45 = vpop.eup %8660  ;;  %v16233_v5 = vsub.f32 %v16231_v9, %v16232_v34  ;;  %v3916_v3 = vmul.f32 1.442695, %v16235_v0  ;;  %v16239_v34 = vsub.f32 %v16237_v37, %v16238_v25 }
 0x56a   : >> { %v4035_v50 = vpop.xlane.xlu0 %4034  ;;  %16227 = vst [vmem:[#allocation123_spill] sm:$0xff] %v13117_v45  ;;  %v13124_v40 = vpop.eup %8662 }
 0x56b   : >> { %8678 = vrcp.f32 %v4035_v50  ;;  %16230 = vst [vmem:[#allocation79_spill] sm:$0xff] %v13124_v40  ;;  %v3872_v18 = vmul.f32 1.442695, %v16233_v5  ;;  %v3884_v5 = vmul.f32 1.442695, %v16239_v34 }
 0x56c   : >> { %8680 = vrcp.f32 %v3993_v31  ;;  %4205 = vadd.xlane.f32.xlu1 %v4204_v19  ;;  %v13129_v62 = vpop.eup %8664 }
 0x56d   : >> { %8682 = vrcp.f32 %v3984_v41  ;;  %v4044_v50 = vpop.xlane.xlu1 %4043  ;;  %4238 = vadd.xlane.f32.xlu0 %v4237_v26  ;;  %v13135_v19 = vpop.eup %8666  ;;  %v4246_v41 = vsel %vm3213_vm5, %v13110_v39, 0.0  ;;  %v4264_v39 = vsel %vm3213_vm5, %v13129_v62, 0.0 }
 0x56e   : >> { %8684 = vrcp.f32 %v13034_v8  ;;  %v3987_v31 = vpop.xlane.xlu0 %3986  ;;  %v13142_v26 = vpop.eup %8668  ;;  %v4189_v8 = vsel %vm3213_vm5, %v13113_v60, 0.0 }
 0x56f   : >> { %8686 = vrcp.f32 %v3987_v31  ;;  %v13149_v9 = vpop.eup %8670 }
 0x570   : >> { %8688 = vpow2.f32 %v3910_v15  ;;  %4247 = vadd.xlane.f32.xlu1 %v4246_v41  ;;  %v8673_v31 = vpop.eup %8672  ;;  %v16240_v15 = vsub.f32 %v16053_v17, %v12684_v42  ;;  %v16241_v41 = vsub.f32 %v16056_v23, %v12691_v20  ;;  %v16242_v42 = vld [vmem:[#allocation95_spill] sm:$0xff]  ;;  %v16243_v20 = vld [vmem:[#allocation88_spill] sm:$0xff] }
 0x571   : >> { %8690 = vpow2.f32 %v3872_v18  ;;  %v3996_v12 = vpop.xlane.xlu1 %3995  ;;  %4190 = vadd.xlane.f32.xlu0 %v4189_v8  ;;  %v8675_v0 = vpop.eup %8674  ;;  %v4198_v18 = vsel %vm3213_vm5, %v13117_v45, 0.0  ;;  %v4513_v17 = vmul.f32 %v8673_v31, %v16242_v42  ;;  %v4207_v31 = vsel %vm3213_vm5, %v13135_v19, 0.0 }
 0x572   : >> { %8692 = vpow2.f32 %v3878_v30  ;;  %v3922_v52 = vmul.f32 1.442695, %v16240_v15  ;;  %v4053_v61 = vpop.xlane.xlu0 %4052  ;;  %v3912_v54 = vmul.f32 1.442695, %v16241_v41  ;;  %v8677_v37 = vpop.eup %8676  ;;  %v4255_v30 = vsel %vm3213_vm5, %v13124_v40, 0.0  ;;  %v16244_v15 = vld [vmem:[#allocation98_spill] sm:$0xff] }
 0x573   : >> { %8694 = vpow2.f32 %v3916_v3  ;;  %v4510_v34 = vmul.f32 %v8675_v0, %v16243_v20  ;;  %v16246_v40 = vld [vmem:[#allocation96_spill] sm:$0xff]  ;;  %v16248_v20 = vld [vmem:[#allocation53_spill] sm:$0xff] }
 0x574   : >> { %8696 = vpow2.f32 %v3954_v2  ;;  %4199 = vadd.xlane.f32.xlu1 %v4198_v18  ;;  %v16245_v2 = vld [vmem:[#allocation94_spill] sm:$0xff] }
 0x575   : >> { %v8679_v8 = vpop.eup %8678  ;;  %8698 = vpow2.f32 %v3884_v5  ;;  %v13165_v25 = vpop.xlane.xlu1 %4061  ;;  %4256 = vadd.xlane.f32.xlu0 %v4255_v30  ;;  %v4512_v18 = vmul.f32 %v8677_v37, %v16245_v2  ;;  %v4249_v2 = vsel %vm3213_vm5, %v13149_v9, 0.0 }
 0x576   : >> { %v8681_v3 = vpop.eup %8680  ;;  %8700 = vpow2.f32 %v3922_v52  ;;  %v4005_v23 = vpop.xlane.xlu0 %4004  ;;  %v4511_v41 = vmul.f32 %v8679_v8, %v16244_v15 }
 0x577   : >> { %v8683_v45 = vpop.eup %8682  ;;  %8702 = vpow2.f32 %v3912_v54  ;;  %v4631_v42 = vpack.c.bf16 %v4513_v17, %v4512_v18  ;;  %v4497_v0 = vmul.f32 %v8681_v3, %v16246_v40  ;;  %v16249_v17 = vld [vmem:[#allocation84_spill] sm:$0xff]  ;;  %v4216_v40 = vsel %vm3213_vm5, %v13142_v26, 0.0 }
 0x578   : >> { %v8685_v5 = vpop.eup %8684  ;;  %8704 = vrcp.f32 %v4053_v61  ;;  %4265 = vadd.xlane.f32.xlu1 %v4264_v39  ;;  %v4630_v30 = vpack.c.bf16 %v4511_v41, %v4510_v34  ;;  %v16247_v39 = vld [vmem:[#allocation93_spill] sm:$0xff] }
 0x579   : >> { %v8687_v52 = vpop.eup %8686  ;;  %8706 = vrcp.f32 %v4044_v50  ;;  %v13175_v8 = vpop.xlane.xlu1 %4013  ;;  %4208 = vadd.xlane.f32.xlu0 %v4207_v31  ;;  %v4494_v37 = vmul.f32 %v8683_v45, %v16247_v39  ;;  %v4496_v41 = vmul.f32 %v8685_v5, %v16249_v17  ;;  %v16251_v45 = vld [vmem:[#allocation125_spill] sm:$0xff]  ;;  %v16252_v31 = vld [vmem:[#allocation138_spill] sm:$0xff]  ;;  %v16259_v17 = vsub.f32 %v16076_v1, %v12757_v63 }
 0x57a   : >> { %v13177_v54 = vpop.eup %8688  ;;  %8708 = vrcp.f32 %v13098_v48  ;;  %8075 = vmatprep.mubr.msk.bf16.mxu0 %vm3213_vm5, %v4630_v30  ;;  %v4047_v61 = vpop.xlane.xlu0 %4046  ;;  %v4495_v15 = vmul.f32 %v8687_v52, %v16248_v20  ;;  %v16250_v48 = vsub.f32 %v16060_v6, %v12706_v53  ;;  %v16253_v30 = vsub.f32 %v16063_v7, %v16252_v31 }
 0x57b   : >> { %v13183_v34 = vpop.eup %8690  ;;  %8710 = vrcp.f32 %v4047_v61  ;;  %8076 = vmatmul.mubr.msk.bf16.vlgmr.msra.gmra.mrb[80].mxu0 %vm3213_vm5, %v4631_v42  ;;  %v4623_v42 = vpack.c.bf16 %v4497_v0, %v4496_v41  ;;  %v16254_v61 = vld [vmem:[#allocation127_spill] sm:$0xff]  ;;  %v16256_v7 = vsub.f32 %v16070_v36, %v12735_v22  ;;  %v4258_v0 = vsel %vm3213_vm5, %v13177_v54, 0.0 }
 0x57c   : >> { %v13189_v50 = vpop.eup %8692  ;;  %v3950_v3 = vmul.f32 1.442695, %v16250_v48  ;;  %8712 = vrcp.f32 %v4005_v23  ;;  %8110 = vmatpush3.bf16.msra.mxu0 %v16251_v45  ;;  %4217 = vadd.xlane.f32.xlu1 %v4216_v40  ;;  %v4622_v18 = vpack.c.bf16 %v4495_v15, %v4494_v37  ;;  %v3880_v52 = vmul.f32 1.442695, %v16253_v30  ;;  %v16260_v40 = vld [vmem:[#allocation128_spill] sm:$0xff] }
 0x57d   : >> { %v13197_v5 = vpop.eup %8694  ;;  %8714 = vrcp.f32 %v3996_v12  ;;  %8145 = vmatprep.subr.bf16.mxu0 %v16254_v61  ;;  %v4056_v53 = vpop.xlane.xlu1 %4055  ;;  %4250 = vadd.xlane.f32.xlu0 %v4249_v2  ;;  %v16255_v23 = vsub.f32 %v16067_v13, %v12728_v28  ;;  %v3956_v12 = vmul.f32 1.442695, %v16256_v7  ;;  %v16257_v28 = vsub.f32 %v16074_v43, %v12750_v56 }
 0x57e   : >> { %v13203_v6 = vpop.eup %8696  ;;  %8716 = vrcp.f32 %v13108_v49  ;;  %8057 = vmatprep.mubr.msk.bf16.mxu1 %vm3213_vm5, %v4622_v18  ;;  %v3999_v37 = vpop.xlane.xlu0 %3998  ;;  %v16258_v49 = vld [vmem:[#allocation126_spill] sm:$0xff]  ;;  %v4201_v22 = vsel %vm3213_vm5, %v13183_v34, 0.0  ;;  %v3924_v41 = vmul.f32 1.442695, %v16259_v17  ;;  %v16261_v56 = vsub.f32 %v16080_v32, %v12772_v14  ;;  %v16263_v32 = vld [vmem:[#allocation107_spill] sm:$0xff] }
 0x57f   : >> { %v3918_v39 = vmul.f32 1.442695, %v16255_v23  ;;  %v13210_v20 = vpop.eup %8698  ;;  %8718 = vrcp.f32 %v3999_v37  ;;  %8058 = vmatmul.mubr.msk.bf16.vlgmr.msra.gmra.mrb[64].mxu1 %vm3213_vm5, %v4623_v42  ;;  %v3962_v13 = vmul.f32 1.442695, %v16257_v28  ;;  %v16262_v18 = vsub.f32 %v16082_v11, %v12779_v24  ;;  %v16264_v11 = vld [vmem:[#allocation55_spill] sm:$0xff]  ;;  %v16266_v28 = vld [vmem:[#allocation90_spill] sm:$0xff] }
 0x580   : >> { %v13218_v15 = vpop.eup %8700  ;;  %8720 = vpow2.f32 %v3950_v3  ;;  %8092 = vmatpush3.bf16.msra.mxu1 %v16258_v49  ;;  %4259 = vadd.xlane.f32.xlu1 %v4258_v0  ;;  %v3930_v43 = vmul.f32 1.442695, %v16261_v56  ;;  %v4210_v63 = vsel %vm3213_vm5, %v13189_v50, 0.0  ;;  %v4267_v30 = vsel %vm3213_vm5, %v13197_v5, 0.0  ;;  %v16265_v37 = vld [vmem:[#allocation111_spill] sm:$0xff] }
 0x581   : >> { %v13226_v36 = vpop.eup %8702  ;;  %8722 = vpow2.f32 %v3880_v52  ;;  %8127 = vmatprep.subr.bf16.mxu1 %v16260_v40  ;;  %v4008_v48 = vpop.xlane.xlu1 %4007  ;;  %4202 = vadd.xlane.f32.xlu0 %v4201_v22  ;;  %v3952_v31 = vmul.f32 1.442695, %v16262_v18  ;;  %v4324_v0 = vsel %vm3213_vm5, %v13203_v6, 0.0  ;;  %v4219_v22 = vsel %vm3213_vm5, %v13210_v20, 0.0 }
 0x582   : >> { %v8705_v3 = vpop.eup %8704  ;;  %8724 = vpow2.f32 %v3918_v39  ;;  %v4065_v45 = vpop.xlane.xlu0 %4064 }
 0x583   : >> { %v8707_v2 = vpop.eup %8706  ;;  %8726 = vpow2.f32 %v3956_v12  ;;  %v4517_v42 = vmul.f32 %v8705_v3, %v16263_v32  ;;  %v16270_v32 = vld [vmem:[#allocation92_spill] sm:$0xff] }
 0x584   : >> { %v8709_v1 = vpop.eup %8708  ;;  %8728 = vpow2.f32 %v3962_v13  ;;  %4211 = vadd.xlane.f32.xlu1 %v4210_v63  ;;  %v4514_v39 = vmul.f32 %v8707_v2, %v16264_v11 }
 0x585   : >> { %v8711_v52 = vpop.eup %8710  ;;  %8730 = vpow2.f32 %v3924_v41  ;;  %v13242_v14 = vpop.xlane.xlu1 %4073  ;;  %4268 = vadd.xlane.f32.xlu0 %v4267_v30  ;;  %v4516_v13 = vmul.f32 %v8709_v1, %v16266_v28  ;;  %v16269_v1 = vld [vmem:[#allocation62_spill] sm:$0xff] }
 0x586   : >> { %v8713_v23 = vpop.eup %8712  ;;  %8732 = vpow2.f32 %v3930_v43  ;;  %v4017_v24 = vpop.xlane.xlu0 %4016  ;;  %v4515_v7 = vmul.f32 %v8711_v52, %v16265_v37  ;;  %v16267_v43 = vld [vmem:[#allocation103_spill] sm:$0xff] }
 0x587   : >> { %v8715_v12 = vpop.eup %8714  ;;  %8734 = vpow2.f32 %v3952_v31  ;;  %v4633_v56 = vpack.c.bf16 %v4517_v42, %v4516_v13  ;;  %v4501_v2 = vmul.f32 %v8713_v23, %v16267_v43  ;;  %v16268_v31 = vld [vmem:[#allocation172_spill] sm:$0xff] }
 0x588   : >> { %v8717_v49 = vpop.eup %8716  ;;  %8736 = vrcp.f32 %v4065_v45  ;;  %4325 = vadd.xlane.f32.xlu1 %v4324_v0  ;;  %v4632_v17 = vpack.c.bf16 %v4515_v7, %v4514_v39  ;;  %v4498_v63 = vmul.f32 %v8715_v12, %v16268_v31  ;;  %v4261_v39 = vsel %vm3213_vm5, %v13226_v36, 0.0 }
 0x589   : >> { %v8719_v41 = vpop.eup %8718  ;;  %8738 = vrcp.f32 %v4056_v53  ;;  %v13252_v3 = vpop.xlane.xlu1 %4025  ;;  %4220 = vadd.xlane.f32.xlu0 %v4219_v22  ;;  %v4276_v53 = vsel %vm3213_vm5, %v13218_v15, 0.0  ;;  %v4500_v42 = vmul.f32 %v8717_v49, %v16270_v32  ;;  %v16272_v12 = vsub.f32 %v16088_v44, %v12801_v57  ;;  %v16277_v57 = vld [vmem:[#allocation141_spill] sm:$0xff] }
 0x58a   : >> { %v13255_v18 = vpop.eup %8720  ;;  %8740 = vrcp.f32 %v13165_v25  ;;  %8079 = vmatprep.mubr.msk.bf16.mxu0 %vm3213_vm5, %v4632_v17  ;;  %v4059_v45 = vpop.xlane.xlu0 %4058  ;;  %v4499_v30 = vmul.f32 %v8719_v41, %v16269_v1  ;;  %v16271_v25 = vsub.f32 %v16086_v10, %v12794_v33  ;;  %v16274_v33 = vld [vmem:[#allocation91_spill] sm:$0xff]  ;;  %v16276_v41 = vld [vmem:[#allocation148_spill] sm:$0xff] }
 0x58b   : >> { %v13261_v52 = vpop.eup %8722  ;;  %8742 = vrcp.f32 %v4059_v45  ;;  %8080 = vmatmul.mubr.msk.bf16.gmra.mrb[84].mxu0 %vm3213_vm5, %v4633_v56  ;;  %v3920_v0 = vmul.f32 1.442695, %v16272_v12  ;;  %v4625_v13 = vpack.c.bf16 %v4501_v2, %v4500_v42  ;;  %v16275_v10 = vsub.f32 %v16093_v38, %v16274_v33  ;;  %v16279_v38 = vld [vmem:[#allocation152_spill] sm:$0xff]  ;;  %v16282_v1 = vld [vmem:[#allocation143_spill] sm:$0xff]  ;;  %v16286_v12 = vld [vmem:[#allocation154_spill] sm:$0xff] }
 0x58c   : >> { %v13267_v23 = vpop.eup %8724  ;;  %v3958_v11 = vmul.f32 1.442695, %v16271_v25  ;;  %8744 = vrcp.f32 %v4017_v24  ;;  %4277 = vadd.xlane.f32.xlu1 %v4276_v53  ;;  %v4624_v37 = vpack.c.bf16 %v4499_v30, %v4498_v63  ;;  %v16278_v44 = vsub.f32 %v16276_v41, %v16277_v57  ;;  %v16281_v63 = vld [vmem:[#allocation157_spill] sm:$0xff] }
 0x58d   : >> { %v13274_v7 = vpop.eup %8726  ;;  %8746 = vrcp.f32 %v4008_v48  ;;  %v4068_v28 = vpop.xlane.xlu1 %4067  ;;  %4262 = vadd.xlane.f32.xlu0 %v4261_v39  ;;  %v3926_v24 = vmul.f32 1.442695, %v16275_v10  ;;  %v4318_v56 = vsel %vm3213_vm5, %v13255_v18, 0.0  ;;  %v4213_v45 = vsel %vm3213_vm5, %v13261_v52, 0.0 }
 0x58e   : >> { %v13279_v49 = vpop.eup %8728  ;;  %8748 = vrcp.f32 %v13175_v8  ;;  %8061 = vmatprep.mubr.msk.bf16.mxu1 %vm3213_vm5, %v4624_v37  ;;  %v4011_v22 = vpop.xlane.xlu0 %4010  ;;  %v3964_v48 = vmul.f32 1.442695, %v16278_v44  ;;  %v16280_v8 = vsub.f32 %v16102_v59, %v16279_v38  ;;  %v16283_v30 = vsub.f32 %v16281_v63, %v16282_v1  ;;  %v16285_v37 = vld [vmem:[#allocation151_spill] sm:$0xff]  ;;  %v16291_v63 = vld [vmem:[#allocation174_spill] sm:$0xff] }
 0x58f   : >> { %16273 = vst [vmem:[#allocation70_spill] sm:$0xff] %v13279_v49  ;;  %v13286_v17 = vpop.eup %8730  ;;  %8750 = vrcp.f32 %v4011_v22  ;;  %8062 = vmatmul.mubr.msk.bf16.gmra.mrb[68].mxu1 %vm3213_vm5, %v4625_v13  ;;  %v16284_v25 = vsub.f32 %v16112_v4, %v12860_v55  ;;  %v16287_v13 = vsub.f32 %v16285_v37, %v16286_v12  ;;  %v16288_v4 = vld [vmem:[#allocation117_spill] sm:$0xff]  ;;  %v16290_v38 = vld [vmem:[#allocation119_spill] sm:$0xff]  ;;  %v16292_v37 = vld [vmem:[#allocation110_spill] sm:$0xff] }
 0x590   : >> { %v13294_v43 = vpop.eup %8732  ;;  %8752 = vpow2.f32 %v3958_v11  ;;  %v3970_v2 = vmul.f32 1.442695, %v16280_v8  ;;  %4319 = vadd.xlane.f32.xlu1 %v4318_v56  ;;  %v3932_v53 = vmul.f32 1.442695, %v16283_v30 }
 0x591   : >> { %v13301_v31 = vpop.eup %8734  ;;  %8754 = vpow2.f32 %v3920_v0  ;;  %v4020_v32 = vpop.xlane.xlu1 %4019  ;;  %4214 = vadd.xlane.f32.xlu0 %v4213_v45  ;;  %v3938_v59 = vmul.f32 1.442695, %v16284_v25  ;;  %v3960_v33 = vmul.f32 1.442695, %v16287_v13  ;;  %v4270_v0 = vsel %vm3213_vm5, %v13267_v23, 0.0 }
 0x592   : >> { %v8737_v42 = vpop.eup %8736  ;;  %8756 = vpow2.f32 %v3926_v24  ;;  %v4077_v11 = vpop.xlane.xlu0 %4076  ;;  %v4327_v24 = vsel %vm3213_vm5, %v13274_v7, 0.0 }
 0x593   : >> { %v8739_v39 = vpop.eup %8738  ;;  %8758 = vpow2.f32 %v3964_v48  ;;  %v4521_v41 = vmul.f32 %v8737_v42, %v16288_v4  ;;  %v16289_v48 = vld [vmem:[#allocation64_spill] sm:$0xff]  ;;  %v16295_v4 = vld [vmem:[#allocation175_spill] sm:$0xff] }
 0x594   : >> { %v8741_v10 = vpop.eup %8740  ;;  %8760 = vpow2.f32 %v3970_v2  ;;  %4271 = vadd.xlane.f32.xlu1 %v4270_v0  ;;  %v4518_v56 = vmul.f32 %v8739_v39, %v16289_v48  ;;  %v4336_v2 = vsel %vm3213_vm5, %v13279_v49, 0.0 }
 0x595   : >> { %v8743_v22 = vpop.eup %8742  ;;  %8762 = vpow2.f32 %v3932_v53  ;;  %v13316_v55 = vpop.xlane.xlu1 %4133  ;;  %4328 = vadd.xlane.f32.xlu0 %v4327_v24  ;;  %v4520_v1 = vmul.f32 %v8741_v10, %v16291_v63  ;;  %v4279_v53 = vsel %vm3213_vm5, %v13286_v17, 0.0  ;;  %v16294_v10 = vld [vmem:[#allocation71_spill] sm:$0xff]  ;;  %v16300_v63 = vld [vmem:[#allocation102_spill] sm:$0xff] }
 0x596   : >> { %v8745_v57 = vpop.eup %8744  ;;  %8764 = vpow2.f32 %v3938_v59  ;;  %v4029_v44 = vpop.xlane.xlu0 %4028  ;;  %v4519_v8 = vmul.f32 %v8743_v22, %v16290_v38  ;;  %v4321_v38 = vsel %vm3213_vm5, %v13301_v31, 0.0 }
 0x597   : >> { %v8747_v45 = vpop.eup %8746  ;;  %8766 = vpow2.f32 %v3960_v33  ;;  %v4635_v39 = vpack.c.bf16 %v4521_v41, %v4520_v1  ;;  %v4505_v12 = vmul.f32 %v8745_v57, %v16292_v37  ;;  %v16293_v33 = vld [vmem:[#allocation176_spill] sm:$0xff] }
 0x598   : >> { %v8749_v30 = vpop.eup %8748  ;;  %8768 = vrcp.f32 %v4077_v11  ;;  %4337 = vadd.xlane.f32.xlu1 %v4336_v2  ;;  %v4634_v42 = vpack.c.bf16 %v4519_v8, %v4518_v56  ;;  %v4502_v0 = vmul.f32 %v8747_v45, %v16293_v33  ;;  %v16299_v2 = vld [vmem:[#allocation158_spill] sm:$0xff] }
 0x599   : >> { %v8751_v25 = vpop.eup %8750  ;;  %8770 = vrcp.f32 %v4068_v28  ;;  %v13326_v59 = vpop.xlane.xlu1 %4085  ;;  %4280 = vadd.xlane.f32.xlu0 %v4279_v53  ;;  %v4288_v28 = vsel %vm3213_vm5, %v13294_v43, 0.0  ;;  %v4504_v41 = vmul.f32 %v8749_v30, %v16295_v4  ;;  %v16301_v1 = vsub.f32 %v16299_v2, %v16300_v63 }
 0x59a   : >> { %v13329_v13 = vpop.eup %8752  ;;  %8772 = vrcp.f32 %v13242_v14  ;;  %8083 = vmatprep.mubr.msk.bf16.mxu0 %vm3213_vm5, %v4634_v42  ;;  %v4071_v11 = vpop.xlane.xlu0 %4070  ;;  %v4503_v24 = vmul.f32 %v8751_v25, %v16294_v10  ;;  %v16296_v14 = vld [vmem:[#allocation105_spill] sm:$0xff] }
 0x59b   : >> { %v13335_v22 = vpop.eup %8754  ;;  %8774 = vrcp.f32 %v4071_v11  ;;  %8084 = vmatmul.mubr.msk.bf16.gmra.mrb[88].mxu0 %vm3213_vm5, %v4635_v39  ;;  %v16297_v48 = vsub.f32 %v16122_v46, %v16296_v14  ;;  %v3928_v53 = vmul.f32 1.442695, %v16301_v1  ;;  %v4627_v42 = vpack.c.bf16 %v4505_v12, %v4504_v41  ;;  %v16303_v46 = vld [vmem:[#allocation162_spill] sm:$0xff]  ;;  %v16304_v39 = vld [vmem:[#allocation100_spill] sm:$0xff]  ;;  %v16307_v10 = vld [vmem:[#allocation101_spill] sm:$0xff] }
 0x59c   : >> { %v13341_v57 = vpop.eup %8756  ;;  %8776 = vrcp.f32 %v4029_v44  ;;  %4289 = vadd.xlane.f32.xlu1 %v4288_v28  ;;  %v4626_v8 = vpack.c.bf16 %v4503_v24, %v4502_v0  ;;  %v16305_v44 = vsub.f32 %v16303_v46, %v16304_v39  ;;  %v16306_v0 = vld [vmem:[#allocation156_spill] sm:$0xff]  ;;  %v4330_v12 = vsel %vm3213_vm5, %v13329_v13, 0.0 }
 0x59d   : >> { %v3966_v56 = vmul.f32 1.442695, %v16297_v48  ;;  %v13348_v45 = vpop.eup %8758  ;;  %8778 = vrcp.f32 %v4020_v32  ;;  %v4128_v30 = vpop.xlane.xlu1 %4127  ;;  %4322 = vadd.xlane.f32.xlu0 %v4321_v38  ;;  %v16308_v24 = vsub.f32 %v16306_v0, %v16307_v10  ;;  %v4273_v14 = vsel %vm3213_vm5, %v13335_v22, 0.0  ;;  %v16313_v38 = vld [vmem:[#allocation165_spill] sm:$0xff] }
 0x59e   : >> { %16298 = vst [vmem:[#allocation120_spill] sm:$0xff] %v13348_v45  ;;  %v13353_v25 = vpop.eup %8760  ;;  %v3934_v37 = vmul.f32 1.442695, %v16305_v44  ;;  %8780 = vrcp.f32 %v13252_v3  ;;  %8065 = vmatprep.mubr.msk.bf16.mxu1 %vm3213_vm5, %v4626_v8  ;;  %v4023_v11 = vpop.xlane.xlu0 %4022  ;;  %v16310_v3 = vld [vmem:[#allocation59_spill] sm:$0xff]  ;;  %v16314_v8 = vld [vmem:[#allocation54_spill] sm:$0xff] }
 0x59f   : >> { %16302 = vst [vmem:[#allocation181_spill] sm:$0xff] %v13353_v25  ;;  %v13360_v33 = vpop.eup %8762  ;;  %v3972_v32 = vmul.f32 1.442695, %v16308_v24  ;;  %8782 = vrcp.f32 %v4023_v11  ;;  %8066 = vmatmul.mubr.msk.bf16.gmra.mrb[72].mxu1 %vm3213_vm5, %v4627_v42  ;;  %v16311_v4 = vsub.f32 %v16145_v58, %v16310_v3  ;;  %v16315_v2 = vsub.f32 %v16313_v38, %v16314_v8  ;;  %v16317_v44 = vld [vmem:[#allocation159_spill] sm:$0xff]  ;;  %v16318_v11 = vld [vmem:[#allocation106_spill] sm:$0xff] }
 0x5a0   : >> { %v13368_v28 = vpop.eup %8764  ;;  %8784 = vpow2.f32 %v3966_v56  ;;  %4331 = vadd.xlane.f32.xlu1 %v4330_v12  ;;  %v16316_v56 = vsub.f32 %v16155_v21, %v12948_v47  ;;  %v16319_v0 = vsub.f32 %v16317_v44, %v16318_v11  ;;  %v16320_v21 = vld [vmem:[#allocation124_spill] sm:$0xff]  ;;  %v16322_v8 = vld [vmem:[#allocation130_spill] sm:$0xff] }
 0x5a1   : >> { %16309 = vst [vmem:[#allocation171_spill] sm:$0xff] %v13368_v28  ;;  %v3978_v41 = vmul.f32 1.442695, %v16311_v4  ;;  %v13375_v48 = vpop.eup %8766  ;;  %8786 = vpow2.f32 %v3928_v53  ;;  %v3940_v63 = vmul.f32 1.442695, %v16315_v2  ;;  %v4080_v1 = vpop.xlane.xlu1 %4079  ;;  %4274 = vadd.xlane.f32.xlu0 %v4273_v14  ;;  %v4282_v53 = vsel %vm3213_vm5, %v13341_v57, 0.0 }
 0x5a2   : >> { %16312 = vst [vmem:[#allocation129_spill] sm:$0xff] %v13375_v48  ;;  %v8769_v42 = vpop.eup %8768  ;;  %8788 = vpow2.f32 %v3934_v37  ;;  %v3946_v58 = vmul.f32 1.442695, %v16316_v56  ;;  %v4137_v46 = vpop.xlane.xlu0 %4136  ;;  %v3968_v10 = vmul.f32 1.442695, %v16319_v0  ;;  %v4339_v37 = vsel %vm3213_vm5, %v13348_v45, 0.0 }
 0x5a3   : >> { %v8771_v39 = vpop.eup %8770  ;;  %8790 = vpow2.f32 %v3972_v32  ;;  %v4525_v32 = vmul.f32 %v8769_v42, %v16320_v21  ;;  %v16321_v14 = vld [vmem:[#allocation75_spill] sm:$0xff]  ;;  %v16323_v44 = vld [vmem:[#allocation178_spill] sm:$0xff]  ;;  %v4291_v42 = vsel %vm3213_vm5, %v13360_v33, 0.0 }
 0x5a4   : >> { %v8773_v24 = vpop.eup %8772  ;;  %8792 = vpow2.f32 %v3978_v41  ;;  %4283 = vadd.xlane.f32.xlu1 %v4282_v53  ;;  %v4522_v38 = vmul.f32 %v8771_v39, %v16321_v14  ;;  %v4348_v41 = vsel %vm3213_vm5, %v13353_v25, 0.0  ;;  %v16327_v14 = vld [vmem:[#allocation83_spill] sm:$0xff] }
 0x5a5   : >> { %v8775_v12 = vpop.eup %8774  ;;  %8794 = vpow2.f32 %v3940_v63  ;;  %v13390_v47 = vpop.xlane.xlu1 %4145  ;;  %4340 = vadd.xlane.f32.xlu0 %v4339_v37  ;;  %v4524_v11 = vmul.f32 %v8773_v24, %v16323_v44  ;;  %v16324_v37 = vld [vmem:[#allocation118_spill] sm:$0xff]  ;;  %v16326_v24 = vld [vmem:[#allocation180_spill] sm:$0xff] }
 0x5a6   : >> { %v8777_v3 = vpop.eup %8776  ;;  %8796 = vpow2.f32 %v3946_v58  ;;  %v4089_v4 = vpop.xlane.xlu0 %4088  ;;  %v4523_v2 = vmul.f32 %v8775_v12, %v16322_v8 }
 0x5a7   : >> { %v8779_v56 = vpop.eup %8778  ;;  %8798 = vpow2.f32 %v3968_v10  ;;  %v4637_v39 = vpack.c.bf16 %v4525_v32, %v4524_v11  ;;  %v4509_v10 = vmul.f32 %v8777_v3, %v16324_v37  ;;  %v16328_v32 = vld [vmem:[#allocation179_spill] sm:$0xff] }
 0x5a8   : >> { %v8781_v63 = vpop.eup %8780  ;;  %8800 = vrcp.f32 %v4137_v46  ;;  %4349 = vadd.xlane.f32.xlu1 %v4348_v41  ;;  %v4636_v0 = vpack.c.bf16 %v4523_v2, %v4522_v38  ;;  %v4506_v21 = vmul.f32 %v8779_v56, %v16326_v24  ;;  %v16335_v24 = vld [vmem:[#allocation56_spill] sm:$0xff] }
 0x5a9   : >> { %v8783_v58 = vpop.eup %8782  ;;  %8802 = vrcp.f32 %v4128_v30  ;;  %v13400_v53 = vpop.xlane.xlu1 %4097  ;;  %4292 = vadd.xlane.f32.xlu0 %v4291_v42  ;;  %v4300_v30 = vsel %vm3213_vm5, %v13368_v28, 0.0  ;;  %v4508_v3 = vmul.f32 %v8781_v63, %v16328_v32 }
 0x5aa   : >> { %v13403_v12 = vpop.eup %8784  ;;  %8804 = vrcp.f32 %v13316_v55  ;;  %8087 = vmatprep.mubr.msk.bf16.mxu0 %vm3213_vm5, %v4636_v0  ;;  %v4131_v46 = vpop.xlane.xlu0 %4130  ;;  %v4507_v8 = vmul.f32 %v8783_v58, %v16327_v14  ;;  %v4333_v55 = vsel %vm3213_vm5, %v13375_v48, 0.0  ;;  %v16331_v0 = vld [vmem:[#allocation163_spill] sm:$0xff]  ;;  %v16332_v58 = vld [vmem:[#allocation113_spill] sm:$0xff] }
 0x5ab   : >> { %16325 = vst [vmem:[#allocation77_spill] sm:$0xff] %v13403_v12  ;;  %v13409_v38 = vpop.eup %8786  ;;  %8806 = vrcp.f32 %v4131_v46  ;;  %8088 = vmatmul.mubr.msk.bf16.gmra.mrb[92].mxu0 %vm3213_vm5, %v4637_v39  ;;  %v4629_v11 = vpack.c.bf16 %v4509_v10, %v4508_v3  ;;  %v16333_v39 = vsub.f32 %v16331_v0, %v16332_v58  ;;  %v16334_v46 = vld [vmem:[#allocation166_spill] sm:$0xff]  ;;  %v4342_v10 = vsel %vm3213_vm5, %v13403_v12, 0.0  ;;  %v16354_v48 = vld [vmem:[#allocation185_spill] sm:$0xff] }
 0x5ac   : >> { %v13415_v2 = vpop.eup %8788  ;;  %8808 = vrcp.f32 %v4089_v4  ;;  %4301 = vadd.xlane.f32.xlu1 %v4300_v30  ;;  %v4628_v56 = vpack.c.bf16 %v4507_v8, %v4506_v21  ;;  %v16336_v21 = vsub.f32 %v16334_v46, %v16335_v24  ;;  %v16338_v8 = vld [vmem:[#allocation169_spill] sm:$0xff]  ;;  %v16339_v30 = vld [vmem:[#allocation108_spill] sm:$0xff]  ;;  %v4285_v3 = vsel %vm3213_vm5, %v13409_v38, 0.0  ;;  %v16342_v0 = vld [vmem:[#allocation58_spill] sm:$0xff] }
 0x5ad   : >> { %v13419_v41 = vpop.eup %8790  ;;  %8810 = vrcp.f32 %v4080_v1  ;;  %v4140_v44 = vpop.xlane.xlu1 %4139  ;;  %4334 = vadd.xlane.f32.xlu0 %v4333_v55  ;;  %v3974_v63 = vmul.f32 1.442695, %v16333_v39  ;;  %v16344_v46 = vld [vmem:[#allocation170_spill] sm:$0xff]  ;;  %v16345_v24 = vld [vmem:[#allocation60_spill] sm:$0xff]  ;;  %v4294_v45 = vsel %vm3213_vm5, %v13415_v2, 0.0 }
 0x5ae   : >> { %16329 = vst [vmem:[#allocation132_spill] sm:$0xff] %v13419_v41  ;;  %v13421_v42 = vpop.eup %8792  ;;  %8812 = vrcp.f32 %v13326_v59  ;;  %8069 = vmatprep.mubr.msk.bf16.mxu1 %vm3213_vm5, %v4628_v56  ;;  %v4083_v4 = vpop.xlane.xlu0 %4082  ;;  %v3936_v1 = vmul.f32 1.442695, %v16336_v21  ;;  %v16340_v59 = vsub.f32 %v16338_v8, %v16339_v30  ;;  %v16341_v56 = vld [vmem:[#allocation164_spill] sm:$0xff]  ;;  %v16346_v21 = vsub.f32 %v16344_v46, %v16345_v24 }
 0x5af   : >> { %16330 = vst [vmem:[#allocation72_spill] sm:$0xff] %v13421_v42  ;;  %v13428_v37 = vpop.eup %8794  ;;  %8814 = vrcp.f32 %v4083_v4  ;;  %8070 = vmatmul.mubr.msk.bf16.gmra.mrb[76].mxu1 %vm3213_vm5, %v4629_v11  ;;  %v16343_v58 = vsub.f32 %v16341_v56, %v16342_v0  ;;  %v16350_v0 = vld [vmem:[#allocation136_spill] sm:$0xff] }
 0x5b0   : >> { %v13436_v14 = vpop.eup %8796  ;;  %v3942_v32 = vmul.f32 1.442695, %v16340_v59  ;;  %4343 = vadd.xlane.f32.xlu1 %v4342_v10  ;;  %8816 = vpow2.f32 %v3974_v63  ;;  %v3948_v25 = vmul.f32 1.442695, %v16346_v21  ;;  %v16347_v10 = vld [vmem:[#allocation167_spill] sm:$0xff]  ;;  %v16348_v59 = vld [vmem:[#allocation116_spill] sm:$0xff] }
 0x5b1   : >> { %16337 = vst [vmem:[#allocation122_spill] sm:$0xff] %v13436_v14  ;;  %v13443_v55 = vpop.eup %8798  ;;  %v3980_v39 = vmul.f32 1.442695, %v16343_v58  ;;  %v4092_v11 = vpop.xlane.xlu1 %4091  ;;  %4286 = vadd.xlane.f32.xlu0 %v4285_v3  ;;  %8818 = vpow2.f32 %v3936_v1  ;;  %v16349_v12 = vsub.f32 %v16347_v10, %v16348_v59  ;;  %v4351_v63 = vsel %vm3213_vm5, %v13419_v41, 0.0  ;;  %v16352_v10 = vld [vmem:[#allocation80_spill] sm:$0xff] }
 0x5b2   : >> { %v8801_v4 = vpop.eup %8800  ;;  %v4149_v8 = vpop.xlane.xlu0 %4148  ;;  %8820 = vpow2.f32 %v3942_v32  ;;  %v4360_v41 = vsel %vm3213_vm5, %v13421_v42, 0.0 }
 0x5b3   : >> { %v8803_v30 = vpop.eup %8802  ;;  %v3976_v49 = vmul.f32 1.442695, %v16349_v12  ;;  %8822 = vpow2.f32 %v3980_v39  ;;  %v4545_v58 = vmul.f32 %v8801_v4, %v16350_v0  ;;  %v16351_v12 = vld [vmem:[#allocation74_spill] sm:$0xff]  ;;  %v4303_v4 = vsel %vm3213_vm5, %v13428_v37, 0.0 }
 0x5b4   : >> { %v8805_v56 = vpop.eup %8804  ;;  %4295 = vadd.xlane.f32.xlu1 %v4294_v45  ;;  %8824 = vpow2.f32 %v3948_v25  ;;  %v4542_v21 = vmul.f32 %v8803_v30, %v16351_v12  ;;  %v16353_v45 = vld [vmem:[#allocation182_spill] sm:$0xff] }
 0x5b5   : >> { %v8807_v3 = vpop.eup %8806  ;;  %v13459_v46 = vpop.xlane.xlu1 %4157  ;;  %4352 = vadd.xlane.f32.xlu0 %v4351_v63  ;;  %8826 = vpow2.f32 %v3976_v49  ;;  %v4544_v32 = vmul.f32 %v8805_v56, %v16353_v45  ;;  %v16355_v56 = vld [vmem:[#allocation184_spill] sm:$0xff] }
 0x5b6   : >> { %v8809_v1 = vpop.eup %8808  ;;  %v4101_v24 = vpop.xlane.xlu0 %4100  ;;  %v4543_v59 = vmul.f32 %v8807_v3, %v16352_v10  ;;  %8828 = vrcp.f32 %v4149_v8  ;;  %v16357_v10 = vld [vmem:[#allocation183_spill] sm:$0xff] }
 0x5b7   : >> { %v8811_v28 = vpop.eup %8810  ;;  %v4647_v0 = vpack.c.bf16 %v4545_v58, %v4544_v32  ;;  %v4529_v30 = vmul.f32 %v8809_v1, %v16354_v48  ;;  %8830 = vrcp.f32 %v4140_v44  ;;  %v4312_v48 = vsel %vm3213_vm5, %v13436_v14, 0.0 }
 0x5b8   : >> { %v8813_v39 = vpop.eup %8812  ;;  %4361 = vadd.xlane.f32.xlu1 %v4360_v41  ;;  %v4646_v63 = vpack.c.bf16 %v4543_v59, %v4542_v21  ;;  %8832 = vrcp.f32 %v13390_v47  ;;  %v4526_v8 = vmul.f32 %v8811_v28, %v16355_v56  ;;  %v16356_v41 = vld [vmem:[#allocation85_spill] sm:$0xff]  ;;  %v4345_v47 = vsel %vm3213_vm5, %v13443_v55, 0.0 }
 0x5b9   : >> { %v8815_v25 = vpop.eup %8814  ;;  %v13469_v3 = vpop.xlane.xlu1 %4109  ;;  %4304 = vadd.xlane.f32.xlu0 %v4303_v4  ;;  %v4528_v45 = vmul.f32 %v8813_v39, %v16357_v10  ;;  %v16364_v10 = vld [vmem:[#allocation133_spill] sm:$0xff] }
 0x5ba   : >> { %8111 = vmatprep.mubr.msk.bf16.mxu0 %vm3213_vm5, %v4646_v63  ;;  %v4143_v49 = vpop.xlane.xlu0 %4142  ;;  %v4527_v12 = vmul.f32 %v8815_v25, %v16356_v41  ;;  %v13479_v44 = vpop.eup %8816 }
 0x5bb   : >> { %8834 = vrcp.f32 %v4143_v49  ;;  %8112 = vmatmul.mubr.msk.bf16.vlgmr.msra.gmra.mrb[96].mxu0 %vm3213_vm5, %v4647_v0  ;;  %16358 = vst [vmem:[#allocation81_spill] sm:$0xff] %v13479_v44  ;;  %v13484_v58 = vpop.eup %8818  ;;  %v4639_v1 = vpack.c.bf16 %v4529_v30, %v4528_v45 }
 0x5bc   : >> { %8836 = vrcp.f32 %v4101_v24  ;;  %8146 = vmatpush3.bf16.msra.mxu0 %v16254_v61  ;;  %4313 = vadd.xlane.f32.xlu1 %v4312_v48  ;;  %v4638_v28 = vpack.c.bf16 %v4527_v12, %v4526_v8  ;;  %v13486_v59 = vpop.eup %8820  ;;  %v16360_v61 = vld [vmem:[#allocation66_spill] sm:$0xff] }
 0x5bd   : >> { %8838 = vrcp.f32 %v4092_v11  ;;  %v4152_v21 = vpop.xlane.xlu1 %4151  ;;  %4346 = vadd.xlane.f32.xlu0 %v4345_v47  ;;  %v13490_v32 = vpop.eup %8822  ;;  %v16361_v39 = vsub.f32 %v16213_v35, %v16360_v61  ;;  %v4354_v11 = vsel %vm3213_vm5, %v13479_v44, 0.0  ;;  %v4306_v56 = vsel %vm3213_vm5, %v13486_v59, 0.0 }
 0x5be   : >> { %8840 = vrcp.f32 %v13400_v53  ;;  %8093 = vmatprep.mubr.msk.bf16.mxu1 %vm3213_vm5, %v4638_v28  ;;  %v4095_v24 = vpop.xlane.xlu0 %4094  ;;  %16359 = vst [vmem:[#allocation78_spill] sm:$0xff] %v13490_v32  ;;  %v13498_v63 = vpop.eup %8824  ;;  %v4297_v53 = vsel %vm3213_vm5, %v13484_v58, 0.0  ;;  %v16365_v28 = vld [vmem:[#allocation89_spill] sm:$0xff] }
 0x5bf   : >> { %v3944_v4 = vmul.f32 1.442695, %v16361_v39  ;;  %8842 = vrcp.f32 %v4095_v24  ;;  %8094 = vmatmul.mubr.msk.bf16.vlgmr.msra.gmra.mrb[80].mxu1 %vm3213_vm5, %v4639_v1  ;;  %16362 = vst [vmem:[#allocation134_spill] sm:$0xff] %v13498_v63  ;;  %v13503_v25 = vpop.eup %8826  ;;  %v16366_v24 = vld [vmem:[#allocation86_spill] sm:$0xff] }
 0x5c0   : >> { %8128 = vmatpush3.bf16.msra.mxu1 %v16260_v40  ;;  %4355 = vadd.xlane.f32.xlu1 %v4354_v11  ;;  %16363 = vst [vmem:[#allocation87_spill] sm:$0xff] %v13503_v25  ;;  %v8829_v35 = vpop.eup %8828  ;;  %v4363_v40 = vsel %vm3213_vm5, %v13490_v32, 0.0 }
 0x5c1   : >> { %v4104_v0 = vpop.xlane.xlu1 %4103  ;;  %4298 = vadd.xlane.f32.xlu0 %v4297_v53  ;;  %v8831_v49 = vpop.eup %8830  ;;  %8844 = vpow2.f32 %v3944_v4  ;;  %v4549_v45 = vmul.f32 %v8829_v35, %v16364_v10  ;;  %v16367_v4 = vld [vmem:[#allocation76_spill] sm:$0xff]  ;;  %v16368_v10 = vld [vmem:[#allocation82_spill] sm:$0xff] }
 0x5c2   : >> { %v4161_v30 = vpop.xlane.xlu0 %4160  ;;  %v8833_v8 = vpop.eup %8832  ;;  %v4546_v1 = vmul.f32 %v8831_v49, %v16365_v28 }
 0x5c3   : >> { %v4548_v11 = vmul.f32 %v8833_v8, %v16367_v4  ;;  %8846 = vrcp.f32 %v4161_v30  ;;  %v16369_v8 = vld [vmem:[#allocation187_spill] sm:$0xff] }
 0x5c4   : >> { %4307 = vadd.xlane.f32.xlu1 %v4306_v56  ;;  %v4315_v56 = vsel %vm3213_vm5, %v13498_v63, 0.0  ;;  %8848 = vrcp.f32 %v4152_v21  ;;  %v16370_v30 = vld [vmem:[#allocation139_spill] sm:$0xff] }
 0x5c5   : >> { %v8835_v41 = vpop.eup %8834  ;;  %v13509_v12 = vpop.xlane.xlu1 %4169  ;;  %4364 = vadd.xlane.f32.xlu0 %v4363_v40  ;;  %v4649_v35 = vpack.c.bf16 %v4549_v45, %v4548_v11  ;;  %8850 = vrcp.f32 %v13459_v46  ;;  %v4357_v45 = vsel %vm3213_vm5, %v13503_v25, 0.0 }
 0x5c6   : >> { %v8837_v48 = vpop.eup %8836  ;;  %v4113_v47 = vpop.xlane.xlu0 %4112  ;;  %v4547_v61 = vmul.f32 %v8835_v41, %v16366_v24 }
 0x5c7   : >> { %v8839_v39 = vpop.eup %8838  ;;  %v4533_v44 = vmul.f32 %v8837_v48, %v16368_v10 }
 0x5c8   : >> { %v8841_v53 = vpop.eup %8840  ;;  %v4648_v42 = vpack.c.bf16 %v4547_v61, %v4546_v1  ;;  %v4530_v41 = vmul.f32 %v8839_v39, %v16369_v8  ;;  %v16371_v1 = vld [vmem:[#allocation131_spill] sm:$0xff] }
 0x5c9   : >> { %v8843_v32 = vpop.eup %8842  ;;  %v13517_v40 = vpop.xlane.xlu1 %4121  ;;  %4316 = vadd.xlane.f32.xlu0 %v4315_v56  ;;  %v4532_v21 = vmul.f32 %v8841_v53, %v16371_v1  ;;  %v16373_v56 = vld [vmem:[#allocation146_spill] sm:$0xff]  ;;  %v16374_v8 = vld [vmem:[#allocation135_spill] sm:$0xff] }
 0x5ca   : >> { %8115 = vmatprep.mubr.msk.bf16.mxu0 %vm3213_vm5, %v4648_v42  ;;  %v4155_v49 = vpop.xlane.xlu0 %4154  ;;  %v4531_v28 = vmul.f32 %v8843_v32, %v16370_v30  ;;  %v16375_v30 = vld [vmem:[#allocation150_spill] sm:$0xff] }
 0x5cb   : >> { %8852 = vrcp.f32 %v4155_v49  ;;  %8116 = vmatmul.mubr.msk.bf16.gmra.mrb[100].mxu0 %vm3213_vm5, %v4649_v35  ;;  %v13528_v48 = vpop.eup %8844  ;;  %v4641_v42 = vpack.c.bf16 %v4533_v44, %v4532_v21  ;;  %v16372_v44 = vld [vmem:[#allocation65_spill] sm:$0xff] }
 0x5cc   : >> { %8854 = vrcp.f32 %v4113_v47  ;;  %v4640_v24 = vpack.c.bf16 %v4531_v28, %v4530_v41  ;;  %v4309_v47 = vsel %vm3213_vm5, %v13528_v48, 0.0  ;;  %v16376_v21 = vld [vmem:[#allocation137_spill] sm:$0xff] }
 0x5cd   : >> { %8856 = vrcp.f32 %v4104_v0  ;;  %v4164_v46 = vpop.xlane.xlu1 %4163  ;;  %4358 = vadd.xlane.f32.xlu0 %v4357_v45  ;;  %v8847_v39 = vpop.eup %8846 }
 0x5ce   : >> { %8858 = vrcp.f32 %v13469_v3  ;;  %8097 = vmatprep.mubr.msk.bf16.mxu1 %vm3213_vm5, %v4640_v24  ;;  %v4107_v32 = vpop.xlane.xlu0 %4106  ;;  %v8849_v11 = vpop.eup %8848  ;;  %v4553_v35 = vmul.f32 %v8847_v39, %v16373_v56 }
 0x5cf   : >> { %8860 = vrcp.f32 %v4107_v32  ;;  %8098 = vmatmul.mubr.msk.bf16.gmra.mrb[84].mxu1 %vm3213_vm5, %v4641_v42  ;;  %v8851_v0 = vpop.eup %8850  ;;  %v4550_v41 = vmul.f32 %v8849_v11, %v16374_v8  ;;  %v16378_v11 = vld [vmem:[#allocation142_spill] sm:$0xff] }
 0x5d0   : >> { %v4552_v45 = vmul.f32 %v8851_v0, %v16376_v21 }
 0x5d1   : >> { %v4116_v61 = vpop.xlane.xlu1 %4115  ;;  %4310 = vadd.xlane.f32.xlu0 %v4309_v47 }
 0x5d2   : >> { %v4173_v4 = vpop.xlane.xlu0 %4172  ;;  %v4651_v25 = vpack.c.bf16 %v4553_v35, %v4552_v45 }
 0x5d3   : >> { %8862 = vrcp.f32 %v4173_v4  ;;  %v16380_v4 = vld [vmem:[#allocation144_spill] sm:$0xff] }
 0x5d4   : >> { %8864 = vrcp.f32 %v4164_v46 }
 0x5d5   : >> { %v8853_v53 = vpop.eup %8852  ;;  %5430 = vrot.lane.b32.xlu1 %v16372_v44, %s9277_s22  ;;  %v4230_v3 = vpop.xlane.xlu1 %4229  ;;  %v16377_v44 = vld [vmem:[#allocation149_spill] sm:$0xff]  ;;  %8866 = vrcp.f32 %v13509_v12 }
 0x5d6   : >> { %v8855_v10 = vpop.eup %8854  ;;  %v4125_v49 = vpop.xlane.xlu0 %4124  ;;  %v4551_v28 = vmul.f32 %v8853_v53, %v16375_v30  ;;  %v16379_v53 = vld [vmem:[#allocation153_spill] sm:$0xff] }
 0x5d7   : >> { %v8857_v1 = vpop.eup %8856  ;;  %v4537_v14 = vmul.f32 %v8855_v10, %v16377_v44 }
 0x5d8   : >> { %v8859_v24 = vpop.eup %8858  ;;  %v4650_v42 = vpack.c.bf16 %v4551_v28, %v4550_v41  ;;  %v4534_v56 = vmul.f32 %v8857_v1, %v16378_v11  ;;  %v16384_v11 = vld [vmem:[#allocation63_spill] sm:$0xff] }
 0x5d9   : >> { %v8861_v32 = vpop.eup %8860  ;;  %v4182_v47 = vpop.xlane.xlu1 %4181  ;;  %v4536_v0 = vmul.f32 %v8859_v24, %v16380_v4 }
 0x5da   : >> { %8119 = vmatprep.mubr.msk.bf16.mxu0 %vm3213_vm5, %v4650_v42  ;;  %v4167_v39 = vpop.xlane.xlu0 %4166  ;;  %v4535_v8 = vmul.f32 %v8861_v32, %v16379_v53 }
 0x5db   : >> { %8868 = vrcp.f32 %v4167_v39  ;;  %8120 = vmatmul.mubr.msk.bf16.gmra.mrb[104].mxu0 %vm3213_vm5, %v4651_v25  ;;  %v4643_v41 = vpack.c.bf16 %v4537_v14, %v4536_v0  ;;  %v16382_v14 = vld [vmem:[#allocation97_spill] sm:$0xff] }
 0x5dc   : >> { %8870 = vrcp.f32 %v4125_v49  ;;  %v4642_v46 = vpack.c.bf16 %v4535_v8, %v4534_v56  ;;  %v16381_v49 = vld [vmem:[#allocation160_spill] sm:$0xff]  ;;  %v16385_v56 = vld [vmem:[#allocation145_spill] sm:$0xff] }
 0x5dd   : >> { %8872 = vrcp.f32 %v4116_v61  ;;  %v4224_v35 = vpop.xlane.xlu1 %4223  ;;  %v8863_v30 = vpop.eup %8862 }
 0x5de   : >> { %8874 = vrcp.f32 %v13517_v40  ;;  %8101 = vmatprep.mubr.msk.bf16.mxu1 %vm3213_vm5, %v4642_v46  ;;  %v4119_v12 = vpop.xlane.xlu0 %4118  ;;  %v8865_v1 = vpop.eup %8864  ;;  %v4557_v24 = vmul.f32 %v8863_v30, %v16381_v49  ;;  %v16383_v40 = vld [vmem:[#allocation173_spill] sm:$0xff] }
 0x5df   : >> { %8876 = vrcp.f32 %v4119_v12  ;;  %8102 = vmatmul.mubr.msk.bf16.gmra.mrb[88].mxu1 %vm3213_vm5, %v4643_v41  ;;  %v8867_v25 = vpop.eup %8866  ;;  %v4554_v32 = vmul.f32 %v8865_v1, %v16382_v14  ;;  %v16386_v12 = vld [vmem:[#allocation109_spill] sm:$0xff] }
 0x5e0   : >> { %v4556_v53 = vmul.f32 %v8867_v25, %v16385_v56  ;;  %v16388_v14 = vld [vmem:[#allocation161_spill] sm:$0xff]  ;;  %v16389_v25 = vld [vmem:[#allocation147_spill] sm:$0xff] }
 0x5e1   : >> { %v4176_v10 = vpop.xlane.xlu1 %4175 }
 0x5e2   : >> { %v4233_v28 = vpop.xlane.xlu0 %4232  ;;  %v4653_v41 = vpack.c.bf16 %v4557_v24, %v4556_v53 }
 0x5e3   : >> { %8878 = vrcp.f32 %v4233_v28 }
 0x5e4   : >> { %8880 = vrcp.f32 %v4224_v35 }
 0x5e5   : >> { %v8869_v21 = vpop.eup %8868  ;;  %v4242_v45 = vpop.xlane.xlu1 %4241  ;;  %8882 = vrcp.f32 %v4230_v3 }
 0x5e6   : >> { %v8871_v61 = vpop.eup %8870  ;;  %v4185_v42 = vpop.xlane.xlu0 %4184  ;;  %v4555_v44 = vmul.f32 %v8869_v21, %v16383_v40  ;;  %v16387_v21 = vld [vmem:[#allocation99_spill] sm:$0xff] }
 0x5e7   : >> { %v8873_v39 = vpop.eup %8872  ;;  %5554 = vrot.lane.b32.xlu0 %v16384_v11, %s9277_s22  ;;  %v4541_v30 = vmul.f32 %v8871_v61, %v16386_v12 }
 0x5e8   : >> { %v8875_v8 = vpop.eup %8874  ;;  %v4652_v4 = vpack.c.bf16 %v4555_v44, %v4554_v32  ;;  %v4538_v49 = vmul.f32 %v8873_v39, %v16387_v21  ;;  %v16393_v21 = vld [vmem:[#allocation155_spill] sm:$0xff] }
 0x5e9   : >> { %v8877_v0 = vpop.eup %8876  ;;  %v4194_v46 = vpop.xlane.xlu1 %4193  ;;  %v4540_v28 = vmul.f32 %v8875_v8, %v16389_v25 }
 0x5ea   : >> { %8123 = vmatprep.mubr.msk.bf16.mxu0 %vm3213_vm5, %v4652_v4  ;;  %v4227_v1 = vpop.xlane.xlu0 %4226  ;;  %v4539_v40 = vmul.f32 %v8877_v0, %v16388_v14  ;;  %v16390_v4 = vld [vmem:[#allocation168_spill] sm:$0xff] }
 0x5eb   : >> { %8884 = vrcp.f32 %v4227_v1  ;;  %8124 = vmatmul.mubr.msk.bf16.gmra.mrb[108].mxu0 %vm3213_vm5, %v4653_v41  ;;  %v4645_v24 = vpack.c.bf16 %v4541_v30, %v4540_v28  ;;  %v16391_v41 = vld [vmem:[#allocation57_spill] sm:$0xff] }
 0x5ec   : >> { %8886 = vrcp.f32 %v4185_v42  ;;  %v4644_v32 = vpack.c.bf16 %v4539_v40, %v4538_v49 }
 0x5ed   : >> { %8888 = vrcp.f32 %v4176_v10  ;;  %v4236_v35 = vpop.xlane.xlu1 %4235  ;;  %v8879_v44 = vpop.eup %8878 }
 0x5ee   : >> { %8890 = vrcp.f32 %v4182_v47  ;;  %8105 = vmatprep.mubr.msk.bf16.mxu1 %vm3213_vm5, %v4644_v32  ;;  %v4179_v3 = vpop.xlane.xlu0 %4178  ;;  %v8881_v11 = vpop.eup %8880  ;;  %v4577_v8 = vmul.f32 %v8879_v44, %v16390_v4  ;;  %v16392_v47 = vld [vmem:[#allocation177_spill] sm:$0xff] }
 0x5ef   : >> { %8892 = vrcp.f32 %v4179_v3  ;;  %8106 = vmatmul.mubr.msk.bf16.gmra.mrb[92].mxu1 %vm3213_vm5, %v4645_v24  ;;  %v8883_v56 = vpop.eup %8882  ;;  %v4574_v12 = vmul.f32 %v8881_v11, %v16391_v41  ;;  %v16394_v32 = vld [vmem:[#allocation69_spill] sm:$0xff] }
 0x5f0   : >> { %v4576_v49 = vmul.f32 %v8883_v56, %v16393_v21  ;;  %v16395_v4 = vld [vmem:[#allocation61_spill] sm:$0xff] }
 0x5f1   : >> { %v4188_v61 = vpop.xlane.xlu1 %4187  ;;  %v16396_v41 = vld [vmem:[#allocation121_spill] sm:$0xff] }
 0x5f2   : >> { %v4245_v39 = vpop.xlane.xlu0 %4244  ;;  %v4663_v28 = vpack.c.bf16 %v4577_v8, %v4576_v49 }
 0x5f3   : >> { %8894 = vrcp.f32 %v4245_v39 }
 0x5f4   : >> { %8896 = vrcp.f32 %v4236_v35 }
 0x5f5   : >> { %v8885_v53 = vpop.eup %8884  ;;  %v4254_v42 = vpop.xlane.xlu1 %4253  ;;  %8898 = vrcp.f32 %v4242_v45 }
 0x5f6   : >> { %v8887_v0 = vpop.eup %8886  ;;  %v4197_v10 = vpop.xlane.xlu0 %4196  ;;  %v4575_v30 = vmul.f32 %v8885_v53, %v16392_v47  ;;  %v16397_v47 = vld [vmem:[#allocation104_spill] sm:$0xff] }
 0x5f7   : >> { %v8889_v1 = vpop.eup %8888  ;;  %v4561_v24 = vmul.f32 %v8887_v0, %v16394_v32 }
 0x5f8   : >> { %v8891_v14 = vpop.eup %8890  ;;  %v4662_v40 = vpack.c.bf16 %v4575_v30, %v4574_v12  ;;  %v4558_v11 = vmul.f32 %v8889_v1, %v16395_v4 }
 0x5f9   : >> { %v8893_v25 = vpop.eup %8892  ;;  %v4206_v3 = vpop.xlane.xlu1 %4205  ;;  %v4560_v63 = vmul.f32 %v8891_v14, %v16397_v47 }
 0x5fa   : >> { %8147 = vmatprep.mubr.msk.bf16.mxu0 %vm3213_vm5, %v4662_v40  ;;  %v4239_v44 = vpop.xlane.xlu0 %4238  ;;  %v4559_v53 = vmul.f32 %v8893_v25, %v16396_v41 }
 0x5fb   : >> { %8900 = vrcp.f32 %v4239_v44  ;;  %8148 = vmatmul.mubr.msk.bf16.vlgmr.msra.gmra.mrb[112].mxu0 %vm3213_vm5, %v4663_v28  ;;  %v4655_v56 = vpack.c.bf16 %v4561_v24, %v4560_v63  ;;  %v16399_v28 = vld [vmem:[#allocation115_spill] sm:$0xff] }
 0x5fc   : >> { %8902 = vrcp.f32 %v4197_v10  ;;  %v4654_v39 = vpack.c.bf16 %v4559_v53, %v4558_v11 }
 0x5fd   : >> { %8904 = vrcp.f32 %v4188_v61  ;;  %v4248_v8 = vpop.xlane.xlu1 %4247  ;;  %v8895_v0 = vpop.eup %8894  ;;  %v16398_v61 = vld [vmem:[#allocation67_spill] sm:$0xff] }
 0x5fe   : >> { %8906 = vrcp.f32 %v4194_v46  ;;  %8129 = vmatprep.mubr.msk.bf16.mxu1 %vm3213_vm5, %v4654_v39  ;;  %v4191_v45 = vpop.xlane.xlu0 %4190  ;;  %v8897_v30 = vpop.eup %8896  ;;  %v4581_v10 = vmul.f32 %v8895_v0, %v13079_v16  ;;  %v16400_v39 = vld [vmem:[#allocation112_spill] sm:$0xff] }
 0x5ff   : >> { %8908 = vrcp.f32 %v4191_v45  ;;  %8130 = vmatmul.mubr.msk.bf16.vlgmr.msra.gmra.mrb[96].mxu1 %vm3213_vm5, %v4655_v56  ;;  %v8899_v1 = vpop.eup %8898  ;;  %v4578_v40 = vmul.f32 %v8897_v30, %v16398_v61  ;;  %v16402_v61 = vld [vmem:[#allocation68_spill] sm:$0xff] }
 0x600   : >> { %v4580_v32 = vmul.f32 %v8899_v1, %v16399_v28 }
 0x601   : >> { %v4200_v35 = vpop.xlane.xlu1 %4199 }
 0x602   : >> { %v4257_v12 = vpop.xlane.xlu0 %4256  ;;  %v4665_v41 = vpack.c.bf16 %v4581_v10, %v4580_v32  ;;  %v16401_v10 = vld [vmem:[#allocation79_spill] sm:$0xff] }
 0x603   : >> { %8910 = vrcp.f32 %v4257_v12 }
 0x604   : >> { %8912 = vrcp.f32 %v4248_v8 }
 0x605   : >> { %v8901_v21 = vpop.eup %8900  ;;  %v4266_v49 = vpop.xlane.xlu1 %4265  ;;  %8914 = vrcp.f32 %v4254_v42 }
 0x606   : >> { %v8903_v14 = vpop.eup %8902  ;;  %v4209_v63 = vpop.xlane.xlu0 %4208  ;;  %v4579_v46 = vmul.f32 %v8901_v21, %v13106_v27 }
 0x607   : >> { %v8905_v25 = vpop.eup %8904  ;;  %v4565_v53 = vmul.f32 %v8903_v14, %v13096_v29 }
 0x608   : >> { %v8907_v24 = vpop.eup %8906  ;;  %v4664_v44 = vpack.c.bf16 %v4579_v46, %v4578_v40  ;;  %v4562_v47 = vmul.f32 %v8905_v25, %v13072_v51  ;;  %v16403_v25 = vld [vmem:[#allocation73_spill] sm:$0xff] }
 0x609   : >> { %v8909_v4 = vpop.eup %8908  ;;  %v4218_v11 = vpop.xlane.xlu1 %4217  ;;  %v4564_v56 = vmul.f32 %v8907_v24, %v16400_v39  ;;  %v16405_v39 = vld [vmem:[#allocation114_spill] sm:$0xff] }
 0x60a   : >> { %8151 = vmatprep.mubr.msk.bf16.mxu0 %vm3213_vm5, %v4664_v44  ;;  %v4251_v16 = vpop.xlane.xlu0 %4250  ;;  %v4563_v27 = vmul.f32 %v8909_v4, %v13113_v60 }
 0x60b   : >> { %8916 = vrcp.f32 %v4251_v16  ;;  %8152 = vmatmul.mubr.msk.bf16.gmra.mrb[116].mxu0 %vm3213_vm5, %v4665_v41  ;;  %v4657_v8 = vpack.c.bf16 %v4565_v53, %v4564_v56 }
 0x60c   : >> { %8918 = vrcp.f32 %v4209_v63  ;;  %v4656_v29 = vpack.c.bf16 %v4563_v27, %v4562_v47  ;;  %v16404_v47 = vld [vmem:[#allocation123_spill] sm:$0xff] }
 0x60d   : >> { %8920 = vrcp.f32 %v4200_v35  ;;  %v4260_v42 = vpop.xlane.xlu1 %4259  ;;  %v8911_v45 = vpop.eup %8910 }
 0x60e   : >> { %8922 = vrcp.f32 %v4206_v3  ;;  %8133 = vmatprep.mubr.msk.bf16.mxu1 %vm3213_vm5, %v4656_v29  ;;  %v4203_v51 = vpop.xlane.xlu0 %4202  ;;  %v8913_v12 = vpop.eup %8912  ;;  %v4585_v14 = vmul.f32 %v8911_v45, %v16401_v10 }
 0x60f   : >> { %8924 = vrcp.f32 %v4203_v51  ;;  %8134 = vmatmul.mubr.msk.bf16.gmra.mrb[100].mxu1 %vm3213_vm5, %v4657_v8  ;;  %v8915_v30 = vpop.eup %8914  ;;  %v4582_v3 = vmul.f32 %v8913_v12, %v16402_v61 }
 0x610   : >> { %v4584_v28 = vmul.f32 %v8915_v30, %v16403_v25 }
 0x611   : >> { %v4212_v60 = vpop.xlane.xlu1 %4211 }
 0x612   : >> { %v4269_v0 = vpop.xlane.xlu0 %4268  ;;  %v4667_v41 = vpack.c.bf16 %v4585_v14, %v4584_v28 }
 0x613   : >> { %8926 = vrcp.f32 %v4269_v0 }
 0x614   : >> { %8928 = vrcp.f32 %v4260_v42 }
 0x615   : >> { %v8917_v1 = vpop.eup %8916  ;;  %v13595_v21 = vpop.xlane.xlu1 %4325  ;;  %8930 = vrcp.f32 %v4266_v49 }
 0x616   : >> { %v8919_v35 = vpop.eup %8918  ;;  %v4221_v63 = vpop.xlane.xlu0 %4220  ;;  %v4583_v40 = vmul.f32 %v8917_v1, %v13149_v9 }
 0x617   : >> { %v8921_v46 = vpop.eup %8920  ;;  %v4569_v53 = vmul.f32 %v8919_v35, %v13135_v19 }
 0x618   : >> { %v8923_v32 = vpop.eup %8922  ;;  %v4666_v24 = vpack.c.bf16 %v4583_v40, %v4582_v3  ;;  %v4566_v27 = vmul.f32 %v8921_v46, %v16404_v47 }
 0x619   : >> { %v8925_v44 = vpop.eup %8924  ;;  %v13601_v4 = vpop.xlane.xlu1 %4277  ;;  %v4568_v56 = vmul.f32 %v8923_v32, %v16405_v39 }
 0x61a   : >> { %8155 = vmatprep.mubr.msk.bf16.mxu0 %vm3213_vm5, %v4666_v24  ;;  %v4263_v16 = vpop.xlane.xlu0 %4262  ;;  %v4567_v9 = vmul.f32 %v8925_v44, %v13183_v34 }
 0x61b   : >> { %8932 = vrcp.f32 %v4263_v16  ;;  %8156 = vmatmul.mubr.msk.bf16.gmra.mrb[120].mxu0 %vm3213_vm5, %v4667_v41  ;;  %v4659_v8 = vpack.c.bf16 %v4569_v53, %v4568_v56 }
 0x61c   : >> { %8934 = vrcp.f32 %v4221_v63  ;;  %v4658_v29 = vpack.c.bf16 %v4567_v9, %v4566_v27 }
 0x61d   : >> { %8936 = vrcp.f32 %v4212_v60  ;;  %v4320_v42 = vpop.xlane.xlu1 %4319  ;;  %v8927_v51 = vpop.eup %8926 }
 0x61e   : >> { %8938 = vrcp.f32 %v4218_v11  ;;  %8137 = vmatprep.mubr.msk.bf16.mxu1 %vm3213_vm5, %v4658_v29  ;;  %v4215_v19 = vpop.xlane.xlu0 %4214  ;;  %v8929_v45 = vpop.eup %8928  ;;  %v4589_v60 = vmul.f32 %v8927_v51, %v13197_v5 }
 0x61f   : >> { %8940 = vrcp.f32 %v4215_v19  ;;  %8138 = vmatmul.mubr.msk.bf16.gmra.mrb[104].mxu1 %vm3213_vm5, %v4659_v8  ;;  %v8931_v0 = vpop.eup %8930  ;;  %v4586_v11 = vmul.f32 %v8929_v45, %v13177_v54 }
 0x620   : >> { %v4588_v63 = vmul.f32 %v8931_v0, %v13129_v62  ;;  %8942 = vrcp.f32 %v4320_v42 }
 0x621   : >> { %v4272_v49 = vpop.xlane.xlu1 %4271 }
 0x622   : >> { %v13611_v34 = vpop.xlane.xlu0 %4328  ;;  %v4669_v25 = vpack.c.bf16 %v4589_v60, %v4588_v63 }
 0x625   : >> { %v8933_v12 = vpop.eup %8932  ;;  %v13613_v30 = vpop.xlane.xlu1 %4337 }
 0x626   : >> { %v8935_v1 = vpop.eup %8934  ;;  %v4281_v10 = vpop.xlane.xlu0 %4280  ;;  %v4587_v14 = vmul.f32 %v8933_v12, %v13226_v36 }
 0x627   : >> { %v8937_v35 = vpop.eup %8936  ;;  %v4573_v28 = vmul.f32 %v8935_v1, %v13210_v20 }
 0x628   : >> { %v8939_v61 = vpop.eup %8938  ;;  %v4668_v3 = vpack.c.bf16 %v4587_v14, %v4586_v11  ;;  %v4570_v32 = vmul.f32 %v8937_v35, %v13189_v50  ;;  %v16406_v14 = vld [vmem:[#allocation25_spill] sm:$0xff] }
 0x629   : >> { %v8941_v40 = vpop.eup %8940  ;;  %v4290_v46 = vpop.xlane.xlu1 %4289  ;;  %v4572_v62 = vmul.f32 %v8939_v61, %v13142_v26 }
 0x62a   : >> { %8159 = vmatprep.mubr.msk.bf16.mxu0 %vm3213_vm5, %v4668_v3  ;;  %v4323_v5 = vpop.xlane.xlu0 %4322  ;;  %v4571_v54 = vmul.f32 %v8941_v40, %v13261_v52  ;;  %v8943_v50 = vpop.eup %8942 }
 0x62b   : >> { %8944 = vrcp.f32 %v4323_v5  ;;  %8160 = vmatmul.mubr.msk.bf16.gmra.mrb[124].mxu0 %vm3213_vm5, %v4669_v25  ;;  %v4661_v44 = vpack.c.bf16 %v4573_v28, %v4572_v62  ;;  %v4606_v26 = vmul.f32 %v8943_v50, %v13255_v18 }
 0x62c   : >> { %v4660_v36 = vpack.c.bf16 %v4571_v54, %v4570_v32  ;;  %8946 = vrcp.f32 %v4272_v49 }
 0x62d   : >> { %v4332_v24 = vpop.xlane.xlu1 %4331 }
 0x62e   : >> { %8141 = vmatprep.mubr.msk.bf16.mxu1 %vm3213_vm5, %v4660_v36  ;;  %v4275_v41 = vpop.xlane.xlu0 %4274 }
 0x62f   : >> { %8948 = vrcp.f32 %v4275_v41  ;;  %8142 = vmatmul.mubr.msk.bf16.gmra.mrb[108].mxu1 %vm3213_vm5, %v4661_v44 }
 0x630   : >> { %8950 = vrcp.f32 %v4281_v10 }
 0x631   : >> { %v4284_v20 = vpop.xlane.xlu1 %4283 }
 0x632   : >> { %v13627_v53 = vpop.xlane.xlu0 %4340 }
 0x635   : >> { %v8945_v52 = vpop.eup %8944  ;;  %v13629_v16 = vpop.xlane.xlu1 %4349 }
 0x636   : >> { %v4293_v47 = vpop.xlane.xlu0 %4292  ;;  %v4607_v27 = vmul.f32 %v8945_v52, %v13301_v31  ;;  %v8947_v9 = vpop.eup %8946 }
 0x637   : >> { %v4590_v8 = vmul.f32 %v8947_v9, %v13267_v23 }
 0x638   : >> { %v4678_v39 = vpack.c.bf16 %v4607_v27, %v4606_v26  ;;  %v8486_v27 = vld [vmem:[%s13591_s4] sm:$0xff]  }
 0x639   : >> { %v8949_v56 = vpop.eup %8948  ;;  %v4302_v29 = vpop.xlane.xlu1 %4301 }
 0x63a   : >> { %8183 = vmatprep.mubr.msk.bf16.mxu0 %vm3213_vm5, %v4678_v39  ;;  %v4335_v42 = vpop.xlane.xlu0 %4334  ;;  %v4591_v19 = vmul.f32 %v8949_v56, %v13335_v22  ;;  %v8951_v3 = vpop.eup %8950 }
 0x63b   : >> { %v4593_v50 = vmul.f32 %v8951_v3, %v13286_v17 }
 0x63c   : >> { %v4670_v49 = vpack.c.bf16 %v4591_v19, %v4590_v8 }
 0x63d   : >> { %v13636_v51 = vpop.xlane.xlu1 %4343 }
 0x63e   : >> { %8165 = vmatprep.mubr.msk.bf16.mxu1 %vm3213_vm5, %v4670_v49  ;;  %v4287_v45 = vpop.xlane.xlu0 %4286 }
 0x63f   : >> { %8952 = vrcp.f32 %v4287_v45 }
 0x640   : >> { %8954 = vrcp.f32 %v13601_v4  ;;  %v16407_v4 = vld [vmem:[#allocation22_spill] sm:$0xff] }
 0x641   : >> { %v4296_v18 = vpop.xlane.xlu1 %4295  ;;  %8956 = vrcp.f32 %v4284_v20 }
 0x642   : >> { %v13639_v0 = vpop.xlane.xlu0 %4352  ;;  %8958 = vrcp.f32 %v13595_v21 }
 0x643   : >> { %8960 = vrcp.f32 %v13611_v34 }
 0x644   : >> { %8962 = vrcp.f32 %v4290_v46 }
 0x645   : >> { %v13641_v31 = vpop.xlane.xlu1 %4361  ;;  %8964 = vrcp.f32 %v4293_v47 }
 0x646   : >> { %v4305_v12 = vpop.xlane.xlu0 %4304 }
 0x649   : >> { %v13644_v60 = vpop.xlane.xlu1 %4313  ;;  %v8953_v46 = vpop.eup %8952 }
 0x64a   : >> { %v13646_v23 = vpop.xlane.xlu0 %4346  ;;  %v8955_v62 = vpop.eup %8954  ;;  %v4595_v19 = vmul.f32 %v8953_v46, %v13409_v38 }
 0x64b   : >> { %v8957_v20 = vpop.eup %8956  ;;  %v4592_v17 = vmul.f32 %v8955_v62, %v13218_v15  ;;  %v8487_v15 = vld [vmem:[%s13591_s4 + $0x8] sm:$0xff]   ;;  %s7693_s4 = sshll.u32 %s9270_s5, 5 }
 0x64c   : >> { %v8959_v49 = vpop.eup %8958 }
 0x64d   : >> { %v13650_v22 = vpop.xlane.xlu1 %4355 }
 0x64e   : >> { %v8077_v1 = vpop.f32.mrb[80].mxu0  ;;  %v4299_v11 = vpop.xlane.xlu0 %4298 }
 0x64f   : >> { %v5696_v10 = vmul.f32 %v8077_v1, %v16406_v14  ;;  %v4871_v35 = vpop.f32.mrb[81].mxu0  ;;  %8966 = vrcp.f32 %v4299_v11  ;;  %v8961_v1 = vpop.eup %8960 }
 0x650   : >> { %v5694_v63 = vmul.f32 %v16407_v4, %v4871_v35  ;;  %v8078_v61 = vpop.f32.mrb[82].mxu0  ;;  %8968 = vrcp.f32 %v4332_v24  ;;  %v4594_v35 = vmul.f32 %v8957_v20, %v13341_v57  ;;  %v8963_v38 = vpop.eup %8962  ;;  %v13690_v57 = vmul.f32 %v8961_v1, %v13274_v7  ;;  %v16409_v20 = vld [vmem:[#allocation23_spill] sm:$0xff] }
 0x651   : >> { %v5837_v40 = vsel %vm1859_vm4, %v5696_v10, 0.0  ;;  %v5697_v21 = vmul.f32 %v8078_v61, %v16406_v14  ;;  %v13656_v34 = vpop.xlane.xlu1 %4307  ;;  %v4874_v25 = vpop.f32.mrb[83].mxu0  ;;  %8970 = vrcp.f32 %v4296_v18 }
 0x652   : >> { %v5836_v28 = vsel %vm1859_vm4, %v5694_v63, 0.0  ;;  %v5695_v5 = vmul.f32 %v16407_v4, %v4874_v25  ;;  %v8059_v32 = vpop.f32.mrb[64].mxu1  ;;  %v13660_v54 = vpop.xlane.xlu0 %4364  ;;  %8972 = vrcp.f32 %v4302_v29  ;;  %v4671_v63 = vpack.c.bf16 %v4593_v50, %v4592_v17 }
 0x653   : >> { %v13662_v36 = vadd.f32 %v5837_v40, %v5836_v28  ;;  %v5852_v24 = vsel %vm1859_vm4, %v5697_v21, 0.0  ;;  %v5680_v44 = vmul.f32 %v8059_v32, %v16406_v14  ;;  %v4747_v41 = vpop.f32.mrb[65].mxu1  ;;  %8974 = vrcp.f32 %v4335_v42 }
 0x654   : >> { %v5851_v52 = vsel %vm1859_vm4, %v5695_v5, 0.0  ;;  %v5678_v47 = vmul.f32 %v16407_v4, %v4747_v41  ;;  %v8060_v26 = vpop.f32.mrb[66].mxu1  ;;  %8976 = vrcp.f32 %v4305_v12  ;;  %v8965_v12 = vpop.eup %8964  ;;  %v4672_v40 = vpack.c.bf16 %v4595_v19, %v4594_v35 }
 0x655   : >> { %v13670_v9 = vadd.f32 %v5852_v24, %v5851_v52  ;;  %v5807_v39 = vsel %vm1859_vm4, %v5680_v44, 0.0  ;;  %v5681_v56 = vmul.f32 %v8060_v26, %v16406_v14  ;;  %v5431_v29 = vpop.permute.xlu1 %5430  ;;  %v4750_v8 = vpop.f32.mrb[67].mxu1  ;;  %8978 = vrcp.f32 %v13613_v30 }
 0x656   : >> { %v5806_v42 = vsel %vm1859_vm4, %v5678_v47, 0.0  ;;  %v5679_v45 = vmul.f32 %v16407_v4, %v4750_v8  ;;  %8163 = vmatprep.subr.bf16.mxu1 %v5431_v29  ;;  %v4317_v18 = vpop.xlane.xlu0 %4316  ;;  %8980 = vrcp.f32 %v13627_v53  ;;  %v4597_v30 = vmul.f32 %v8965_v12, %v13360_v33 }
 0x657   : >> { %v13678_v11 = vadd.f32 %v5807_v39, %v5806_v42  ;;  %v5822_v10 = vsel %vm1859_vm4, %v5681_v56, 0.0  ;;  %8164 = vmatpush3.bf16.msra.mxu1 %v5431_v29  ;;  %8982 = vrcp.f32 %v13636_v51  ;;  %v4608_v53 = vmul.f32 %v8959_v49, %v13203_v6  ;;  %v16408_v6 = vld [vmem:[#allocation24_spill] sm:$0xff] }
 0x658   : >> { %v5821_v61 = vsel %vm1859_vm4, %v5679_v45, 0.0  ;;  %8199 = vmatprep.subr.bf16.mxu1 %v8486_v27  ;;  %8984 = vrcp.f32 %v13646_v23  ;;  %v4596_v24 = vmul.f32 %v8963_v38, %v13294_v43 }
 0x659   : >> { %v13685_v3 = vadd.f32 %v5822_v10, %v5821_v61  ;;  %v8967_v21 = vpop.eup %8966  ;;  %8986 = vrcp.f32 %v13656_v34  ;;  %v4679_v44 = vpack.c.bf16 %v13690_v57, %v4608_v53 }
 0x65a   : >> { %8166 = vmatmul.mubr.msk.bf16.vlgmr.msra.gmra.mrb[112].mxu1 %vm3213_vm5, %v4671_v63  ;;  %v4359_v25 = vpop.xlane.xlu0 %4358  ;;  %v8969_v46 = vpop.eup %8968  ;;  %v4599_v32 = vmul.f32 %v8967_v21, %v13484_v58  ;;  %8988 = vrcp.f32 %v4317_v18  ;;  %v4673_v52 = vpack.c.bf16 %v4597_v30, %v4596_v24 }
 0x65b   : >> { %8169 = vmatprep.mubr.msk.bf16.mxu1 %vm3213_vm5, %v4672_v40  ;;  %8200 = vmatpush3.bf16.msra.mxu1 %v8486_v27  ;;  %v8971_v28 = vpop.eup %8970  ;;  %v4610_v26 = vmul.f32 %v8969_v46, %v13329_v13  ;;  %v16410_v27 = vld [vmem:[#allocation129_spill] sm:$0xff]  ;;  %v16411_v13 = vld [vmem:[#allocation171_spill] sm:$0xff] }
 0x65c   : >> { %8201 = vmatprep.subr.bf16.mxu1 %v8487_v15  ;;  %v8973_v5 = vpop.eup %8972  ;;  %v4598_v33 = vmul.f32 %v8971_v28, %v13415_v2 }
 0x65d   : >> { %v8975_v7 = vpop.eup %8974 }
 0x65e   : >> { %v8081_v62 = vpop.f32.mrb[84].mxu0  ;;  %v4311_v51 = vpop.xlane.xlu0 %4310  ;;  %v4674_v43 = vpack.c.bf16 %v4599_v32, %v4598_v33  ;;  %v4611_v39 = vmul.f32 %v8975_v7, %v16410_v27  ;;  %v16412_v7 = vld [vmem:[#allocation120_spill] sm:$0xff] }
 0x65f   : >> { %8990 = vrcp.f32 %v4311_v51  ;;  %v4887_v23 = vpop.f32.mrb[85].mxu0  ;;  %8202 = vmatpush3.bf16.msra.mxu1 %v8487_v15  ;;  %v8977_v41 = vpop.eup %8976  ;;  %v5700_v34 = vmul.f32 %v8081_v62, %v16408_v6 }
 0x660   : >> { %8992 = vrcp.f32 %v13629_v16  ;;  %v5698_v58 = vmul.f32 %v16409_v20, %v4887_v23  ;;  %v8082_v50 = vpop.f32.mrb[86].mxu0  ;;  %v8979_v19 = vpop.eup %8978  ;;  %v4601_v17 = vmul.f32 %v8977_v41, %v13428_v37  ;;  %v4680_v61 = vpack.c.bf16 %v4611_v39, %v4610_v26  ;;  %v16415_v26 = vld [vmem:[#allocation134_spill] sm:$0xff] }
 0x661   : >> { %8994 = vrcp.f32 %v13644_v60  ;;  %v4890_v47 = vpop.f32.mrb[87].mxu0  ;;  %v5701_v16 = vmul.f32 %v8082_v50, %v16408_v6  ;;  %v8981_v42 = vpop.eup %8980  ;;  %v5841_v45 = vsel %vm1859_vm4, %v5700_v34, 0.0  ;;  %v16413_v34 = vld [vmem:[#allocation70_spill] sm:$0xff] }
 0x662   : >> { %8996 = vrcp.f32 %v13639_v0  ;;  %v5839_v2 = vsel %vm1859_vm4, %v5698_v58, 0.0  ;;  %v5699_v56 = vmul.f32 %v16409_v20, %v4890_v47  ;;  %v8063_v29 = vpop.f32.mrb[68].mxu1  ;;  %8170 = vmatmul.mubr.msk.bf16.gmra.mrb[116].mxu1 %vm3213_vm5, %v4673_v52  ;;  %v5555_v8 = vpop.permute.xlu0 %5554  ;;  %v4600_v0 = vmul.f32 %v8973_v5, %v16411_v13  ;;  %v16414_v47 = vld [vmem:[#allocation77_spill] sm:$0xff] }
 0x663   : >> { %8998 = vrcp.f32 %v4359_v25  ;;  %v5840_v60 = vadd.f32 %v5839_v2, %v13662_v36  ;;  %v4763_v49 = vpop.f32.mrb[69].mxu1  ;;  %8173 = vmatprep.mubr.msk.bf16.mxu1 %vm3213_vm5, %v4674_v43  ;;  %8181 = vmatprep.subr.bf16.mxu0 %v5555_v8  ;;  %v5684_v1 = vmul.f32 %v8063_v29, %v16408_v6  ;;  %v8983_v36 = vpop.eup %8982  ;;  %v5856_v12 = vsel %vm1859_vm4, %v5701_v16, 0.0 }
 0x664   : >> { %v5854_v18 = vsel %vm1859_vm4, %v5699_v56, 0.0  ;;  %v5682_v10 = vmul.f32 %v16409_v20, %v4763_v49  ;;  %v8064_v35 = vpop.f32.mrb[70].mxu1  ;;  %8182 = vmatpush3.bf16.msra.mxu0 %v5555_v8  ;;  %9000 = vrcp.f32 %v13650_v22  ;;  %v8985_v37 = vpop.eup %8984  ;;  %v4675_v5 = vpack.c.bf16 %v4601_v17, %v4600_v0 }
 0x665   : >> { %v5855_v38 = vadd.f32 %v5854_v18, %v13670_v9  ;;  %v4766_v63 = vpop.f32.mrb[71].mxu1  ;;  %v5842_v15 = vadd.f32 %v5841_v45, %v5840_v60  ;;  %v5685_v21 = vmul.f32 %v8064_v35, %v16408_v6  ;;  %v8987_v46 = vpop.eup %8986  ;;  %v5811_v9 = vsel %vm1859_vm4, %v5684_v1, 0.0 }
 0x666   : >> { %v5809_v40 = vsel %vm1859_vm4, %v5682_v10, 0.0  ;;  %v5683_v25 = vmul.f32 %v16409_v20, %v4766_v63  ;;  %v8989_v28 = vpop.eup %8988  ;;  %v4613_v62 = vmul.f32 %v8981_v42, %v16412_v7  ;;  %v4615_v33 = vmul.f32 %v8985_v37, %v13443_v55  ;;  %v16420_v42 = vld [vmem:[#allocation87_spill] sm:$0xff]  ;;  %v16421_v63 = vld [vmem:[#allocation181_spill] sm:$0xff] }
 0x667   : >> { %v5810_v57 = vadd.f32 %v5809_v40, %v13678_v11  ;;  %8184 = vmatmul.mubr.msk.bf16.vlgmr.msra.gmra.mrb[128].mxu0 %vm3213_vm5, %v4679_v44  ;;  %v5857_v22 = vadd.f32 %v5856_v12, %v5855_v38  ;;  %v5826_v11 = vsel %vm1859_vm4, %v5685_v21, 0.0  ;;  %v4602_v44 = vmul.f32 %v8987_v46, %v13486_v59  ;;  %v16422_v37 = vld [vmem:[#allocation81_spill] sm:$0xff] }
 0x668   : >> { %v5824_v30 = vsel %vm1859_vm4, %v5683_v25, 0.0  ;;  %8187 = vmatprep.mubr.msk.bf16.mxu0 %vm3213_vm5, %v4680_v61  ;;  %v4612_v58 = vmul.f32 %v8979_v19, %v16413_v34  ;;  %9002 = vrcp.f32 %v13660_v54  ;;  %v4614_v43 = vmul.f32 %v8983_v36, %v16414_v47  ;;  %v16417_v54 = vld [vmem:[#allocation31_spill] sm:$0xff]  ;;  %v16423_v34 = vld [vmem:[#allocation78_spill] sm:$0xff]  ;;  %v16424_v47 = vld [vmem:[#allocation72_spill] sm:$0xff] }
 0x669   : >> { %v8991_v53 = vpop.eup %8990  ;;  %v5825_v32 = vadd.f32 %v5824_v30, %v13685_v3  ;;  %v5812_v51 = vadd.f32 %v5811_v9, %v5810_v57  ;;  %v4605_v27 = vmul.f32 %v8989_v28, %v16415_v26  ;;  %9004 = vrcp.f32 %v13641_v31  ;;  %v16418_v19 = vld [vmem:[#allocation27_spill] sm:$0xff]  ;;  %v16419_v31 = vld [vmem:[#allocation132_spill] sm:$0xff] }
 0x66a   : >> { %v8993_v24 = vpop.eup %8992  ;;  %8174 = vmatmul.mubr.msk.bf16.gmra.mrb[120].mxu1 %vm3213_vm5, %v4675_v5  ;;  %v4603_v23 = vmul.f32 %v8991_v53, %v13528_v48  ;;  %v4681_v2 = vpack.c.bf16 %v4613_v62, %v4612_v58  ;;  %v4682_v55 = vpack.c.bf16 %v4615_v33, %v4614_v43  ;;  %v16416_v48 = vld [vmem:[#allocation122_spill] sm:$0xff] }
 0x66b   : >> { %v8995_v41 = vpop.eup %8994  ;;  %v5827_v50 = vadd.f32 %v5826_v11, %v5825_v32  ;;  %v4616_v61 = vmul.f32 %v8993_v24, %v16421_v63 }
 0x66c   : >> { %v8997_v52 = vpop.eup %8996  ;;  %v4676_v3 = vpack.c.bf16 %v4603_v23, %v4602_v44  ;;  %v4604_v16 = vmul.f32 %v8995_v41, %v16416_v48 }
 0x66d   : >> { %v8999_v39 = vpop.eup %8998  ;;  %v4617_v17 = vmul.f32 %v8997_v52, %v16419_v31 }
 0x66e   : >> { %v8085_v59 = vpop.f32.mrb[88].mxu0  ;;  %8177 = vmatprep.mubr.msk.bf16.mxu1 %vm3213_vm5, %v4676_v3  ;;  %v9001_v56 = vpop.eup %9000  ;;  %v4677_v13 = vpack.c.bf16 %v4605_v27, %v4604_v16  ;;  %v4619_v45 = vmul.f32 %v8999_v39, %v16420_v42 }
 0x66f   : >> { %v4903_v29 = vpop.f32.mrb[89].mxu0  ;;  %8188 = vmatmul.mubr.msk.bf16.gmra.mrb[132].mxu0 %vm3213_vm5, %v4681_v2  ;;  %v5704_v8 = vmul.f32 %v8085_v59, %v16417_v54  ;;  %v4618_v12 = vmul.f32 %v9001_v56, %v16422_v37  ;;  %v4683_v30 = vpack.c.bf16 %v4617_v17, %v4616_v61  ;;  %v16425_v2 = vld [vmem:[#allocation30_spill] sm:$0xff] }
 0x670   : >> { %v5702_v60 = vmul.f32 %v16418_v19, %v4903_v29  ;;  %v8086_v49 = vpop.f32.mrb[90].mxu0  ;;  %8191 = vmatprep.mubr.msk.bf16.mxu0 %vm3213_vm5, %v4682_v55  ;;  %v16426_v55 = vld [vmem:[#allocation28_spill] sm:$0xff] }
 0x671   : >> { %v4906_v0 = vpop.f32.mrb[91].mxu0  ;;  %v5705_v1 = vmul.f32 %v8086_v49, %v16417_v54  ;;  %v5845_v40 = vsel %vm1859_vm4, %v5704_v8, 0.0  ;;  %v4684_v5 = vpack.c.bf16 %v4619_v45, %v4618_v12 }
 0x672   : >> { %v5843_v18 = vsel %vm1859_vm4, %v5702_v60, 0.0  ;;  %v5703_v10 = vmul.f32 %v16418_v19, %v4906_v0  ;;  %v8067_v35 = vpop.f32.mrb[72].mxu1  ;;  %8178 = vmatmul.mubr.msk.bf16.gmra.mrb[124].mxu1 %vm3213_vm5, %v4677_v13 }
 0x673   : >> { %v5844_v36 = vadd.f32 %v5843_v18, %v5842_v15  ;;  %v4779_v38 = vpop.f32.mrb[73].mxu1  ;;  %v5688_v25 = vmul.f32 %v8067_v35, %v16417_v54  ;;  %v9003_v15 = vpop.eup %9002  ;;  %v5860_v32 = vsel %vm1859_vm4, %v5705_v1, 0.0 }
 0x674   : >> { %v5858_v21 = vsel %vm1859_vm4, %v5703_v10, 0.0  ;;  %v5686_v46 = vmul.f32 %v16418_v19, %v4779_v38  ;;  %v8068_v57 = vpop.f32.mrb[74].mxu1  ;;  %v9005_v23 = vpop.eup %9004  ;;  %v4621_v58 = vmul.f32 %v9003_v15, %v16423_v34 }
 0x675   : >> { %v5859_v28 = vadd.f32 %v5858_v21, %v5857_v22  ;;  %v4782_v9 = vpop.f32.mrb[75].mxu1  ;;  %v5846_v53 = vadd.f32 %v5845_v40, %v5844_v36  ;;  %v5689_v62 = vmul.f32 %v8068_v57, %v16417_v54  ;;  %v5815_v22 = vsel %vm1859_vm4, %v5688_v25, 0.0 }
 0x676   : >> { %v5813_v7 = vsel %vm1859_vm4, %v5686_v46, 0.0  ;;  %v5687_v24 = vmul.f32 %v16418_v19, %v4782_v9  ;;  %v4620_v43 = vmul.f32 %v9005_v23, %v16424_v47 }
 0x677   : >> { %v5814_v11 = vadd.f32 %v5813_v7, %v5812_v51  ;;  %8192 = vmatmul.mubr.msk.bf16.gmra.mrb[136].mxu0 %vm3213_vm5, %v4683_v30  ;;  %v5861_v44 = vadd.f32 %v5860_v32, %v5859_v28  ;;  %v5830_v3 = vsel %vm1859_vm4, %v5689_v62, 0.0 }
 0x678   : >> { %v5828_v33 = vsel %vm1859_vm4, %v5687_v24, 0.0  ;;  %8195 = vmatprep.mubr.msk.bf16.mxu0 %vm3213_vm5, %v4684_v5  ;;  %v4685_v51 = vpack.c.bf16 %v4621_v58, %v4620_v43 }
 0x679   : >> { %v5829_v41 = vadd.f32 %v5828_v33, %v5827_v50  ;;  %v5816_v52 = vadd.f32 %v5815_v22, %v5814_v11 }
 0x67b   : >> { %v5831_v26 = vadd.f32 %v5830_v3, %v5829_v41 }
 0x67e   : >> { %v8089_v27 = vpop.f32.mrb[92].mxu0 }
 0x67f   : >> { %v4919_v39 = vpop.f32.mrb[93].mxu0  ;;  %8196 = vmatmul.mubr.msk.bf16.gmra.mrb[140].mxu0 %vm3213_vm5, %v4685_v51  ;;  %v5708_v59 = vmul.f32 %v8089_v27, %v16425_v2 }
 0x680   : >> { %v5706_v48 = vmul.f32 %v16426_v55, %v4919_v39  ;;  %v8090_v16 = vpop.f32.mrb[94].mxu0 }
 0x681   : >> { %v4922_v56 = vpop.f32.mrb[95].mxu0  ;;  %v5709_v29 = vmul.f32 %v8090_v16, %v16425_v2  ;;  %v5849_v0 = vsel %vm1859_vm4, %v5708_v59, 0.0 }
 0x682   : >> { %v5847_v50 = vsel %vm1859_vm4, %v5706_v48, 0.0  ;;  %v5707_v8 = vmul.f32 %v16426_v55, %v4922_v56  ;;  %v8071_v60 = vpop.f32.mrb[76].mxu1 }
 0x683   : >> { %v5848_v49 = vadd.f32 %v5847_v50, %v5846_v53  ;;  %v4795_v13 = vpop.f32.mrb[77].mxu1  ;;  %v5692_v17 = vmul.f32 %v8071_v60, %v16425_v2  ;;  %v5864_v35 = vsel %vm1859_vm4, %v5709_v29, 0.0 }
 0x684   : >> { %v5862_v31 = vsel %vm1859_vm4, %v5707_v8, 0.0  ;;  %v5690_v42 = vmul.f32 %v16426_v55, %v4795_v13  ;;  %v8072_v45 = vpop.f32.mrb[78].mxu1 }
 0x685   : >> { %v5850_v18 = vadd.f32 %v5849_v0, %v5848_v49  ;;  %v5863_v1 = vadd.f32 %v5862_v31, %v5861_v44  ;;  %v4798_v10 = vpop.f32.mrb[79].mxu1  ;;  %v5693_v38 = vmul.f32 %v8072_v45, %v16425_v2  ;;  %v5819_v12 = vsel %vm1859_vm4, %v5692_v17, 0.0 }
 0x686   : >> { %v5817_v36 = vsel %vm1859_vm4, %v5690_v42, 0.0  ;;  %v5691_v63 = vmul.f32 %v16426_v55, %v4798_v10 }
 0x687   : >> { %v5865_v61 = vadd.f32 %v5864_v35, %v5863_v1  ;;  %v5818_v37 = vadd.f32 %v5817_v36, %v5816_v52  ;;  %v5834_v57 = vsel %vm1859_vm4, %v5693_v38, 0.0 }
 0x688   : >> { %v5832_v40 = vsel %vm1859_vm4, %v5691_v63, 0.0 }
 0x689   : >> { %v6053_v21 = vpack.c.bf16 %v5865_v61, %v5850_v18  ;;  %v5820_v25 = vadd.f32 %v5819_v12, %v5818_v37  ;;  %v5833_v46 = vadd.f32 %v5832_v40, %v5831_v26 }
 0x68b   : >> { %v5835_v28 = vadd.f32 %v5834_v57, %v5833_v46 }
 0x68d   : >> { %v6052_v9 = vpack.c.bf16 %v5835_v28, %v5820_v25 }
 0x68e   : >> { %v8113_v30 = vpop.f32.mrb[96].mxu0 }
 0x68f   : >> { %v5728_v5 = vmul.f32 %v8113_v30, %v16406_v14  ;;  %v5119_v53 = vpop.f32.mrb[97].mxu0  ;;  %8203 = vmatprep.mubr.msk.bf16.mxu1 %vm1859_vm4, %v6052_v9 }
 0x690   : >> { %v5726_v15 = vmul.f32 %v16407_v4, %v5119_v53  ;;  %v8114_v32 = vpop.f32.mrb[98].mxu0  ;;  %8204 = vmatmul.mubr.msk.bf16.vlgmr.msra.gmra.mrb[128].mxu1 %vm1859_vm4, %v6053_v21 }
 0x691   : >> { %v5897_v7 = vsel %vm1859_vm4, %v5728_v5, 0.0  ;;  %v5729_v62 = vmul.f32 %v8114_v32, %v16406_v14  ;;  %v5122_v24 = vpop.f32.mrb[99].mxu0 }
 0x692   : >> { %v5896_v11 = vsel %vm1859_vm4, %v5726_v15, 0.0  ;;  %v5727_v44 = vmul.f32 %v16407_v4, %v5122_v24  ;;  %v8095_v23 = vpop.f32.mrb[80].mxu1 }
 0x693   : >> { %v5898_v22 = vadd.f32 %v5897_v7, %v5896_v11  ;;  %v5912_v33 = vsel %vm1859_vm4, %v5729_v62, 0.0  ;;  %v5712_v41 = vmul.f32 %v8095_v23, %v16406_v14  ;;  %v4995_v34 = vpop.f32.mrb[81].mxu1 }
 0x694   : >> { %v5911_v58 = vsel %vm1859_vm4, %v5727_v44, 0.0  ;;  %v5710_v52 = vmul.f32 %v16407_v4, %v4995_v34  ;;  %v8096_v3 = vpop.f32.mrb[82].mxu1 }
 0x695   : >> { %v5913_v47 = vadd.f32 %v5912_v33, %v5911_v58  ;;  %v5867_v43 = vsel %vm1859_vm4, %v5712_v41, 0.0  ;;  %v5713_v26 = vmul.f32 %v8096_v3, %v16406_v14  ;;  %v4998_v51 = vpop.f32.mrb[83].mxu1 }
 0x696   : >> { %v5866_v27 = vsel %vm1859_vm4, %v5710_v52, 0.0  ;;  %v5711_v39 = vmul.f32 %v16407_v4, %v4998_v51 }
 0x697   : >> { %v5868_v59 = vadd.f32 %v5867_v43, %v5866_v27  ;;  %v5882_v48 = vsel %vm1859_vm4, %v5713_v26, 0.0 }
 0x698   : >> { %v5881_v16 = vsel %vm1859_vm4, %v5711_v39, 0.0 }
 0x699   : >> { %v5883_v56 = vadd.f32 %v5882_v48, %v5881_v16 }
 0x69e   : >> { %v8117_v50 = vpop.f32.mrb[100].mxu0 }
 0x69f   : >> { %v5135_v29 = vpop.f32.mrb[101].mxu0  ;;  %v5732_v8 = vmul.f32 %v8117_v50, %v16408_v6 }
 0x6a0   : >> { %v5730_v60 = vmul.f32 %v16409_v20, %v5135_v29  ;;  %v8118_v49 = vpop.f32.mrb[102].mxu0 }
 0x6a1   : >> { %v5138_v13 = vpop.f32.mrb[103].mxu0  ;;  %v5733_v31 = vmul.f32 %v8118_v49, %v16408_v6  ;;  %v5901_v1 = vsel %vm1859_vm4, %v5732_v8, 0.0 }
 0x6a2   : >> { %v5899_v0 = vsel %vm1859_vm4, %v5730_v60, 0.0  ;;  %v5731_v17 = vmul.f32 %v16409_v20, %v5138_v13  ;;  %v8099_v42 = vpop.f32.mrb[84].mxu1 }
 0x6a3   : >> { %v5900_v45 = vadd.f32 %v5899_v0, %v5898_v22  ;;  %v5011_v18 = vpop.f32.mrb[85].mxu1  ;;  %v5716_v35 = vmul.f32 %v8099_v42, %v16408_v6  ;;  %v5916_v12 = vsel %vm1859_vm4, %v5733_v31, 0.0 }
 0x6a4   : >> { %v5914_v10 = vsel %vm1859_vm4, %v5731_v17, 0.0  ;;  %v5714_v36 = vmul.f32 %v16409_v20, %v5011_v18  ;;  %v8100_v38 = vpop.f32.mrb[86].mxu1 }
 0x6a5   : >> { %v5915_v63 = vadd.f32 %v5914_v10, %v5913_v47  ;;  %v5014_v61 = vpop.f32.mrb[87].mxu1  ;;  %v5902_v37 = vadd.f32 %v5901_v1, %v5900_v45  ;;  %v5717_v21 = vmul.f32 %v8100_v38, %v16408_v6  ;;  %v5871_v28 = vsel %vm1859_vm4, %v5716_v35, 0.0 }
 0x6a6   : >> { %v5869_v40 = vsel %vm1859_vm4, %v5714_v36, 0.0  ;;  %v5715_v25 = vmul.f32 %v16409_v20, %v5014_v61 }
 0x6a7   : >> { %v5870_v46 = vadd.f32 %v5869_v40, %v5868_v59  ;;  %v5917_v57 = vadd.f32 %v5916_v12, %v5915_v63  ;;  %v5886_v53 = vsel %vm1859_vm4, %v5717_v21, 0.0 }
 0x6a8   : >> { %v5884_v9 = vsel %vm1859_vm4, %v5715_v25, 0.0 }
 0x6a9   : >> { %v5885_v30 = vadd.f32 %v5884_v9, %v5883_v56  ;;  %v5872_v5 = vadd.f32 %v5871_v28, %v5870_v46 }
 0x6ab   : >> { %v5887_v15 = vadd.f32 %v5886_v53, %v5885_v30 }
 0x6ae   : >> { %v8121_v32 = vpop.f32.mrb[104].mxu0 }
 0x6af   : >> { %v5151_v7 = vpop.f32.mrb[105].mxu0  ;;  %v5736_v62 = vmul.f32 %v8121_v32, %v16417_v54 }
 0x6b0   : >> { %v5734_v24 = vmul.f32 %v16418_v19, %v5151_v7  ;;  %v8122_v11 = vpop.f32.mrb[106].mxu0 }
 0x6b1   : >> { %v5154_v44 = vpop.f32.mrb[107].mxu0  ;;  %v5737_v22 = vmul.f32 %v8122_v11, %v16417_v54  ;;  %v5905_v52 = vsel %vm1859_vm4, %v5736_v62, 0.0 }
 0x6b2   : >> { %v5903_v23 = vsel %vm1859_vm4, %v5734_v24, 0.0  ;;  %v5735_v33 = vmul.f32 %v16418_v19, %v5154_v44  ;;  %v8103_v41 = vpop.f32.mrb[88].mxu1 }
 0x6b3   : >> { %v5904_v34 = vadd.f32 %v5903_v23, %v5902_v37  ;;  %v5027_v58 = vpop.f32.mrb[89].mxu1  ;;  %v5720_v47 = vmul.f32 %v8103_v41, %v16417_v54  ;;  %v5920_v59 = vsel %vm1859_vm4, %v5737_v22, 0.0 }
 0x6b4   : >> { %v5918_v3 = vsel %vm1859_vm4, %v5735_v33, 0.0  ;;  %v5718_v43 = vmul.f32 %v16418_v19, %v5027_v58  ;;  %v8104_v26 = vpop.f32.mrb[90].mxu1 }
 0x6b5   : >> { %v5919_v51 = vadd.f32 %v5918_v3, %v5917_v57  ;;  %v5030_v27 = vpop.f32.mrb[91].mxu1  ;;  %v5906_v39 = vadd.f32 %v5905_v52, %v5904_v34  ;;  %v5721_v16 = vmul.f32 %v8104_v26, %v16417_v54  ;;  %v5875_v8 = vsel %vm1859_vm4, %v5720_v47, 0.0 }
 0x6b6   : >> { %v5873_v48 = vsel %vm1859_vm4, %v5718_v43, 0.0  ;;  %v5719_v56 = vmul.f32 %v16418_v19, %v5030_v27 }
 0x6b7   : >> { %v5874_v50 = vadd.f32 %v5873_v48, %v5872_v5  ;;  %v5921_v29 = vadd.f32 %v5920_v59, %v5919_v51  ;;  %v5890_v0 = vsel %vm1859_vm4, %v5721_v16, 0.0 }
 0x6b8   : >> { %v5888_v60 = vsel %vm1859_vm4, %v5719_v56, 0.0 }
 0x6b9   : >> { %v5889_v49 = vadd.f32 %v5888_v60, %v5887_v15  ;;  %v5876_v13 = vadd.f32 %v5875_v8, %v5874_v50 }
 0x6bb   : >> { %v5891_v31 = vadd.f32 %v5890_v0, %v5889_v49 }
 0x6be   : >> { %v8125_v17 = vpop.f32.mrb[108].mxu0 }
 0x6bf   : >> { %v5167_v42 = vpop.f32.mrb[109].mxu0  ;;  %v5740_v45 = vmul.f32 %v8125_v17, %v16425_v2 }
 0x6c0   : >> { %v5738_v18 = vmul.f32 %v16426_v55, %v5167_v42  ;;  %v8126_v1 = vpop.f32.mrb[110].mxu0 }
 0x6c1   : >> { %v5170_v10 = vpop.f32.mrb[111].mxu0  ;;  %v5741_v36 = vmul.f32 %v8126_v1, %v16425_v2  ;;  %v5909_v12 = vsel %vm1859_vm4, %v5740_v45, 0.0 }
 0x6c2   : >> { %v5907_v35 = vsel %vm1859_vm4, %v5738_v18, 0.0  ;;  %v5739_v38 = vmul.f32 %v16426_v55, %v5170_v10  ;;  %v8107_v63 = vpop.f32.mrb[92].mxu1 }
 0x6c3   : >> { %v5908_v61 = vadd.f32 %v5907_v35, %v5906_v39  ;;  %v5043_v37 = vpop.f32.mrb[93].mxu1  ;;  %v5724_v21 = vmul.f32 %v8107_v63, %v16425_v2  ;;  %v5924_v30 = vsel %vm1859_vm4, %v5741_v36, 0.0 }
 0x6c4   : >> { %v5922_v40 = vsel %vm1859_vm4, %v5739_v38, 0.0  ;;  %v5722_v25 = vmul.f32 %v16426_v55, %v5043_v37  ;;  %v8108_v46 = vpop.f32.mrb[94].mxu1 }
 0x6c5   : >> { %v5910_v57 = vadd.f32 %v5909_v12, %v5908_v61  ;;  %v5923_v28 = vadd.f32 %v5922_v40, %v5921_v29  ;;  %v5046_v9 = vpop.f32.mrb[95].mxu1  ;;  %v5725_v53 = vmul.f32 %v8108_v46, %v16425_v2  ;;  %v5879_v62 = vsel %vm1859_vm4, %v5724_v21, 0.0 }
 0x6c6   : >> { %v5877_v5 = vsel %vm1859_vm4, %v5722_v25, 0.0  ;;  %v5723_v15 = vmul.f32 %v16426_v55, %v5046_v9 }
 0x6c7   : >> { %v5925_v32 = vadd.f32 %v5924_v30, %v5923_v28  ;;  %v5878_v7 = vadd.f32 %v5877_v5, %v5876_v13  ;;  %v5894_v22 = vsel %vm1859_vm4, %v5725_v53, 0.0 }
 0x6c8   : >> { %v5892_v24 = vsel %vm1859_vm4, %v5723_v15, 0.0 }
 0x6c9   : >> { %v5880_v11 = vadd.f32 %v5879_v62, %v5878_v7  ;;  %v5893_v44 = vadd.f32 %v5892_v24, %v5891_v31  ;;  %v6055_v23 = vpack.c.bf16 %v5925_v32, %v5910_v57 }
 0x6cb   : >> { %v5895_v33 = vadd.f32 %v5894_v22, %v5893_v44 }
 0x6cd   : >> { %v6054_v41 = vpack.c.bf16 %v5895_v33, %v5880_v11 }
 0x6ce   : >> { %v8149_v34 = vpop.f32.mrb[112].mxu0 }
 0x6cf   : >> { %v5760_v58 = vmul.f32 %v8149_v34, %v16406_v14  ;;  %v5367_v52 = vpop.f32.mrb[113].mxu0  ;;  %8207 = vmatprep.mubr.msk.bf16.mxu1 %vm1859_vm4, %v6054_v41 }
 0x6d0   : >> { %v5758_v3 = vmul.f32 %v16407_v4, %v5367_v52  ;;  %v8150_v47 = vpop.f32.mrb[114].mxu0  ;;  %8208 = vmatmul.mubr.msk.bf16.gmra.mrb[132].mxu1 %vm1859_vm4, %v6055_v23 }
 0x6d1   : >> { %v5957_v43 = vsel %vm1859_vm4, %v5760_v58, 0.0  ;;  %v5761_v26 = vmul.f32 %v8150_v47, %v16406_v14  ;;  %v5370_v51 = vpop.f32.mrb[115].mxu0 }
 0x6d2   : >> { %v5956_v27 = vsel %vm1859_vm4, %v5758_v3, 0.0  ;;  %v5759_v39 = vmul.f32 %v16407_v4, %v5370_v51  ;;  %v8131_v59 = vpop.f32.mrb[96].mxu1 }
 0x6d3   : >> { %v5958_v48 = vadd.f32 %v5957_v43, %v5956_v27  ;;  %v5972_v16 = vsel %vm1859_vm4, %v5761_v26, 0.0  ;;  %v5744_v56 = vmul.f32 %v8131_v59, %v16406_v14  ;;  %v5243_v50 = vpop.f32.mrb[97].mxu1 }
 0x6d4   : >> { %v5971_v29 = vsel %vm1859_vm4, %v5759_v39, 0.0  ;;  %v5742_v8 = vmul.f32 %v16407_v4, %v5243_v50  ;;  %v8132_v60 = vpop.f32.mrb[98].mxu1 }
 0x6d5   : >> { %v5973_v49 = vadd.f32 %v5972_v16, %v5971_v29  ;;  %v5927_v13 = vsel %vm1859_vm4, %v5744_v56, 0.0  ;;  %v5745_v0 = vmul.f32 %v8132_v60, %v16406_v14  ;;  %v5246_v31 = vpop.f32.mrb[99].mxu1 }
 0x6d6   : >> { %v5926_v17 = vsel %vm1859_vm4, %v5742_v8, 0.0  ;;  %v5743_v42 = vmul.f32 %v16407_v4, %v5246_v31 }
 0x6d7   : >> { %v5928_v45 = vadd.f32 %v5927_v13, %v5926_v17  ;;  %v5942_v18 = vsel %vm1859_vm4, %v5745_v0, 0.0 }
 0x6d8   : >> { %v5941_v1 = vsel %vm1859_vm4, %v5743_v42, 0.0 }
 0x6d9   : >> { %v5943_v10 = vadd.f32 %v5942_v18, %v5941_v1 }
 0x6de   : >> { %v8153_v35 = vpop.f32.mrb[116].mxu0 }
 0x6df   : >> { %v5383_v36 = vpop.f32.mrb[117].mxu0  ;;  %v5764_v38 = vmul.f32 %v8153_v35, %v16408_v6 }
 0x6e0   : >> { %v5762_v63 = vmul.f32 %v16409_v20, %v5383_v36  ;;  %v8154_v61 = vpop.f32.mrb[118].mxu0 }
 0x6e1   : >> { %v5386_v37 = vpop.f32.mrb[119].mxu0  ;;  %v5765_v40 = vmul.f32 %v8154_v61, %v16408_v6  ;;  %v5961_v28 = vsel %vm1859_vm4, %v5764_v38, 0.0 }
 0x6e2   : >> { %v5959_v12 = vsel %vm1859_vm4, %v5762_v63, 0.0  ;;  %v5763_v21 = vmul.f32 %v16409_v20, %v5386_v37  ;;  %v8135_v25 = vpop.f32.mrb[100].mxu1 }
 0x6e3   : >> { %v5960_v46 = vadd.f32 %v5959_v12, %v5958_v48  ;;  %v5259_v57 = vpop.f32.mrb[101].mxu1  ;;  %v5748_v30 = vmul.f32 %v8135_v25, %v16408_v6  ;;  %v5976_v62 = vsel %vm1859_vm4, %v5765_v40, 0.0 }
 0x6e4   : >> { %v5974_v9 = vsel %vm1859_vm4, %v5763_v21, 0.0  ;;  %v5746_v5 = vmul.f32 %v16409_v20, %v5259_v57  ;;  %v8136_v53 = vpop.f32.mrb[102].mxu1 }
 0x6e5   : >> { %v5975_v15 = vadd.f32 %v5974_v9, %v5973_v49  ;;  %v5262_v32 = vpop.f32.mrb[103].mxu1  ;;  %v5962_v7 = vadd.f32 %v5961_v28, %v5960_v46  ;;  %v5749_v11 = vmul.f32 %v8136_v53, %v16408_v6  ;;  %v5931_v33 = vsel %vm1859_vm4, %v5748_v30, 0.0 }
 0x6e6   : >> { %v5929_v24 = vsel %vm1859_vm4, %v5746_v5, 0.0  ;;  %v5747_v44 = vmul.f32 %v16409_v20, %v5262_v32 }
 0x6e7   : >> { %v5930_v23 = vadd.f32 %v5929_v24, %v5928_v45  ;;  %v5977_v22 = vadd.f32 %v5976_v62, %v5975_v15  ;;  %v5946_v52 = vsel %vm1859_vm4, %v5749_v11, 0.0 }
 0x6e8   : >> { %v5944_v41 = vsel %vm1859_vm4, %v5747_v44, 0.0 }
 0x6e9   : >> { %v5945_v34 = vadd.f32 %v5944_v41, %v5943_v10  ;;  %v5932_v58 = vadd.f32 %v5931_v33, %v5930_v23 }
 0x6eb   : >> { %v5947_v3 = vadd.f32 %v5946_v52, %v5945_v34 }
 0x6ee   : >> { %v8157_v47 = vpop.f32.mrb[120].mxu0 }
 0x6ef   : >> { %v5399_v43 = vpop.f32.mrb[121].mxu0  ;;  %v5768_v26 = vmul.f32 %v8157_v47, %v16417_v54 }
 0x6f0   : >> { %v5766_v51 = vmul.f32 %v16418_v19, %v5399_v43  ;;  %v8158_v27 = vpop.f32.mrb[122].mxu0 }
 0x6f1   : >> { %v5402_v39 = vpop.f32.mrb[123].mxu0  ;;  %v5769_v48 = vmul.f32 %v8158_v27, %v16417_v54  ;;  %v5965_v8 = vsel %vm1859_vm4, %v5768_v26, 0.0 }
 0x6f2   : >> { %v5963_v59 = vsel %vm1859_vm4, %v5766_v51, 0.0  ;;  %v5767_v16 = vmul.f32 %v16418_v19, %v5402_v39  ;;  %v8139_v56 = vpop.f32.mrb[104].mxu1 }
 0x6f3   : >> { %v5964_v50 = vadd.f32 %v5963_v59, %v5962_v7  ;;  %v5275_v29 = vpop.f32.mrb[105].mxu1  ;;  %v5752_v49 = vmul.f32 %v8139_v56, %v16417_v54  ;;  %v5980_v45 = vsel %vm1859_vm4, %v5769_v48, 0.0 }
 0x6f4   : >> { %v5978_v60 = vsel %vm1859_vm4, %v5767_v16, 0.0  ;;  %v5750_v13 = vmul.f32 %v16418_v19, %v5275_v29  ;;  %v8140_v0 = vpop.f32.mrb[106].mxu1 }
 0x6f5   : >> { %v5979_v31 = vadd.f32 %v5978_v60, %v5977_v22  ;;  %v5278_v17 = vpop.f32.mrb[107].mxu1  ;;  %v5966_v42 = vadd.f32 %v5965_v8, %v5964_v50  ;;  %v5753_v1 = vmul.f32 %v8140_v0, %v16417_v54  ;;  %v5935_v38 = vsel %vm1859_vm4, %v5752_v49, 0.0 }
 0x6f6   : >> { %v5933_v18 = vsel %vm1859_vm4, %v5750_v13, 0.0  ;;  %v5751_v10 = vmul.f32 %v16418_v19, %v5278_v17 }
 0x6f7   : >> { %v5934_v35 = vadd.f32 %v5933_v18, %v5932_v58  ;;  %v5981_v36 = vadd.f32 %v5980_v45, %v5979_v31  ;;  %v5950_v12 = vsel %vm1859_vm4, %v5753_v1, 0.0 }
 0x6f8   : >> { %v5948_v63 = vsel %vm1859_vm4, %v5751_v10, 0.0 }
 0x6f9   : >> { %v5949_v61 = vadd.f32 %v5948_v63, %v5947_v3  ;;  %v5936_v37 = vadd.f32 %v5935_v38, %v5934_v35 }
 0x6fb   : >> { %v5951_v40 = vadd.f32 %v5950_v12, %v5949_v61 }
 0x6fe   : >> { %v8161_v21 = vpop.f32.mrb[124].mxu0 }
 0x6ff   : >> { %v5415_v25 = vpop.f32.mrb[125].mxu0  ;;  %v5772_v46 = vmul.f32 %v8161_v21, %v16425_v2 }
 0x700   : >> { %v5770_v57 = vmul.f32 %v16426_v55, %v5415_v25  ;;  %v8162_v28 = vpop.f32.mrb[126].mxu0 }
 0x701   : >> { %v5418_v9 = vpop.f32.mrb[127].mxu0  ;;  %v5773_v5 = vmul.f32 %v8162_v28, %v16425_v2  ;;  %v5969_v62 = vsel %vm1859_vm4, %v5772_v46, 0.0 }
 0x702   : >> { %v5967_v30 = vsel %vm1859_vm4, %v5770_v57, 0.0  ;;  %v5771_v53 = vmul.f32 %v16426_v55, %v5418_v9  ;;  %v8143_v15 = vpop.f32.mrb[108].mxu1 }
 0x703   : >> { %v5968_v32 = vadd.f32 %v5967_v30, %v5966_v42  ;;  %v5291_v7 = vpop.f32.mrb[109].mxu1  ;;  %v5756_v11 = vmul.f32 %v8143_v15, %v16425_v2  ;;  %v5984_v34 = vsel %vm1859_vm4, %v5773_v5, 0.0 }
 0x704   : >> { %v5982_v24 = vsel %vm1859_vm4, %v5771_v53, 0.0  ;;  %v5754_v44 = vmul.f32 %v16426_v55, %v5291_v7  ;;  %v8144_v23 = vpop.f32.mrb[110].mxu1 }
 0x705   : >> { %v5970_v22 = vadd.f32 %v5969_v62, %v5968_v32  ;;  %v5983_v33 = vadd.f32 %v5982_v24, %v5981_v36  ;;  %v5294_v41 = vpop.f32.mrb[111].mxu1  ;;  %v5757_v52 = vmul.f32 %v8144_v23, %v16425_v2  ;;  %v5939_v26 = vsel %vm1859_vm4, %v5756_v11, 0.0 }
 0x706   : >> { %v5937_v58 = vsel %vm1859_vm4, %v5754_v44, 0.0  ;;  %v5755_v3 = vmul.f32 %v16426_v55, %v5294_v41 }
 0x707   : >> { %v5985_v47 = vadd.f32 %v5984_v34, %v5983_v33  ;;  %v5938_v43 = vadd.f32 %v5937_v58, %v5936_v37  ;;  %v5954_v48 = vsel %vm1859_vm4, %v5757_v52, 0.0 }
 0x708   : >> { %v5952_v51 = vsel %vm1859_vm4, %v5755_v3, 0.0 }
 0x709   : >> { %v5940_v27 = vadd.f32 %v5939_v26, %v5938_v43  ;;  %v5953_v39 = vadd.f32 %v5952_v51, %v5951_v40  ;;  %v6057_v59 = vpack.c.bf16 %v5985_v47, %v5970_v22 }
 0x70b   : >> { %v5955_v16 = vadd.f32 %v5954_v48, %v5953_v39 }
 0x70d   : >> { %v6056_v56 = vpack.c.bf16 %v5955_v16, %v5940_v27 }
 0x70f   : >> { %8211 = vmatprep.mubr.msk.bf16.mxu1 %vm1859_vm4, %v6056_v56 }
 0x710   : >> { %8212 = vmatmul.mubr.msk.bf16.gmra.mrb[136].mxu1 %vm1859_vm4, %v6057_v59 }
 0x72d   : >> { %v8167_v50 = vpop.f32.mrb[112].mxu1 }
 0x72e   : >> { %v5776_v29 = vmul.f32 %v8167_v50, %v16406_v14  ;;  %v5491_v8 = vpop.f32.mrb[113].mxu1 }
 0x72f   : >> { %v5774_v60 = vmul.f32 %v16407_v4, %v5491_v8  ;;  %v8168_v49 = vpop.f32.mrb[114].mxu1 }
 0x730   : >> { %v5987_v13 = vsel %vm1859_vm4, %v5776_v29, 0.0  ;;  %v5777_v0 = vmul.f32 %v8168_v49, %v16406_v14  ;;  %v5494_v31 = vpop.f32.mrb[115].mxu1 }
 0x731   : >> { %v5986_v17 = vsel %vm1859_vm4, %v5774_v60, 0.0  ;;  %v5775_v42 = vmul.f32 %v16407_v4, %v5494_v31 }
 0x732   : >> { %v5988_v45 = vadd.f32 %v5987_v13, %v5986_v17  ;;  %v6002_v18 = vsel %vm1859_vm4, %v5777_v0, 0.0 }
 0x733   : >> { %v6001_v1 = vsel %vm1859_vm4, %v5775_v42, 0.0 }
 0x734   : >> { %v6003_v10 = vadd.f32 %v6002_v18, %v6001_v1 }
 0x735   : >> { %v8171_v35 = vpop.f32.mrb[116].mxu1 }
 0x736   : >> { %v5507_v36 = vpop.f32.mrb[117].mxu1  ;;  %v5780_v38 = vmul.f32 %v8171_v35, %v16408_v6 }
 0x737   : >> { %v5778_v63 = vmul.f32 %v16409_v20, %v5507_v36  ;;  %v8172_v61 = vpop.f32.mrb[118].mxu1 }
 0x738   : >> { %v5510_v37 = vpop.f32.mrb[119].mxu1  ;;  %v5781_v40 = vmul.f32 %v8172_v61, %v16408_v6  ;;  %v5991_v57 = vsel %vm1859_vm4, %v5780_v38, 0.0 }
 0x739   : >> { %v5989_v12 = vsel %vm1859_vm4, %v5778_v63, 0.0  ;;  %v5779_v21 = vmul.f32 %v16409_v20, %v5510_v37 }
 0x73a   : >> { %v5990_v25 = vadd.f32 %v5989_v12, %v5988_v45  ;;  %v8185_v46 = vpop.f32.mrb[128].mxu0  ;;  %v6006_v7 = vsel %vm1859_vm4, %v5781_v40, 0.0 }
 0x73b   : >> { %v6004_v28 = vsel %vm1859_vm4, %v5779_v21, 0.0  ;;  %v5792_v9 = vmul.f32 %v8185_v46, %v16406_v14  ;;  %v5615_v30 = vpop.f32.mrb[129].mxu0 }
 0x73c   : >> { %v6005_v5 = vadd.f32 %v6004_v28, %v6003_v10  ;;  %v5790_v53 = vmul.f32 %v16407_v4, %v5615_v30  ;;  %v8186_v15 = vpop.f32.mrb[130].mxu0  ;;  %v5992_v32 = vadd.f32 %v5991_v57, %v5990_v25 }
 0x73d   : >> { %v6017_v62 = vsel %vm1859_vm4, %v5792_v9, 0.0  ;;  %v5793_v24 = vmul.f32 %v8186_v15, %v16406_v14  ;;  %v8175_v11 = vpop.f32.mrb[120].mxu1  ;;  %v5618_v44 = vpop.f32.mrb[131].mxu0 }
 0x73e   : >> { %v6016_v23 = vsel %vm1859_vm4, %v5790_v53, 0.0  ;;  %v5791_v22 = vmul.f32 %v16407_v4, %v5618_v44  ;;  %v5523_v33 = vpop.f32.mrb[121].mxu1  ;;  %v6007_v41 = vadd.f32 %v6006_v7, %v6005_v5  ;;  %v5784_v52 = vmul.f32 %v8175_v11, %v16417_v54 }
 0x73f   : >> { %v6018_v34 = vadd.f32 %v6017_v62, %v6016_v23  ;;  %v6032_v58 = vsel %vm1859_vm4, %v5793_v24, 0.0  ;;  %v5782_v3 = vmul.f32 %v16418_v19, %v5523_v33  ;;  %v8176_v47 = vpop.f32.mrb[122].mxu1 }
 0x740   : >> { %v6031_v43 = vsel %vm1859_vm4, %v5791_v22, 0.0  ;;  %v5526_v26 = vpop.f32.mrb[123].mxu1  ;;  %v5785_v27 = vmul.f32 %v8176_v47, %v16417_v54  ;;  %v5995_v48 = vsel %vm1859_vm4, %v5784_v52, 0.0 }
 0x741   : >> { %v6033_v14 = vadd.f32 %v6032_v58, %v6031_v43  ;;  %v5993_v51 = vsel %vm1859_vm4, %v5782_v3, 0.0  ;;  %v5783_v4 = vmul.f32 %v16418_v19, %v5526_v26 }
 0x742   : >> { %v5994_v39 = vadd.f32 %v5993_v51, %v5992_v32  ;;  %v8189_v59 = vpop.f32.mrb[132].mxu0  ;;  %v6010_v13 = vsel %vm1859_vm4, %v5785_v27, 0.0 }
 0x743   : >> { %v6008_v16 = vsel %vm1859_vm4, %v5783_v4, 0.0  ;;  %v5631_v56 = vpop.f32.mrb[133].mxu0  ;;  %v5796_v29 = vmul.f32 %v8189_v59, %v16408_v6 }
 0x744   : >> { %v6009_v50 = vadd.f32 %v6008_v16, %v6007_v41  ;;  %v5794_v8 = vmul.f32 %v16409_v20, %v5631_v56  ;;  %v8190_v60 = vpop.f32.mrb[134].mxu0  ;;  %v5996_v49 = vadd.f32 %v5995_v48, %v5994_v39 }
 0x745   : >> { %v8179_v0 = vpop.f32.mrb[124].mxu1  ;;  %v5634_v31 = vpop.f32.mrb[135].mxu0  ;;  %v5797_v42 = vmul.f32 %v8190_v60, %v16408_v6  ;;  %v6021_v63 = vsel %vm1859_vm4, %v5796_v29, 0.0 }
 0x746   : >> { %v6019_v17 = vsel %vm1859_vm4, %v5794_v8, 0.0  ;;  %v5795_v45 = vmul.f32 %v16409_v20, %v5634_v31  ;;  %v5539_v18 = vpop.f32.mrb[125].mxu1  ;;  %v6011_v1 = vadd.f32 %v6010_v13, %v6009_v50  ;;  %v5788_v35 = vmul.f32 %v8179_v0, %v16425_v2 }
 0x747   : >> { %v6020_v10 = vadd.f32 %v6019_v17, %v6018_v34  ;;  %v5786_v36 = vmul.f32 %v16426_v55, %v5539_v18  ;;  %v8180_v38 = vpop.f32.mrb[126].mxu1  ;;  %v6036_v25 = vsel %vm1859_vm4, %v5797_v42, 0.0  ;;  %v16427_v18 = vld [vmem:[#allocation52_spill] sm:$0xff] }
 0x748   : >> { %v6034_v61 = vsel %vm1859_vm4, %v5795_v45, 0.0  ;;  %v5789_v37 = vmul.f32 %v8180_v38, %v16425_v2  ;;  %v5542_v12 = vpop.f32.mrb[127].mxu1  ;;  %v5999_v28 = vsel %vm1859_vm4, %v5788_v35, 0.0 }
 0x749   : >> { %v6035_v40 = vadd.f32 %v6034_v61, %v6033_v14  ;;  %v5997_v6 = vsel %vm1859_vm4, %v5786_v36, 0.0  ;;  %v5787_v20 = vmul.f32 %v16426_v55, %v5542_v12  ;;  %v6022_v21 = vadd.f32 %v6021_v63, %v6020_v10  ;;  %v16428_v36 = vld [vmem:[#allocation50_spill] sm:$0xff]  ;;  %v16429_v63 = vld [vmem:[#allocation51_spill] sm:$0xff]  ;;  %v16430_v12 = vld [vmem:[#allocation49_spill] sm:$0xff] }
 0x74a   : >> { %v5998_v46 = vadd.f32 %v5997_v6, %v5996_v49  ;;  %v8193_v57 = vpop.f32.mrb[136].mxu0  ;;  %v6014_v24 = vsel %vm1859_vm4, %v5789_v37, 0.0 }
 0x74b   : >> { %v6012_v9 = vsel %vm1859_vm4, %v5787_v20, 0.0  ;;  %v5647_v30 = vpop.f32.mrb[137].mxu0  ;;  %v6037_v5 = vadd.f32 %v6036_v25, %v6035_v40  ;;  %v5800_v32 = vmul.f32 %v8193_v57, %v16417_v54 }
 0x74c   : >> { %v6000_v53 = vadd.f32 %v5999_v28, %v5998_v46  ;;  %v6013_v15 = vadd.f32 %v6012_v9, %v6011_v1  ;;  %v5798_v7 = vmul.f32 %v16418_v19, %v5647_v30  ;;  %v8194_v62 = vpop.f32.mrb[138].mxu0 }
 0x74d   : >> { %v5650_v11 = vpop.f32.mrb[139].mxu0  ;;  %v5801_v22 = vmul.f32 %v8194_v62, %v16417_v54  ;;  %v6025_v34 = vsel %vm1859_vm4, %v5800_v32, 0.0 }
 0x74e   : >> { %v6015_v44 = vadd.f32 %v6014_v24, %v6013_v15  ;;  %v6023_v23 = vsel %vm1859_vm4, %v5798_v7, 0.0  ;;  %v5799_v33 = vmul.f32 %v16418_v19, %v5650_v11  ;;  %v16432_v7 = vld [vmem:[#allocation46_spill] sm:$0xff]  ;;  %v16433_v24 = vld [vmem:[#allocation47_spill] sm:$0xff] }
 0x74f   : >> { %v6024_v41 = vadd.f32 %v6023_v23, %v6022_v21  ;;  %v6040_v43 = vsel %vm1859_vm4, %v5801_v22, 0.0  ;;  %v16434_v23 = vld [vmem:[#allocation45_spill] sm:$0xff] }
 0x750   : >> { %v6038_v58 = vsel %vm1859_vm4, %v5799_v33, 0.0  ;;  %v6058_v52 = vpack.c.bf16 %v6015_v44, %v6000_v53 }
 0x751   : >> { %v6039_v3 = vadd.f32 %v6038_v58, %v6037_v5  ;;  %v6026_v47 = vadd.f32 %v6025_v34, %v6024_v41  ;;  %v16431_v5 = vld [vmem:[#allocation48_spill] sm:$0xff] }
 0x752   : >> { %v8197_v26 = vpop.f32.mrb[140].mxu0  ;;  %8215 = vmatprep.mubr.msk.bf16.mxu1 %vm1859_vm4, %v6058_v52 }
 0x753   : >> { %v5663_v14 = vpop.f32.mrb[141].mxu0  ;;  %v6041_v51 = vadd.f32 %v6040_v43, %v6039_v3  ;;  %v5804_v27 = vmul.f32 %v8197_v26, %v16425_v2 }
 0x754   : >> { %v5802_v54 = vmul.f32 %v16426_v55, %v5663_v14  ;;  %v8198_v19 = vpop.f32.mrb[142].mxu0  ;;  %v16435_v14 = vld [vmem:[#allocation44_spill] sm:$0xff] }
 0x755   : >> { %v5666_v4 = vpop.f32.mrb[143].mxu0  ;;  %v5805_v59 = vmul.f32 %v8198_v19, %v16425_v2  ;;  %v6029_v56 = vsel %vm1859_vm4, %v5804_v27, 0.0  ;;  %v13994_v2 = vld [vmem:[%s6060_s0] ss:$0 sm:$0xff]  ;;  %v16436_v19 = vld [vmem:[#allocation42_spill] sm:$0xff]  ;;  %s14260_s0 = scalar_lea.vmem %s14778_s16, %s7693_s4 }
 0x756   : >> { %v6027_v39 = vsel %vm1859_vm4, %v5802_v54, 0.0  ;;  %v5803_v48 = vmul.f32 %v16426_v55, %v5666_v4 }
 0x757   : >> { %v6028_v16 = vadd.f32 %v6027_v39, %v6026_v47  ;;  %v6044_v60 = vsel %vm1859_vm4, %v5805_v59, 0.0  ;;  %v16437_v39 = vld [vmem:[#allocation43_spill] sm:$0xff] }
 0x758   : >> { %v6042_v50 = vsel %vm1859_vm4, %v5803_v48, 0.0 }
 0x759   : >> { %v6030_v29 = vadd.f32 %v6029_v56, %v6028_v16  ;;  %v6043_v8 = vadd.f32 %v6042_v50, %v6041_v51  ;;  %v16438_v16 = vld [vmem:[#allocation41_spill] sm:$0xff] }
 0x75b   : >> { %v6045_v49 = vadd.f32 %v6044_v60, %v6043_v8 }
 0x75d   : >> { %v6059_v13 = vpack.c.bf16 %v6045_v49, %v6030_v29 }
 0x75f   : >> { %8216 = vmatmul.mubr.msk.bf16.gmra.mrb[140].mxu1 %vm1859_vm4, %v6059_v13 }
 0x763   : >> { %v8205_v55 = vpop.f32.mrb[128].mxu1 }
 0x764   : >> { %v6138_v0 = vpop.f32.mrb[129].mxu1  ;;  %v6147_v31 = vadd.f32 %v8205_v55, %v13994_v2 }
 0x765   : >> { %v6139_v17 = vadd.f32 %v13994_v2, %v6138_v0  ;;  %v8206_v42 = vpop.f32.mrb[130].mxu1 }
 0x766   : >> { %v6141_v45 = vpop.f32.mrb[131].mxu1  ;;  %v6150_v10 = vadd.f32 %v8206_v42, %v13994_v2  ;;  %v14004_v38 = vadd.f32 %v16428_v36, %v6147_v31  ;;  %v16439_v36 = vld [vmem:[#allocation40_spill] sm:$0xff] }
 0x767   : >> { %v13999_v1 = vadd.f32 %v16427_v18, %v6139_v17  ;;  %v6142_v35 = vadd.f32 %v13994_v2, %v6141_v45 }
 0x768   : >> { %v14012_v40 = vadd.f32 %v16430_v12, %v6150_v10  ;;  %v6227_v20 = vsel %vm1859_vm4, %v14004_v38, 0.0 }
 0x769   : >> { %v14007_v61 = vadd.f32 %v16429_v63, %v6142_v35  ;;  %v6221_v37 = vsel %vm1859_vm4, %v13999_v1, 0.0 }
 0x76a   : >> { %6222 = vadd.xlane.f32.xlu1 %v6221_v37  ;;  %v6230_v21 = vsel %vm1859_vm4, %v14012_v40, 0.0 }
 0x76b   : >> { %v6224_v6 = vsel %vm1859_vm4, %v14007_v61, 0.0 }
 0x76c   : >> { %6225 = vadd.xlane.f32.xlu0 %v6224_v6 }
 0x76e   : >> { %6228 = vadd.xlane.f32.xlu1 %v6227_v20 }
 0x770   : >> { %6231 = vadd.xlane.f32.xlu0 %v6230_v21 }
 0x7a3   : >> { %v8209_v25 = vpop.f32.mrb[132].mxu1 }
 0x7a4   : >> { %v6154_v46 = vpop.f32.mrb[133].mxu1  ;;  %v6163_v57 = vadd.f32 %v8209_v25, %v13994_v2  ;;  %v16440_v25 = vld [vmem:[#allocation38_spill] sm:$0xff] }
 0x7a5   : >> { %v6155_v28 = vadd.f32 %v13994_v2, %v6154_v46  ;;  %v8210_v9 = vpop.f32.mrb[134].mxu1 }
 0x7a6   : >> { %v6157_v30 = vpop.f32.mrb[135].mxu1  ;;  %v6166_v15 = vadd.f32 %v8210_v9, %v13994_v2  ;;  %v14028_v62 = vadd.f32 %v16432_v7, %v6163_v57  ;;  %v16441_v57 = vld [vmem:[#allocation39_spill] sm:$0xff] }
 0x7a7   : >> { %v14023_v53 = vadd.f32 %v16431_v5, %v6155_v28  ;;  %v6158_v32 = vadd.f32 %v13994_v2, %v6157_v30 }
 0x7a8   : >> { %v14036_v22 = vadd.f32 %v16434_v23, %v6166_v15  ;;  %v6239_v41 = vsel %vm1859_vm4, %v14028_v62, 0.0  ;;  %v16442_v15 = vld [vmem:[#allocation37_spill] sm:$0xff] }
 0x7a9   : >> { %v14031_v11 = vadd.f32 %v16433_v24, %v6158_v32  ;;  %v6233_v44 = vsel %vm1859_vm4, %v14023_v53, 0.0 }
 0x7aa   : >> { %6234 = vadd.xlane.f32.xlu1 %v6233_v44  ;;  %v6242_v34 = vsel %vm1859_vm4, %v14036_v22, 0.0 }
 0x7ab   : >> { %v6236_v33 = vsel %vm1859_vm4, %v14031_v11, 0.0 }
 0x7ac   : >> { %6237 = vadd.xlane.f32.xlu0 %v6236_v33 }
 0x7ae   : >> { %6240 = vadd.xlane.f32.xlu1 %v6239_v41 }
 0x7b0   : >> { %6243 = vadd.xlane.f32.xlu0 %v6242_v34 }
 0x7e3   : >> { %v8213_v58 = vpop.f32.mrb[136].mxu1 }
 0x7e4   : >> { %v6170_v52 = vpop.f32.mrb[137].mxu1  ;;  %v6179_v3 = vadd.f32 %v8213_v58, %v13994_v2 }
 0x7e5   : >> { %v6171_v47 = vadd.f32 %v13994_v2, %v6170_v52  ;;  %v8214_v43 = vpop.f32.mrb[138].mxu1 }
 0x7e6   : >> { %v6173_v26 = vpop.f32.mrb[139].mxu1  ;;  %v6182_v27 = vadd.f32 %v8214_v43, %v13994_v2  ;;  %v14052_v4 = vadd.f32 %v16436_v19, %v6179_v3 }
 0x7e7   : >> { %v14047_v51 = vadd.f32 %v16435_v14, %v6171_v47  ;;  %v6174_v54 = vadd.f32 %v13994_v2, %v6173_v26 }
 0x7e8   : >> { %v14060_v56 = vadd.f32 %v16438_v16, %v6182_v27  ;;  %v6251_v29 = vsel %vm1859_vm4, %v14052_v4, 0.0 }
 0x7e9   : >> { %v14055_v59 = vadd.f32 %v16437_v39, %v6174_v54  ;;  %v6245_v48 = vsel %vm1859_vm4, %v14047_v51, 0.0 }
 0x7ea   : >> { %6246 = vadd.xlane.f32.xlu1 %v6245_v48  ;;  %v6254_v8 = vsel %vm1859_vm4, %v14060_v56, 0.0 }
 0x7eb   : >> { %v6248_v50 = vsel %vm1859_vm4, %v14055_v59, 0.0 }
 0x7ec   : >> { %6249 = vadd.xlane.f32.xlu0 %v6248_v50 }
 0x7ee   : >> { %6252 = vadd.xlane.f32.xlu1 %v6251_v29 }
 0x7f0   : >> { %6255 = vadd.xlane.f32.xlu0 %v6254_v8 }
 0x7f7   : >> { %v6223_v60 = vpop.xlane.xlu1 %6222 }
 0x7f8   : >> { %v6270_v55 = vmul.f32 0.03125, %v6223_v60  ;;  %v8488_v60 = vld [vmem:[%s6475_s23] sm:$0xff]  }
 0x7f9   : >> { %v6226_v49 = vpop.xlane.xlu0 %6225  ;;  %8219 = vmatprep.subr.bf16.mxu0 %v8488_v60 }
 0x7fa   : >> { %v6271_v35 = vmul.f32 0.03125, %v6226_v49  ;;  %v14076_v6 = vsub.f32 %v13999_v1, %v6270_v55  ;;  %v8489_v49 = vld [vmem:[%s6475_s23 + $0x8] sm:$0xff]   ;;  %8220 = vmatpush3.bf16.msra.mxu0 %v8488_v60  ;;  %s6488_s23 = scalar_lea.vmem %s14777_s15, %s9270_s5 }
 0x7fb   : >> { %v6229_v0 = vpop.xlane.xlu1 %6228  ;;  %8221 = vmatprep.subr.bf16.mxu0 %v8489_v49 }
 0x7fc   : >> { %v6272_v21 = vmul.f32 0.03125, %v6229_v0  ;;  %v14087_v5 = vsub.f32 %v14007_v61, %v6271_v35  ;;  %v6302_v23 = vmul.f32 %v14076_v6, %v14076_v6 }
 0x7fd   : >> { %v6232_v18 = vpop.xlane.xlu0 %6231 }
 0x7fe   : >> { %v14095_v7 = vsub.f32 %v14004_v38, %v6272_v21  ;;  %v6303_v38 = vmul.f32 %v14087_v5, %v14087_v5  ;;  %v6318_v47 = vsel %vm1859_vm4, %v6302_v23, 0.0  ;;  %8222 = vmatpush3.bf16.msra.mxu0 %v8489_v49 }
 0x800   : >> { %v6304_v43 = vmul.f32 %v14095_v7, %v14095_v7  ;;  %v6321_v14 = vsel %vm1859_vm4, %v6303_v38, 0.0 }
 0x802   : >> { %v6324_v54 = vsel %vm1859_vm4, %v6304_v43, 0.0 }
 0x832   : >> { %v8217_v13 = vpop.f32.mrb[140].mxu1 }
 0x833   : >> { %v6186_v31 = vpop.f32.mrb[141].mxu1  ;;  %v6195_v17 = vadd.f32 %v8217_v13, %v13994_v2 }
 0x834   : >> { %v6187_v42 = vadd.f32 %v13994_v2, %v6186_v31  ;;  %v8218_v45 = vpop.f32.mrb[142].mxu1 }
 0x835   : >> { %v6189_v10 = vpop.f32.mrb[143].mxu1  ;;  %v6198_v37 = vadd.f32 %v8218_v45, %v13994_v2  ;;  %v14079_v46 = vadd.f32 %v16440_v25, %v6195_v17 }
 0x836   : >> { %v14071_v63 = vadd.f32 %v16439_v36, %v6187_v42  ;;  %v6190_v12 = vadd.f32 %v13994_v2, %v6189_v10  ;;  %v6273_v2 = vmul.f32 0.03125, %v6232_v18 }
 0x837   : >> { %v6235_v20 = vpop.xlane.xlu1 %6234  ;;  %v14090_v1 = vadd.f32 %v16442_v15, %v6198_v37  ;;  %v6263_v44 = vsel %vm1859_vm4, %v14079_v46, 0.0 }
 0x838   : >> { %v14082_v28 = vadd.f32 %v16441_v57, %v6190_v12  ;;  %v6257_v9 = vsel %vm1859_vm4, %v14071_v63, 0.0  ;;  %v6274_v24 = vmul.f32 0.03125, %v6235_v20  ;;  %v14102_v33 = vsub.f32 %v14012_v40, %v6273_v2 }
 0x839   : >> { %6258 = vadd.xlane.f32.xlu1 %v6257_v9  ;;  %v6238_v30 = vpop.xlane.xlu0 %6237  ;;  %v6266_v34 = vsel %vm1859_vm4, %v14090_v1, 0.0 }
 0x83a   : >> { %v6260_v32 = vsel %vm1859_vm4, %v14082_v28, 0.0  ;;  %v6275_v41 = vmul.f32 0.03125, %v6238_v30  ;;  %v14109_v52 = vsub.f32 %v14023_v53, %v6274_v24  ;;  %v6305_v27 = vmul.f32 %v14102_v33, %v14102_v33 }
 0x83b   : >> { %6261 = vadd.xlane.f32.xlu0 %v6260_v32  ;;  %v6241_v61 = vpop.xlane.xlu1 %6240 }
 0x83c   : >> { %v6276_v3 = vmul.f32 0.03125, %v6241_v61  ;;  %v14115_v40 = vsub.f32 %v14031_v11, %v6275_v41  ;;  %v6306_v19 = vmul.f32 %v14109_v52, %v14109_v52  ;;  %v6327_v39 = vsel %vm1859_vm4, %v6305_v27, 0.0 }
 0x83d   : >> { %6264 = vadd.xlane.f32.xlu1 %v6263_v44  ;;  %v6244_v58 = vpop.xlane.xlu0 %6243 }
 0x83e   : >> { %v6277_v26 = vmul.f32 0.03125, %v6244_v58  ;;  %v14121_v53 = vsub.f32 %v14028_v62, %v6276_v3  ;;  %v6307_v48 = vmul.f32 %v14115_v40, %v14115_v40  ;;  %v6330_v16 = vsel %vm1859_vm4, %v6306_v19, 0.0 }
 0x83f   : >> { %6267 = vadd.xlane.f32.xlu0 %v6266_v34 }
 0x840   : >> { %v14127_v11 = vsub.f32 %v14036_v22, %v6277_v26  ;;  %v6308_v62 = vmul.f32 %v14121_v53, %v14121_v53  ;;  %v6333_v50 = vsel %vm1859_vm4, %v6307_v48, 0.0 }
 0x841   : >> { %6319 = vadd.xlane.f32.xlu1 %v6318_v47 }
 0x842   : >> { %v6309_v29 = vmul.f32 %v14127_v11, %v14127_v11  ;;  %v6336_v22 = vsel %vm1859_vm4, %v6308_v62, 0.0 }
 0x843   : >> { %6322 = vadd.xlane.f32.xlu0 %v6321_v14 }
 0x844   : >> { %v6339_v8 = vsel %vm1859_vm4, %v6309_v29, 0.0 }
 0x845   : >> { %6325 = vadd.xlane.f32.xlu1 %v6324_v54 }
 0x847   : >> { %6328 = vadd.xlane.f32.xlu0 %v6327_v39 }
 0x849   : >> { %6331 = vadd.xlane.f32.xlu1 %v6330_v16 }
 0x84b   : >> { %6334 = vadd.xlane.f32.xlu0 %v6333_v50 }
 0x84d   : >> { %6337 = vadd.xlane.f32.xlu1 %v6336_v22 }
 0x84f   : >> { %6340 = vadd.xlane.f32.xlu0 %v6339_v8 }
 0x877   : >> { %v6247_v13 = vpop.xlane.xlu1 %6246 }
 0x878   : >> { %v6278_v55 = vmul.f32 0.03125, %v6247_v13 }
 0x879   : >> { %v6250_v0 = vpop.xlane.xlu0 %6249 }
 0x87a   : >> { %v14145_v31 = vsub.f32 %v14047_v51, %v6278_v55  ;;  %v6279_v17 = vmul.f32 0.03125, %v6250_v0 }
 0x87b   : >> { %v6253_v42 = vpop.xlane.xlu1 %6252 }
 0x87c   : >> { %v14148_v45 = vsub.f32 %v14055_v59, %v6279_v17  ;;  %v6280_v18 = vmul.f32 0.03125, %v6253_v42  ;;  %v6310_v10 = vmul.f32 %v14145_v31, %v14145_v31 }
 0x87d   : >> { %v6256_v35 = vpop.xlane.xlu0 %6255 }
 0x87e   : >> { %v14153_v36 = vsub.f32 %v14052_v4, %v6280_v18  ;;  %v6281_v37 = vmul.f32 0.03125, %v6256_v35  ;;  %v6342_v12 = vsel %vm1859_vm4, %v6310_v10, 0.0  ;;  %v6311_v51 = vmul.f32 %v14148_v45, %v14148_v45  ;;  %v14196_v10 = vld [vmem:[%s6217_s21] ss:$0 sm:$0xff]  ;;  %s6664_s21 = scalar_lea.vmem %s14779_s17, %s9270_s5 }
 0x87f   : >> { %6343 = vadd.xlane.f32.xlu1 %v6342_v12 }
 0x880   : >> { %v14159_v20 = vsub.f32 %v14060_v56, %v6281_v37  ;;  %v6345_v59 = vsel %vm1859_vm4, %v6311_v51, 0.0  ;;  %v6312_v21 = vmul.f32 %v14153_v36, %v14153_v36 }
 0x881   : >> { %6346 = vadd.xlane.f32.xlu0 %v6345_v59 }
 0x882   : >> { %v6348_v25 = vsel %vm1859_vm4, %v6312_v21, 0.0  ;;  %v6313_v4 = vmul.f32 %v14159_v20, %v14159_v20 }
 0x883   : >> { %6349 = vadd.xlane.f32.xlu1 %v6348_v25 }
 0x884   : >> { %v6351_v57 = vsel %vm1859_vm4, %v6313_v4, 0.0 }
 0x885   : >> { %6352 = vadd.xlane.f32.xlu0 %v6351_v57  ;;  %v14205_v57 = vld [vmem:[%s6219_s30] ss:$0 sm:$0xff]  ;;  %s6834_s30 = scalar_lea.vmem %s14780_s18, %s9270_s5  ;;  %s1807_s5 = sadd.s32 1, %s9270_s5  }
 0x886   : >> { %p14613_p11 = scmp.ge.s32.totalorder %s1807_s5, 4  }
 0x887   : > { %s16472_s22 = sld [smem:[#allocation8_spill]] (%p14613_p11)  ;;  %s14721_s29 = scalar_lea.sflag (%p14613_p11), [#allocation3], %s755_s6 }
 0x888   : > { %s9278_s26 = smov (%p14613_p11), [#allocation2]  }
 0x889   : > { %s9076_s5 = sshll.u32 (%p14613_p11), %s9278_s26, 4  ;;  %s9077_s5 = int_to_ptr.vmem [resolvable:$false] %s9076_s5 }
 0x88a   : > { %s9078_s24 = scalar_lea.vmem (%p14613_p11), %s9077_s5, 4096 }
 0x88d   : > { %s7694_s3 = sshll.u32 (%p14613_p11), %s16472_s22, 11 }
 0x8c6   : >> { %v6259_v9 = vpop.xlane.xlu1 %6258 }
 0x8c7   : >> { %v6282_v30 = vmul.f32 0.03125, %v6259_v9 }
 0x8c8   : >> { %v6262_v2 = vpop.xlane.xlu0 %6261 }
 0x8c9   : >> { %v14169_v56 = vsub.f32 %v14071_v63, %v6282_v30  ;;  %v6283_v15 = vmul.f32 0.03125, %v6262_v2 }
 0x8ca   : >> { %v6265_v32 = vpop.xlane.xlu1 %6264 }
 0x8cb   : >> { %v14172_v24 = vsub.f32 %v14082_v28, %v6283_v15  ;;  %v6284_v44 = vmul.f32 0.03125, %v6265_v32  ;;  %v6314_v23 = vmul.f32 %v14169_v56, %v14169_v56 }
 0x8cc   : >> { %v6268_v61 = vpop.xlane.xlu0 %6267 }
 0x8cd   : >> { %v14177_v41 = vsub.f32 %v14079_v46, %v6284_v44  ;;  %v6285_v34 = vmul.f32 0.03125, %v6268_v61  ;;  %v6354_v38 = vsel %vm1859_vm4, %v6314_v23, 0.0  ;;  %v6315_v63 = vmul.f32 %v14172_v24, %v14172_v24 }
 0x8ce   : >> { %6355 = vadd.xlane.f32.xlu1 %v6354_v38  ;;  %v6320_v58 = vpop.xlane.xlu1 %6319 }
 0x8cf   : >> { %v14183_v3 = vsub.f32 %v14090_v1, %v6285_v34  ;;  %v6366_v28 = vmul.f32 0.03125, %v6320_v58  ;;  %v6357_v47 = vsel %vm1859_vm4, %v6315_v63, 0.0  ;;  %v6316_v43 = vmul.f32 %v14177_v41, %v14177_v41 }
 0x8d0   : >> { %6358 = vadd.xlane.f32.xlu0 %v6357_v47  ;;  %v6323_v46 = vpop.xlane.xlu0 %6322 }
 0x8d1   : >> { %v6382_v26 = vadd.f32 1e-05, %v6366_v28  ;;  %v6367_v14 = vmul.f32 0.03125, %v6323_v46  ;;  %v6360_v27 = vsel %vm1859_vm4, %v6316_v43, 0.0  ;;  %v6317_v54 = vmul.f32 %v14183_v3, %v14183_v3 }
 0x8d2   : >> { %6361 = vadd.xlane.f32.xlu1 %v6360_v27  ;;  %v6326_v19 = vpop.xlane.xlu1 %6325 }
 0x8d3   : >> { %9006 = vrsqrt.f32 %v6382_v26  ;;  %v6383_v1 = vadd.f32 1e-05, %v6367_v14  ;;  %v6368_v39 = vmul.f32 0.03125, %v6326_v19  ;;  %v6363_v48 = vsel %vm1859_vm4, %v6317_v54, 0.0 }
 0x8d4   : >> { %6364 = vadd.xlane.f32.xlu0 %v6363_v48  ;;  %v6329_v16 = vpop.xlane.xlu0 %6328  ;;  %v8491_v48 = vld [vmem:[%s14260_s0 + $0x8] sm:$0xff]  }
 0x8d5   : >> { %9008 = vrsqrt.f32 %v6383_v1  ;;  %v6384_v62 = vadd.f32 1e-05, %v6368_v39  ;;  %v6369_v50 = vmul.f32 0.03125, %v6329_v16  ;;  %v8490_v39 = vld [vmem:[%s14260_s0] sm:$0xff]  }
 0x8d6   : >> { %v6332_v29 = vpop.xlane.xlu1 %6331  ;;  %8239 = vmatprep.subr.bf16.mxu1 %v8490_v39 }
 0x8d7   : >> { %9010 = vrsqrt.f32 %v6384_v62  ;;  %v6385_v22 = vadd.f32 1e-05, %v6369_v50  ;;  %v6370_v8 = vmul.f32 0.03125, %v6332_v29  ;;  %8240 = vmatpush3.bf16.msra.mxu1 %v8490_v39 }
 0x8d8   : >> { %v6335_v60 = vpop.xlane.xlu0 %6334  ;;  %8241 = vmatprep.subr.bf16.mxu1 %v8491_v48 }
 0x8d9   : >> { %9012 = vrsqrt.f32 %v6385_v22  ;;  %v6386_v49 = vadd.f32 1e-05, %v6370_v8  ;;  %v6371_v13 = vmul.f32 0.03125, %v6335_v60 }
 0x8da   : >> { %v6338_v55 = vpop.xlane.xlu1 %6337 }
 0x8db   : >> { %9014 = vrsqrt.f32 %v6386_v49  ;;  %v6387_v0 = vadd.f32 1e-05, %v6371_v13  ;;  %v6372_v17 = vmul.f32 0.03125, %v6338_v55  ;;  %8242 = vmatpush3.bf16.msra.mxu1 %v8491_v48 }
 0x8dc   : >> { %v6341_v42 = vpop.xlane.xlu0 %6340 }
 0x8dd   : >> { %v9007_v18 = vpop.eup %9006  ;;  %9016 = vrsqrt.f32 %v6387_v0  ;;  %v6388_v35 = vadd.f32 1e-05, %v6372_v17  ;;  %v6373_v37 = vmul.f32 0.03125, %v6341_v42 }
 0x8de   : >> { %v6414_v12 = vmul.f32 %v9007_v18, %v14076_v6 }
 0x8df   : >> { %v9009_v51 = vpop.eup %9008  ;;  %9018 = vrsqrt.f32 %v6388_v35  ;;  %v6389_v59 = vadd.f32 1e-05, %v6373_v37 }
 0x8e0   : >> { %v6415_v21 = vmul.f32 %v9009_v51, %v14087_v5  ;;  %v6436_v25 = vmul.f32 %v14196_v10, %v6414_v12 }
 0x8e1   : >> { %v9011_v4 = vpop.eup %9010  ;;  %9020 = vrsqrt.f32 %v6389_v59 }
 0x8e2   : >> { %v6416_v9 = vmul.f32 %v9011_v4, %v14095_v7  ;;  %v6437_v30 = vmul.f32 %v14196_v10, %v6415_v21  ;;  %v14212_v32 = vadd.f32 %v14205_v57, %v6436_v25 }
 0x8e3   : >> { %v9013_v6 = vpop.eup %9012 }
 0x8e4   : >> { %v6438_v2 = vmul.f32 %v14196_v10, %v6416_v9  ;;  %v6417_v15 = vmul.f32 %v9013_v6, %v14102_v33  ;;  %v14215_v5 = vadd.f32 %v14205_v57, %v6437_v30 }
 0x8e5   : >> { %v9015_v44 = vpop.eup %9014 }
 0x8e6   : >> { %v6439_v23 = vmul.f32 %v14196_v10, %v6417_v15  ;;  %v6418_v61 = vmul.f32 %v9015_v44, %v14109_v52  ;;  %v6480_v7 = vpack.c.bf16 %v14215_v5, %v14212_v32  ;;  %v14222_v38 = vadd.f32 %v14205_v57, %v6438_v2  ;;  %v8492_v15 = vld [vmem:[%s14260_s0 + $0x10] sm:$0xff]   ;;  %v8493_v44 = vld [vmem:[%s14260_s0 + $0x18] sm:$0xff]   ;;  %s16474_s0 = sld [smem:[#allocation196_spill]] (%p14613_p11) }
 0x8e7   : >> { %v9017_v34 = vpop.eup %9016  ;;  %8243 = vmatprep.subr.bf16.mxu1 %v8492_v15 }
 0x8e8   : >> { %v14225_v33 = vadd.f32 %v14205_v57, %v6439_v23  ;;  %v6419_v63 = vmul.f32 %v9017_v34, %v14115_v40  ;;  %8223 = vmatprep.mubr.msk.bf16.mxu0 %vm1859_vm4, %v6480_v7  ;;  %v6440_v58 = vmul.f32 %v14196_v10, %v6418_v61  ;;  %8244 = vmatpush3.bf16.msra.mxu1 %v8492_v15 }
 0x8e9   : >> { %v9019_v28 = vpop.eup %9018  ;;  %8245 = vmatprep.subr.bf16.mxu1 %v8493_v44 }
 0x8ea   : >> { %v6420_v47 = vmul.f32 %v9019_v28, %v14121_v53  ;;  %v6481_v52 = vpack.c.bf16 %v14225_v33, %v14222_v38  ;;  %v6441_v43 = vmul.f32 %v14196_v10, %v6419_v63  ;;  %v14237_v40 = vadd.f32 %v14205_v57, %v6440_v58 }
 0x8eb   : >> { %v9021_v46 = vpop.eup %9020 }
 0x8ec   : >> { %v6421_v26 = vmul.f32 %v9021_v46, %v14127_v11  ;;  %8224 = vmatmul.mubr.msk.bf16.vlgmr.msra.gmra.mrb[144].mxu0 %vm1859_vm4, %v6481_v52  ;;  %v14240_v14 = vadd.f32 %v14205_v57, %v6441_v43  ;;  %v6442_v27 = vmul.f32 %v14196_v10, %v6420_v47  ;;  %8246 = vmatpush3.bf16.msra.mxu1 %v8493_v44  ;;  %s14709_s1 = scalar_lea.hbm (%p14613_p11), %s16474_s0, %s7694_s3 }
 0x8ee   : >> { %v6482_v53 = vpack.c.bf16 %v14240_v14, %v14237_v40  ;;  %v6443_v54 = vmul.f32 %v14196_v10, %v6421_v26  ;;  %v14248_v19 = vadd.f32 %v14205_v57, %v6442_v27 }
 0x8f0   : >> { %8227 = vmatprep.mubr.msk.bf16.mxu0 %vm1859_vm4, %v6482_v53  ;;  %v14251_v11 = vadd.f32 %v14205_v57, %v6443_v54 }
 0x8f2   : >> { %v6483_v1 = vpack.c.bf16 %v14251_v11, %v14248_v19 }
 0x8f4   : >> { %8228 = vmatmul.mubr.msk.bf16.gmra.mrb[148].mxu0 %vm1859_vm4, %v6483_v1 }
 0x90c   : >> { %v6344_v16 = vpop.xlane.xlu1 %6343 }
 0x90d   : >> { %v6374_v62 = vmul.f32 0.03125, %v6344_v16 }
 0x90e   : >> { %v6347_v50 = vpop.xlane.xlu0 %6346 }
 0x90f   : >> { %v6390_v29 = vadd.f32 1e-05, %v6374_v62  ;;  %v6375_v22 = vmul.f32 0.03125, %v6347_v50 }
 0x910   : >> { %v6350_v8 = vpop.xlane.xlu1 %6349 }
 0x911   : >> { %9022 = vrsqrt.f32 %v6390_v29  ;;  %v6391_v60 = vadd.f32 1e-05, %v6375_v22  ;;  %v6376_v49 = vmul.f32 0.03125, %v6350_v8 }
 0x912   : >> { %v6353_v13 = vpop.xlane.xlu0 %6352 }
 0x913   : >> { %9024 = vrsqrt.f32 %v6391_v60  ;;  %v6392_v55 = vadd.f32 1e-05, %v6376_v49  ;;  %v6377_v0 = vmul.f32 0.03125, %v6353_v13  ;;  %v7646_v13 = vld [vmem:[%s6488_s23] ss:$0 sm:$0xff] }
 0x915   : >> { %9026 = vrsqrt.f32 %v6392_v55  ;;  %v6393_v17 = vadd.f32 1e-05, %v6377_v0 }
 0x917   : >> { %9028 = vrsqrt.f32 %v6393_v17 }
 0x91b   : >> { %v9023_v42 = vpop.eup %9022 }
 0x91c   : >> { %v6422_v18 = vmul.f32 %v9023_v42, %v14145_v31 }
 0x91d   : >> { %v9025_v35 = vpop.eup %9024 }
 0x91e   : >> { %v6423_v37 = vmul.f32 %v9025_v35, %v14148_v45  ;;  %v6444_v12 = vmul.f32 %v14196_v10, %v6422_v18 }
 0x91f   : >> { %v9027_v51 = vpop.eup %9026 }
 0x920   : >> { %v6424_v59 = vmul.f32 %v9027_v51, %v14153_v36  ;;  %v6445_v21 = vmul.f32 %v14196_v10, %v6423_v37  ;;  %v14271_v9 = vadd.f32 %v14205_v57, %v6444_v12 }
 0x921   : >> { %v9029_v25 = vpop.eup %9028 }
 0x922   : >> { %v6425_v4 = vmul.f32 %v9029_v25, %v14159_v20  ;;  %v14274_v31 = vadd.f32 %v14205_v57, %v6445_v21  ;;  %v6446_v45 = vmul.f32 %v14196_v10, %v6424_v59 }
 0x924   : >> { %v6484_v30 = vpack.c.bf16 %v14274_v31, %v14271_v9  ;;  %v6447_v6 = vmul.f32 %v14196_v10, %v6425_v4  ;;  %v14282_v36 = vadd.f32 %v14205_v57, %v6446_v45 }
 0x926   : >> { %8231 = vmatprep.mubr.msk.bf16.mxu0 %vm1859_vm4, %v6484_v30  ;;  %v14285_v20 = vadd.f32 %v14205_v57, %v6447_v6 }
 0x928   : >> { %v6485_v2 = vpack.c.bf16 %v14285_v20, %v14282_v36 }
 0x92a   : >> { %8232 = vmatmul.mubr.msk.bf16.gmra.mrb[152].mxu0 %vm1859_vm4, %v6485_v2 }
 0x95b   : >> { %v6356_v23 = vpop.xlane.xlu1 %6355 }
 0x95c   : >> { %v6378_v61 = vmul.f32 0.03125, %v6356_v23 }
 0x95d   : >> { %v6359_v7 = vpop.xlane.xlu0 %6358 }
 0x95e   : >> { %v6394_v34 = vadd.f32 1e-05, %v6378_v61  ;;  %v6379_v63 = vmul.f32 0.03125, %v6359_v7 }
 0x95f   : >> { %v6362_v58 = vpop.xlane.xlu1 %6361 }
 0x960   : >> { %9030 = vrsqrt.f32 %v6394_v34  ;;  %v6395_v28 = vadd.f32 1e-05, %v6379_v63  ;;  %v6380_v47 = vmul.f32 0.03125, %v6362_v58 }
 0x961   : >> { %v6365_v52 = vpop.xlane.xlu0 %6364 }
 0x962   : >> { %9032 = vrsqrt.f32 %v6395_v28  ;;  %v6396_v43 = vadd.f32 1e-05, %v6380_v47  ;;  %v6381_v46 = vmul.f32 0.03125, %v6365_v52 }
 0x964   : >> { %9034 = vrsqrt.f32 %v6396_v43  ;;  %v6397_v26 = vadd.f32 1e-05, %v6381_v46 }
 0x966   : >> { %9036 = vrsqrt.f32 %v6397_v26 }
 0x96a   : >> { %v9031_v27 = vpop.eup %9030 }
 0x96b   : >> { %v6426_v53 = vmul.f32 %v9031_v27, %v14169_v56 }
 0x96c   : >> { %v9033_v54 = vpop.eup %9032 }
 0x96d   : >> { %v6427_v1 = vmul.f32 %v9033_v54, %v14172_v24  ;;  %v6448_v39 = vmul.f32 %v14196_v10, %v6426_v53 }
 0x96e   : >> { %v9035_v48 = vpop.eup %9034 }
 0x96f   : >> { %v6428_v16 = vmul.f32 %v9035_v48, %v14177_v41  ;;  %v6449_v62 = vmul.f32 %v14196_v10, %v6427_v1  ;;  %v14299_v22 = vadd.f32 %v14205_v57, %v6448_v39 }
 0x970   : >> { %v9037_v50 = vpop.eup %9036 }
 0x971   : >> { %v6429_v29 = vmul.f32 %v9037_v50, %v14183_v3  ;;  %v14302_v8 = vadd.f32 %v14205_v57, %v6449_v62  ;;  %v6450_v56 = vmul.f32 %v14196_v10, %v6428_v16 }
 0x973   : >> { %v6486_v24 = vpack.c.bf16 %v14302_v8, %v14299_v22  ;;  %v6451_v60 = vmul.f32 %v14196_v10, %v6429_v29  ;;  %v14310_v41 = vadd.f32 %v14205_v57, %v6450_v56 }
 0x975   : >> { %8235 = vmatprep.mubr.msk.bf16.mxu0 %vm1859_vm4, %v6486_v24  ;;  %v14313_v3 = vadd.f32 %v14205_v57, %v6451_v60 }
 0x977   : >> { %v6487_v49 = vpack.c.bf16 %v14313_v3, %v14310_v41 }
 0x979   : >> { %8236 = vmatmul.mubr.msk.bf16.gmra.mrb[156].mxu0 %vm1859_vm4, %v6487_v49 }
 0x9bf   : >> { %v8225_v55 = vpop.f32.mrb[144].mxu0 }
 0x9c0   : >> { %v6575_v10 = vadd.f32 %v8225_v55, %v7646_v13  ;;  %v6566_v0 = vpop.f32.mrb[145].mxu0 }
 0x9c1   : >> { %v6567_v17 = vadd.f32 %v7646_v13, %v6566_v0  ;;  %v8226_v42 = vpop.f32.mrb[146].mxu0 }
 0x9c2   : >> { %v6578_v18 = vadd.f32 %v8226_v42, %v7646_v13  ;;  %v6569_v35 = vpop.f32.mrb[147].mxu0  ;;  %v6631_v57 = vmax.f32 %v6575_v10, 0.0 }
 0x9c3   : >> { %v6570_v37 = vadd.f32 %v7646_v13, %v6569_v35  ;;  %v6629_v51 = vmax.f32 %v6567_v17, 0.0 }
 0x9c4   : >> { %v6632_v12 = vmax.f32 %v6578_v18, 0.0 }
 0x9c5   : >> { %v6630_v59 = vmax.f32 %v6570_v37, 0.0 }
 0x9c6   : >> { %v6657_v21 = vpack.c.bf16 %v6632_v12, %v6631_v57  ;;  %v14334_v12 = vld [vmem:[%s6664_s21] ss:$0 sm:$0xff]  ;;  %s16471_s21 = sld [smem:[#allocation195_spill]] (%p14613_p11) }
 0x9c7   : >> { %v6656_v25 = vpack.c.bf16 %v6630_v59, %v6629_v51  ;;  %v8229_v4 = vpop.f32.mrb[148].mxu0 }
 0x9c8   : >> { %v6591_v45 = vadd.f32 %v8229_v4, %v7646_v13  ;;  %v6582_v30 = vpop.f32.mrb[149].mxu0 }
 0x9c9   : >> { %v6583_v6 = vadd.f32 %v7646_v13, %v6582_v30  ;;  %v8230_v2 = vpop.f32.mrb[150].mxu0  ;;  %8247 = vmatprep.mubr.msk.bf16.mxu1 %vm6696_vm8, %v6656_v25 }
 0x9ca   : >> { %v6594_v15 = vadd.f32 %v8230_v2, %v7646_v13  ;;  %v6585_v44 = vpop.f32.mrb[151].mxu0  ;;  %8248 = vmatmul.mubr.msk.bf16.vlgmr.msra.gmra.mrb[144].mxu1 %vm6696_vm8, %v6657_v21  ;;  %v6635_v61 = vmax.f32 %v6591_v45, 0.0 }
 0x9cb   : >> { %v6586_v23 = vadd.f32 %v7646_v13, %v6585_v44  ;;  %v6633_v34 = vmax.f32 %v6583_v6, 0.0 }
 0x9cc   : >> { %v6636_v7 = vmax.f32 %v6594_v15, 0.0 }
 0x9cd   : >> { %v6634_v63 = vmax.f32 %v6586_v23, 0.0 }
 0x9ce   : >> { %v6659_v58 = vpack.c.bf16 %v6636_v7, %v6635_v61 }
 0x9cf   : >> { %v6658_v28 = vpack.c.bf16 %v6634_v63, %v6633_v34 }
 0x9d1   : >> { %8251 = vmatprep.mubr.msk.bf16.mxu1 %vm6696_vm8, %v6658_v28 }
 0x9d2   : >> { %8252 = vmatmul.mubr.msk.bf16.gmra.mrb[148].mxu1 %vm6696_vm8, %v6659_v58 }
 0x9fd   : >> { %v8233_v47 = vpop.f32.mrb[152].mxu0 }
 0x9fe   : >> { %v6607_v52 = vadd.f32 %v8233_v47, %v7646_v13  ;;  %v6598_v43 = vpop.f32.mrb[153].mxu0 }
 0x9ff   : >> { %v6599_v46 = vadd.f32 %v7646_v13, %v6598_v43  ;;  %v8234_v26 = vpop.f32.mrb[154].mxu0 }
 0xa00   : >> { %v6610_v27 = vadd.f32 %v8234_v26, %v7646_v13  ;;  %v6601_v53 = vpop.f32.mrb[155].mxu0  ;;  %v6639_v1 = vmax.f32 %v6607_v52, 0.0 }
 0xa01   : >> { %v6602_v54 = vadd.f32 %v7646_v13, %v6601_v53  ;;  %v6637_v48 = vmax.f32 %v6599_v46, 0.0 }
 0xa02   : >> { %v6640_v39 = vmax.f32 %v6610_v27, 0.0 }
 0xa03   : >> { %v6638_v16 = vmax.f32 %v6602_v54, 0.0 }
 0xa04   : >> { %v6661_v62 = vpack.c.bf16 %v6640_v39, %v6639_v1 }
 0xa05   : >> { %v6660_v50 = vpack.c.bf16 %v6638_v16, %v6637_v48 }
 0xa07   : >> { %8255 = vmatprep.mubr.msk.bf16.mxu1 %vm6696_vm8, %v6660_v50 }
 0xa08   : >> { %8256 = vmatmul.mubr.msk.bf16.gmra.mrb[152].mxu1 %vm6696_vm8, %v6661_v62 }
 0xa4c   : >> { %v8237_v29 = vpop.f32.mrb[156].mxu0 }
 0xa4d   : >> { %v6623_v56 = vadd.f32 %v8237_v29, %v7646_v13  ;;  %v6614_v24 = vpop.f32.mrb[157].mxu0 }
 0xa4e   : >> { %v6615_v60 = vadd.f32 %v7646_v13, %v6614_v24  ;;  %v8238_v49 = vpop.f32.mrb[158].mxu0 }
 0xa4f   : >> { %v6626_v55 = vadd.f32 %v8238_v49, %v7646_v13  ;;  %v6617_v10 = vpop.f32.mrb[159].mxu0  ;;  %v6643_v17 = vmax.f32 %v6623_v56, 0.0 }
 0xa50   : >> { %v6618_v0 = vadd.f32 %v7646_v13, %v6617_v10  ;;  %v6641_v18 = vmax.f32 %v6615_v60, 0.0 }
 0xa51   : >> { %v6644_v42 = vmax.f32 %v6626_v55, 0.0 }
 0xa52   : >> { %v6642_v35 = vmax.f32 %v6618_v0, 0.0 }
 0xa53   : >> { %v6663_v37 = vpack.c.bf16 %v6644_v42, %v6643_v17 }
 0xa54   : >> { %v6662_v57 = vpack.c.bf16 %v6642_v35, %v6641_v18 }
 0xa56   : >> { %8259 = vmatprep.mubr.msk.bf16.mxu1 %vm6696_vm8, %v6662_v57 }
 0xa57   : >> { %8260 = vmatmul.mubr.msk.bf16.gmra.mrb[156].mxu1 %vm6696_vm8, %v6663_v37 }
 0xa9d   : >> { %v8249_v51 = vpop.f32.mrb[144].mxu1 }
 0xa9e   : >> { %v6764_v59 = vadd.f32 %v8249_v51, %v14334_v12  ;;  %v6755_v13 = vpop.f32.mrb[145].mxu1 }
 0xa9f   : >> { %v6756_v21 = vadd.f32 %v14334_v12, %v6755_v13  ;;  %v8250_v25 = vpop.f32.mrb[146].mxu1 }
 0xaa0   : >> { %v14339_v4 = vadd.f32 %v6764_v59, %v14222_v38  ;;  %v6767_v45 = vadd.f32 %v8250_v25, %v14334_v12  ;;  %v6758_v30 = vpop.f32.mrb[147].mxu1 }
 0xaa1   : >> { %v6759_v6 = vadd.f32 %v14334_v12, %v6758_v30  ;;  %v14344_v2 = vadd.f32 %v6756_v21, %v14212_v32 }
 0xaa2   : >> { %v14347_v15 = vadd.f32 %v6767_v45, %v14225_v33  ;;  %v6844_v44 = vsel %vm1859_vm4, %v14339_v4, 0.0 }
 0xaa3   : >> { %6845 = vadd.xlane.f32.xlu1 %v6844_v44  ;;  %v14352_v23 = vadd.f32 %v6759_v6, %v14215_v5  ;;  %v6838_v32 = vsel %vm1859_vm4, %v14344_v2, 0.0 }
 0xaa4   : >> { %v6847_v38 = vsel %vm1859_vm4, %v14347_v15, 0.0 }
 0xaa5   : >> { %6848 = vadd.xlane.f32.xlu0 %v6847_v38  ;;  %v8253_v61 = vpop.f32.mrb[148].mxu1  ;;  %v6841_v47 = vsel %vm1859_vm4, %v14352_v23, 0.0 }
 0xaa6   : >> { %v6780_v7 = vadd.f32 %v8253_v61, %v14334_v12  ;;  %v6771_v34 = vpop.f32.mrb[149].mxu1 }
 0xaa7   : >> { %v6772_v33 = vadd.f32 %v14334_v12, %v6771_v34  ;;  %6839 = vadd.xlane.f32.xlu1 %v6838_v32  ;;  %v8254_v63 = vpop.f32.mrb[150].mxu1 }
 0xaa8   : >> { %v14361_v58 = vadd.f32 %v6780_v7, %v14248_v19  ;;  %v6783_v5 = vadd.f32 %v8254_v63, %v14334_v12  ;;  %v6774_v28 = vpop.f32.mrb[151].mxu1 }
 0xaa9   : >> { %v6775_v52 = vadd.f32 %v14334_v12, %v6774_v28  ;;  %6842 = vadd.xlane.f32.xlu0 %v6841_v47  ;;  %v14368_v43 = vadd.f32 %v6772_v33, %v14237_v40 }
 0xaaa   : >> { %v14371_v46 = vadd.f32 %v6783_v5, %v14251_v11  ;;  %v6856_v26 = vsel %vm1859_vm4, %v14361_v58, 0.0 }
 0xaab   : >> { %6857 = vadd.xlane.f32.xlu1 %v6856_v26  ;;  %v14376_v19 = vadd.f32 %v6775_v52, %v14240_v14  ;;  %v6850_v53 = vsel %vm1859_vm4, %v14368_v43, 0.0 }
 0xaac   : >> { %v6859_v27 = vsel %vm1859_vm4, %v14371_v46, 0.0 }
 0xaad   : >> { %6860 = vadd.xlane.f32.xlu0 %v6859_v27  ;;  %v6853_v40 = vsel %vm1859_vm4, %v14376_v19, 0.0 }
 0xaaf   : >> { %6851 = vadd.xlane.f32.xlu1 %v6850_v53 }
 0xab1   : >> { %6854 = vadd.xlane.f32.xlu0 %v6853_v40 }
 0xadb   : >> { %v8257_v11 = vpop.f32.mrb[152].mxu1 }
 0xadc   : >> { %v6796_v54 = vadd.f32 %v8257_v11, %v14334_v12  ;;  %v6787_v1 = vpop.f32.mrb[153].mxu1 }
 0xadd   : >> { %v6788_v39 = vadd.f32 %v14334_v12, %v6787_v1  ;;  %v8258_v14 = vpop.f32.mrb[154].mxu1 }
 0xade   : >> { %v14387_v48 = vadd.f32 %v6796_v54, %v14282_v36  ;;  %v6799_v16 = vadd.f32 %v8258_v14, %v14334_v12  ;;  %v6790_v62 = vpop.f32.mrb[155].mxu1 }
 0xadf   : >> { %v6791_v50 = vadd.f32 %v14334_v12, %v6790_v62  ;;  %v14392_v29 = vadd.f32 %v6788_v39, %v14271_v9 }
 0xae0   : >> { %v14395_v56 = vadd.f32 %v6799_v16, %v14285_v20  ;;  %v6868_v24 = vsel %vm1859_vm4, %v14387_v48, 0.0 }
 0xae1   : >> { %6869 = vadd.xlane.f32.xlu1 %v6868_v24  ;;  %v14400_v60 = vadd.f32 %v6791_v50, %v14274_v31  ;;  %v6862_v49 = vsel %vm1859_vm4, %v14392_v29, 0.0 }
 0xae2   : >> { %v6871_v36 = vsel %vm1859_vm4, %v14395_v56, 0.0 }
 0xae3   : >> { %6872 = vadd.xlane.f32.xlu0 %v6871_v36  ;;  %v6865_v9 = vsel %vm1859_vm4, %v14400_v60, 0.0 }
 0xae5   : >> { %6863 = vadd.xlane.f32.xlu1 %v6862_v49 }
 0xae7   : >> { %6866 = vadd.xlane.f32.xlu0 %v6865_v9 }
 0xb2a   : >> { %v8261_v20 = vpop.f32.mrb[156].mxu1 }
 0xb2b   : >> { %v6803_v55 = vpop.f32.mrb[157].mxu1  ;;  %v6812_v10 = vadd.f32 %v8261_v20, %v14334_v12 }
 0xb2c   : >> { %v6804_v0 = vadd.f32 %v14334_v12, %v6803_v55  ;;  %v8262_v31 = vpop.f32.mrb[158].mxu1 }
 0xb2d   : >> { %v6806_v17 = vpop.f32.mrb[159].mxu1  ;;  %v6815_v18 = vadd.f32 %v8262_v31, %v14334_v12  ;;  %v14416_v37 = vadd.f32 %v6812_v10, %v14310_v41 }
 0xb2e   : >> { %v14411_v42 = vadd.f32 %v6804_v0, %v14299_v22  ;;  %v6807_v35 = vadd.f32 %v14334_v12, %v6806_v17 }
 0xb2f   : >> { %v14424_v21 = vadd.f32 %v6815_v18, %v14313_v3  ;;  %v6880_v45 = vsel %vm1859_vm4, %v14416_v37, 0.0 }
 0xb30   : >> { %v14419_v57 = vadd.f32 %v6807_v35, %v14302_v8  ;;  %v6846_v51 = vpop.xlane.xlu1 %6845  ;;  %v6874_v59 = vsel %vm1859_vm4, %v14411_v42, 0.0 }
 0xb31   : >> { %v6888_v13 = vmul.f32 0.03125, %v6846_v51  ;;  %6875 = vadd.xlane.f32.xlu1 %v6874_v59  ;;  %v6883_v38 = vsel %vm1859_vm4, %v14424_v21, 0.0 }
 0xb32   : >> { %v6849_v22 = vpop.xlane.xlu0 %6848  ;;  %v6877_v25 = vsel %vm1859_vm4, %v14419_v57, 0.0 }
 0xb33   : >> { %v14429_v12 = vsub.f32 %v14339_v4, %v6888_v13  ;;  %v6889_v41 = vmul.f32 0.03125, %v6849_v22  ;;  %6878 = vadd.xlane.f32.xlu0 %v6877_v25 }
 0xb34   : >> { %v6840_v8 = vpop.xlane.xlu1 %6839 }
 0xb35   : >> { %v14434_v30 = vsub.f32 %v14347_v15, %v6889_v41  ;;  %v6886_v6 = vmul.f32 0.03125, %v6840_v8  ;;  %6881 = vadd.xlane.f32.xlu1 %v6880_v45  ;;  %v6920_v3 = vmul.f32 %v14429_v12, %v14429_v12 }
 0xb36   : >> { %v6843_v44 = vpop.xlane.xlu0 %6842 }
 0xb37   : >> { %v14441_v4 = vsub.f32 %v14344_v2, %v6886_v6  ;;  %v6887_v61 = vmul.f32 0.03125, %v6843_v44  ;;  %6884 = vadd.xlane.f32.xlu0 %v6883_v38  ;;  %v6940_v7 = vsel %vm1859_vm4, %v6920_v3, 0.0  ;;  %v6921_v15 = vmul.f32 %v14434_v30, %v14434_v30 }
 0xb38   : >> { %v6858_v34 = vpop.xlane.xlu1 %6857 }
 0xb39   : >> { %v14447_v32 = vsub.f32 %v14352_v23, %v6887_v61  ;;  %v6892_v33 = vmul.f32 0.03125, %v6858_v34  ;;  %6941 = vadd.xlane.f32.xlu1 %v6940_v7  ;;  %v6943_v63 = vsel %vm1859_vm4, %v6921_v15, 0.0  ;;  %v6918_v5 = vmul.f32 %v14441_v4, %v14441_v4 }
 0xb3a   : >> { %v6861_v2 = vpop.xlane.xlu0 %6860 }
 0xb3b   : >> { %v14453_v28 = vsub.f32 %v14361_v58, %v6892_v33  ;;  %v6893_v47 = vmul.f32 0.03125, %v6861_v2  ;;  %6944 = vadd.xlane.f32.xlu0 %v6943_v63  ;;  %v6934_v52 = vsel %vm1859_vm4, %v6918_v5, 0.0  ;;  %v6919_v26 = vmul.f32 %v14447_v32, %v14447_v32 }
 0xb3c   : >> { %v6852_v23 = vpop.xlane.xlu1 %6851 }
 0xb3d   : >> { %v14459_v27 = vsub.f32 %v14371_v46, %v6893_v47  ;;  %v6890_v53 = vmul.f32 0.03125, %v6852_v23  ;;  %6935 = vadd.xlane.f32.xlu1 %v6934_v52  ;;  %v6937_v40 = vsel %vm1859_vm4, %v6919_v26, 0.0  ;;  %v6924_v11 = vmul.f32 %v14453_v28, %v14453_v28 }
 0xb3e   : >> { %v6855_v58 = vpop.xlane.xlu0 %6854 }
 0xb3f   : >> { %v14465_v54 = vsub.f32 %v14368_v43, %v6890_v53  ;;  %v6891_v1 = vmul.f32 0.03125, %v6855_v58  ;;  %6938 = vadd.xlane.f32.xlu0 %v6937_v40  ;;  %v6952_v39 = vsel %vm1859_vm4, %v6924_v11, 0.0  ;;  %v6925_v14 = vmul.f32 %v14459_v27, %v14459_v27 }
 0xb41   : >> { %v14471_v46 = vsub.f32 %v14376_v19, %v6891_v1  ;;  %6953 = vadd.xlane.f32.xlu1 %v6952_v39  ;;  %v6955_v16 = vsel %vm1859_vm4, %v6925_v14, 0.0  ;;  %v6922_v62 = vmul.f32 %v14465_v54, %v14465_v54 }
 0xb43   : >> { %6956 = vadd.xlane.f32.xlu0 %v6955_v16  ;;  %v6946_v43 = vsel %vm1859_vm4, %v6922_v62, 0.0  ;;  %v6923_v50 = vmul.f32 %v14471_v46, %v14471_v46 }
 0xb45   : >> { %6947 = vadd.xlane.f32.xlu1 %v6946_v43  ;;  %v6949_v24 = vsel %vm1859_vm4, %v6923_v50, 0.0 }
 0xb47   : >> { %6950 = vadd.xlane.f32.xlu0 %v6949_v24 }
 0xb6e   : >> { %v6870_v36 = vpop.xlane.xlu1 %6869 }
 0xb6f   : >> { %v6896_v49 = vmul.f32 0.03125, %v6870_v36 }
 0xb70   : >> { %v6873_v19 = vpop.xlane.xlu0 %6872 }
 0xb71   : >> { %v14481_v9 = vsub.f32 %v14387_v48, %v6896_v49  ;;  %v6897_v20 = vmul.f32 0.03125, %v6873_v19 }
 0xb72   : >> { %v6864_v55 = vpop.xlane.xlu1 %6863 }
 0xb73   : >> { %v14484_v10 = vsub.f32 %v14395_v56, %v6897_v20  ;;  %v6894_v0 = vmul.f32 0.03125, %v6864_v55  ;;  %v6928_v31 = vmul.f32 %v14481_v9, %v14481_v9 }
 0xb74   : >> { %v6867_v17 = vpop.xlane.xlu0 %6866 }
 0xb75   : >> { %v14489_v18 = vsub.f32 %v14392_v29, %v6894_v0  ;;  %v6895_v35 = vmul.f32 0.03125, %v6867_v17  ;;  %v6964_v51 = vsel %vm1859_vm4, %v6928_v31, 0.0  ;;  %v6929_v48 = vmul.f32 %v14484_v10, %v14484_v10  ;;  %v14536_v31 = vld [vmem:[%s6834_s30] ss:$0 sm:$0xff]  ;;  %s7273_s30 = sshll.u32 (%p14613_p11), %s10406_s2, 4  ;;  %s14711_s30 = int_to_ptr.vmem [resolvable:$true] %s7273_s30 }
 0xb76   : >> { %6965 = vadd.xlane.f32.xlu1 %v6964_v51  ;;  %s9072_s23 = scalar_lea.vmem (%p14613_p11), %s14711_s30, 2048  ;;  %p9079_p1 = scmp.lt.s32.totalorder (%p14613_p11), %s14711_s30, %s9077_s5 }
 0xb77   : >> { %v14495_v59 = vsub.f32 %v14400_v60, %v6895_v35  ;;  %v6967_v56 = vsel %vm1859_vm4, %v6929_v48, 0.0  ;;  %v6926_v13 = vmul.f32 %v14489_v18, %v14489_v18  ;;  %p9073_p12 = scmp.ne.s32.totalorder (%p14613_p11), %s14711_s30, %s9072_s23  ;;  %p9080_p2 = scmp.lt.s32.totalorder (%p14613_p11), %s9078_s24, %s9072_s23 }
 0xb78   : >> { %6968 = vadd.xlane.f32.xlu0 %v6967_v56  ;;  %v14539_v56 = vld [vmem:[%s6836_s27] ss:$0 sm:$0xff] }
 0xb79   : >> { %v6958_v22 = vsel %vm1859_vm4, %v6926_v13, 0.0  ;;  %v6927_v29 = vmul.f32 %v14495_v59, %v14495_v59  ;;  %p9074_p13 = pnand (%p14613_p11), %p9073_p12, %p9434_p5  ;;  %p9081_p3 = por (%p14613_p11), %p9080_p2, %p9079_p1 }
 0xb7a   : >> { %6959 = vadd.xlane.f32.xlu1 %v6958_v22 }
 0xb7b   : >> { %v6961_v25 = vsel %vm1859_vm4, %v6927_v29, 0.0  ;;  %p9075_p0 = pneg (%p14613_p11), %p9074_p13 }
 0xb7c   : >> { %6962 = vadd.xlane.f32.xlu0 %v6961_v25 }
 0xb7d   : > { %p9082_p4 = pnand (%p14613_p11), %p9081_p3, %p9075_p0 }
 0xbbe   : >> { %v6876_v41 = vpop.xlane.xlu1 %6875 }
 0xbbf   : >> { %v6898_v8 = vmul.f32 0.03125, %v6876_v41 }
 0xbc0   : >> { %v6879_v45 = vpop.xlane.xlu0 %6878 }
 0xbc1   : >> { %v14505_v60 = vsub.f32 %v14411_v42, %v6898_v8  ;;  %v6899_v6 = vmul.f32 0.03125, %v6879_v45 }
 0xbc2   : >> { %v6882_v3 = vpop.xlane.xlu1 %6881 }
 0xbc3   : >> { %v14508_v44 = vsub.f32 %v14419_v57, %v6899_v6  ;;  %v6900_v38 = vmul.f32 0.03125, %v6882_v3  ;;  %v6930_v61 = vmul.f32 %v14505_v60, %v14505_v60 }
 0xbc4   : >> { %v6885_v7 = vpop.xlane.xlu0 %6884 }
 0xbc5   : >> { %v14513_v15 = vsub.f32 %v14416_v37, %v6900_v38  ;;  %v6901_v34 = vmul.f32 0.03125, %v6885_v7  ;;  %v6970_v33 = vsel %vm1859_vm4, %v6930_v61, 0.0  ;;  %v6931_v42 = vmul.f32 %v14508_v44, %v14508_v44 }
 0xbc6   : >> { %6971 = vadd.xlane.f32.xlu1 %v6970_v33  ;;  %v6942_v63 = vpop.xlane.xlu1 %6941 }
 0xbc7   : >> { %v14519_v5 = vsub.f32 %v14424_v21, %v6901_v34  ;;  %v6984_v57 = vmul.f32 0.03125, %v6942_v63  ;;  %v6973_v2 = vsel %vm1859_vm4, %v6931_v42, 0.0  ;;  %v6932_v47 = vmul.f32 %v14513_v15, %v14513_v15 }
 0xbc8   : >> { %6974 = vadd.xlane.f32.xlu0 %v6973_v2  ;;  %v6945_v37 = vpop.xlane.xlu0 %6944 }
 0xbc9   : >> { %v7000_v52 = vadd.f32 1e-05, %v6984_v57  ;;  %v6985_v26 = vmul.f32 0.03125, %v6945_v37  ;;  %v6976_v23 = vsel %vm1859_vm4, %v6932_v47, 0.0  ;;  %v6933_v53 = vmul.f32 %v14519_v5, %v14519_v5 }
 0xbca   : >> { %6977 = vadd.xlane.f32.xlu1 %v6976_v23  ;;  %v6936_v40 = vpop.xlane.xlu1 %6935 }
 0xbcb   : >> { %9038 = vrsqrt.f32 %v7000_v52  ;;  %v7001_v21 = vadd.f32 1e-05, %v6985_v26  ;;  %v6982_v11 = vmul.f32 0.03125, %v6936_v40  ;;  %v6979_v58 = vsel %vm1859_vm4, %v6933_v53, 0.0 }
 0xbcc   : >> { %6980 = vadd.xlane.f32.xlu0 %v6979_v58  ;;  %v6939_v1 = vpop.xlane.xlu0 %6938 }
 0xbcd   : >> { %9040 = vrsqrt.f32 %v7001_v21  ;;  %v6998_v39 = vadd.f32 1e-05, %v6982_v11  ;;  %v6983_v14 = vmul.f32 0.03125, %v6939_v1 }
 0xbce   : >> { %v6954_v16 = vpop.xlane.xlu1 %6953 }
 0xbcf   : >> { %9042 = vrsqrt.f32 %v6998_v39  ;;  %v6999_v62 = vadd.f32 1e-05, %v6983_v14  ;;  %v6988_v43 = vmul.f32 0.03125, %v6954_v16 }
 0xbd0   : >> { %v6957_v50 = vpop.xlane.xlu0 %6956 }
 0xbd1   : >> { %9044 = vrsqrt.f32 %v6999_v62  ;;  %v7004_v24 = vadd.f32 1e-05, %v6988_v43  ;;  %v6989_v36 = vmul.f32 0.03125, %v6957_v50 }
 0xbd2   : >> { %v6948_v49 = vpop.xlane.xlu1 %6947 }
 0xbd3   : >> { %9046 = vrsqrt.f32 %v7004_v24  ;;  %v7005_v19 = vadd.f32 1e-05, %v6989_v36  ;;  %v6986_v20 = vmul.f32 0.03125, %v6948_v49 }
 0xbd4   : >> { %v6951_v55 = vpop.xlane.xlu0 %6950 }
 0xbd5   : >> { %v9039_v0 = vpop.eup %9038  ;;  %9048 = vrsqrt.f32 %v7005_v19  ;;  %v7002_v17 = vadd.f32 1e-05, %v6986_v20  ;;  %v6987_v35 = vmul.f32 0.03125, %v6951_v55 }
 0xbd6   : >> { %v7032_v51 = vmul.f32 %v9039_v0, %v14429_v12 }
 0xbd7   : >> { %v9041_v48 = vpop.eup %9040  ;;  %9050 = vrsqrt.f32 %v7002_v17  ;;  %v7003_v13 = vadd.f32 1e-05, %v6987_v35 }
 0xbd8   : >> { %v7054_v22 = vmul.f32 %v14536_v31, %v7032_v51  ;;  %v7033_v29 = vmul.f32 %v9041_v48, %v14434_v30 }
 0xbd9   : >> { %v9043_v25 = vpop.eup %9042  ;;  %9052 = vrsqrt.f32 %v7003_v13 }
 0xbda   : >> { %v14544_v26 = vadd.f32 %v14539_v56, %v7054_v22   ;;  %v7055_v8 = vmul.f32 %v14536_v31, %v7033_v29  ;;  %v7030_v45 = vmul.f32 %v9043_v25, %v14441_v4 }
 0xbdb   : >> { %v9045_v6 = vpop.eup %9044 }
 0xbdc   : >> { %v16443_v41 = vmov %v14544_v26  ;;  %v14549_v12 = vadd.f32 %v14539_v56, %v7055_v8   ;;  %v7052_v3 = vmul.f32 %v14536_v31, %v7030_v45  ;;  %v7031_v38 = vmul.f32 %v9045_v6, %v14447_v32 }
 0xbdd   : >> { %v9047_v61 = vpop.eup %9046 }
 0xbde   : >> { %v14554_v3 = vadd.f32 %v14539_v56, %v7052_v3   ;;  %v7053_v7 = vmul.f32 %v14536_v31, %v7031_v38  ;;  %v7036_v34 = vmul.f32 %v9047_v61, %v14453_v28 }
 0xbdf   : >> { %v9049_v33 = vpop.eup %9048 }
 0xbe0   : >> { %v16444_v30 = vmov %v14554_v3  ;;  %v14559_v52 = vadd.f32 %v14539_v56, %v7053_v7   ;;  %v7058_v4 = vmul.f32 %v14536_v31, %v7036_v34  ;;  %v7037_v63 = vmul.f32 %v9049_v33, %v14459_v27 }
 0xbe1   : >> { %v9051_v57 = vpop.eup %9050 }
 0xbe2   : >> { %v16445_v42 = vmov %v14559_v52  ;;  %v14564_v8 = vadd.f32 %v14539_v56, %v7058_v4   ;;  %v7059_v32 = vmul.f32 %v14536_v31, %v7037_v63  ;;  %v7034_v47 = vmul.f32 %v9051_v57, %v14465_v54 }
 0xbe3   : >> { %v9053_v37 = vpop.eup %9052 }
 0xbe4   : >> { %v16446_v2 = vmov %v14564_v8  ;;  %v14569_v20 = vadd.f32 %v14539_v56, %v7059_v32   ;;  %v7056_v26 = vmul.f32 %v14536_v31, %v7034_v47  ;;  %v7035_v52 = vmul.f32 %v9053_v37, %v14471_v46 }
 0xbe6   : >> { %v16447_v28 = vmov %v14569_v20  ;;  %v14574_v63 = vadd.f32 %v14539_v56, %v7056_v26   ;;  %v7057_v27 = vmul.f32 %v14536_v31, %v7035_v52 }
 0xbe8   : >> { %v16448_v23 = vmov %v14574_v63  ;;  %v14578_v54 = vadd.f32 %v14539_v56, %v7057_v27  }
 0xbea   : >> { %v16449_v40 = vmov %v14578_v54 }
 0xc03   : >> { %v6966_v53 = vpop.xlane.xlu1 %6965 }
 0xc04   : >> { %v6992_v21 = vmul.f32 0.03125, %v6966_v53 }
 0xc05   : >> { %v6969_v11 = vpop.xlane.xlu0 %6968 }
 0xc06   : >> { %v7008_v58 = vadd.f32 1e-05, %v6992_v21  ;;  %v6993_v1 = vmul.f32 0.03125, %v6969_v11 }
 0xc07   : >> { %v6960_v39 = vpop.xlane.xlu1 %6959 }
 0xc08   : >> { %9054 = vrsqrt.f32 %v7008_v58  ;;  %v7009_v14 = vadd.f32 1e-05, %v6993_v1  ;;  %v6990_v16 = vmul.f32 0.03125, %v6960_v39  ;;  %v7095_v1 = vpack.c.bf16 (%p14613_p11), %v14549_v12, %v16443_v41 }
 0xc09   : >> { %v6963_v62 = vpop.xlane.xlu0 %6962 }
 0xc0a   : >> { %9056 = vrsqrt.f32 %v7009_v14  ;;  %v7006_v46 = vadd.f32 1e-05, %v6990_v16  ;;  %v6991_v43 = vmul.f32 0.03125, %v6963_v62 }
 0xc0c   : >> { %9058 = vrsqrt.f32 %v7006_v46  ;;  %v7007_v50 = vadd.f32 1e-05, %v6991_v43 }
 0xc0e   : >> { %9060 = vrsqrt.f32 %v7007_v50 }
 0xc12   : >> { %v9055_v24 = vpop.eup %9054 }
 0xc13   : >> { %v7040_v36 = vmul.f32 %v9055_v24, %v14481_v9 }
 0xc14   : >> { %v9057_v54 = vpop.eup %9056 }
 0xc15   : >> { %v7062_v49 = vmul.f32 %v14536_v31, %v7040_v36  ;;  %v7041_v19 = vmul.f32 %v9057_v54, %v14484_v10  ;;  %v16465_v54 = vmov %v16449_v40 }
 0xc16   : >> { %v9059_v20 = vpop.eup %9058 }
 0xc17   : >> { %v14584_v53 = vadd.f32 %v14539_v56, %v7062_v49   ;;  %v7063_v0 = vmul.f32 %v14536_v31, %v7041_v19  ;;  %v7038_v17 = vmul.f32 %v9059_v20, %v14489_v18  ;;  %v16463_v20 = vmov %v16447_v28 }
 0xc18   : >> { %v9061_v35 = vpop.eup %9060 }
 0xc19   : >> { %v16450_v55 = vmov %v14584_v53  ;;  %v14589_v6 = vadd.f32 %v14539_v56, %v7063_v0   ;;  %v7060_v48 = vmul.f32 %v14536_v31, %v7038_v17  ;;  %v7039_v9 = vmul.f32 %v9061_v35, %v14495_v59 }
 0xc1b   : >> { %v16451_v51 = vmov %v14589_v6  ;;  %v14594_v32 = vadd.f32 %v14539_v56, %v7060_v48   ;;  %v7061_v10 = vmul.f32 %v14536_v31, %v7039_v9 }
 0xc1d   : >> { %v16452_v13 = vmov %v14594_v32  ;;  %v14598_v4 = vadd.f32 %v14539_v56, %v7061_v10  }
 0xc1f   : >> { %v16453_v22 = vmov %v14598_v4 }
 0xc53   : >> { %v6972_v29 = vpop.xlane.xlu1 %6971 }
 0xc54   : >> { %v6994_v25 = vmul.f32 0.03125, %v6972_v29 }
 0xc55   : >> { %v6975_v8 = vpop.xlane.xlu0 %6974 }
 0xc56   : >> { %v7010_v18 = vadd.f32 1e-05, %v6994_v25  ;;  %v6995_v45 = vmul.f32 0.03125, %v6975_v8  ;;  %v16464_v8 = vmov %v16446_v2 }
 0xc57   : >> { %v6978_v3 = vpop.xlane.xlu1 %6977 }
 0xc58   : >> { %9062 = vrsqrt.f32 %v7010_v18  ;;  %v7011_v6 = vadd.f32 1e-05, %v6995_v45  ;;  %v6996_v38 = vmul.f32 0.03125, %v6978_v3  ;;  %v16470_v3 = vmov %v16444_v30 }
 0xc59   : >> { %v6981_v61 = vpop.xlane.xlu0 %6980 }
 0xc5a   : >> { %9064 = vrsqrt.f32 %v7011_v6  ;;  %v7012_v59 = vadd.f32 1e-05, %v6996_v38  ;;  %v6997_v7 = vmul.f32 0.03125, %v6981_v61  ;;  %v16459_v6 = vmov %v16451_v51 }
 0xc5c   : >> { %9066 = vrsqrt.f32 %v7012_v59  ;;  %v7013_v34 = vadd.f32 1e-05, %v6997_v7  ;;  %v16467_v59 = vmov %v14549_v12 }
 0xc5e   : >> { %9068 = vrsqrt.f32 %v7013_v34 }
 0xc62   : >> { %v9063_v33 = vpop.eup %9062 }
 0xc63   : >> { %v7042_v63 = vmul.f32 %v9063_v33, %v14505_v60 }
 0xc64   : >> { %v9065_v4 = vpop.eup %9064 }
 0xc65   : >> { %v7064_v57 = vmul.f32 %v14536_v31, %v7042_v63  ;;  %v7043_v32 = vmul.f32 %v9065_v4, %v14508_v44  ;;  %v16461_v4 = vmov %v16453_v22  ;;  %v16466_v63 = vmov %v16448_v23 }
 0xc66   : >> { %v9067_v47 = vpop.eup %9066 }
 0xc67   : >> { %v7086_v37 = vadd.f32 %v14539_v56, %v7064_v57   ;;  %v7065_v26 = vmul.f32 %v14536_v31, %v7043_v32  ;;  %v7044_v52 = vmul.f32 %v9067_v47, %v14513_v15  ;;  %v16462_v32 = vmov %v16452_v13  ;;  %v9070_v15 = vld [vmem:[%s14782_s20] sm:$0xff] (%p14613_p11)  }
 0xc68   : >> { %v9069_v27 = vpop.eup %9068  ;;  %8263 = vmatprep.subr.bf16.mxu0 (%p14613_p11), %v9070_v15  ;;  %8283 = vmatprep.subr.bf16.mxu1 (%p14613_p11), %v9070_v15 }
 0xc69   : >> { %v7087_v11 = vadd.f32 %v14539_v56, %v7065_v26   ;;  %v7066_v53 = vmul.f32 %v14536_v31, %v7044_v52  ;;  %v7045_v21 = vmul.f32 %v9069_v27, %v14519_v5  ;;  %v16458_v14 = vmov %v7086_v37  ;;  %1806 = sbr.rel (!%p14613_p11) target bundleno = 403 (0x193), region = 177  ;;  %v9071_v5 = vld [vmem:[%s14782_s20 + $0x8] sm:$0xff] (%p14613_p11)   ;;  %8264 = vmatpush3.bf16.msra.mxu0 (%p14613_p11), %v9070_v15 }
 0xc6a   : >> { %v16468_v26 = vmov %v16443_v41  ;;  %v16469_v52 = vmov %v16445_v42  ;;  %8285 = vmatpush3.bf16.msra.mxu1 (%p14613_p11), %v9070_v15  ;;  %8265 = vmatprep.subr.bf16.mxu0 (%p14613_p11), %v9071_v5  ;;  %v7097_v41 = vpack.c.bf16 (%p14613_p11), %v16447_v28, %v16446_v2 }
 0xc6b   : >> { %v7088_v60 = vadd.f32 %v14539_v56, %v7066_v53   ;;  %v7067_v58 = vmul.f32 %v14536_v31, %v7045_v21  ;;  %v16457_v25 = vmov %v7087_v11  ;;  %v16460_v53 = vmov %v16450_v55  ;;  %8284 = vmatprep.subr.bf16.mxu1 (%p14613_p11), %v9071_v5 }
 0xc6c   : > { %v7094_v31 = vpack.c.bf16 (%p14613_p11), %v16445_v42, %v16444_v30  ;;  %v7096_v30 = vpack.c.bf16 (%p14613_p11), %v16449_v40, %v16448_v23  ;;  %v7100_v42 = vpack.c.bf16 (%p14613_p11), %v7087_v11, %v7086_v37  ;;  %v7674_v23 = vld [vmem:[%s16471_s21] ss:$0 sm:$0xff] (%p14613_p11) }
 0xc6d   : >> { %v7089_v44 = vadd.f32 %v14539_v56, %v7067_v58   ;;  %v16456_v39 = vmov %v7088_v60  ;;  %v7098_v56 = vpack.c.bf16 (%p14613_p11), %v16453_v22, %v16452_v13  ;;  %8266 = vmatpush3.bf16.msra.mxu0 (%p14613_p11), %v9071_v5 }
 0xc6e   : > { %8267 = vmatprep.mubr.msk.bf16.mxu0 (%p14613_p11), %vm1859_vm4, %v7094_v31  ;;  %v7099_v39 = vpack.c.bf16 (%p14613_p11), %v16451_v51, %v16450_v55  ;;  %8286 = vmatpush3.bf16.msra.mxu1 (%p14613_p11), %v9071_v5 }
 0xc6f   : >> { %v16455_v21 = vmov %v7089_v44  ;;  %8275 = vmatprep.mubr.msk.bf16.mxu1 (%p14613_p11), %vm1859_vm4, %v7098_v56  ;;  %v7101_v12 = vpack.c.bf16 (%p14613_p11), %v7089_v44, %v7088_v60 }
 0xc70   : > { %8268 = vmatmul.mubr.msk.bf16.vlgmr.msra.gmra.mrb[0].mxu0 %vm1859_vm4, %v7095_v1 }
 0xc71   : > { %8276 = vmatmul.mubr.msk.bf16.vlgmr.msra.gmra.mrb[0].mxu1 %vm1859_vm4, %v7099_v39  ;;  %8271 = vmatprep.mubr.msk.bf16.mxu0 %vm1859_vm4, %v7096_v30 }
 0xc72   : > { %8279 = vmatprep.mubr.msk.bf16.mxu1 %vm1859_vm4, %v7100_v42 }
 0xc78   : > { %8272 = vmatmul.mubr.msk.bf16.gmra.mrb[4].mxu0 %vm1859_vm4, %v7097_v41 }
 0xc79   : > { %8280 = vmatmul.mubr.msk.bf16.gmra.mrb[4].mxu1 %vm1859_vm4, %v7101_v12 }
 0xd43   : > { %v8269_v40 = vpop.f32.mrb[0].mxu0 }
 0xd44   : > { %v8277_v14 = vpop.f32.mrb[0].mxu1  ;;  %v7189_v16 = vadd.f32 %v8269_v40, %v7674_v23  ;;  %v7180_v46 = vpop.f32.mrb[1].mxu0 }
 0xd45   : > { %v7221_v62 = vadd.f32 %v8277_v14, %v7674_v23  ;;  %v7212_v43 = vpop.f32.mrb[1].mxu1  ;;  %v7181_v2 = vadd.f32 %v7674_v23, %v7180_v46  ;;  %v8270_v50 = vpop.f32.mrb[2].mxu0 }
 0xd46   : > { %v7213_v28 = vadd.f32 %v7674_v23, %v7212_v43  ;;  %v8278_v24 = vpop.f32.mrb[2].mxu1  ;;  %7245 = vst [vmem:[%s10406_s2 + $0x10] sm:$0xff] %v7189_v16  ;;  %v7192_v36 = vadd.f32 %v8270_v50, %v7674_v23  ;;  %v7183_v49 = vpop.f32.mrb[3].mxu0 }
 0xd47   : > { %7253 = vst [vmem:[%s10406_s2 + $0x50] sm:$0xff] %v7221_v62  ;;  %v7224_v54 = vadd.f32 %v8278_v24, %v7674_v23  ;;  %v7215_v19 = vpop.f32.mrb[3].mxu1  ;;  %7243 = vst [vmem:[%s10406_s2] sm:$0xff] %v7181_v2  ;;  %v7184_v20 = vadd.f32 %v7674_v23, %v7183_v49 }
 0xd48   : > { %7251 = vst [vmem:[%s10406_s2 + $0x40] sm:$0xff] %v7213_v28  ;;  %v7216_v55 = vadd.f32 %v7674_v23, %v7215_v19  ;;  %7246 = vst [vmem:[%s10406_s2 + $0x18] sm:$0xff] %v7192_v36 }
 0xd49   : > { %7254 = vst [vmem:[%s10406_s2 + $0x58] sm:$0xff] %v7224_v54  ;;  %7244 = vst [vmem:[%s10406_s2 + $0x8] sm:$0xff] %v7184_v20 }
 0xd4a   : > { %7252 = vst [vmem:[%s10406_s2 + $0x48] sm:$0xff] %v7216_v55 }
 0xd4b   : > { %v8273_v0 = vpop.f32.mrb[4].mxu0 }
 0xd4c   : > { %v8281_v17 = vpop.f32.mrb[4].mxu1  ;;  %v7205_v35 = vadd.f32 %v8273_v0, %v7674_v23  ;;  %v7196_v48 = vpop.f32.mrb[5].mxu0 }
 0xd4d   : > { %v7237_v51 = vadd.f32 %v8281_v17, %v7674_v23  ;;  %v7228_v9 = vpop.f32.mrb[5].mxu1  ;;  %v7197_v13 = vadd.f32 %v7674_v23, %v7196_v48  ;;  %v8274_v22 = vpop.f32.mrb[6].mxu0 }
 0xd4e   : > { %v7229_v10 = vadd.f32 %v7674_v23, %v7228_v9  ;;  %v8282_v29 = vpop.f32.mrb[6].mxu1  ;;  %7249 = vst [vmem:[%s10406_s2 + $0x30] sm:$0xff] %v7205_v35  ;;  %v7208_v25 = vadd.f32 %v8274_v22, %v7674_v23  ;;  %v7199_v18 = vpop.f32.mrb[7].mxu0 }
 0xd4f   : > { %7257 = vst [vmem:[%s10406_s2 + $0x70] sm:$0xff] %v7237_v51  ;;  %v7240_v8 = vadd.f32 %v8282_v29, %v7674_v23  ;;  %v7231_v45 = vpop.f32.mrb[7].mxu1  ;;  %7247 = vst [vmem:[%s10406_s2 + $0x20] sm:$0xff] %v7197_v13  ;;  %v7200_v3 = vadd.f32 %v7674_v23, %v7199_v18 }
 0xd50   : > { %7255 = vst [vmem:[%s10406_s2 + $0x60] sm:$0xff] %v7229_v10  ;;  %v7232_v6 = vadd.f32 %v7674_v23, %v7231_v45  ;;  %7250 = vst [vmem:[%s10406_s2 + $0x38] sm:$0xff] %v7208_v25 }
 0xd51   : > { %7258 = vst [vmem:[%s10406_s2 + $0x78] sm:$0xff] %v7240_v8  ;;  %7248 = vst [vmem:[%s10406_s2 + $0x28] sm:$0xff] %v7200_v3 }
 0xd52   : > { %7256 = vst [vmem:[%s10406_s2 + $0x68] sm:$0xff] %v7232_v6 }
 0xd53   : > { %9085 = shalt.err (!%p9082_p4)
}
 0xd54   : > { %s9086_s6 = scalar_lea.hbm %s14709_s1, 2048  ;;  %s9090_s22 = scalar_lea.hbm %s16474_s0, 4096 }
 0xd55   : > { %p9087_p7 = scmp.ne.s32.totalorder %s14709_s1, %s9086_s6  ;;  %p9091_p10 = scmp.lt.u32.totalorder %s14709_s1, %s16474_s0 }
 0xd56   : > { %p9092_p11 = scmp.lt.u32.totalorder %s9090_s22, %s9086_s6  ;;  %p9094_p13 = scmp.lt.u32.totalorder %s9086_s6, %s14709_s1 }
 0xd57   : > { %p9088_p8 = pnand %p9087_p7, %p9434_p5 }
 0xd58   : > { %p9093_p12 = por %p9092_p11, %p9091_p10 }
 0xd59   : > { %p9089_p9 = pneg %p9088_p8 }
 0xd5a   : > { %p9095_p0 = por %p9094_p13, %p9093_p12 }
 0xd5c   : > { %p9096_p1 = pnand %p9095_p0, %p9089_p9 }
 0xd5e   : > { %9099 = shalt.err (!%p9096_p1)
}
 0xd5f   : > { %s9279_s27 = smov 128   ;;  %s9280_s23 = smov 8  }
 0xd60   : > { %8295 = dma.vmem_to_hbm [thread:$0]  (%p9434_p5), %s14711_s30, 2048, %s14709_s1, %s14721_s29, %s9279_s27, %s9279_s27, %s9280_s23  }
 0xd61 PF: > { %s16475_s26 = sld [smem:[#allocation7_spill]]  ;;  %s16476_s5 = sld [smem:[#allocation5_spill]] }
 0xd67   : > { %p8301_p2 = scmp.ge.s32.totalorder %s16475_s26, 2  ;;  %s7288_s2 = sand.u32 1, %s16476_s5  }
 0xd68   : > { %s7289_s6 = scalar_lea.sflag [#allocation3], %s7288_s2 }
 0xd69   : > { %p8298_p3 = pnand %p8301_p2, %p9438_p6 }
 0xd6b   : > { %9185 = dma.done.wait (!%p8298_p3), %s7289_s6, 2048  }
 0xd6c   : > { %9187 = vsyncadd (!%p8298_p3), %s7289_s6, 4294965248  ;;  %s16478_s30 = sld [smem:[#allocation9_spill]]  ;;  %s16479_s21 = sld [smem:[#allocation6_spill]] }
 0xd6d   : > { %s16480_s29 = sld [smem:[#allocation10_spill]]  ;;  %s16481_s3 = smov %s9194_s28 }
 0xd72   : > { %p32_p4 = scmp.ge.s32.totalorder %s16478_s30, 4   ;;  %s16482_s28 = smov %s16479_s21 }
 0xd74   :  { %34 = sbr.rel (!%p32_p4) target bundleno = 13 (0xd), region = 188 }
 0xd7b   :  { %7294 = vsyncpa [#allocation3], 1 }
 0xd7c   :  { %7296 = vsyncpa [#allocation3 + $0x1], 1 }

</bundles_post_ra>
